<compile_context>
chip_gen: v6e
topology: v6e:2x2x1
jax: 0.10.0
libtpu: 0.0.40
codegen_flags: <defaults>
</compile_context>

<pallas_src>
import jax
import jax.numpy as jnp
import numpy as np
from jax import lax
from jax.experimental import pallas as pl
from jax.experimental.pallas import tpu as pltpu


# ----------------------------------------------------------------------------
# Pallas kernel: whole sequence in one invocation, skewed 2-layer recurrence.
# ----------------------------------------------------------------------------
def lstm_kernel(
    x_ref,       # (T, Bp, 1)    time-major input
    v0_ref,      # (1, 4Hp)      folded emb -> layer-0 input weights
    b0_ref,      # (1, 4Hp)      folded layer-0 bias (b_emb@Wih0^T + b_ih0 + b_hh0)
    wcomb_ref,   # (2Hp, 8Hp)    [[Whh0^T | Wih1^T], [0 | Whh1^T]] (gate-padded)
    b1_ref,      # (1, 4Hp)      layer-1 bias (b_ih1 + b_hh1, gate-padded)
    wout_ref,    # (Hp, 1)       out_layer weight^T (row-padded)
    bout_ref,    # (1, 1)        out_layer bias
    out_ref,     # (Bp, 1)       final output
    hstate_ref,  # scratch (Bp, 2Hp): [h0(s-1) | h1(s-2)]
    cstate_ref,  # scratch (Bp, 2Hp): [c0(s-1) | c1(s-2)]
):
    T = x_ref.shape[0]
    Hp = wout_ref.shape[0]          # per-gate lane tile (128)
    GL = 4 * Hp                     # width of one layer's gate block

    v0 = v0_ref[...]
    b0 = b0_ref[...]
    b1 = b1_ref[...]
    wcomb = wcomb_ref[...]

    def cell(gates, c_prev):
        # PyTorch LSTM gate order i | f | g | o, each in its own 128-lane tile.
        i = jax.nn.sigmoid(gates[:, 0 * Hp:1 * Hp])
        f = jax.nn.sigmoid(gates[:, 1 * Hp:2 * Hp])
        g = jnp.tanh(gates[:, 2 * Hp:3 * Hp])
        o = jax.nn.sigmoid(gates[:, 3 * Hp:4 * Hp])
        c = f * c_prev + i * g
        h = o * jnp.tanh(c)
        return h, c

    # ---- prologue: layer 0 at t=0 (h0(-1)=0, h1(-1)=0 -> no matmul) --------
    h0, c0 = cell(x_ref[0] * v0 + b0, 0.0)
    hstate_ref[:, :Hp] = h0
    hstate_ref[:, Hp:] = jnp.zeros_like(h0)     # h1(-1) = 0
    cstate_ref[:, :Hp] = c0
    cstate_ref[:, Hp:] = jnp.zeros_like(c0)     # c1(-1) = 0

    # ---- skewed recurrence: iteration s -> layer-0 @ t=s, layer-1 @ t=s-1 ---
    def step(s, carry):
        hcat = hstate_ref[...]                                        # (Bp, 2Hp)
        gates = jnp.dot(hcat, wcomb, preferred_element_type=jnp.float32)

        # layer 0, timestep s  (input contribution is state-independent)
        u0 = x_ref[s] * v0 + b0                                       # (Bp, 4Hp)
        h0, c0 = cell(u0 + gates[:, :GL], cstate_ref[:, :Hp])
        # layer 1, timestep s-1
        h1, c1 = cell(gates[:, GL:] + b1, cstate_ref[:, Hp:])

        hstate_ref[:, :Hp] = h0
        hstate_ref[:, Hp:] = h1
        cstate_ref[:, :Hp] = c0
        cstate_ref[:, Hp:] = c1
        return carry

    lax.fori_loop(1, T, step, 0, unroll=max(1, min(8, T - 1)))

    # ---- epilogue: layer 1 at t = T-1, then the output projection ----------
    gates1 = jnp.dot(hstate_ref[...], wcomb[:, GL:],
                     preferred_element_type=jnp.float32) + b1
    h1, _ = cell(gates1, cstate_ref[:, Hp:])
    out_ref[...] = (
        jnp.dot(h1, wout_ref[...], preferred_element_type=jnp.float32)
        + bout_ref[...]
    )


# ----------------------------------------------------------------------------
# Wrapper: weight folding / gate-tile padding / pallas_call plumbing.
# ----------------------------------------------------------------------------
@jax.jit
def lstm_forward(x, params):
    x = x.astype(jnp.float32)
    B, T = x.shape
    H = params["w_emb"].shape[0]
    Hp = max(128, ((H + 127) // 128) * 128)   # one 128-lane tile per gate
    Bp = ((B + 7) // 8) * 8                   # pad batch to full sublanes

    f32 = lambda a: jnp.asarray(a, jnp.float32)

    # ---- fold emb_layer + layer-0 input matmul (input_size == 1, exact) ----
    w_emb = f32(params["w_emb"])[:, 0]                              # (H,)
    v0 = w_emb @ f32(params["w_ih0"]).T                             # (4H,)
    b0 = (f32(params["b_emb"]) @ f32(params["w_ih0"]).T
          + f32(params["b_ih0"]) + f32(params["b_hh0"]))            # (4H,)
    b1 = f32(params["b_ih1"]) + f32(params["b_hh1"])                # (4H,)

    def place_gates(dst, m, row_off, col_off):
        # m: (R, 4H) with PyTorch i|f|g|o blocks; gate k goes to columns
        # [col_off + k*Hp, col_off + k*Hp + H); everything else stays zero.
        m = f32(m)
        R = m.shape[0]
        for k in range(4):
            dst = dst.at[row_off:row_off + R,
                         col_off + k * Hp:col_off + k * Hp + H].set(
                             m[:, k * H:(k + 1) * H])
        return dst

    v0p = place_gates(jnp.zeros((1, 4 * Hp), jnp.float32), v0[None, :], 0, 0)
    b0p = place_gates(jnp.zeros((1, 4 * Hp), jnp.float32), b0[None, :], 0, 0)
    b1p = place_gates(jnp.zeros((1, 4 * Hp), jnp.float32), b1[None, :], 0, 0)

    # Combined recurrent weight for the skewed step:
    #   [h0(s-1) | h1(s-2)] @ [[Whh0^T | Wih1^T],
    #                          [   0   | Whh1^T]] -> [gates0(s) | gates1(s-1)]
    wcombp = jnp.zeros((2 * Hp, 8 * Hp), jnp.float32)
    wcombp = place_gates(wcombp, f32(params["w_hh0"]).T, 0, 0)
    wcombp = place_gates(wcombp, f32(params["w_ih1"]).T, 0, 4 * Hp)
    wcombp = place_gates(wcombp, f32(params["w_hh1"]).T, Hp, 4 * Hp)

    woutp = jnp.zeros((Hp, 1), jnp.float32).at[:H, 0].set(f32(params["w_out"])[0])
    boutp = f32(params["b_out"]).reshape(1, 1)

    # time-major input, batch padded: (T, Bp, 1)
    x_tb = jnp.transpose(x, (1, 0))
    x_tb = jnp.pad(x_tb, ((0, 0), (0, Bp - B)))[:, :, None]

    cost = pl.CostEstimate(
        flops=int(2 * T * Bp * (2 * Hp) * (8 * Hp)),
        transcendentals=int(8 * T * Bp * Hp),
        bytes_accessed=int(4 * (x_tb.size + v0p.size + b0p.size + wcombp.size
                                + b1p.size + woutp.size + boutp.size + Bp)),
    )

    vmem_spec = pl.BlockSpec(memory_space=pltpu.MemorySpace.VMEM)
    out = pl.pallas_call(
        lstm_kernel,
        out_shape=jax.ShapeDtypeStruct((Bp, 1), jnp.float32),
        in_specs=[vmem_spec] * 7,
        out_specs=vmem_spec,
        scratch_shapes=[
            pltpu.VMEM((Bp, 2 * Hp), jnp.float32),   # [h0 | h1] hidden state
            pltpu.VMEM((Bp, 2 * Hp), jnp.float32),   # [c0 | c1] cell state
        ],
        compiler_params=pltpu.CompilerParams(vmem_limit_bytes=32 * 1024 * 1024),
        cost_estimate=cost,
    )(x_tb, v0p, b0p, wcombp, b1p, woutp, boutp)

    return out[:B, 0]   # matches .squeeze(1) -> (B,)


# ----------------------------------------------------------------------------
# Deterministic parameter init (PyTorch-style uniform(-1/sqrt(H), 1/sqrt(H)))
# ----------------------------------------------------------------------------
def init_params(key, input_dim=1, hidden=32):
    H = hidden
    k = 1.0 / np.sqrt(H)
    keys = jax.random.split(key, 14)
    u = lambda kk, shape: jax.random.uniform(kk, shape, jnp.float32, -k, k)
    return {
        "w_emb": u(keys[0], (H, input_dim)),
        "b_emb": u(keys[1], (H,)),
        "w_ih0": u(keys[2], (4 * H, H)),
        "w_hh0": u(keys[3], (4 * H, H)),
        "b_ih0": u(keys[4], (4 * H,)),
        "b_hh0": u(keys[5], (4 * H,)),
        "w_ih1": u(keys[6], (4 * H, H)),
        "w_hh1": u(keys[7], (4 * H, H)),
        "b_ih1": u(keys[8], (4 * H,)),
        "b_hh1": u(keys[9], (4 * H,)),
        "w_out": u(keys[10], (input_dim, H)),
        "b_out": u(keys[11], (input_dim,)),
    }


# ----------------------------------------------------------------------------
# Pure-JAX reference (mirrors PyTorch nn.LSTM i,f,g,o gate ordering)
# ----------------------------------------------------------------------------
def lstm_reference(x, p):
    x = x.astype(jnp.float32)
    B, T = x.shape
    H = p["w_emb"].shape[0]
    emb = x[:, :, None] @ p["w_emb"].T + p["b_emb"]  # (B, T, H)

    def run_layer(inp, w_ih, w_hh, b_ih, b_hh):
        h = jnp.zeros((B, H), jnp.float32)
        c = jnp.zeros((B, H), jnp.float32)
        outs = []
        for t in range(T):
            gates = inp[:, t] @ w_ih.T + h @ w_hh.T + b_ih + b_hh
            i = jax.nn.sigmoid(gates[:, 0 * H:1 * H])
            f = jax.nn.sigmoid(gates[:, 1 * H:2 * H])
            g = jnp.tanh(gates[:, 2 * H:3 * H])
            o = jax.nn.sigmoid(gates[:, 3 * H:4 * H])
            c = f * c + i * g
            h = o * jnp.tanh(c)
            outs.append(h)
        return jnp.stack(outs, axis=1)

    out0 = run_layer(emb, p["w_ih0"], p["w_hh0"], p["b_ih0"], p["b_hh0"])
    out1 = run_layer(out0, p["w_ih1"], p["w_hh1"], p["b_ih1"], p["b_hh1"])
    last = out1[:, -1]                               # (B, H)
    return (last @ p["w_out"].T + p["b_out"])[:, 0]  # (B,)


if __name__ == "__main__":
    key = jax.random.PRNGKey(0)
    k_x, k_p = jax.random.split(key)

    B, T, H = 2, 8, 32
    x = jax.random.normal(k_x, (B, T), jnp.float32)
    params = init_params(k_p, input_dim=1, hidden=H)

    out_kernel = jax.block_until_ready(lstm_forward(x, params))
    out_ref = jax.block_until_ready(lstm_reference(x, params))

    assert out_kernel.shape == (B,), out_kernel.shape
    np.testing.assert_allclose(np.asarray(out_kernel), np.asarray(out_ref),
                               rtol=2e-5, atol=2e-5)
    print("KERNEL_OK")
</pallas_src>

<mosaic_0001>
module attributes {stable_mosaic.version = 11 : i64} {
  func.func @lstm_kernel(%arg0: memref<8x8x1xf32, #tpu.memory_space<vmem>>, %arg1: memref<1x512xf32, #tpu.memory_space<vmem>>, %arg2: memref<1x512xf32, #tpu.memory_space<vmem>>, %arg3: memref<256x1024xf32, #tpu.memory_space<vmem>>, %arg4: memref<1x512xf32, #tpu.memory_space<vmem>>, %arg5: memref<128x1xf32, #tpu.memory_space<vmem>>, %arg6: memref<1x1xf32, #tpu.memory_space<vmem>>, %arg7: memref<8x1xf32, #tpu.memory_space<vmem>>, %arg8: memref<8x256xf32, #tpu.memory_space<vmem>>, %arg9: memref<8x256xf32, #tpu.memory_space<vmem>>) attributes {dimension_semantics = [], scalar_prefetch = 0 : i64, scratch_operands = 2 : i64, tpu.core_type = #tpu.core_type<tc>} {
    %c0 = arith.constant 0 : index
    %c0_0 = arith.constant 0 : index
    %0 = vector.load %arg1[%c0, %c0_0] : memref<1x512xf32, #tpu.memory_space<vmem>>, vector<1x512xf32>
    %c0_1 = arith.constant 0 : index
    %c0_2 = arith.constant 0 : index
    %1 = vector.load %arg2[%c0_1, %c0_2] : memref<1x512xf32, #tpu.memory_space<vmem>>, vector<1x512xf32>
    %c0_3 = arith.constant 0 : index
    %c0_4 = arith.constant 0 : index
    %2 = vector.load %arg4[%c0_3, %c0_4] : memref<1x512xf32, #tpu.memory_space<vmem>>, vector<1x512xf32>
    %c0_5 = arith.constant 0 : index
    %c0_6 = arith.constant 0 : index
    %3 = vector.load %arg3[%c0_5, %c0_6] : memref<256x1024xf32, #tpu.memory_space<vmem>>, vector<256x1024xf32>
    %c0_7 = arith.constant 0 : index
    %c0_8 = arith.constant 0 : index
    %c0_9 = arith.constant 0 : index
    %4 = vector.load %arg0[%c0_7, %c0_8, %c0_9] : memref<8x8x1xf32, #tpu.memory_space<vmem>>, vector<1x8x1xf32>
    %5 = vector.shape_cast %4 : vector<1x8x1xf32> to vector<8x1xf32>
    %6 = vector.broadcast %5 : vector<8x1xf32> to vector<8x512xf32>
    %7 = vector.broadcast %0 : vector<1x512xf32> to vector<8x512xf32>
    %8 = arith.mulf %6, %7 : vector<8x512xf32>
    %9 = vector.broadcast %1 : vector<1x512xf32> to vector<8x512xf32>
    %10 = arith.addf %8, %9 : vector<8x512xf32>
    %11 = vector.extract_strided_slice %10 {offsets = [0, 0], sizes = [8, 128], strides = [1, 1]} : vector<8x512xf32> to vector<8x128xf32>
    %12 = arith.negf %11 : vector<8x128xf32>
    %13 = math.exp %12 : vector<8x128xf32>
    %cst = arith.constant 1.000000e+00 : f32
    %14 = vector.broadcast %cst : f32 to vector<8x128xf32>
    %15 = arith.addf %14, %13 : vector<8x128xf32>
    %16 = arith.divf %14, %15 : vector<8x128xf32>
    %17 = vector.extract_strided_slice %10 {offsets = [0, 128], sizes = [8, 128], strides = [1, 1]} : vector<8x512xf32> to vector<8x128xf32>
    %18 = arith.negf %17 : vector<8x128xf32>
    %19 = math.exp %18 : vector<8x128xf32>
    %cst_10 = arith.constant 1.000000e+00 : f32
    %20 = vector.broadcast %cst_10 : f32 to vector<8x128xf32>
    %21 = arith.addf %20, %19 : vector<8x128xf32>
    %22 = arith.divf %20, %21 : vector<8x128xf32>
    %23 = vector.extract_strided_slice %10 {offsets = [0, 256], sizes = [8, 128], strides = [1, 1]} : vector<8x512xf32> to vector<8x128xf32>
    %24 = math.tanh %23 : vector<8x128xf32>
    %25 = vector.extract_strided_slice %10 {offsets = [0, 384], sizes = [8, 128], strides = [1, 1]} : vector<8x512xf32> to vector<8x128xf32>
    %26 = arith.negf %25 : vector<8x128xf32>
    %27 = math.exp %26 : vector<8x128xf32>
    %cst_11 = arith.constant 1.000000e+00 : f32
    %28 = vector.broadcast %cst_11 : f32 to vector<8x128xf32>
    %29 = arith.addf %28, %27 : vector<8x128xf32>
    %30 = arith.divf %28, %29 : vector<8x128xf32>
    %cst_12 = arith.constant 0.000000e+00 : f32
    %31 = vector.broadcast %cst_12 : f32 to vector<8x128xf32>
    %32 = arith.mulf %22, %31 : vector<8x128xf32>
    %33 = arith.mulf %16, %24 : vector<8x128xf32>
    %34 = arith.addf %32, %33 : vector<8x128xf32>
    %35 = math.tanh %34 : vector<8x128xf32>
    %36 = arith.mulf %30, %35 : vector<8x128xf32>
    %c0_13 = arith.constant 0 : index
    %c0_14 = arith.constant 0 : index
    %37 = vector.load %arg8[%c0_13, %c0_14] : memref<8x256xf32, #tpu.memory_space<vmem>>, vector<8x128xf32>
    tpu.vector_store %arg8[%c0_13, %c0_14], %36 {strides = array<i32>} : memref<8x256xf32, #tpu.memory_space<vmem>>, vector<8x128xf32>,
    %cst_15 = arith.constant 0.000000e+00 : f32
    %38 = vector.broadcast %cst_15 : f32 to vector<8x128xf32>
    %c0_16 = arith.constant 0 : index
    %c128 = arith.constant 128 : index
    %39 = vector.load %arg8[%c0_16, %c128] : memref<8x256xf32, #tpu.memory_space<vmem>>, vector<8x128xf32>
    tpu.vector_store %arg8[%c0_16, %c128], %38 {strides = array<i32>} : memref<8x256xf32, #tpu.memory_space<vmem>>, vector<8x128xf32>,
    %c0_17 = arith.constant 0 : index
    %c0_18 = arith.constant 0 : index
    %40 = vector.load %arg9[%c0_17, %c0_18] : memref<8x256xf32, #tpu.memory_space<vmem>>, vector<8x128xf32>
    tpu.vector_store %arg9[%c0_17, %c0_18], %34 {strides = array<i32>} : memref<8x256xf32, #tpu.memory_space<vmem>>, vector<8x128xf32>,
    %cst_19 = arith.constant 0.000000e+00 : f32
    %41 = vector.broadcast %cst_19 : f32 to vector<8x128xf32>
    %c0_20 = arith.constant 0 : index
    %c128_21 = arith.constant 128 : index
    %42 = vector.load %arg9[%c0_20, %c128_21] : memref<8x256xf32, #tpu.memory_space<vmem>>, vector<8x128xf32>
    tpu.vector_store %arg9[%c0_20, %c128_21], %41 {strides = array<i32>} : memref<8x256xf32, #tpu.memory_space<vmem>>, vector<8x128xf32>,
    %c1_i32 = arith.constant 1 : i32
    %c0_22 = arith.constant 0 : index
    %c0_23 = arith.constant 0 : index
    %43 = vector.load %arg8[%c0_22, %c0_23] : memref<8x256xf32, #tpu.memory_space<vmem>>, vector<8x256xf32>
    %cst_24 = arith.constant dense<0.000000e+00> : vector<8x1024xf32>
    %44 = tpu.matmul %43, %3, %cst_24 {dimension_numbers = #tpu.dot_dimension_numbers<[1], [0], [0], [1], [0, 0, 1, 1], [], []>} : vector<8x256xf32>, vector<256x1024xf32>, vector<8x1024xf32> -> vector<8x1024xf32>
    %45 = arith.index_cast %c1_i32 : i32 to index
    %c0_25 = arith.constant 0 : index
    %c0_26 = arith.constant 0 : index
    %46 = vector.load %arg0[%45, %c0_25, %c0_26] : memref<8x8x1xf32, #tpu.memory_space<vmem>>, vector<1x8x1xf32>
    %47 = vector.shape_cast %46 : vector<1x8x1xf32> to vector<8x1xf32>
    %48 = vector.broadcast %47 : vector<8x1xf32> to vector<8x512xf32>
    %49 = vector.broadcast %0 : vector<1x512xf32> to vector<8x512xf32>
    %50 = arith.mulf %48, %49 : vector<8x512xf32>
    %51 = vector.broadcast %1 : vector<1x512xf32> to vector<8x512xf32>
    %52 = arith.addf %50, %51 : vector<8x512xf32>
    %53 = vector.extract_strided_slice %44 {offsets = [0, 0], sizes = [8, 512], strides = [1, 1]} : vector<8x1024xf32> to vector<8x512xf32>
    %54 = arith.addf %52, %53 : vector<8x512xf32>
    %c0_27 = arith.constant 0 : index
    %c0_28 = arith.constant 0 : index
    %55 = vector.load %arg9[%c0_27, %c0_28] : memref<8x256xf32, #tpu.memory_space<vmem>>, vector<8x128xf32>
    %56 = vector.extract_strided_slice %54 {offsets = [0, 0], sizes = [8, 128], strides = [1, 1]} : vector<8x512xf32> to vector<8x128xf32>
    %57 = arith.negf %56 : vector<8x128xf32>
    %58 = math.exp %57 : vector<8x128xf32>
    %cst_29 = arith.constant 1.000000e+00 : f32
    %59 = vector.broadcast %cst_29 : f32 to vector<8x128xf32>
    %60 = arith.addf %59, %58 : vector<8x128xf32>
    %61 = arith.divf %59, %60 : vector<8x128xf32>
    %62 = vector.extract_strided_slice %54 {offsets = [0, 128], sizes = [8, 128], strides = [1, 1]} : vector<8x512xf32> to vector<8x128xf32>
    %63 = arith.negf %62 : vector<8x128xf32>
    %64 = math.exp %63 : vector<8x128xf32>
    %cst_30 = arith.constant 1.000000e+00 : f32
    %65 = vector.broadcast %cst_30 : f32 to vector<8x128xf32>
    %66 = arith.addf %65, %64 : vector<8x128xf32>
    %67 = arith.divf %65, %66 : vector<8x128xf32>
    %68 = vector.extract_strided_slice %54 {offsets = [0, 256], sizes = [8, 128], strides = [1, 1]} : vector<8x512xf32> to vector<8x128xf32>
    %69 = math.tanh %68 : vector<8x128xf32>
    %70 = vector.extract_strided_slice %54 {offsets = [0, 384], sizes = [8, 128], strides = [1, 1]} : vector<8x512xf32> to vector<8x128xf32>
    %71 = arith.negf %70 : vector<8x128xf32>
    %72 = math.exp %71 : vector<8x128xf32>
    %cst_31 = arith.constant 1.000000e+00 : f32
    %73 = vector.broadcast %cst_31 : f32 to vector<8x128xf32>
    %74 = arith.addf %73, %72 : vector<8x128xf32>
    %75 = arith.divf %73, %74 : vector<8x128xf32>
    %76 = arith.mulf %67, %55 : vector<8x128xf32>
    %77 = arith.mulf %61, %69 : vector<8x128xf32>
    %78 = arith.addf %76, %77 : vector<8x128xf32>
    %79 = math.tanh %78 : vector<8x128xf32>
    %80 = arith.mulf %75, %79 : vector<8x128xf32>
    %81 = vector.extract_strided_slice %44 {offsets = [0, 512], sizes = [8, 512], strides = [1, 1]} : vector<8x1024xf32> to vector<8x512xf32>
    %82 = vector.broadcast %2 : vector<1x512xf32> to vector<8x512xf32>
    %83 = arith.addf %81, %82 : vector<8x512xf32>
    %c0_32 = arith.constant 0 : index
    %c128_33 = arith.constant 128 : index
    %84 = vector.load %arg9[%c0_32, %c128_33] : memref<8x256xf32, #tpu.memory_space<vmem>>, vector<8x128xf32>
    %85 = vector.extract_strided_slice %83 {offsets = [0, 0], sizes = [8, 128], strides = [1, 1]} : vector<8x512xf32> to vector<8x128xf32>
    %86 = arith.negf %85 : vector<8x128xf32>
    %87 = math.exp %86 : vector<8x128xf32>
    %cst_34 = arith.constant 1.000000e+00 : f32
    %88 = vector.broadcast %cst_34 : f32 to vector<8x128xf32>
    %89 = arith.addf %88, %87 : vector<8x128xf32>
    %90 = arith.divf %88, %89 : vector<8x128xf32>
    %91 = vector.extract_strided_slice %83 {offsets = [0, 128], sizes = [8, 128], strides = [1, 1]} : vector<8x512xf32> to vector<8x128xf32>
    %92 = arith.negf %91 : vector<8x128xf32>
    %93 = math.exp %92 : vector<8x128xf32>
    %cst_35 = arith.constant 1.000000e+00 : f32
    %94 = vector.broadcast %cst_35 : f32 to vector<8x128xf32>
    %95 = arith.addf %94, %93 : vector<8x128xf32>
    %96 = arith.divf %94, %95 : vector<8x128xf32>
    %97 = vector.extract_strided_slice %83 {offsets = [0, 256], sizes = [8, 128], strides = [1, 1]} : vector<8x512xf32> to vector<8x128xf32>
    %98 = math.tanh %97 : vector<8x128xf32>
    %99 = vector.extract_strided_slice %83 {offsets = [0, 384], sizes = [8, 128], strides = [1, 1]} : vector<8x512xf32> to vector<8x128xf32>
    %100 = arith.negf %99 : vector<8x128xf32>
    %101 = math.exp %100 : vector<8x128xf32>
    %cst_36 = arith.constant 1.000000e+00 : f32
    %102 = vector.broadcast %cst_36 : f32 to vector<8x128xf32>
    %103 = arith.addf %102, %101 : vector<8x128xf32>
    %104 = arith.divf %102, %103 : vector<8x128xf32>
    %105 = arith.mulf %96, %84 : vector<8x128xf32>
    %106 = arith.mulf %90, %98 : vector<8x128xf32>
    %107 = arith.addf %105, %106 : vector<8x128xf32>
    %108 = math.tanh %107 : vector<8x128xf32>
    %109 = arith.mulf %104, %108 : vector<8x128xf32>
    %c0_37 = arith.constant 0 : index
    %c0_38 = arith.constant 0 : index
    %110 = vector.load %arg8[%c0_37, %c0_38] : memref<8x256xf32, #tpu.memory_space<vmem>>, vector<8x128xf32>
    tpu.vector_store %arg8[%c0_37, %c0_38], %80 {strides = array<i32>} : memref<8x256xf32, #tpu.memory_space<vmem>>, vector<8x128xf32>,
    %c0_39 = arith.constant 0 : index
    %c128_40 = arith.constant 128 : index
    %111 = vector.load %arg8[%c0_39, %c128_40] : memref<8x256xf32, #tpu.memory_space<vmem>>, vector<8x128xf32>
    tpu.vector_store %arg8[%c0_39, %c128_40], %109 {strides = array<i32>} : memref<8x256xf32, #tpu.memory_space<vmem>>, vector<8x128xf32>,
    %c0_41 = arith.constant 0 : index
    %c0_42 = arith.constant 0 : index
    %112 = vector.load %arg9[%c0_41, %c0_42] : memref<8x256xf32, #tpu.memory_space<vmem>>, vector<8x128xf32>
    tpu.vector_store %arg9[%c0_41, %c0_42], %78 {strides = array<i32>} : memref<8x256xf32, #tpu.memory_space<vmem>>, vector<8x128xf32>,
    %c0_43 = arith.constant 0 : index
    %c128_44 = arith.constant 128 : index
    %113 = vector.load %arg9[%c0_43, %c128_44] : memref<8x256xf32, #tpu.memory_space<vmem>>, vector<8x128xf32>
    tpu.vector_store %arg9[%c0_43, %c128_44], %107 {strides = array<i32>} : memref<8x256xf32, #tpu.memory_space<vmem>>, vector<8x128xf32>,
    %c2_i32 = arith.constant 2 : i32
    %c0_45 = arith.constant 0 : index
    %c0_46 = arith.constant 0 : index
    %114 = vector.load %arg8[%c0_45, %c0_46] : memref<8x256xf32, #tpu.memory_space<vmem>>, vector<8x256xf32>
    %cst_47 = arith.constant dense<0.000000e+00> : vector<8x1024xf32>
    %115 = tpu.matmul %114, %3, %cst_47 {dimension_numbers = #tpu.dot_dimension_numbers<[1], [0], [0], [1], [0, 0, 1, 1], [], []>} : vector<8x256xf32>, vector<256x1024xf32>, vector<8x1024xf32> -> vector<8x1024xf32>
    %116 = arith.index_cast %c2_i32 : i32 to index
    %c0_48 = arith.constant 0 : index
    %c0_49 = arith.constant 0 : index
    %117 = vector.load %arg0[%116, %c0_48, %c0_49] : memref<8x8x1xf32, #tpu.memory_space<vmem>>, vector<1x8x1xf32>
    %118 = vector.shape_cast %117 : vector<1x8x1xf32> to vector<8x1xf32>
    %119 = vector.broadcast %118 : vector<8x1xf32> to vector<8x512xf32>
    %120 = vector.broadcast %0 : vector<1x512xf32> to vector<8x512xf32>
    %121 = arith.mulf %119, %120 : vector<8x512xf32>
    %122 = vector.broadcast %1 : vector<1x512xf32> to vector<8x512xf32>
    %123 = arith.addf %121, %122 : vector<8x512xf32>
    %124 = vector.extract_strided_slice %115 {offsets = [0, 0], sizes = [8, 512], strides = [1, 1]} : vector<8x1024xf32> to vector<8x512xf32>
    %125 = arith.addf %123, %124 : vector<8x512xf32>
    %c0_50 = arith.constant 0 : index
    %c0_51 = arith.constant 0 : index
    %126 = vector.load %arg9[%c0_50, %c0_51] : memref<8x256xf32, #tpu.memory_space<vmem>>, vector<8x128xf32>
    %127 = vector.extract_strided_slice %125 {offsets = [0, 0], sizes = [8, 128], strides = [1, 1]} : vector<8x512xf32> to vector<8x128xf32>
    %128 = arith.negf %127 : vector<8x128xf32>
    %129 = math.exp %128 : vector<8x128xf32>
    %cst_52 = arith.constant 1.000000e+00 : f32
    %130 = vector.broadcast %cst_52 : f32 to vector<8x128xf32>
    %131 = arith.addf %130, %129 : vector<8x128xf32>
    %132 = arith.divf %130, %131 : vector<8x128xf32>
    %133 = vector.extract_strided_slice %125 {offsets = [0, 128], sizes = [8, 128], strides = [1, 1]} : vector<8x512xf32> to vector<8x128xf32>
    %134 = arith.negf %133 : vector<8x128xf32>
    %135 = math.exp %134 : vector<8x128xf32>
    %cst_53 = arith.constant 1.000000e+00 : f32
    %136 = vector.broadcast %cst_53 : f32 to vector<8x128xf32>
    %137 = arith.addf %136, %135 : vector<8x128xf32>
    %138 = arith.divf %136, %137 : vector<8x128xf32>
    %139 = vector.extract_strided_slice %125 {offsets = [0, 256], sizes = [8, 128], strides = [1, 1]} : vector<8x512xf32> to vector<8x128xf32>
    %140 = math.tanh %139 : vector<8x128xf32>
    %141 = vector.extract_strided_slice %125 {offsets = [0, 384], sizes = [8, 128], strides = [1, 1]} : vector<8x512xf32> to vector<8x128xf32>
    %142 = arith.negf %141 : vector<8x128xf32>
    %143 = math.exp %142 : vector<8x128xf32>
    %cst_54 = arith.constant 1.000000e+00 : f32
    %144 = vector.broadcast %cst_54 : f32 to vector<8x128xf32>
    %145 = arith.addf %144, %143 : vector<8x128xf32>
    %146 = arith.divf %144, %145 : vector<8x128xf32>
    %147 = arith.mulf %138, %126 : vector<8x128xf32>
    %148 = arith.mulf %132, %140 : vector<8x128xf32>
    %149 = arith.addf %147, %148 : vector<8x128xf32>
    %150 = math.tanh %149 : vector<8x128xf32>
    %151 = arith.mulf %146, %150 : vector<8x128xf32>
    %152 = vector.extract_strided_slice %115 {offsets = [0, 512], sizes = [8, 512], strides = [1, 1]} : vector<8x1024xf32> to vector<8x512xf32>
    %153 = vector.broadcast %2 : vector<1x512xf32> to vector<8x512xf32>
    %154 = arith.addf %152, %153 : vector<8x512xf32>
    %c0_55 = arith.constant 0 : index
    %c128_56 = arith.constant 128 : index
    %155 = vector.load %arg9[%c0_55, %c128_56] : memref<8x256xf32, #tpu.memory_space<vmem>>, vector<8x128xf32>
    %156 = vector.extract_strided_slice %154 {offsets = [0, 0], sizes = [8, 128], strides = [1, 1]} : vector<8x512xf32> to vector<8x128xf32>
    %157 = arith.negf %156 : vector<8x128xf32>
    %158 = math.exp %157 : vector<8x128xf32>
    %cst_57 = arith.constant 1.000000e+00 : f32
    %159 = vector.broadcast %cst_57 : f32 to vector<8x128xf32>
    %160 = arith.addf %159, %158 : vector<8x128xf32>
    %161 = arith.divf %159, %160 : vector<8x128xf32>
    %162 = vector.extract_strided_slice %154 {offsets = [0, 128], sizes = [8, 128], strides = [1, 1]} : vector<8x512xf32> to vector<8x128xf32>
    %163 = arith.negf %162 : vector<8x128xf32>
    %164 = math.exp %163 : vector<8x128xf32>
    %cst_58 = arith.constant 1.000000e+00 : f32
    %165 = vector.broadcast %cst_58 : f32 to vector<8x128xf32>
    %166 = arith.addf %165, %164 : vector<8x128xf32>
    %167 = arith.divf %165, %166 : vector<8x128xf32>
    %168 = vector.extract_strided_slice %154 {offsets = [0, 256], sizes = [8, 128], strides = [1, 1]} : vector<8x512xf32> to vector<8x128xf32>
    %169 = math.tanh %168 : vector<8x128xf32>
    %170 = vector.extract_strided_slice %154 {offsets = [0, 384], sizes = [8, 128], strides = [1, 1]} : vector<8x512xf32> to vector<8x128xf32>
    %171 = arith.negf %170 : vector<8x128xf32>
    %172 = math.exp %171 : vector<8x128xf32>
    %cst_59 = arith.constant 1.000000e+00 : f32
    %173 = vector.broadcast %cst_59 : f32 to vector<8x128xf32>
    %174 = arith.addf %173, %172 : vector<8x128xf32>
    %175 = arith.divf %173, %174 : vector<8x128xf32>
    %176 = arith.mulf %167, %155 : vector<8x128xf32>
    %177 = arith.mulf %161, %169 : vector<8x128xf32>
    %178 = arith.addf %176, %177 : vector<8x128xf32>
    %179 = math.tanh %178 : vector<8x128xf32>
    %180 = arith.mulf %175, %179 : vector<8x128xf32>
    %c0_60 = arith.constant 0 : index
    %c0_61 = arith.constant 0 : index
    %181 = vector.load %arg8[%c0_60, %c0_61] : memref<8x256xf32, #tpu.memory_space<vmem>>, vector<8x128xf32>
    tpu.vector_store %arg8[%c0_60, %c0_61], %151 {strides = array<i32>} : memref<8x256xf32, #tpu.memory_space<vmem>>, vector<8x128xf32>,
    %c0_62 = arith.constant 0 : index
    %c128_63 = arith.constant 128 : index
    %182 = vector.load %arg8[%c0_62, %c128_63] : memref<8x256xf32, #tpu.memory_space<vmem>>, vector<8x128xf32>
    tpu.vector_store %arg8[%c0_62, %c128_63], %180 {strides = array<i32>} : memref<8x256xf32, #tpu.memory_space<vmem>>, vector<8x128xf32>,
    %c0_64 = arith.constant 0 : index
    %c0_65 = arith.constant 0 : index
    %183 = vector.load %arg9[%c0_64, %c0_65] : memref<8x256xf32, #tpu.memory_space<vmem>>, vector<8x128xf32>
    tpu.vector_store %arg9[%c0_64, %c0_65], %149 {strides = array<i32>} : memref<8x256xf32, #tpu.memory_space<vmem>>, vector<8x128xf32>,
    %c0_66 = arith.constant 0 : index
    %c128_67 = arith.constant 128 : index
    %184 = vector.load %arg9[%c0_66, %c128_67] : memref<8x256xf32, #tpu.memory_space<vmem>>, vector<8x128xf32>
    tpu.vector_store %arg9[%c0_66, %c128_67], %178 {strides = array<i32>} : memref<8x256xf32, #tpu.memory_space<vmem>>, vector<8x128xf32>,
    %c3_i32 = arith.constant 3 : i32
    %c0_68 = arith.constant 0 : index
    %c0_69 = arith.constant 0 : index
    %185 = vector.load %arg8[%c0_68, %c0_69] : memref<8x256xf32, #tpu.memory_space<vmem>>, vector<8x256xf32>
    %cst_70 = arith.constant dense<0.000000e+00> : vector<8x1024xf32>
    %186 = tpu.matmul %185, %3, %cst_70 {dimension_numbers = #tpu.dot_dimension_numbers<[1], [0], [0], [1], [0, 0, 1, 1], [], []>} : vector<8x256xf32>, vector<256x1024xf32>, vector<8x1024xf32> -> vector<8x1024xf32>
    %187 = arith.index_cast %c3_i32 : i32 to index
    %c0_71 = arith.constant 0 : index
    %c0_72 = arith.constant 0 : index
    %188 = vector.load %arg0[%187, %c0_71, %c0_72] : memref<8x8x1xf32, #tpu.memory_space<vmem>>, vector<1x8x1xf32>
    %189 = vector.shape_cast %188 : vector<1x8x1xf32> to vector<8x1xf32>
    %190 = vector.broadcast %189 : vector<8x1xf32> to vector<8x512xf32>
    %191 = vector.broadcast %0 : vector<1x512xf32> to vector<8x512xf32>
    %192 = arith.mulf %190, %191 : vector<8x512xf32>
    %193 = vector.broadcast %1 : vector<1x512xf32> to vector<8x512xf32>
    %194 = arith.addf %192, %193 : vector<8x512xf32>
    %195 = vector.extract_strided_slice %186 {offsets = [0, 0], sizes = [8, 512], strides = [1, 1]} : vector<8x1024xf32> to vector<8x512xf32>
    %196 = arith.addf %194, %195 : vector<8x512xf32>
    %c0_73 = arith.constant 0 : index
    %c0_74 = arith.constant 0 : index
    %197 = vector.load %arg9[%c0_73, %c0_74] : memref<8x256xf32, #tpu.memory_space<vmem>>, vector<8x128xf32>
    %198 = vector.extract_strided_slice %196 {offsets = [0, 0], sizes = [8, 128], strides = [1, 1]} : vector<8x512xf32> to vector<8x128xf32>
    %199 = arith.negf %198 : vector<8x128xf32>
    %200 = math.exp %199 : vector<8x128xf32>
    %cst_75 = arith.constant 1.000000e+00 : f32
    %201 = vector.broadcast %cst_75 : f32 to vector<8x128xf32>
    %202 = arith.addf %201, %200 : vector<8x128xf32>
    %203 = arith.divf %201, %202 : vector<8x128xf32>
    %204 = vector.extract_strided_slice %196 {offsets = [0, 128], sizes = [8, 128], strides = [1, 1]} : vector<8x512xf32> to vector<8x128xf32>
    %205 = arith.negf %204 : vector<8x128xf32>
    %206 = math.exp %205 : vector<8x128xf32>
    %cst_76 = arith.constant 1.000000e+00 : f32
    %207 = vector.broadcast %cst_76 : f32 to vector<8x128xf32>
    %208 = arith.addf %207, %206 : vector<8x128xf32>
    %209 = arith.divf %207, %208 : vector<8x128xf32>
    %210 = vector.extract_strided_slice %196 {offsets = [0, 256], sizes = [8, 128], strides = [1, 1]} : vector<8x512xf32> to vector<8x128xf32>
    %211 = math.tanh %210 : vector<8x128xf32>
    %212 = vector.extract_strided_slice %196 {offsets = [0, 384], sizes = [8, 128], strides = [1, 1]} : vector<8x512xf32> to vector<8x128xf32>
    %213 = arith.negf %212 : vector<8x128xf32>
    %214 = math.exp %213 : vector<8x128xf32>
    %cst_77 = arith.constant 1.000000e+00 : f32
    %215 = vector.broadcast %cst_77 : f32 to vector<8x128xf32>
    %216 = arith.addf %215, %214 : vector<8x128xf32>
    %217 = arith.divf %215, %216 : vector<8x128xf32>
    %218 = arith.mulf %209, %197 : vector<8x128xf32>
    %219 = arith.mulf %203, %211 : vector<8x128xf32>
    %220 = arith.addf %218, %219 : vector<8x128xf32>
    %221 = math.tanh %220 : vector<8x128xf32>
    %222 = arith.mulf %217, %221 : vector<8x128xf32>
    %223 = vector.extract_strided_slice %186 {offsets = [0, 512], sizes = [8, 512], strides = [1, 1]} : vector<8x1024xf32> to vector<8x512xf32>
    %224 = vector.broadcast %2 : vector<1x512xf32> to vector<8x512xf32>
    %225 = arith.addf %223, %224 : vector<8x512xf32>
    %c0_78 = arith.constant 0 : index
    %c128_79 = arith.constant 128 : index
    %226 = vector.load %arg9[%c0_78, %c128_79] : memref<8x256xf32, #tpu.memory_space<vmem>>, vector<8x128xf32>
    %227 = vector.extract_strided_slice %225 {offsets = [0, 0], sizes = [8, 128], strides = [1, 1]} : vector<8x512xf32> to vector<8x128xf32>
    %228 = arith.negf %227 : vector<8x128xf32>
    %229 = math.exp %228 : vector<8x128xf32>
    %cst_80 = arith.constant 1.000000e+00 : f32
    %230 = vector.broadcast %cst_80 : f32 to vector<8x128xf32>
    %231 = arith.addf %230, %229 : vector<8x128xf32>
    %232 = arith.divf %230, %231 : vector<8x128xf32>
    %233 = vector.extract_strided_slice %225 {offsets = [0, 128], sizes = [8, 128], strides = [1, 1]} : vector<8x512xf32> to vector<8x128xf32>
    %234 = arith.negf %233 : vector<8x128xf32>
    %235 = math.exp %234 : vector<8x128xf32>
    %cst_81 = arith.constant 1.000000e+00 : f32
    %236 = vector.broadcast %cst_81 : f32 to vector<8x128xf32>
    %237 = arith.addf %236, %235 : vector<8x128xf32>
    %238 = arith.divf %236, %237 : vector<8x128xf32>
    %239 = vector.extract_strided_slice %225 {offsets = [0, 256], sizes = [8, 128], strides = [1, 1]} : vector<8x512xf32> to vector<8x128xf32>
    %240 = math.tanh %239 : vector<8x128xf32>
    %241 = vector.extract_strided_slice %225 {offsets = [0, 384], sizes = [8, 128], strides = [1, 1]} : vector<8x512xf32> to vector<8x128xf32>
    %242 = arith.negf %241 : vector<8x128xf32>
    %243 = math.exp %242 : vector<8x128xf32>
    %cst_82 = arith.constant 1.000000e+00 : f32
    %244 = vector.broadcast %cst_82 : f32 to vector<8x128xf32>
    %245 = arith.addf %244, %243 : vector<8x128xf32>
    %246 = arith.divf %244, %245 : vector<8x128xf32>
    %247 = arith.mulf %238, %226 : vector<8x128xf32>
    %248 = arith.mulf %232, %240 : vector<8x128xf32>
    %249 = arith.addf %247, %248 : vector<8x128xf32>
    %250 = math.tanh %249 : vector<8x128xf32>
    %251 = arith.mulf %246, %250 : vector<8x128xf32>
    %c0_83 = arith.constant 0 : index
    %c0_84 = arith.constant 0 : index
    %252 = vector.load %arg8[%c0_83, %c0_84] : memref<8x256xf32, #tpu.memory_space<vmem>>, vector<8x128xf32>
    tpu.vector_store %arg8[%c0_83, %c0_84], %222 {strides = array<i32>} : memref<8x256xf32, #tpu.memory_space<vmem>>, vector<8x128xf32>,
    %c0_85 = arith.constant 0 : index
    %c128_86 = arith.constant 128 : index
    %253 = vector.load %arg8[%c0_85, %c128_86] : memref<8x256xf32, #tpu.memory_space<vmem>>, vector<8x128xf32>
    tpu.vector_store %arg8[%c0_85, %c128_86], %251 {strides = array<i32>} : memref<8x256xf32, #tpu.memory_space<vmem>>, vector<8x128xf32>,
    %c0_87 = arith.constant 0 : index
    %c0_88 = arith.constant 0 : index
    %254 = vector.load %arg9[%c0_87, %c0_88] : memref<8x256xf32, #tpu.memory_space<vmem>>, vector<8x128xf32>
    tpu.vector_store %arg9[%c0_87, %c0_88], %220 {strides = array<i32>} : memref<8x256xf32, #tpu.memory_space<vmem>>, vector<8x128xf32>,
    %c0_89 = arith.constant 0 : index
    %c128_90 = arith.constant 128 : index
    %255 = vector.load %arg9[%c0_89, %c128_90] : memref<8x256xf32, #tpu.memory_space<vmem>>, vector<8x128xf32>
    tpu.vector_store %arg9[%c0_89, %c128_90], %249 {strides = array<i32>} : memref<8x256xf32, #tpu.memory_space<vmem>>, vector<8x128xf32>,
    %c4_i32 = arith.constant 4 : i32
    %c0_91 = arith.constant 0 : index
    %c0_92 = arith.constant 0 : index
    %256 = vector.load %arg8[%c0_91, %c0_92] : memref<8x256xf32, #tpu.memory_space<vmem>>, vector<8x256xf32>
    %cst_93 = arith.constant dense<0.000000e+00> : vector<8x1024xf32>
    %257 = tpu.matmul %256, %3, %cst_93 {dimension_numbers = #tpu.dot_dimension_numbers<[1], [0], [0], [1], [0, 0, 1, 1], [], []>} : vector<8x256xf32>, vector<256x1024xf32>, vector<8x1024xf32> -> vector<8x1024xf32>
    %258 = arith.index_cast %c4_i32 : i32 to index
    %c0_94 = arith.constant 0 : index
    %c0_95 = arith.constant 0 : index
    %259 = vector.load %arg0[%258, %c0_94, %c0_95] : memref<8x8x1xf32, #tpu.memory_space<vmem>>, vector<1x8x1xf32>
    %260 = vector.shape_cast %259 : vector<1x8x1xf32> to vector<8x1xf32>
    %261 = vector.broadcast %260 : vector<8x1xf32> to vector<8x512xf32>
    %262 = vector.broadcast %0 : vector<1x512xf32> to vector<8x512xf32>
    %263 = arith.mulf %261, %262 : vector<8x512xf32>
    %264 = vector.broadcast %1 : vector<1x512xf32> to vector<8x512xf32>
    %265 = arith.addf %263, %264 : vector<8x512xf32>
    %266 = vector.extract_strided_slice %257 {offsets = [0, 0], sizes = [8, 512], strides = [1, 1]} : vector<8x1024xf32> to vector<8x512xf32>
    %267 = arith.addf %265, %266 : vector<8x512xf32>
    %c0_96 = arith.constant 0 : index
    %c0_97 = arith.constant 0 : index
    %268 = vector.load %arg9[%c0_96, %c0_97] : memref<8x256xf32, #tpu.memory_space<vmem>>, vector<8x128xf32>
    %269 = vector.extract_strided_slice %267 {offsets = [0, 0], sizes = [8, 128], strides = [1, 1]} : vector<8x512xf32> to vector<8x128xf32>
    %270 = arith.negf %269 : vector<8x128xf32>
    %271 = math.exp %270 : vector<8x128xf32>
    %cst_98 = arith.constant 1.000000e+00 : f32
    %272 = vector.broadcast %cst_98 : f32 to vector<8x128xf32>
    %273 = arith.addf %272, %271 : vector<8x128xf32>
    %274 = arith.divf %272, %273 : vector<8x128xf32>
    %275 = vector.extract_strided_slice %267 {offsets = [0, 128], sizes = [8, 128], strides = [1, 1]} : vector<8x512xf32> to vector<8x128xf32>
    %276 = arith.negf %275 : vector<8x128xf32>
    %277 = math.exp %276 : vector<8x128xf32>
    %cst_99 = arith.constant 1.000000e+00 : f32
    %278 = vector.broadcast %cst_99 : f32 to vector<8x128xf32>
    %279 = arith.addf %278, %277 : vector<8x128xf32>
    %280 = arith.divf %278, %279 : vector<8x128xf32>
    %281 = vector.extract_strided_slice %267 {offsets = [0, 256], sizes = [8, 128], strides = [1, 1]} : vector<8x512xf32> to vector<8x128xf32>
    %282 = math.tanh %281 : vector<8x128xf32>
    %283 = vector.extract_strided_slice %267 {offsets = [0, 384], sizes = [8, 128], strides = [1, 1]} : vector<8x512xf32> to vector<8x128xf32>
    %284 = arith.negf %283 : vector<8x128xf32>
    %285 = math.exp %284 : vector<8x128xf32>
    %cst_100 = arith.constant 1.000000e+00 : f32
    %286 = vector.broadcast %cst_100 : f32 to vector<8x128xf32>
    %287 = arith.addf %286, %285 : vector<8x128xf32>
    %288 = arith.divf %286, %287 : vector<8x128xf32>
    %289 = arith.mulf %280, %268 : vector<8x128xf32>
    %290 = arith.mulf %274, %282 : vector<8x128xf32>
    %291 = arith.addf %289, %290 : vector<8x128xf32>
    %292 = math.tanh %291 : vector<8x128xf32>
    %293 = arith.mulf %288, %292 : vector<8x128xf32>
    %294 = vector.extract_strided_slice %257 {offsets = [0, 512], sizes = [8, 512], strides = [1, 1]} : vector<8x1024xf32> to vector<8x512xf32>
    %295 = vector.broadcast %2 : vector<1x512xf32> to vector<8x512xf32>
    %296 = arith.addf %294, %295 : vector<8x512xf32>
    %c0_101 = arith.constant 0 : index
    %c128_102 = arith.constant 128 : index
    %297 = vector.load %arg9[%c0_101, %c128_102] : memref<8x256xf32, #tpu.memory_space<vmem>>, vector<8x128xf32>
    %298 = vector.extract_strided_slice %296 {offsets = [0, 0], sizes = [8, 128], strides = [1, 1]} : vector<8x512xf32> to vector<8x128xf32>
    %299 = arith.negf %298 : vector<8x128xf32>
    %300 = math.exp %299 : vector<8x128xf32>
    %cst_103 = arith.constant 1.000000e+00 : f32
    %301 = vector.broadcast %cst_103 : f32 to vector<8x128xf32>
    %302 = arith.addf %301, %300 : vector<8x128xf32>
    %303 = arith.divf %301, %302 : vector<8x128xf32>
    %304 = vector.extract_strided_slice %296 {offsets = [0, 128], sizes = [8, 128], strides = [1, 1]} : vector<8x512xf32> to vector<8x128xf32>
    %305 = arith.negf %304 : vector<8x128xf32>
    %306 = math.exp %305 : vector<8x128xf32>
    %cst_104 = arith.constant 1.000000e+00 : f32
    %307 = vector.broadcast %cst_104 : f32 to vector<8x128xf32>
    %308 = arith.addf %307, %306 : vector<8x128xf32>
    %309 = arith.divf %307, %308 : vector<8x128xf32>
    %310 = vector.extract_strided_slice %296 {offsets = [0, 256], sizes = [8, 128], strides = [1, 1]} : vector<8x512xf32> to vector<8x128xf32>
    %311 = math.tanh %310 : vector<8x128xf32>
    %312 = vector.extract_strided_slice %296 {offsets = [0, 384], sizes = [8, 128], strides = [1, 1]} : vector<8x512xf32> to vector<8x128xf32>
    %313 = arith.negf %312 : vector<8x128xf32>
    %314 = math.exp %313 : vector<8x128xf32>
    %cst_105 = arith.constant 1.000000e+00 : f32
    %315 = vector.broadcast %cst_105 : f32 to vector<8x128xf32>
    %316 = arith.addf %315, %314 : vector<8x128xf32>
    %317 = arith.divf %315, %316 : vector<8x128xf32>
    %318 = arith.mulf %309, %297 : vector<8x128xf32>
    %319 = arith.mulf %303, %311 : vector<8x128xf32>
    %320 = arith.addf %318, %319 : vector<8x128xf32>
    %321 = math.tanh %320 : vector<8x128xf32>
    %322 = arith.mulf %317, %321 : vector<8x128xf32>
    %c0_106 = arith.constant 0 : index
    %c0_107 = arith.constant 0 : index
    %323 = vector.load %arg8[%c0_106, %c0_107] : memref<8x256xf32, #tpu.memory_space<vmem>>, vector<8x128xf32>
    tpu.vector_store %arg8[%c0_106, %c0_107], %293 {strides = array<i32>} : memref<8x256xf32, #tpu.memory_space<vmem>>, vector<8x128xf32>,
    %c0_108 = arith.constant 0 : index
    %c128_109 = arith.constant 128 : index
    %324 = vector.load %arg8[%c0_108, %c128_109] : memref<8x256xf32, #tpu.memory_space<vmem>>, vector<8x128xf32>
    tpu.vector_store %arg8[%c0_108, %c128_109], %322 {strides = array<i32>} : memref<8x256xf32, #tpu.memory_space<vmem>>, vector<8x128xf32>,
    %c0_110 = arith.constant 0 : index
    %c0_111 = arith.constant 0 : index
    %325 = vector.load %arg9[%c0_110, %c0_111] : memref<8x256xf32, #tpu.memory_space<vmem>>, vector<8x128xf32>
    tpu.vector_store %arg9[%c0_110, %c0_111], %291 {strides = array<i32>} : memref<8x256xf32, #tpu.memory_space<vmem>>, vector<8x128xf32>,
    %c0_112 = arith.constant 0 : index
    %c128_113 = arith.constant 128 : index
    %326 = vector.load %arg9[%c0_112, %c128_113] : memref<8x256xf32, #tpu.memory_space<vmem>>, vector<8x128xf32>
    tpu.vector_store %arg9[%c0_112, %c128_113], %320 {strides = array<i32>} : memref<8x256xf32, #tpu.memory_space<vmem>>, vector<8x128xf32>,
    %c5_i32 = arith.constant 5 : i32
    %c0_114 = arith.constant 0 : index
    %c0_115 = arith.constant 0 : index
    %327 = vector.load %arg8[%c0_114, %c0_115] : memref<8x256xf32, #tpu.memory_space<vmem>>, vector<8x256xf32>
    %cst_116 = arith.constant dense<0.000000e+00> : vector<8x1024xf32>
    %328 = tpu.matmul %327, %3, %cst_116 {dimension_numbers = #tpu.dot_dimension_numbers<[1], [0], [0], [1], [0, 0, 1, 1], [], []>} : vector<8x256xf32>, vector<256x1024xf32>, vector<8x1024xf32> -> vector<8x1024xf32>
    %329 = arith.index_cast %c5_i32 : i32 to index
    %c0_117 = arith.constant 0 : index
    %c0_118 = arith.constant 0 : index
    %330 = vector.load %arg0[%329, %c0_117, %c0_118] : memref<8x8x1xf32, #tpu.memory_space<vmem>>, vector<1x8x1xf32>
    %331 = vector.shape_cast %330 : vector<1x8x1xf32> to vector<8x1xf32>
    %332 = vector.broadcast %331 : vector<8x1xf32> to vector<8x512xf32>
    %333 = vector.broadcast %0 : vector<1x512xf32> to vector<8x512xf32>
    %334 = arith.mulf %332, %333 : vector<8x512xf32>
    %335 = vector.broadcast %1 : vector<1x512xf32> to vector<8x512xf32>
    %336 = arith.addf %334, %335 : vector<8x512xf32>
    %337 = vector.extract_strided_slice %328 {offsets = [0, 0], sizes = [8, 512], strides = [1, 1]} : vector<8x1024xf32> to vector<8x512xf32>
    %338 = arith.addf %336, %337 : vector<8x512xf32>
    %c0_119 = arith.constant 0 : index
    %c0_120 = arith.constant 0 : index
    %339 = vector.load %arg9[%c0_119, %c0_120] : memref<8x256xf32, #tpu.memory_space<vmem>>, vector<8x128xf32>
    %340 = vector.extract_strided_slice %338 {offsets = [0, 0], sizes = [8, 128], strides = [1, 1]} : vector<8x512xf32> to vector<8x128xf32>
    %341 = arith.negf %340 : vector<8x128xf32>
    %342 = math.exp %341 : vector<8x128xf32>
    %cst_121 = arith.constant 1.000000e+00 : f32
    %343 = vector.broadcast %cst_121 : f32 to vector<8x128xf32>
    %344 = arith.addf %343, %342 : vector<8x128xf32>
    %345 = arith.divf %343, %344 : vector<8x128xf32>
    %346 = vector.extract_strided_slice %338 {offsets = [0, 128], sizes = [8, 128], strides = [1, 1]} : vector<8x512xf32> to vector<8x128xf32>
    %347 = arith.negf %346 : vector<8x128xf32>
    %348 = math.exp %347 : vector<8x128xf32>
    %cst_122 = arith.constant 1.000000e+00 : f32
    %349 = vector.broadcast %cst_122 : f32 to vector<8x128xf32>
    %350 = arith.addf %349, %348 : vector<8x128xf32>
    %351 = arith.divf %349, %350 : vector<8x128xf32>
    %352 = vector.extract_strided_slice %338 {offsets = [0, 256], sizes = [8, 128], strides = [1, 1]} : vector<8x512xf32> to vector<8x128xf32>
    %353 = math.tanh %352 : vector<8x128xf32>
    %354 = vector.extract_strided_slice %338 {offsets = [0, 384], sizes = [8, 128], strides = [1, 1]} : vector<8x512xf32> to vector<8x128xf32>
    %355 = arith.negf %354 : vector<8x128xf32>
    %356 = math.exp %355 : vector<8x128xf32>
    %cst_123 = arith.constant 1.000000e+00 : f32
    %357 = vector.broadcast %cst_123 : f32 to vector<8x128xf32>
    %358 = arith.addf %357, %356 : vector<8x128xf32>
    %359 = arith.divf %357, %358 : vector<8x128xf32>
    %360 = arith.mulf %351, %339 : vector<8x128xf32>
    %361 = arith.mulf %345, %353 : vector<8x128xf32>
    %362 = arith.addf %360, %361 : vector<8x128xf32>
    %363 = math.tanh %362 : vector<8x128xf32>
    %364 = arith.mulf %359, %363 : vector<8x128xf32>
    %365 = vector.extract_strided_slice %328 {offsets = [0, 512], sizes = [8, 512], strides = [1, 1]} : vector<8x1024xf32> to vector<8x512xf32>
    %366 = vector.broadcast %2 : vector<1x512xf32> to vector<8x512xf32>
    %367 = arith.addf %365, %366 : vector<8x512xf32>
    %c0_124 = arith.constant 0 : index
    %c128_125 = arith.constant 128 : index
    %368 = vector.load %arg9[%c0_124, %c128_125] : memref<8x256xf32, #tpu.memory_space<vmem>>, vector<8x128xf32>
    %369 = vector.extract_strided_slice %367 {offsets = [0, 0], sizes = [8, 128], strides = [1, 1]} : vector<8x512xf32> to vector<8x128xf32>
    %370 = arith.negf %369 : vector<8x128xf32>
    %371 = math.exp %370 : vector<8x128xf32>
    %cst_126 = arith.constant 1.000000e+00 : f32
    %372 = vector.broadcast %cst_126 : f32 to vector<8x128xf32>
    %373 = arith.addf %372, %371 : vector<8x128xf32>
    %374 = arith.divf %372, %373 : vector<8x128xf32>
    %375 = vector.extract_strided_slice %367 {offsets = [0, 128], sizes = [8, 128], strides = [1, 1]} : vector<8x512xf32> to vector<8x128xf32>
    %376 = arith.negf %375 : vector<8x128xf32>
    %377 = math.exp %376 : vector<8x128xf32>
    %cst_127 = arith.constant 1.000000e+00 : f32
    %378 = vector.broadcast %cst_127 : f32 to vector<8x128xf32>
    %379 = arith.addf %378, %377 : vector<8x128xf32>
    %380 = arith.divf %378, %379 : vector<8x128xf32>
    %381 = vector.extract_strided_slice %367 {offsets = [0, 256], sizes = [8, 128], strides = [1, 1]} : vector<8x512xf32> to vector<8x128xf32>
    %382 = math.tanh %381 : vector<8x128xf32>
    %383 = vector.extract_strided_slice %367 {offsets = [0, 384], sizes = [8, 128], strides = [1, 1]} : vector<8x512xf32> to vector<8x128xf32>
    %384 = arith.negf %383 : vector<8x128xf32>
    %385 = math.exp %384 : vector<8x128xf32>
    %cst_128 = arith.constant 1.000000e+00 : f32
    %386 = vector.broadcast %cst_128 : f32 to vector<8x128xf32>
    %387 = arith.addf %386, %385 : vector<8x128xf32>
    %388 = arith.divf %386, %387 : vector<8x128xf32>
    %389 = arith.mulf %380, %368 : vector<8x128xf32>
    %390 = arith.mulf %374, %382 : vector<8x128xf32>
    %391 = arith.addf %389, %390 : vector<8x128xf32>
    %392 = math.tanh %391 : vector<8x128xf32>
    %393 = arith.mulf %388, %392 : vector<8x128xf32>
    %c0_129 = arith.constant 0 : index
    %c0_130 = arith.constant 0 : index
    %394 = vector.load %arg8[%c0_129, %c0_130] : memref<8x256xf32, #tpu.memory_space<vmem>>, vector<8x128xf32>
    tpu.vector_store %arg8[%c0_129, %c0_130], %364 {strides = array<i32>} : memref<8x256xf32, #tpu.memory_space<vmem>>, vector<8x128xf32>,
    %c0_131 = arith.constant 0 : index
    %c128_132 = arith.constant 128 : index
    %395 = vector.load %arg8[%c0_131, %c128_132] : memref<8x256xf32, #tpu.memory_space<vmem>>, vector<8x128xf32>
    tpu.vector_store %arg8[%c0_131, %c128_132], %393 {strides = array<i32>} : memref<8x256xf32, #tpu.memory_space<vmem>>, vector<8x128xf32>,
    %c0_133 = arith.constant 0 : index
    %c0_134 = arith.constant 0 : index
    %396 = vector.load %arg9[%c0_133, %c0_134] : memref<8x256xf32, #tpu.memory_space<vmem>>, vector<8x128xf32>
    tpu.vector_store %arg9[%c0_133, %c0_134], %362 {strides = array<i32>} : memref<8x256xf32, #tpu.memory_space<vmem>>, vector<8x128xf32>,
    %c0_135 = arith.constant 0 : index
    %c128_136 = arith.constant 128 : index
    %397 = vector.load %arg9[%c0_135, %c128_136] : memref<8x256xf32, #tpu.memory_space<vmem>>, vector<8x128xf32>
    tpu.vector_store %arg9[%c0_135, %c128_136], %391 {strides = array<i32>} : memref<8x256xf32, #tpu.memory_space<vmem>>, vector<8x128xf32>,
    %c6_i32 = arith.constant 6 : i32
    %c0_137 = arith.constant 0 : index
    %c0_138 = arith.constant 0 : index
    %398 = vector.load %arg8[%c0_137, %c0_138] : memref<8x256xf32, #tpu.memory_space<vmem>>, vector<8x256xf32>
    %cst_139 = arith.constant dense<0.000000e+00> : vector<8x1024xf32>
    %399 = tpu.matmul %398, %3, %cst_139 {dimension_numbers = #tpu.dot_dimension_numbers<[1], [0], [0], [1], [0, 0, 1, 1], [], []>} : vector<8x256xf32>, vector<256x1024xf32>, vector<8x1024xf32> -> vector<8x1024xf32>
    %400 = arith.index_cast %c6_i32 : i32 to index
    %c0_140 = arith.constant 0 : index
    %c0_141 = arith.constant 0 : index
    %401 = vector.load %arg0[%400, %c0_140, %c0_141] : memref<8x8x1xf32, #tpu.memory_space<vmem>>, vector<1x8x1xf32>
    %402 = vector.shape_cast %401 : vector<1x8x1xf32> to vector<8x1xf32>
    %403 = vector.broadcast %402 : vector<8x1xf32> to vector<8x512xf32>
    %404 = vector.broadcast %0 : vector<1x512xf32> to vector<8x512xf32>
    %405 = arith.mulf %403, %404 : vector<8x512xf32>
    %406 = vector.broadcast %1 : vector<1x512xf32> to vector<8x512xf32>
    %407 = arith.addf %405, %406 : vector<8x512xf32>
    %408 = vector.extract_strided_slice %399 {offsets = [0, 0], sizes = [8, 512], strides = [1, 1]} : vector<8x1024xf32> to vector<8x512xf32>
    %409 = arith.addf %407, %408 : vector<8x512xf32>
    %c0_142 = arith.constant 0 : index
    %c0_143 = arith.constant 0 : index
    %410 = vector.load %arg9[%c0_142, %c0_143] : memref<8x256xf32, #tpu.memory_space<vmem>>, vector<8x128xf32>
    %411 = vector.extract_strided_slice %409 {offsets = [0, 0], sizes = [8, 128], strides = [1, 1]} : vector<8x512xf32> to vector<8x128xf32>
    %412 = arith.negf %411 : vector<8x128xf32>
    %413 = math.exp %412 : vector<8x128xf32>
    %cst_144 = arith.constant 1.000000e+00 : f32
    %414 = vector.broadcast %cst_144 : f32 to vector<8x128xf32>
    %415 = arith.addf %414, %413 : vector<8x128xf32>
    %416 = arith.divf %414, %415 : vector<8x128xf32>
    %417 = vector.extract_strided_slice %409 {offsets = [0, 128], sizes = [8, 128], strides = [1, 1]} : vector<8x512xf32> to vector<8x128xf32>
    %418 = arith.negf %417 : vector<8x128xf32>
    %419 = math.exp %418 : vector<8x128xf32>
    %cst_145 = arith.constant 1.000000e+00 : f32
    %420 = vector.broadcast %cst_145 : f32 to vector<8x128xf32>
    %421 = arith.addf %420, %419 : vector<8x128xf32>
    %422 = arith.divf %420, %421 : vector<8x128xf32>
    %423 = vector.extract_strided_slice %409 {offsets = [0, 256], sizes = [8, 128], strides = [1, 1]} : vector<8x512xf32> to vector<8x128xf32>
    %424 = math.tanh %423 : vector<8x128xf32>
    %425 = vector.extract_strided_slice %409 {offsets = [0, 384], sizes = [8, 128], strides = [1, 1]} : vector<8x512xf32> to vector<8x128xf32>
    %426 = arith.negf %425 : vector<8x128xf32>
    %427 = math.exp %426 : vector<8x128xf32>
    %cst_146 = arith.constant 1.000000e+00 : f32
    %428 = vector.broadcast %cst_146 : f32 to vector<8x128xf32>
    %429 = arith.addf %428, %427 : vector<8x128xf32>
    %430 = arith.divf %428, %429 : vector<8x128xf32>
    %431 = arith.mulf %422, %410 : vector<8x128xf32>
    %432 = arith.mulf %416, %424 : vector<8x128xf32>
    %433 = arith.addf %431, %432 : vector<8x128xf32>
    %434 = math.tanh %433 : vector<8x128xf32>
    %435 = arith.mulf %430, %434 : vector<8x128xf32>
    %436 = vector.extract_strided_slice %399 {offsets = [0, 512], sizes = [8, 512], strides = [1, 1]} : vector<8x1024xf32> to vector<8x512xf32>
    %437 = vector.broadcast %2 : vector<1x512xf32> to vector<8x512xf32>
    %438 = arith.addf %436, %437 : vector<8x512xf32>
    %c0_147 = arith.constant 0 : index
    %c128_148 = arith.constant 128 : index
    %439 = vector.load %arg9[%c0_147, %c128_148] : memref<8x256xf32, #tpu.memory_space<vmem>>, vector<8x128xf32>
    %440 = vector.extract_strided_slice %438 {offsets = [0, 0], sizes = [8, 128], strides = [1, 1]} : vector<8x512xf32> to vector<8x128xf32>
    %441 = arith.negf %440 : vector<8x128xf32>
    %442 = math.exp %441 : vector<8x128xf32>
    %cst_149 = arith.constant 1.000000e+00 : f32
    %443 = vector.broadcast %cst_149 : f32 to vector<8x128xf32>
    %444 = arith.addf %443, %442 : vector<8x128xf32>
    %445 = arith.divf %443, %444 : vector<8x128xf32>
    %446 = vector.extract_strided_slice %438 {offsets = [0, 128], sizes = [8, 128], strides = [1, 1]} : vector<8x512xf32> to vector<8x128xf32>
    %447 = arith.negf %446 : vector<8x128xf32>
    %448 = math.exp %447 : vector<8x128xf32>
    %cst_150 = arith.constant 1.000000e+00 : f32
    %449 = vector.broadcast %cst_150 : f32 to vector<8x128xf32>
    %450 = arith.addf %449, %448 : vector<8x128xf32>
    %451 = arith.divf %449, %450 : vector<8x128xf32>
    %452 = vector.extract_strided_slice %438 {offsets = [0, 256], sizes = [8, 128], strides = [1, 1]} : vector<8x512xf32> to vector<8x128xf32>
    %453 = math.tanh %452 : vector<8x128xf32>
    %454 = vector.extract_strided_slice %438 {offsets = [0, 384], sizes = [8, 128], strides = [1, 1]} : vector<8x512xf32> to vector<8x128xf32>
    %455 = arith.negf %454 : vector<8x128xf32>
    %456 = math.exp %455 : vector<8x128xf32>
    %cst_151 = arith.constant 1.000000e+00 : f32
    %457 = vector.broadcast %cst_151 : f32 to vector<8x128xf32>
    %458 = arith.addf %457, %456 : vector<8x128xf32>
    %459 = arith.divf %457, %458 : vector<8x128xf32>
    %460 = arith.mulf %451, %439 : vector<8x128xf32>
    %461 = arith.mulf %445, %453 : vector<8x128xf32>
    %462 = arith.addf %460, %461 : vector<8x128xf32>
    %463 = math.tanh %462 : vector<8x128xf32>
    %464 = arith.mulf %459, %463 : vector<8x128xf32>
    %c0_152 = arith.constant 0 : index
    %c0_153 = arith.constant 0 : index
    %465 = vector.load %arg8[%c0_152, %c0_153] : memref<8x256xf32, #tpu.memory_space<vmem>>, vector<8x128xf32>
    tpu.vector_store %arg8[%c0_152, %c0_153], %435 {strides = array<i32>} : memref<8x256xf32, #tpu.memory_space<vmem>>, vector<8x128xf32>,
    %c0_154 = arith.constant 0 : index
    %c128_155 = arith.constant 128 : index
    %466 = vector.load %arg8[%c0_154, %c128_155] : memref<8x256xf32, #tpu.memory_space<vmem>>, vector<8x128xf32>
    tpu.vector_store %arg8[%c0_154, %c128_155], %464 {strides = array<i32>} : memref<8x256xf32, #tpu.memory_space<vmem>>, vector<8x128xf32>,
    %c0_156 = arith.constant 0 : index
    %c0_157 = arith.constant 0 : index
    %467 = vector.load %arg9[%c0_156, %c0_157] : memref<8x256xf32, #tpu.memory_space<vmem>>, vector<8x128xf32>
    tpu.vector_store %arg9[%c0_156, %c0_157], %433 {strides = array<i32>} : memref<8x256xf32, #tpu.memory_space<vmem>>, vector<8x128xf32>,
    %c0_158 = arith.constant 0 : index
    %c128_159 = arith.constant 128 : index
    %468 = vector.load %arg9[%c0_158, %c128_159] : memref<8x256xf32, #tpu.memory_space<vmem>>, vector<8x128xf32>
    tpu.vector_store %arg9[%c0_158, %c128_159], %462 {strides = array<i32>} : memref<8x256xf32, #tpu.memory_space<vmem>>, vector<8x128xf32>,
    %c7_i32 = arith.constant 7 : i32
    %c0_160 = arith.constant 0 : index
    %c0_161 = arith.constant 0 : index
    %469 = vector.load %arg8[%c0_160, %c0_161] : memref<8x256xf32, #tpu.memory_space<vmem>>, vector<8x256xf32>
    %cst_162 = arith.constant dense<0.000000e+00> : vector<8x1024xf32>
    %470 = tpu.matmul %469, %3, %cst_162 {dimension_numbers = #tpu.dot_dimension_numbers<[1], [0], [0], [1], [0, 0, 1, 1], [], []>} : vector<8x256xf32>, vector<256x1024xf32>, vector<8x1024xf32> -> vector<8x1024xf32>
    %471 = arith.index_cast %c7_i32 : i32 to index
    %c0_163 = arith.constant 0 : index
    %c0_164 = arith.constant 0 : index
    %472 = vector.load %arg0[%471, %c0_163, %c0_164] : memref<8x8x1xf32, #tpu.memory_space<vmem>>, vector<1x8x1xf32>
    %473 = vector.shape_cast %472 : vector<1x8x1xf32> to vector<8x1xf32>
    %474 = vector.broadcast %473 : vector<8x1xf32> to vector<8x512xf32>
    %475 = vector.broadcast %0 : vector<1x512xf32> to vector<8x512xf32>
    %476 = arith.mulf %474, %475 : vector<8x512xf32>
    %477 = vector.broadcast %1 : vector<1x512xf32> to vector<8x512xf32>
    %478 = arith.addf %476, %477 : vector<8x512xf32>
    %479 = vector.extract_strided_slice %470 {offsets = [0, 0], sizes = [8, 512], strides = [1, 1]} : vector<8x1024xf32> to vector<8x512xf32>
    %480 = arith.addf %478, %479 : vector<8x512xf32>
    %c0_165 = arith.constant 0 : index
    %c0_166 = arith.constant 0 : index
    %481 = vector.load %arg9[%c0_165, %c0_166] : memref<8x256xf32, #tpu.memory_space<vmem>>, vector<8x128xf32>
    %482 = vector.extract_strided_slice %480 {offsets = [0, 0], sizes = [8, 128], strides = [1, 1]} : vector<8x512xf32> to vector<8x128xf32>
    %483 = arith.negf %482 : vector<8x128xf32>
    %484 = math.exp %483 : vector<8x128xf32>
    %cst_167 = arith.constant 1.000000e+00 : f32
    %485 = vector.broadcast %cst_167 : f32 to vector<8x128xf32>
    %486 = arith.addf %485, %484 : vector<8x128xf32>
    %487 = arith.divf %485, %486 : vector<8x128xf32>
    %488 = vector.extract_strided_slice %480 {offsets = [0, 128], sizes = [8, 128], strides = [1, 1]} : vector<8x512xf32> to vector<8x128xf32>
    %489 = arith.negf %488 : vector<8x128xf32>
    %490 = math.exp %489 : vector<8x128xf32>
    %cst_168 = arith.constant 1.000000e+00 : f32
    %491 = vector.broadcast %cst_168 : f32 to vector<8x128xf32>
    %492 = arith.addf %491, %490 : vector<8x128xf32>
    %493 = arith.divf %491, %492 : vector<8x128xf32>
    %494 = vector.extract_strided_slice %480 {offsets = [0, 256], sizes = [8, 128], strides = [1, 1]} : vector<8x512xf32> to vector<8x128xf32>
    %495 = math.tanh %494 : vector<8x128xf32>
    %496 = vector.extract_strided_slice %480 {offsets = [0, 384], sizes = [8, 128], strides = [1, 1]} : vector<8x512xf32> to vector<8x128xf32>
    %497 = arith.negf %496 : vector<8x128xf32>
    %498 = math.exp %497 : vector<8x128xf32>
    %cst_169 = arith.constant 1.000000e+00 : f32
    %499 = vector.broadcast %cst_169 : f32 to vector<8x128xf32>
    %500 = arith.addf %499, %498 : vector<8x128xf32>
    %501 = arith.divf %499, %500 : vector<8x128xf32>
    %502 = arith.mulf %493, %481 : vector<8x128xf32>
    %503 = arith.mulf %487, %495 : vector<8x128xf32>
    %504 = arith.addf %502, %503 : vector<8x128xf32>
    %505 = math.tanh %504 : vector<8x128xf32>
    %506 = arith.mulf %501, %505 : vector<8x128xf32>
    %507 = vector.extract_strided_slice %470 {offsets = [0, 512], sizes = [8, 512], strides = [1, 1]} : vector<8x1024xf32> to vector<8x512xf32>
    %508 = vector.broadcast %2 : vector<1x512xf32> to vector<8x512xf32>
    %509 = arith.addf %507, %508 : vector<8x512xf32>
    %c0_170 = arith.constant 0 : index
    %c128_171 = arith.constant 128 : index
    %510 = vector.load %arg9[%c0_170, %c128_171] : memref<8x256xf32, #tpu.memory_space<vmem>>, vector<8x128xf32>
    %511 = vector.extract_strided_slice %509 {offsets = [0, 0], sizes = [8, 128], strides = [1, 1]} : vector<8x512xf32> to vector<8x128xf32>
    %512 = arith.negf %511 : vector<8x128xf32>
    %513 = math.exp %512 : vector<8x128xf32>
    %cst_172 = arith.constant 1.000000e+00 : f32
    %514 = vector.broadcast %cst_172 : f32 to vector<8x128xf32>
    %515 = arith.addf %514, %513 : vector<8x128xf32>
    %516 = arith.divf %514, %515 : vector<8x128xf32>
    %517 = vector.extract_strided_slice %509 {offsets = [0, 128], sizes = [8, 128], strides = [1, 1]} : vector<8x512xf32> to vector<8x128xf32>
    %518 = arith.negf %517 : vector<8x128xf32>
    %519 = math.exp %518 : vector<8x128xf32>
    %cst_173 = arith.constant 1.000000e+00 : f32
    %520 = vector.broadcast %cst_173 : f32 to vector<8x128xf32>
    %521 = arith.addf %520, %519 : vector<8x128xf32>
    %522 = arith.divf %520, %521 : vector<8x128xf32>
    %523 = vector.extract_strided_slice %509 {offsets = [0, 256], sizes = [8, 128], strides = [1, 1]} : vector<8x512xf32> to vector<8x128xf32>
    %524 = math.tanh %523 : vector<8x128xf32>
    %525 = vector.extract_strided_slice %509 {offsets = [0, 384], sizes = [8, 128], strides = [1, 1]} : vector<8x512xf32> to vector<8x128xf32>
    %526 = arith.negf %525 : vector<8x128xf32>
    %527 = math.exp %526 : vector<8x128xf32>
    %cst_174 = arith.constant 1.000000e+00 : f32
    %528 = vector.broadcast %cst_174 : f32 to vector<8x128xf32>
    %529 = arith.addf %528, %527 : vector<8x128xf32>
    %530 = arith.divf %528, %529 : vector<8x128xf32>
    %531 = arith.mulf %522, %510 : vector<8x128xf32>
    %532 = arith.mulf %516, %524 : vector<8x128xf32>
    %533 = arith.addf %531, %532 : vector<8x128xf32>
    %534 = math.tanh %533 : vector<8x128xf32>
    %535 = arith.mulf %530, %534 : vector<8x128xf32>
    %c0_175 = arith.constant 0 : index
    %c0_176 = arith.constant 0 : index
    %536 = vector.load %arg8[%c0_175, %c0_176] : memref<8x256xf32, #tpu.memory_space<vmem>>, vector<8x128xf32>
    tpu.vector_store %arg8[%c0_175, %c0_176], %506 {strides = array<i32>} : memref<8x256xf32, #tpu.memory_space<vmem>>, vector<8x128xf32>,
    %c0_177 = arith.constant 0 : index
    %c128_178 = arith.constant 128 : index
    %537 = vector.load %arg8[%c0_177, %c128_178] : memref<8x256xf32, #tpu.memory_space<vmem>>, vector<8x128xf32>
    tpu.vector_store %arg8[%c0_177, %c128_178], %535 {strides = array<i32>} : memref<8x256xf32, #tpu.memory_space<vmem>>, vector<8x128xf32>,
    %c0_179 = arith.constant 0 : index
    %c0_180 = arith.constant 0 : index
    %538 = vector.load %arg9[%c0_179, %c0_180] : memref<8x256xf32, #tpu.memory_space<vmem>>, vector<8x128xf32>
    tpu.vector_store %arg9[%c0_179, %c0_180], %504 {strides = array<i32>} : memref<8x256xf32, #tpu.memory_space<vmem>>, vector<8x128xf32>,
    %c0_181 = arith.constant 0 : index
    %c128_182 = arith.constant 128 : index
    %539 = vector.load %arg9[%c0_181, %c128_182] : memref<8x256xf32, #tpu.memory_space<vmem>>, vector<8x128xf32>
    tpu.vector_store %arg9[%c0_181, %c128_182], %533 {strides = array<i32>} : memref<8x256xf32, #tpu.memory_space<vmem>>, vector<8x128xf32>,
    %c7_i32_183 = arith.constant 7 : i32
    %c0_184 = arith.constant 0 : index
    %c0_185 = arith.constant 0 : index
    %540 = vector.load %arg8[%c0_184, %c0_185] : memref<8x256xf32, #tpu.memory_space<vmem>>, vector<8x256xf32>
    %541 = vector.extract_strided_slice %3 {offsets = [0, 512], sizes = [256, 512], strides = [1, 1]} : vector<256x1024xf32> to vector<256x512xf32>
    %cst_186 = arith.constant dense<0.000000e+00> : vector<8x512xf32>
    %542 = tpu.matmul %540, %541, %cst_186 {dimension_numbers = #tpu.dot_dimension_numbers<[1], [0], [0], [1], [0, 0, 1, 1], [], []>} : vector<8x256xf32>, vector<256x512xf32>, vector<8x512xf32> -> vector<8x512xf32>
    %543 = vector.broadcast %2 : vector<1x512xf32> to vector<8x512xf32>
    %544 = arith.addf %542, %543 : vector<8x512xf32>
    %c0_187 = arith.constant 0 : index
    %c128_188 = arith.constant 128 : index
    %545 = vector.load %arg9[%c0_187, %c128_188] : memref<8x256xf32, #tpu.memory_space<vmem>>, vector<8x128xf32>
    %546 = vector.extract_strided_slice %544 {offsets = [0, 0], sizes = [8, 128], strides = [1, 1]} : vector<8x512xf32> to vector<8x128xf32>
    %547 = arith.negf %546 : vector<8x128xf32>
    %548 = math.exp %547 : vector<8x128xf32>
    %cst_189 = arith.constant 1.000000e+00 : f32
    %549 = vector.broadcast %cst_189 : f32 to vector<8x128xf32>
    %550 = arith.addf %549, %548 : vector<8x128xf32>
    %551 = arith.divf %549, %550 : vector<8x128xf32>
    %552 = vector.extract_strided_slice %544 {offsets = [0, 128], sizes = [8, 128], strides = [1, 1]} : vector<8x512xf32> to vector<8x128xf32>
    %553 = arith.negf %552 : vector<8x128xf32>
    %554 = math.exp %553 : vector<8x128xf32>
    %cst_190 = arith.constant 1.000000e+00 : f32
    %555 = vector.broadcast %cst_190 : f32 to vector<8x128xf32>
    %556 = arith.addf %555, %554 : vector<8x128xf32>
    %557 = arith.divf %555, %556 : vector<8x128xf32>
    %558 = vector.extract_strided_slice %544 {offsets = [0, 256], sizes = [8, 128], strides = [1, 1]} : vector<8x512xf32> to vector<8x128xf32>
    %559 = math.tanh %558 : vector<8x128xf32>
    %560 = vector.extract_strided_slice %544 {offsets = [0, 384], sizes = [8, 128], strides = [1, 1]} : vector<8x512xf32> to vector<8x128xf32>
    %561 = arith.negf %560 : vector<8x128xf32>
    %562 = math.exp %561 : vector<8x128xf32>
    %cst_191 = arith.constant 1.000000e+00 : f32
    %563 = vector.broadcast %cst_191 : f32 to vector<8x128xf32>
    %564 = arith.addf %563, %562 : vector<8x128xf32>
    %565 = arith.divf %563, %564 : vector<8x128xf32>
    %566 = arith.mulf %557, %545 : vector<8x128xf32>
    %567 = arith.mulf %551, %559 : vector<8x128xf32>
    %568 = arith.addf %566, %567 : vector<8x128xf32>
    %569 = math.tanh %568 : vector<8x128xf32>
    %570 = arith.mulf %565, %569 : vector<8x128xf32>
    %c0_192 = arith.constant 0 : index
    %c0_193 = arith.constant 0 : index
    %571 = vector.load %arg5[%c0_192, %c0_193] : memref<128x1xf32, #tpu.memory_space<vmem>>, vector<128x1xf32>
    %cst_194 = arith.constant dense<0.000000e+00> : vector<8x1xf32>
    %572 = tpu.matmul %570, %571, %cst_194 {dimension_numbers = #tpu.dot_dimension_numbers<[1], [0], [0], [1], [0, 0, 1, 1], [], []>} : vector<8x128xf32>, vector<128x1xf32>, vector<8x1xf32> -> vector<8x1xf32>
    %c0_195 = arith.constant 0 : index
    %c0_196 = arith.constant 0 : index
    %573 = vector.load %arg6[%c0_195, %c0_196] : memref<1x1xf32, #tpu.memory_space<vmem>>, vector<1x1xf32>
    %574 = vector.broadcast %573 : vector<1x1xf32> to vector<8x1xf32>
    %575 = arith.addf %572, %574 : vector<8x1xf32>
    %c0_197 = arith.constant 0 : index
    %c0_198 = arith.constant 0 : index
    %576 = vector.load %arg7[%c0_197, %c0_198] : memref<8x1xf32, #tpu.memory_space<vmem>>, vector<8x1xf32>
    tpu.vector_store %arg7[%c0_197, %c0_198], %575 {strides = array<i32>} : memref<8x1xf32, #tpu.memory_space<vmem>>, vector<8x1xf32>,
    return
  }
}

</mosaic_0001>

<bundles_post_ra>
// kernel: lstm_forward.1
= control target key start
LH: loop header
LB: loop body
LE: loop exit
PB: predicated region body
PF: predicated region fallthrough
CT: control target
= control target key end

     0   :  { %v4338_v0 = vmov 0   ;;  %vm4340_vm0 = vmmov 0   ;;  %vm3195_vm1 = vcmask 7168   ;;  %s11383_s0 = inlined_call_operand.vmem [shape: f32[8,8,1], index: 0, kind: input, shape index: {}]   ;;  %s11384_s3 = inlined_call_operand.vmem [shape: f32[256,1024], index: 3, kind: input, shape index: {}]   ;;  %s11385_s1 = inlined_call_operand.vmem [shape: f32[1,512], index: 1, kind: input, shape index: {}]   ;;  %s11386_s2 = inlined_call_operand.vmem [shape: f32[1,512], index: 2, kind: input, shape index: {}]   ;;  %s11387_s4 = inlined_call_operand.vmem [shape: f32[1,512], index: 4, kind: input, shape index: {}]   ;;  %s11388_s5 = inlined_call_operand.vmem [shape: f32[128,1], index: 5, kind: input, shape index: {}]   ;;  %s11389_s6 = inlined_call_operand.<no memory space> [shape: f32[1,1], index: 6, kind: input, shape index: {}]   ;;  %s11390_s7 = inlined_call_operand.vmem [shape: f32[8,1], index: 7, kind: output, shape index: {}]  }
   0x1   :  { %3312 = vset.pattern.permute.xlu0 %v4338_v0  ;;  %v287_v1 = vld [vmem:[%s11383_s0] sm:$0xff]  ;;  %3313 = vset.pattern.permute.xlu1 %v4338_v0  ;;  %v3204_v2 = vld [vmem:[%s11383_s0 + $0x8] sm:$0xff]  ;;  %v154_v4 = vld [vmem:[%s11384_s3 + $0x3d8] sm:$0xff] }
   0x2   :  { %290 = vperm.xlu0 %3312, %v287_v1   ;;  %v152_v3 = vld [vmem:[%s11384_s3 + $0x3c8] sm:$0xff]  ;;  %444 = vmatprep.subr.mxu1 %v154_v4  ;;  %v151_v5 = vld [vmem:[%s11384_s3 + $0x3c0] sm:$0xff]  ;;  %v153_v6 = vld [vmem:[%s11384_s3 + $0x3d0] sm:$0xff] }
   0x3   :  { %373 = vmatprep.subr.mxu0 %v152_v3  ;;  %v144_v7 = vld [vmem:[%s11384_s3 + $0x388] sm:$0xff]  ;;  %445 = vmatpush1.msra.mxu1 %v153_v6  ;;  %v146_v8 = vld [vmem:[%s11384_s3 + $0x398] sm:$0xff]  ;;  %v143_v9 = vld [vmem:[%s11384_s3 + $0x380] sm:$0xff] }
   0x4   :  { %374 = vmatpush1.msra.mxu0 %v151_v5  ;;  %v145_v10 = vld [vmem:[%s11384_s3 + $0x390] sm:$0xff]  ;;  %446 = vmatprep.subr.mxu1 %v146_v8  ;;  %v136_v11 = vld [vmem:[%s11384_s3 + $0x348] sm:$0xff]  ;;  %v138_v12 = vld [vmem:[%s11384_s3 + $0x358] sm:$0xff] }
   0x5   :  { %375 = vmatprep.subr.mxu0 %v144_v7  ;;  %v135_v13 = vld [vmem:[%s11384_s3 + $0x340] sm:$0xff]  ;;  %v137_v14 = vld [vmem:[%s11384_s3 + $0x350] sm:$0xff]  ;;  %v128_v15 = vld [vmem:[%s11384_s3 + $0x308] sm:$0xff]  ;;  %447 = vmatpush1.msra.mxu1 %v145_v10 }
   0x6   :  { %661 = vperm.xlu0 %3312, %v3204_v2   ;;  %376 = vmatpush1.msra.mxu0 %v143_v9  ;;  %v3225_v16 = vld [vmem:[%s11383_s0 + $0x20] sm:$0xff]  ;;  %v130_v17 = vld [vmem:[%s11384_s3 + $0x318] sm:$0xff]  ;;  %v129_v19 = vld [vmem:[%s11384_s3 + $0x310] sm:$0xff] }
   0x7   :  { %377 = vmatprep.subr.mxu0 %v136_v11  ;;  %448 = vmatprep.subr.mxu1 %v138_v12  ;;  %v127_v18 = vld [vmem:[%s11384_s3 + $0x300] sm:$0xff]  ;;  %v120_v20 = vld [vmem:[%s11384_s3 + $0x2c8] sm:$0xff]  ;;  %v122_v21 = vld [vmem:[%s11384_s3 + $0x2d8] sm:$0xff] }
   0x8   :  { %378 = vmatpush1.msra.mxu0 %v135_v13  ;;  %449 = vmatpush1.msra.mxu1 %v137_v14  ;;  %v119_v22 = vld [vmem:[%s11384_s3 + $0x2c0] sm:$0xff]  ;;  %v121_v23 = vld [vmem:[%s11384_s3 + $0x2d0] sm:$0xff]  ;;  %v112_v25 = vld [vmem:[%s11384_s3 + $0x288] sm:$0xff] }
   0x9   :  { %379 = vmatprep.subr.mxu0 %v128_v15  ;;  %450 = vmatprep.subr.mxu1 %v130_v17  ;;  %v3239_v24 = vld [vmem:[%s11383_s0 + $0x30] sm:$0xff]  ;;  %v114_v26 = vld [vmem:[%s11384_s3 + $0x298] sm:$0xff]  ;;  %v111_v27 = vld [vmem:[%s11384_s3 + $0x280] sm:$0xff] }
   0xa   :  { %1771 = vperm.xlu0 %3312, %v3225_v16   ;;  %380 = vmatpush1.msra.mxu0 %v127_v18  ;;  %v113_v28 = vld [vmem:[%s11384_s3 + $0x290] sm:$0xff]  ;;  %v104_v29 = vld [vmem:[%s11384_s3 + $0x248] sm:$0xff]  ;;  %v106_v30 = vld [vmem:[%s11384_s3 + $0x258] sm:$0xff] }
   0xb   :  { %451 = vmatpush1.msra.mxu1 %v129_v19  ;;  %381 = vmatprep.subr.mxu0 %v120_v20  ;;  %v103_v31 = vld [vmem:[%s11384_s3 + $0x240] sm:$0xff]  ;;  %v105_v32 = vld [vmem:[%s11384_s3 + $0x250] sm:$0xff]  ;;  %v96_v33 = vld [vmem:[%s11384_s3 + $0x208] sm:$0xff] }
   0xc   :  { %452 = vmatprep.subr.mxu1 %v122_v21  ;;  %382 = vmatpush1.msra.mxu0 %v119_v22  ;;  %v98_v34 = vld [vmem:[%s11384_s3 + $0x218] sm:$0xff]  ;;  %v95_v35 = vld [vmem:[%s11384_s3 + $0x200] sm:$0xff]  ;;  %v97_v36 = vld [vmem:[%s11384_s3 + $0x210] sm:$0xff] }
   0xd   :  { %453 = vmatpush1.msra.mxu1 %v121_v23  ;;  %383 = vmatprep.subr.mxu0 %v112_v25  ;;  %v88_v37 = vld [vmem:[%s11384_s3 + $0x1c8] sm:$0xff]  ;;  %v90_v38 = vld [vmem:[%s11384_s3 + $0x1d8] sm:$0xff]  ;;  %v87_v39 = vld [vmem:[%s11384_s3 + $0x1c0] sm:$0xff] }
   0xe   :  { %2497 = vperm.xlu0 %3312, %v3239_v24   ;;  %454 = vmatprep.subr.mxu1 %v114_v26  ;;  %v89_v40 = vld [vmem:[%s11384_s3 + $0x1d0] sm:$0xff]  ;;  %v80_v41 = vld [vmem:[%s11384_s3 + $0x188] sm:$0xff]  ;;  %v82_v42 = vld [vmem:[%s11384_s3 + $0x198] sm:$0xff] }
   0xf   :  { %384 = vmatpush1.msra.mxu0 %v111_v27  ;;  %455 = vmatpush1.msra.mxu1 %v113_v28  ;;  %v79_v43 = vld [vmem:[%s11384_s3 + $0x180] sm:$0xff]  ;;  %v81_v44 = vld [vmem:[%s11384_s3 + $0x190] sm:$0xff]  ;;  %v72_v45 = vld [vmem:[%s11384_s3 + $0x148] sm:$0xff] }
  0x10   :  { %385 = vmatprep.subr.mxu0 %v104_v29  ;;  %456 = vmatprep.subr.mxu1 %v106_v30  ;;  %v74_v46 = vld [vmem:[%s11384_s3 + $0x158] sm:$0xff]  ;;  %v71_v47 = vld [vmem:[%s11384_s3 + $0x140] sm:$0xff]  ;;  %v73_v48 = vld [vmem:[%s11384_s3 + $0x150] sm:$0xff] }
  0x11   :  { %386 = vmatpush1.msra.mxu0 %v103_v31  ;;  %457 = vmatpush1.msra.mxu1 %v105_v32  ;;  %v64_v49 = vld [vmem:[%s11384_s3 + $0x108] sm:$0xff]  ;;  %v66_v50 = vld [vmem:[%s11384_s3 + $0x118] sm:$0xff]  ;;  %v63_v51 = vld [vmem:[%s11384_s3 + $0x100] sm:$0xff] }
  0x12   :  { %387 = vmatprep.subr.mxu0 %v96_v33  ;;  %458 = vmatprep.subr.mxu1 %v98_v34  ;;  %v65_v52 = vld [vmem:[%s11384_s3 + $0x110] sm:$0xff]  ;;  %v56_v53 = vld [vmem:[%s11384_s3 + $0xc8] sm:$0xff]  ;;  %v58_v54 = vld [vmem:[%s11384_s3 + $0xd8] sm:$0xff] }
  0x13   :  { %388 = vmatpush1.msra.mxu0 %v95_v35  ;;  %459 = vmatpush1.msra.mxu1 %v97_v36  ;;  %v55_v55 = vld [vmem:[%s11384_s3 + $0xc0] sm:$0xff]  ;;  %v57_v56 = vld [vmem:[%s11384_s3 + $0xd0] sm:$0xff]  ;;  %v48_v57 = vld [vmem:[%s11384_s3 + $0x88] sm:$0xff] }
  0x14   :  { %389 = vmatprep.subr.mxu0 %v88_v37  ;;  %460 = vmatprep.subr.mxu1 %v90_v38  ;;  %v50_v58 = vld [vmem:[%s11384_s3 + $0x98] sm:$0xff]  ;;  %v47_v59 = vld [vmem:[%s11384_s3 + $0x80] sm:$0xff]  ;;  %v49_v60 = vld [vmem:[%s11384_s3 + $0x90] sm:$0xff] }
  0x15   :  { %390 = vmatpush1.msra.mxu0 %v87_v39  ;;  %461 = vmatpush1.msra.mxu1 %v89_v40  ;;  %v40_v61 = vld [vmem:[%s11384_s3 + $0x48] sm:$0xff]  ;;  %v42_v62 = vld [vmem:[%s11384_s3 + $0x58] sm:$0xff]  ;;  %v39_v63 = vld [vmem:[%s11384_s3 + $0x40] sm:$0xff] }
  0x16   :  { %391 = vmatprep.subr.mxu0 %v80_v41  ;;  %462 = vmatprep.subr.mxu1 %v82_v42  ;;  %v41_v0 = vld [vmem:[%s11384_s3 + $0x50] sm:$0xff]  ;;  %v32_v1 = vld [vmem:[%s11384_s3 + $0x8] sm:$0xff]  ;;  %v34_v2 = vld [vmem:[%s11384_s3 + $0x18] sm:$0xff] }
  0x17   :  { %392 = vmatpush1.msra.mxu0 %v79_v43  ;;  %463 = vmatpush1.msra.mxu1 %v81_v44  ;;  %v31_v3 = vld [vmem:[%s11384_s3] sm:$0xff]  ;;  %v33_v4 = vld [vmem:[%s11384_s3 + $0x10] sm:$0xff]  ;;  %v280_v5 = vld [vmem:[%s11384_s3 + $0x7c8] sm:$0xff] }
  0x18   :  { %393 = vmatprep.subr.mxu0 %v72_v45  ;;  %464 = vmatprep.subr.mxu1 %v74_v46  ;;  %v282_v6 = vld [vmem:[%s11384_s3 + $0x7d8] sm:$0xff]  ;;  %v279_v7 = vld [vmem:[%s11384_s3 + $0x7c0] sm:$0xff]  ;;  %v4597_v8 = vld [vmem:[%s11384_s3 + $0x7d0] sm:$0xff] }
  0x19   :  { %394 = vmatpush1.msra.mxu0 %v71_v47  ;;  %465 = vmatpush1.msra.mxu1 %v73_v48  ;;  %v4602_v9 = vld [vmem:[%s11384_s3 + $0x788] sm:$0xff]  ;;  %v4607_v10 = vld [vmem:[%s11384_s3 + $0x798] sm:$0xff]  ;;  %v4612_v11 = vld [vmem:[%s11384_s3 + $0x780] sm:$0xff] }
  0x1a   :  { %395 = vmatprep.subr.mxu0 %v64_v49  ;;  %466 = vmatprep.subr.mxu1 %v66_v50  ;;  %v4617_v12 = vld [vmem:[%s11384_s3 + $0x790] sm:$0xff]  ;;  %v4622_v13 = vld [vmem:[%s11384_s3 + $0x748] sm:$0xff]  ;;  %v4629_v14 = vld [vmem:[%s11384_s3 + $0x758] sm:$0xff] }
  0x1b   :  { %396 = vmatpush1.msra.mxu0 %v63_v51  ;;  %467 = vmatpush1.msra.mxu1 %v65_v52  ;;  %v4634_v15 = vld [vmem:[%s11384_s3 + $0x740] sm:$0xff]  ;;  %v4641_v16 = vld [vmem:[%s11384_s3 + $0x750] sm:$0xff]  ;;  %v4646_v17 = vld [vmem:[%s11384_s3 + $0x708] sm:$0xff] }
  0x1c   :  { %397 = vmatprep.subr.mxu0 %v56_v53  ;;  %468 = vmatprep.subr.mxu1 %v58_v54  ;;  %v4653_v18 = vld [vmem:[%s11384_s3 + $0x718] sm:$0xff]  ;;  %v4658_v19 = vld [vmem:[%s11384_s3 + $0x700] sm:$0xff]  ;;  %v4665_v20 = vld [vmem:[%s11384_s3 + $0x710] sm:$0xff] }
  0x1d   :  { %398 = vmatpush1.msra.mxu0 %v55_v55  ;;  %469 = vmatpush1.msra.mxu1 %v57_v56  ;;  %v4670_v21 = vld [vmem:[%s11384_s3 + $0x6c8] sm:$0xff]  ;;  %v4677_v22 = vld [vmem:[%s11384_s3 + $0x6d8] sm:$0xff]  ;;  %v4682_v23 = vld [vmem:[%s11384_s3 + $0x6c0] sm:$0xff] }
  0x1e   :  { %399 = vmatprep.subr.mxu0 %v48_v57  ;;  %470 = vmatprep.subr.mxu1 %v50_v58  ;;  %v4689_v24 = vld [vmem:[%s11384_s3 + $0x6d0] sm:$0xff]  ;;  %v4694_v25 = vld [vmem:[%s11384_s3 + $0x688] sm:$0xff]  ;;  %v4701_v26 = vld [vmem:[%s11384_s3 + $0x698] sm:$0xff] }
  0x1f   :  { %400 = vmatpush1.msra.mxu0 %v47_v59  ;;  %471 = vmatpush1.msra.mxu1 %v49_v60  ;;  %v4706_v27 = vld [vmem:[%s11384_s3 + $0x680] sm:$0xff]  ;;  %v4713_v28 = vld [vmem:[%s11384_s3 + $0x690] sm:$0xff]  ;;  %v4718_v29 = vld [vmem:[%s11384_s3 + $0x648] sm:$0xff] }
  0x20   :  { %401 = vmatprep.subr.mxu0 %v40_v61  ;;  %472 = vmatprep.subr.mxu1 %v42_v62  ;;  %v4725_v30 = vld [vmem:[%s11384_s3 + $0x658] sm:$0xff]  ;;  %v4730_v31 = vld [vmem:[%s11384_s3 + $0x640] sm:$0xff]  ;;  %v4737_v32 = vld [vmem:[%s11384_s3 + $0x650] sm:$0xff] }
  0x21   :  { %402 = vmatpush1.msra.mxu0 %v39_v63  ;;  %473 = vmatpush1.msra.mxu1 %v41_v0  ;;  %v4742_v33 = vld [vmem:[%s11384_s3 + $0x608] sm:$0xff]  ;;  %v4749_v34 = vld [vmem:[%s11384_s3 + $0x618] sm:$0xff]  ;;  %v4754_v35 = vld [vmem:[%s11384_s3 + $0x600] sm:$0xff] }
  0x22   :  { %403 = vmatprep.subr.mxu0 %v32_v1  ;;  %474 = vmatprep.subr.mxu1 %v34_v2  ;;  %v4761_v36 = vld [vmem:[%s11384_s3 + $0x610] sm:$0xff]  ;;  %v4766_v37 = vld [vmem:[%s11384_s3 + $0x5c8] sm:$0xff]  ;;  %v4773_v38 = vld [vmem:[%s11384_s3 + $0x5d8] sm:$0xff] }
  0x23   :  { %404 = vmatpush1.msra.mxu0 %v31_v3  ;;  %475 = vmatpush1.msra.mxu1 %v33_v4  ;;  %v4778_v39 = vld [vmem:[%s11384_s3 + $0x5c0] sm:$0xff]  ;;  %v4785_v40 = vld [vmem:[%s11384_s3 + $0x5d0] sm:$0xff]  ;;  %v4790_v41 = vld [vmem:[%s11384_s3 + $0x588] sm:$0xff] }
  0x24   :  { %405 = vmatprep.subr.mxu0 %v280_v5  ;;  %476 = vmatprep.subr.mxu1 %v282_v6  ;;  %v4797_v42 = vld [vmem:[%s11384_s3 + $0x598] sm:$0xff]  ;;  %v4802_v43 = vld [vmem:[%s11384_s3 + $0x580] sm:$0xff]  ;;  %v4809_v44 = vld [vmem:[%s11384_s3 + $0x590] sm:$0xff] }
  0x25   :  { %406 = vmatpush2.msra.mxu0 %v279_v7  ;;  %477 = vmatpush2.msra.mxu1 %v4597_v8  ;;  %v4814_v45 = vld [vmem:[%s11384_s3 + $0x548] sm:$0xff]  ;;  %v4821_v46 = vld [vmem:[%s11384_s3 + $0x558] sm:$0xff]  ;;  %v4826_v47 = vld [vmem:[%s11384_s3 + $0x540] sm:$0xff]  ;;  %v11397_v7 = vmov 0.0  }
  0x26   :  { %407 = vmatprep.subr.mxu0 %v4602_v9  ;;  %478 = vmatprep.subr.mxu1 %v4607_v10  ;;  %v4833_v48 = vld [vmem:[%s11384_s3 + $0x550] sm:$0xff]  ;;  %v4838_v49 = vld [vmem:[%s11384_s3 + $0x508] sm:$0xff]  ;;  %v4845_v50 = vld [vmem:[%s11384_s3 + $0x518] sm:$0xff] }
  0x27   :  { %408 = vmatpush2.msra.mxu0 %v4612_v11  ;;  %479 = vmatpush2.msra.mxu1 %v4617_v12  ;;  %v4850_v51 = vld [vmem:[%s11384_s3 + $0x500] sm:$0xff]  ;;  %v4857_v52 = vld [vmem:[%s11384_s3 + $0x510] sm:$0xff]  ;;  %v4862_v53 = vld [vmem:[%s11384_s3 + $0x4c8] sm:$0xff] }
  0x28   :  { %409 = vmatprep.subr.mxu0 %v4622_v13  ;;  %480 = vmatprep.subr.mxu1 %v4629_v14  ;;  %12100 = vst [vmem:[#allocation5_spill] sm:$0xff] %v4862_v53  ;;  %v4869_v54 = vld [vmem:[%s11384_s3 + $0x4d8] sm:$0xff]  ;;  %v4874_v55 = vld [vmem:[%s11384_s3 + $0x4c0] sm:$0xff]  ;;  %v4881_v56 = vld [vmem:[%s11384_s3 + $0x4d0] sm:$0xff] }
  0x29   :  { %410 = vmatpush2.msra.mxu0 %v4634_v15  ;;  %481 = vmatpush2.msra.mxu1 %v4641_v16  ;;  %12101 = vst [vmem:[#allocation6_spill] sm:$0xff] %v4869_v54  ;;  %12102 = vst [vmem:[#allocation7_spill] sm:$0xff] %v4874_v55  ;;  %v4886_v57 = vld [vmem:[%s11384_s3 + $0x488] sm:$0xff]  ;;  %v4893_v58 = vld [vmem:[%s11384_s3 + $0x498] sm:$0xff] }
  0x2a   :  { %411 = vmatprep.subr.mxu0 %v4646_v17  ;;  %482 = vmatprep.subr.mxu1 %v4653_v18  ;;  %12103 = vst [vmem:[#allocation8_spill] sm:$0xff] %v4881_v56  ;;  %12104 = vst [vmem:[#allocation9_spill] sm:$0xff] %v4886_v57  ;;  %v4898_v59 = vld [vmem:[%s11384_s3 + $0x480] sm:$0xff]  ;;  %v4905_v60 = vld [vmem:[%s11384_s3 + $0x490] sm:$0xff] }
  0x2b   :  { %412 = vmatpush2.msra.mxu0 %v4658_v19  ;;  %483 = vmatpush2.msra.mxu1 %v4665_v20  ;;  %12105 = vst [vmem:[#allocation10_spill] sm:$0xff] %v4893_v58  ;;  %12106 = vst [vmem:[#allocation11_spill] sm:$0xff] %v4898_v59  ;;  %v4910_v61 = vld [vmem:[%s11384_s3 + $0x448] sm:$0xff]  ;;  %v4917_v62 = vld [vmem:[%s11384_s3 + $0x458] sm:$0xff] }
  0x2c   :  { %413 = vmatprep.subr.mxu0 %v4670_v21  ;;  %484 = vmatprep.subr.mxu1 %v4677_v22  ;;  %12107 = vst [vmem:[#allocation12_spill] sm:$0xff] %v4905_v60  ;;  %12108 = vst [vmem:[#allocation13_spill] sm:$0xff] %v4910_v61  ;;  %v4922_v63 = vld [vmem:[%s11384_s3 + $0x440] sm:$0xff]  ;;  %v4929_v0 = vld [vmem:[%s11384_s3 + $0x450] sm:$0xff] }
  0x2d   :  { %414 = vmatpush2.msra.mxu0 %v4682_v23  ;;  %485 = vmatpush2.msra.mxu1 %v4689_v24  ;;  %12109 = vst [vmem:[#allocation14_spill] sm:$0xff] %v4917_v62  ;;  %12110 = vst [vmem:[#allocation15_spill] sm:$0xff] %v4922_v63  ;;  %v4934_v1 = vld [vmem:[%s11384_s3 + $0x408] sm:$0xff]  ;;  %v4941_v2 = vld [vmem:[%s11384_s3 + $0x418] sm:$0xff] }
  0x2e   :  { %415 = vmatprep.subr.mxu0 %v4694_v25  ;;  %486 = vmatprep.subr.mxu1 %v4701_v26  ;;  %12111 = vst [vmem:[#allocation16_spill] sm:$0xff] %v4929_v0  ;;  %12112 = vst [vmem:[#allocation17_spill] sm:$0xff] %v4934_v1  ;;  %v4946_v3 = vld [vmem:[%s11384_s3 + $0x400] sm:$0xff]  ;;  %v4953_v4 = vld [vmem:[%s11384_s3 + $0x410] sm:$0xff] }
  0x2f   :  { %416 = vmatpush2.msra.mxu0 %v4706_v27  ;;  %487 = vmatpush2.msra.mxu1 %v4713_v28  ;;  %12113 = vst [vmem:[#allocation18_spill] sm:$0xff] %v4941_v2  ;;  %12114 = vst [vmem:[#allocation19_spill] sm:$0xff] %v4946_v3  ;;  %v4960_v5 = vld [vmem:[%s11384_s3 + $0x3e8] sm:$0xff]  ;;  %v4967_v6 = vld [vmem:[%s11384_s3 + $0x3f8] sm:$0xff] }
  0x30   :  { %417 = vmatprep.subr.mxu0 %v4718_v29  ;;  %488 = vmatprep.subr.mxu1 %v4725_v30  ;;  %12115 = vst [vmem:[#allocation20_spill] sm:$0xff] %v4953_v4  ;;  %12116 = vst [vmem:[#allocation21_spill] sm:$0xff] %v4960_v5 }
  0x31   :  { %418 = vmatpush2.msra.mxu0 %v4730_v31  ;;  %489 = vmatpush2.msra.mxu1 %v4737_v32  ;;  %12117 = vst [vmem:[#allocation22_spill] sm:$0xff] %v4967_v6 }
  0x32   :  { %419 = vmatprep.subr.mxu0 %v4742_v33  ;;  %490 = vmatprep.subr.mxu1 %v4749_v34 }
  0x33   :  { %420 = vmatpush2.msra.mxu0 %v4754_v35  ;;  %491 = vmatpush2.msra.mxu1 %v4761_v36 }
  0x34   :  { %421 = vmatprep.subr.mxu0 %v4766_v37  ;;  %492 = vmatprep.subr.mxu1 %v4773_v38 }
  0x35   :  { %422 = vmatpush2.msra.mxu0 %v4778_v39  ;;  %493 = vmatpush2.msra.mxu1 %v4785_v40 }
  0x36   :  { %423 = vmatprep.subr.mxu0 %v4790_v41  ;;  %494 = vmatprep.subr.mxu1 %v4797_v42 }
  0x37   :  { %424 = vmatpush2.msra.mxu0 %v4802_v43  ;;  %495 = vmatpush2.msra.mxu1 %v4809_v44 }
  0x38   :  { %425 = vmatprep.subr.mxu0 %v4814_v45  ;;  %496 = vmatprep.subr.mxu1 %v4821_v46 }
  0x39   :  { %426 = vmatpush2.msra.mxu0 %v4826_v47  ;;  %497 = vmatpush2.msra.mxu1 %v4833_v48 }
  0x3a   :  { %427 = vmatprep.subr.mxu0 %v4838_v49  ;;  %498 = vmatprep.subr.mxu1 %v4845_v50 }
  0x3b   :  { %428 = vmatpush2.msra.mxu0 %v4850_v51  ;;  %499 = vmatpush2.msra.mxu1 %v4857_v52 }
  0x3c   :  { %429 = vmatprep.subr.mxu0 %v4862_v53  ;;  %500 = vmatprep.subr.mxu1 %v4869_v54 }
  0x3d   :  { %430 = vmatpush2.msra.mxu0 %v4874_v55  ;;  %501 = vmatpush2.msra.mxu1 %v4881_v56 }
  0x3e   :  { %431 = vmatprep.subr.mxu0 %v4886_v57  ;;  %502 = vmatprep.subr.mxu1 %v4893_v58 }
  0x3f   :  { %432 = vmatpush2.msra.mxu0 %v4898_v59  ;;  %503 = vmatpush2.msra.mxu1 %v4905_v60 }
  0x40   :  { %433 = vmatprep.subr.mxu0 %v4910_v61  ;;  %504 = vmatprep.subr.mxu1 %v4917_v62 }
  0x41   :  { %434 = vmatpush2.msra.mxu0 %v4922_v63  ;;  %505 = vmatpush2.msra.mxu1 %v4929_v0  ;;  %v28_v63 = vld [vmem:[%s11385_s1] sm:$0xf] }
  0x42   :  { %435 = vmatprep.subr.mxu0 %v4934_v1  ;;  %506 = vmatprep.subr.mxu1 %v4941_v2  ;;  %v294_v1 = vlaneseq }
  0x43   :  { %436 = vmatpush2.msra.mxu0 %v4946_v3  ;;  %507 = vmatpush2.msra.mxu1 %v4953_v4  ;;  %v29_v4 = vld [vmem:[%s11386_s2] sm:$0xf] }
  0x44   :  { %437 = vmatprep.mubr.f32.mxu0 %v11397_v7  ;;  %508 = vmatprep.mubr.f32.mxu1 %v11397_v7  ;;  %v295_v2 = vshrl.u32 %v294_v1, 7 }
  0x45   :  { %515 = vmatprep.subr.mxu0 %v4960_v5  ;;  %586 = vmatprep.subr.mxu1 %v4967_v6 }
  0x46   :  { %v4974_v0 = vsub.s32 0, %v295_v2  ;;  %v4976_v3 = vsub.s32 1, %v295_v2  ;;  %v4996_v61 = vsub.s32 3, %v295_v2  ;;  %v5005_v54 = vsub.s32 2, %v295_v2 }
  0x48   :  { %12118 = vst [vmem:[#allocation23_spill] sm:$0xff] %v4974_v0  ;;  %12119 = vst [vmem:[#allocation24_spill] sm:$0xff] %v4976_v3  ;;  %v4985_v7 = vrot.slane %v28_v63, %v4974_v0  ;;  %v4988_v5 = vrot.slane %v28_v63, %v4976_v3  ;;  %v4991_v1 = vrot.slane %v29_v4, %v4974_v0 }
  0x49   :  { %v4994_v6 = vrot.slane %v29_v4, %v4976_v3  ;;  %12124 = vst [vmem:[#allocation29_spill] sm:$0xff] %v4996_v61  ;;  %v5003_v56 = vrot.slane %v28_v63, %v4996_v61  ;;  %12126 = vst [vmem:[#allocation31_spill] sm:$0xff] %v5005_v54  ;;  %v5008_v3 = vrot.slane %v29_v4, %v4996_v61 }
  0x4a   :  { %12120 = vst [vmem:[#allocation25_spill] sm:$0xff] %v4985_v7  ;;  %12121 = vst [vmem:[#allocation26_spill] sm:$0xff] %v4988_v5 }
  0x4b   :  { %12122 = vst [vmem:[#allocation27_spill] sm:$0xff] %v4991_v1  ;;  %12123 = vst [vmem:[#allocation28_spill] sm:$0xff] %v4994_v6 }
  0x4c   :  { %12125 = vst [vmem:[#allocation30_spill] sm:$0xff] %v5003_v56  ;;  %12127 = vst [vmem:[#allocation32_spill] sm:$0xff] %v5008_v3 }
  0x7d   :  { %v291_v62 = vpop.permute.xlu0 %290 }
  0x7e   :  { %v314_v60 = vmul.f32 %v4985_v7, %v291_v62  ;;  %v315_v59 = vmul.f32 %v4988_v5, %v291_v62  ;;  %v317_v7 = vmul.f32 %v5003_v56, %v291_v62  ;;  %v5012_v5 = vrot.slane %v28_v63, %v5005_v54 }
  0x80   :  { %v339_v58 = vadd.f32 %v4991_v1, %v314_v60  ;;  %v340_v57 = vadd.f32 %v4994_v6, %v315_v59  ;;  %12128 = vst [vmem:[#allocation33_spill] sm:$0xff] %v5012_v5  ;;  %v342_v60 = vadd.f32 %v5008_v3, %v317_v7  ;;  %v5016_v59 = vrot.slane %v29_v4, %v5005_v54 }
  0x82   :  { %v3201_v55 = vmul.f32 -1.442695, %v339_v58  ;;  %v3202_v0 = vmul.f32 -1.442695, %v340_v57  ;;  %12129 = vst [vmem:[#allocation34_spill] sm:$0xff] %v5016_v59  ;;  %v316_v58 = vmul.f32 %v5012_v5, %v291_v62 }
  0x83   :  { %v3203_v57 = vmul.f32 -1.442695, %v342_v60 }
  0x84   :  { %3314 = vpow2.f32 %v3201_v55  ;;  %v341_v2 = vadd.f32 %v5016_v59, %v316_v58 }
  0x85   :  { %3316 = vpow2.f32 %v3202_v0 }
  0x86   :  { %3318 = vpow2.f32 %v3203_v57  ;;  %v5062_v57 = vld [vmem:[%s11384_s3 + $0x368] sm:$0xff] }
  0x87   :  { %3320 = vtanh.f32 %v341_v2  ;;  %v5067_v2 = vld [vmem:[%s11384_s3 + $0x378] sm:$0xff] }
  0x88   :  { %12130 = vst [vmem:[#allocation35_spill] sm:$0xff] %v5067_v2 }
  0x91   :  { %v3315_v55 = vpop.eup %3314 }
  0x92   :  { %v3317_v0 = vpop.eup %3316  ;;  %v346_v1 = vadd.f32 1.0, %v3315_v55  ;;  %v5074_v55 = vld [vmem:[%s11384_s3 + $0x360] sm:$0xff] }
  0x93   :  { %v352_v61 = vadd.f32 1.0, %v3317_v0  ;;  %v3319_v63 = vpop.eup %3318  ;;  %12131 = vst [vmem:[#allocation36_spill] sm:$0xff] %v5074_v55  ;;  %v5079_v0 = vld [vmem:[%s11384_s3 + $0x370] sm:$0xff] }
  0x94   :  { %3322 = vrcp.f32 %v346_v1  ;;  %v3321_v56 = vpop.eup %3320  ;;  %v359_v3 = vadd.f32 1.0, %v3319_v63  ;;  %v5033_v1 = vld [vmem:[%s11384_s3 + $0x3f0] sm:$0xff]  ;;  %12132 = vst [vmem:[#allocation37_spill] sm:$0xff] %v5079_v0  ;;  %v5086_v63 = vld [vmem:[%s11384_s3 + $0x328] sm:$0xff] }
  0x95   :  { %3324 = vrcp.f32 %v352_v61  ;;  %v5028_v61 = vld [vmem:[%s11384_s3 + $0x3e0] sm:$0xff]  ;;  %12133 = vst [vmem:[#allocation38_spill] sm:$0xff] %v5086_v63 }
  0x96   :  { %3326 = vrcp.f32 %v359_v3  ;;  %v5050_v3 = vld [vmem:[%s11384_s3 + $0x3a0] sm:$0xff] }
  0xa1   :  { %v3323_v6 = vpop.eup %3322 }
  0xa2   :  { %v3325_v7 = vpop.eup %3324  ;;  %v363_v4 = vmul.f32 %v3323_v6, %v3321_v56  ;;  %v5043_v56 = vld [vmem:[%s11384_s3 + $0x3b8] sm:$0xff]  ;;  %v5055_v6 = vld [vmem:[%s11384_s3 + $0x3b0] sm:$0xff] }
  0xa3   :  { %v362_v54 = vmul.f32 0.0, %v3325_v7  ;;  %v3327_v62 = vpop.eup %3326  ;;  %v5091_v7 = vld [vmem:[%s11384_s3 + $0x338] sm:$0xff] }
  0xa4   :  { %12134 = vst [vmem:[#allocation39_spill] sm:$0xff] %v5091_v7 }
  0xa5   :  { %v5020_v53 = vadd.f32 %v363_v4, %v362_v54  ;;  %v5038_v54 = vld [vmem:[%s11384_s3 + $0x3a8] sm:$0xff]  ;;  %v5098_v4 = vld [vmem:[%s11384_s3 + $0x320] sm:$0xff] }
  0xa6   :  { %12135 = vst [vmem:[#allocation40_spill] sm:$0xff] %v5098_v4 }
  0xa7   :  { %3328 = vtanh.f32 %v5020_v53 }
  0xb4   :  { %v3329_v60 = vpop.eup %3328 }
  0xb5   :  { %v5023_v58 = vmul.f32 %v3329_v60, %v3327_v62  ;;  %v5103_v62 = vld [vmem:[%s11384_s3 + $0x330] sm:$0xff]  ;;  %v5110_v60 = vld [vmem:[%s11384_s3 + $0x2e8] sm:$0xff] }
  0xb6   :  { %12136 = vst [vmem:[#allocation41_spill] sm:$0xff] %v5103_v62  ;;  %12137 = vst [vmem:[#allocation42_spill] sm:$0xff] %v5110_v60 }
  0xb7   :  { %438 = vmatmul.mubr.f32.vlgmr.msra.gmra.mxu0 %v5023_v58  ;;  %509 = vmatmul.mubr.f32.vlgmr.msra.gmra.mxu1 %v5023_v58 }
  0xb8   :  { %516 = vmatpush1.msra.mxu0 %v5028_v61  ;;  %587 = vmatpush1.msra.mxu1 %v5033_v1 }
  0xb9   :  { %517 = vmatprep.subr.mxu0 %v5038_v54  ;;  %588 = vmatprep.subr.mxu1 %v5043_v56 }
  0xba   :  { %518 = vmatpush1.msra.mxu0 %v5050_v3  ;;  %589 = vmatpush1.msra.mxu1 %v5055_v6 }
  0xbb   :  { %519 = vmatprep.subr.mxu0 %v5062_v57  ;;  %590 = vmatprep.subr.mxu1 %v5067_v2  ;;  %v5115_v2 = vld [vmem:[%s11384_s3 + $0x2f8] sm:$0xff] }
  0xbc   :  { %520 = vmatpush1.msra.mxu0 %v5074_v55  ;;  %591 = vmatpush1.msra.mxu1 %v5079_v0  ;;  %12138 = vst [vmem:[#allocation43_spill] sm:$0xff] %v5115_v2  ;;  %v5122_v55 = vld [vmem:[%s11384_s3 + $0x2e0] sm:$0xff]  ;;  %v5127_v0 = vld [vmem:[%s11384_s3 + $0x2f0] sm:$0xff] }
  0xbd   :  { %521 = vmatprep.subr.mxu0 %v5086_v63  ;;  %592 = vmatprep.subr.mxu1 %v5091_v7  ;;  %12139 = vst [vmem:[#allocation44_spill] sm:$0xff] %v5122_v55  ;;  %12140 = vst [vmem:[#allocation45_spill] sm:$0xff] %v5127_v0  ;;  %v5134_v63 = vld [vmem:[%s11384_s3 + $0x2a8] sm:$0xff]  ;;  %v5139_v7 = vld [vmem:[%s11384_s3 + $0x2b8] sm:$0xff] }
  0xbe   :  { %522 = vmatpush1.msra.mxu0 %v5098_v4  ;;  %593 = vmatpush1.msra.mxu1 %v5103_v62  ;;  %12141 = vst [vmem:[#allocation46_spill] sm:$0xff] %v5134_v63  ;;  %12142 = vst [vmem:[#allocation47_spill] sm:$0xff] %v5139_v7  ;;  %v5146_v4 = vld [vmem:[%s11384_s3 + $0x2a0] sm:$0xff]  ;;  %v5151_v62 = vld [vmem:[%s11384_s3 + $0x2b0] sm:$0xff] }
  0xbf   :  { %523 = vmatprep.subr.mxu0 %v5110_v60  ;;  %594 = vmatprep.subr.mxu1 %v5115_v2  ;;  %12143 = vst [vmem:[#allocation48_spill] sm:$0xff] %v5146_v4  ;;  %12144 = vst [vmem:[#allocation49_spill] sm:$0xff] %v5151_v62  ;;  %v5158_v60 = vld [vmem:[%s11384_s3 + $0x268] sm:$0xff]  ;;  %v5163_v2 = vld [vmem:[%s11384_s3 + $0x278] sm:$0xff] }
  0xc0   :  { %524 = vmatpush1.msra.mxu0 %v5122_v55  ;;  %595 = vmatpush1.msra.mxu1 %v5127_v0  ;;  %12145 = vst [vmem:[#allocation50_spill] sm:$0xff] %v5158_v60  ;;  %12146 = vst [vmem:[#allocation51_spill] sm:$0xff] %v5163_v2  ;;  %v5170_v55 = vld [vmem:[%s11384_s3 + $0x260] sm:$0xff]  ;;  %v5175_v0 = vld [vmem:[%s11384_s3 + $0x270] sm:$0xff] }
  0xc1   :  { %525 = vmatprep.subr.mxu0 %v5134_v63  ;;  %596 = vmatprep.subr.mxu1 %v5139_v7  ;;  %12147 = vst [vmem:[#allocation52_spill] sm:$0xff] %v5170_v55  ;;  %12148 = vst [vmem:[#allocation53_spill] sm:$0xff] %v5175_v0  ;;  %v5182_v63 = vld [vmem:[%s11384_s3 + $0x228] sm:$0xff]  ;;  %v5187_v7 = vld [vmem:[%s11384_s3 + $0x238] sm:$0xff] }
  0xc2   :  { %526 = vmatpush1.msra.mxu0 %v5146_v4  ;;  %597 = vmatpush1.msra.mxu1 %v5151_v62  ;;  %12149 = vst [vmem:[#allocation54_spill] sm:$0xff] %v5182_v63  ;;  %12150 = vst [vmem:[#allocation55_spill] sm:$0xff] %v5187_v7  ;;  %v5194_v4 = vld [vmem:[%s11384_s3 + $0x220] sm:$0xff]  ;;  %v5199_v62 = vld [vmem:[%s11384_s3 + $0x230] sm:$0xff] }
  0xc3   :  { %527 = vmatprep.subr.mxu0 %v5158_v60  ;;  %598 = vmatprep.subr.mxu1 %v5163_v2  ;;  %12151 = vst [vmem:[#allocation56_spill] sm:$0xff] %v5194_v4  ;;  %12152 = vst [vmem:[#allocation57_spill] sm:$0xff] %v5199_v62  ;;  %v5206_v60 = vld [vmem:[%s11384_s3 + $0x1e8] sm:$0xff]  ;;  %v5211_v2 = vld [vmem:[%s11384_s3 + $0x1f8] sm:$0xff] }
  0xc4   :  { %528 = vmatpush1.msra.mxu0 %v5170_v55  ;;  %599 = vmatpush1.msra.mxu1 %v5175_v0  ;;  %12153 = vst [vmem:[#allocation58_spill] sm:$0xff] %v5206_v60  ;;  %12154 = vst [vmem:[#allocation59_spill] sm:$0xff] %v5211_v2  ;;  %v5218_v55 = vld [vmem:[%s11384_s3 + $0x1e0] sm:$0xff]  ;;  %v5223_v0 = vld [vmem:[%s11384_s3 + $0x1f0] sm:$0xff] }
  0xc5   :  { %529 = vmatprep.subr.mxu0 %v5182_v63  ;;  %600 = vmatprep.subr.mxu1 %v5187_v7  ;;  %12155 = vst [vmem:[#allocation60_spill] sm:$0xff] %v5218_v55  ;;  %12156 = vst [vmem:[#allocation61_spill] sm:$0xff] %v5223_v0  ;;  %v5230_v63 = vld [vmem:[%s11384_s3 + $0x1a8] sm:$0xff]  ;;  %v5235_v7 = vld [vmem:[%s11384_s3 + $0x1b8] sm:$0xff] }
  0xc6   :  { %530 = vmatpush1.msra.mxu0 %v5194_v4  ;;  %601 = vmatpush1.msra.mxu1 %v5199_v62  ;;  %12157 = vst [vmem:[#allocation62_spill] sm:$0xff] %v5230_v63  ;;  %12158 = vst [vmem:[#allocation63_spill] sm:$0xff] %v5235_v7  ;;  %v5242_v4 = vld [vmem:[%s11384_s3 + $0x1a0] sm:$0xff]  ;;  %v5247_v62 = vld [vmem:[%s11384_s3 + $0x1b0] sm:$0xff] }
  0xc7   :  { %531 = vmatprep.subr.mxu0 %v5206_v60  ;;  %602 = vmatprep.subr.mxu1 %v5211_v2  ;;  %12159 = vst [vmem:[#allocation64_spill] sm:$0xff] %v5242_v4  ;;  %12160 = vst [vmem:[#allocation65_spill] sm:$0xff] %v5247_v62  ;;  %v5254_v60 = vld [vmem:[%s11384_s3 + $0x168] sm:$0xff]  ;;  %v5259_v2 = vld [vmem:[%s11384_s3 + $0x178] sm:$0xff] }
  0xc8   :  { %532 = vmatpush1.msra.mxu0 %v5218_v55  ;;  %603 = vmatpush1.msra.mxu1 %v5223_v0  ;;  %12161 = vst [vmem:[#allocation66_spill] sm:$0xff] %v5254_v60  ;;  %12162 = vst [vmem:[#allocation67_spill] sm:$0xff] %v5259_v2  ;;  %v5266_v55 = vld [vmem:[%s11384_s3 + $0x160] sm:$0xff]  ;;  %v5271_v0 = vld [vmem:[%s11384_s3 + $0x170] sm:$0xff] }
  0xc9   :  { %533 = vmatprep.subr.mxu0 %v5230_v63  ;;  %604 = vmatprep.subr.mxu1 %v5235_v7  ;;  %12163 = vst [vmem:[#allocation68_spill] sm:$0xff] %v5266_v55  ;;  %12164 = vst [vmem:[#allocation69_spill] sm:$0xff] %v5271_v0  ;;  %v5278_v63 = vld [vmem:[%s11384_s3 + $0x128] sm:$0xff]  ;;  %v5283_v7 = vld [vmem:[%s11384_s3 + $0x138] sm:$0xff] }
  0xca   :  { %534 = vmatpush1.msra.mxu0 %v5242_v4  ;;  %605 = vmatpush1.msra.mxu1 %v5247_v62  ;;  %12165 = vst [vmem:[#allocation70_spill] sm:$0xff] %v5278_v63  ;;  %12166 = vst [vmem:[#allocation71_spill] sm:$0xff] %v5283_v7  ;;  %v5290_v4 = vld [vmem:[%s11384_s3 + $0x120] sm:$0xff]  ;;  %v5295_v62 = vld [vmem:[%s11384_s3 + $0x130] sm:$0xff] }
  0xcb   :  { %535 = vmatprep.subr.mxu0 %v5254_v60  ;;  %606 = vmatprep.subr.mxu1 %v5259_v2  ;;  %12167 = vst [vmem:[#allocation72_spill] sm:$0xff] %v5290_v4  ;;  %12168 = vst [vmem:[#allocation73_spill] sm:$0xff] %v5295_v62  ;;  %v5302_v60 = vld [vmem:[%s11384_s3 + $0xe8] sm:$0xff]  ;;  %v5307_v2 = vld [vmem:[%s11384_s3 + $0xf8] sm:$0xff] }
  0xcc   :  { %536 = vmatpush1.msra.mxu0 %v5266_v55  ;;  %607 = vmatpush1.msra.mxu1 %v5271_v0  ;;  %12169 = vst [vmem:[#allocation74_spill] sm:$0xff] %v5302_v60  ;;  %12170 = vst [vmem:[#allocation75_spill] sm:$0xff] %v5307_v2  ;;  %v5314_v55 = vld [vmem:[%s11384_s3 + $0xe0] sm:$0xff]  ;;  %v5319_v0 = vld [vmem:[%s11384_s3 + $0xf0] sm:$0xff] }
  0xcd   :  { %537 = vmatprep.subr.mxu0 %v5278_v63  ;;  %608 = vmatprep.subr.mxu1 %v5283_v7  ;;  %12171 = vst [vmem:[#allocation76_spill] sm:$0xff] %v5314_v55  ;;  %12172 = vst [vmem:[#allocation77_spill] sm:$0xff] %v5319_v0  ;;  %v5326_v63 = vld [vmem:[%s11384_s3 + $0xa8] sm:$0xff]  ;;  %v5331_v7 = vld [vmem:[%s11384_s3 + $0xb8] sm:$0xff] }
  0xce   :  { %538 = vmatpush1.msra.mxu0 %v5290_v4  ;;  %609 = vmatpush1.msra.mxu1 %v5295_v62  ;;  %12173 = vst [vmem:[#allocation78_spill] sm:$0xff] %v5326_v63  ;;  %12174 = vst [vmem:[#allocation79_spill] sm:$0xff] %v5331_v7  ;;  %v5338_v4 = vld [vmem:[%s11384_s3 + $0xa0] sm:$0xff]  ;;  %v5343_v62 = vld [vmem:[%s11384_s3 + $0xb0] sm:$0xff] }
  0xcf   :  { %539 = vmatprep.subr.mxu0 %v5302_v60  ;;  %610 = vmatprep.subr.mxu1 %v5307_v2  ;;  %12175 = vst [vmem:[#allocation80_spill] sm:$0xff] %v5338_v4  ;;  %12176 = vst [vmem:[#allocation81_spill] sm:$0xff] %v5343_v62  ;;  %v5350_v60 = vld [vmem:[%s11384_s3 + $0x68] sm:$0xff]  ;;  %v5355_v2 = vld [vmem:[%s11384_s3 + $0x78] sm:$0xff] }
  0xd0   :  { %540 = vmatpush1.msra.mxu0 %v5314_v55  ;;  %611 = vmatpush1.msra.mxu1 %v5319_v0  ;;  %12177 = vst [vmem:[#allocation82_spill] sm:$0xff] %v5350_v60  ;;  %12178 = vst [vmem:[#allocation83_spill] sm:$0xff] %v5355_v2  ;;  %v5362_v55 = vld [vmem:[%s11384_s3 + $0x60] sm:$0xff]  ;;  %v5367_v0 = vld [vmem:[%s11384_s3 + $0x70] sm:$0xff] }
  0xd1   :  { %541 = vmatprep.subr.mxu0 %v5326_v63  ;;  %612 = vmatprep.subr.mxu1 %v5331_v7  ;;  %12179 = vst [vmem:[#allocation84_spill] sm:$0xff] %v5362_v55  ;;  %12180 = vst [vmem:[#allocation85_spill] sm:$0xff] %v5367_v0  ;;  %v5374_v63 = vld [vmem:[%s11384_s3 + $0x28] sm:$0xff]  ;;  %v5379_v7 = vld [vmem:[%s11384_s3 + $0x38] sm:$0xff] }
  0xd2   :  { %542 = vmatpush1.msra.mxu0 %v5338_v4  ;;  %613 = vmatpush1.msra.mxu1 %v5343_v62  ;;  %12181 = vst [vmem:[#allocation86_spill] sm:$0xff] %v5374_v63  ;;  %12182 = vst [vmem:[#allocation87_spill] sm:$0xff] %v5379_v7  ;;  %v5386_v4 = vld [vmem:[%s11384_s3 + $0x20] sm:$0xff]  ;;  %v5391_v62 = vld [vmem:[%s11384_s3 + $0x30] sm:$0xff] }
  0xd3   :  { %543 = vmatprep.subr.mxu0 %v5350_v60  ;;  %614 = vmatprep.subr.mxu1 %v5355_v2  ;;  %12183 = vst [vmem:[#allocation88_spill] sm:$0xff] %v5386_v4  ;;  %12184 = vst [vmem:[#allocation89_spill] sm:$0xff] %v5391_v62  ;;  %v5398_v60 = vld [vmem:[%s11384_s3 + $0x7e8] sm:$0xff]  ;;  %v5403_v2 = vld [vmem:[%s11384_s3 + $0x7f8] sm:$0xff] }
  0xd4   :  { %544 = vmatpush1.msra.mxu0 %v5362_v55  ;;  %615 = vmatpush1.msra.mxu1 %v5367_v0  ;;  %12185 = vst [vmem:[#allocation90_spill] sm:$0xff] %v5398_v60  ;;  %12186 = vst [vmem:[#allocation91_spill] sm:$0xff] %v5403_v2  ;;  %v5410_v55 = vld [vmem:[%s11384_s3 + $0x7e0] sm:$0xff]  ;;  %v5415_v0 = vld [vmem:[%s11384_s3 + $0x7f0] sm:$0xff] }
  0xd5   :  { %545 = vmatprep.subr.mxu0 %v5374_v63  ;;  %616 = vmatprep.subr.mxu1 %v5379_v7  ;;  %12187 = vst [vmem:[#allocation92_spill] sm:$0xff] %v5410_v55  ;;  %12188 = vst [vmem:[#allocation93_spill] sm:$0xff] %v5415_v0  ;;  %v5422_v63 = vld [vmem:[%s11384_s3 + $0x7a8] sm:$0xff]  ;;  %v5427_v7 = vld [vmem:[%s11384_s3 + $0x7b8] sm:$0xff] }
  0xd6   :  { %546 = vmatpush1.msra.mxu0 %v5386_v4  ;;  %617 = vmatpush1.msra.mxu1 %v5391_v62  ;;  %12189 = vst [vmem:[#allocation94_spill] sm:$0xff] %v5422_v63  ;;  %12190 = vst [vmem:[#allocation95_spill] sm:$0xff] %v5427_v7  ;;  %v5434_v4 = vld [vmem:[%s11384_s3 + $0x7a0] sm:$0xff]  ;;  %v5439_v62 = vld [vmem:[%s11384_s3 + $0x7b0] sm:$0xff] }
  0xd7   :  { %547 = vmatprep.subr.mxu0 %v5398_v60  ;;  %618 = vmatprep.subr.mxu1 %v5403_v2  ;;  %12191 = vst [vmem:[#allocation96_spill] sm:$0xff] %v5434_v4  ;;  %12192 = vst [vmem:[#allocation97_spill] sm:$0xff] %v5439_v62  ;;  %v5446_v60 = vld [vmem:[%s11384_s3 + $0x768] sm:$0xff]  ;;  %v5451_v2 = vld [vmem:[%s11384_s3 + $0x778] sm:$0xff] }
  0xd8   :  { %548 = vmatpush2.msra.mxu0 %v5410_v55  ;;  %619 = vmatpush2.msra.mxu1 %v5415_v0  ;;  %12193 = vst [vmem:[#allocation98_spill] sm:$0xff] %v5446_v60  ;;  %12194 = vst [vmem:[#allocation99_spill] sm:$0xff] %v5451_v2  ;;  %v5458_v55 = vld [vmem:[%s11384_s3 + $0x760] sm:$0xff]  ;;  %v5463_v0 = vld [vmem:[%s11384_s3 + $0x770] sm:$0xff] }
  0xd9   :  { %549 = vmatprep.subr.mxu0 %v5422_v63  ;;  %620 = vmatprep.subr.mxu1 %v5427_v7  ;;  %12195 = vst [vmem:[#allocation100_spill] sm:$0xff] %v5458_v55  ;;  %12196 = vst [vmem:[#allocation101_spill] sm:$0xff] %v5463_v0  ;;  %v5470_v63 = vld [vmem:[%s11384_s3 + $0x728] sm:$0xff]  ;;  %v5475_v7 = vld [vmem:[%s11384_s3 + $0x738] sm:$0xff] }
  0xda   :  { %550 = vmatpush2.msra.mxu0 %v5434_v4  ;;  %621 = vmatpush2.msra.mxu1 %v5439_v62  ;;  %12197 = vst [vmem:[#allocation102_spill] sm:$0xff] %v5470_v63  ;;  %12198 = vst [vmem:[#allocation103_spill] sm:$0xff] %v5475_v7  ;;  %v5482_v4 = vld [vmem:[%s11384_s3 + $0x720] sm:$0xff]  ;;  %v5487_v62 = vld [vmem:[%s11384_s3 + $0x730] sm:$0xff] }
  0xdb   :  { %551 = vmatprep.subr.mxu0 %v5446_v60  ;;  %622 = vmatprep.subr.mxu1 %v5451_v2  ;;  %12199 = vst [vmem:[#allocation104_spill] sm:$0xff] %v5482_v4  ;;  %12200 = vst [vmem:[#allocation105_spill] sm:$0xff] %v5487_v62  ;;  %v5494_v60 = vld [vmem:[%s11384_s3 + $0x6e8] sm:$0xff]  ;;  %v5499_v2 = vld [vmem:[%s11384_s3 + $0x6f8] sm:$0xff] }
  0xdc   :  { %552 = vmatpush2.msra.mxu0 %v5458_v55  ;;  %623 = vmatpush2.msra.mxu1 %v5463_v0  ;;  %12201 = vst [vmem:[#allocation106_spill] sm:$0xff] %v5494_v60  ;;  %12202 = vst [vmem:[#allocation107_spill] sm:$0xff] %v5499_v2  ;;  %v5506_v55 = vld [vmem:[%s11384_s3 + $0x6e0] sm:$0xff]  ;;  %v5511_v0 = vld [vmem:[%s11384_s3 + $0x6f0] sm:$0xff] }
  0xdd   :  { %553 = vmatprep.subr.mxu0 %v5470_v63  ;;  %624 = vmatprep.subr.mxu1 %v5475_v7  ;;  %12203 = vst [vmem:[#allocation108_spill] sm:$0xff] %v5506_v55  ;;  %12204 = vst [vmem:[#allocation109_spill] sm:$0xff] %v5511_v0  ;;  %v5518_v63 = vld [vmem:[%s11384_s3 + $0x6a8] sm:$0xff]  ;;  %v5523_v7 = vld [vmem:[%s11384_s3 + $0x6b8] sm:$0xff] }
  0xde   :  { %554 = vmatpush2.msra.mxu0 %v5482_v4  ;;  %625 = vmatpush2.msra.mxu1 %v5487_v62  ;;  %12205 = vst [vmem:[#allocation110_spill] sm:$0xff] %v5518_v63  ;;  %12206 = vst [vmem:[#allocation111_spill] sm:$0xff] %v5523_v7  ;;  %v5530_v4 = vld [vmem:[%s11384_s3 + $0x6a0] sm:$0xff]  ;;  %v5535_v62 = vld [vmem:[%s11384_s3 + $0x6b0] sm:$0xff] }
  0xdf   :  { %555 = vmatprep.subr.mxu0 %v5494_v60  ;;  %626 = vmatprep.subr.mxu1 %v5499_v2  ;;  %12207 = vst [vmem:[#allocation112_spill] sm:$0xff] %v5530_v4  ;;  %12208 = vst [vmem:[#allocation113_spill] sm:$0xff] %v5535_v62  ;;  %v5542_v60 = vld [vmem:[%s11384_s3 + $0x668] sm:$0xff]  ;;  %v5547_v2 = vld [vmem:[%s11384_s3 + $0x678] sm:$0xff] }
  0xe0   :  { %556 = vmatpush2.msra.mxu0 %v5506_v55  ;;  %627 = vmatpush2.msra.mxu1 %v5511_v0  ;;  %12209 = vst [vmem:[#allocation114_spill] sm:$0xff] %v5542_v60  ;;  %12210 = vst [vmem:[#allocation115_spill] sm:$0xff] %v5547_v2  ;;  %v5554_v55 = vld [vmem:[%s11384_s3 + $0x660] sm:$0xff]  ;;  %v5559_v0 = vld [vmem:[%s11384_s3 + $0x670] sm:$0xff] }
  0xe1   :  { %557 = vmatprep.subr.mxu0 %v5518_v63  ;;  %628 = vmatprep.subr.mxu1 %v5523_v7  ;;  %12211 = vst [vmem:[#allocation116_spill] sm:$0xff] %v5554_v55  ;;  %12212 = vst [vmem:[#allocation117_spill] sm:$0xff] %v5559_v0  ;;  %v5566_v63 = vld [vmem:[%s11384_s3 + $0x628] sm:$0xff]  ;;  %v5571_v7 = vld [vmem:[%s11384_s3 + $0x638] sm:$0xff] }
  0xe2   :  { %558 = vmatpush2.msra.mxu0 %v5530_v4  ;;  %629 = vmatpush2.msra.mxu1 %v5535_v62  ;;  %12213 = vst [vmem:[#allocation118_spill] sm:$0xff] %v5566_v63  ;;  %12214 = vst [vmem:[#allocation119_spill] sm:$0xff] %v5571_v7  ;;  %v5578_v4 = vld [vmem:[%s11384_s3 + $0x620] sm:$0xff]  ;;  %v5583_v62 = vld [vmem:[%s11384_s3 + $0x630] sm:$0xff] }
  0xe3   :  { %559 = vmatprep.subr.mxu0 %v5542_v60  ;;  %630 = vmatprep.subr.mxu1 %v5547_v2  ;;  %12215 = vst [vmem:[#allocation120_spill] sm:$0xff] %v5578_v4  ;;  %12216 = vst [vmem:[#allocation121_spill] sm:$0xff] %v5583_v62  ;;  %v5590_v60 = vld [vmem:[%s11384_s3 + $0x5e8] sm:$0xff]  ;;  %v5595_v2 = vld [vmem:[%s11384_s3 + $0x5f8] sm:$0xff] }
  0xe4   :  { %560 = vmatpush2.msra.mxu0 %v5554_v55  ;;  %631 = vmatpush2.msra.mxu1 %v5559_v0  ;;  %12217 = vst [vmem:[#allocation122_spill] sm:$0xff] %v5590_v60  ;;  %12218 = vst [vmem:[#allocation123_spill] sm:$0xff] %v5595_v2  ;;  %v5602_v55 = vld [vmem:[%s11384_s3 + $0x5e0] sm:$0xff]  ;;  %v5607_v0 = vld [vmem:[%s11384_s3 + $0x5f0] sm:$0xff] }
  0xe5   :  { %561 = vmatprep.subr.mxu0 %v5566_v63  ;;  %632 = vmatprep.subr.mxu1 %v5571_v7  ;;  %12219 = vst [vmem:[#allocation124_spill] sm:$0xff] %v5602_v55  ;;  %12220 = vst [vmem:[#allocation125_spill] sm:$0xff] %v5607_v0  ;;  %v5614_v63 = vld [vmem:[%s11384_s3 + $0x5a8] sm:$0xff]  ;;  %v5619_v7 = vld [vmem:[%s11384_s3 + $0x5b8] sm:$0xff] }
  0xe6   :  { %562 = vmatpush2.msra.mxu0 %v5578_v4  ;;  %633 = vmatpush2.msra.mxu1 %v5583_v62  ;;  %12221 = vst [vmem:[#allocation126_spill] sm:$0xff] %v5614_v63  ;;  %12222 = vst [vmem:[#allocation127_spill] sm:$0xff] %v5619_v7  ;;  %v5626_v4 = vld [vmem:[%s11384_s3 + $0x5a0] sm:$0xff]  ;;  %v5631_v62 = vld [vmem:[%s11384_s3 + $0x5b0] sm:$0xff] }
  0xe7   :  { %563 = vmatprep.subr.mxu0 %v5590_v60  ;;  %634 = vmatprep.subr.mxu1 %v5595_v2  ;;  %12223 = vst [vmem:[#allocation128_spill] sm:$0xff] %v5626_v4  ;;  %12224 = vst [vmem:[#allocation129_spill] sm:$0xff] %v5631_v62  ;;  %v5638_v60 = vld [vmem:[%s11384_s3 + $0x568] sm:$0xff]  ;;  %v5643_v2 = vld [vmem:[%s11384_s3 + $0x578] sm:$0xff] }
  0xe8   :  { %564 = vmatpush2.msra.mxu0 %v5602_v55  ;;  %635 = vmatpush2.msra.mxu1 %v5607_v0  ;;  %12225 = vst [vmem:[#allocation130_spill] sm:$0xff] %v5638_v60  ;;  %12226 = vst [vmem:[#allocation131_spill] sm:$0xff] %v5643_v2  ;;  %v5650_v55 = vld [vmem:[%s11384_s3 + $0x560] sm:$0xff]  ;;  %v5655_v0 = vld [vmem:[%s11384_s3 + $0x570] sm:$0xff] }
  0xe9   :  { %565 = vmatprep.subr.mxu0 %v5614_v63  ;;  %636 = vmatprep.subr.mxu1 %v5619_v7  ;;  %12227 = vst [vmem:[#allocation132_spill] sm:$0xff] %v5650_v55  ;;  %12228 = vst [vmem:[#allocation133_spill] sm:$0xff] %v5655_v0  ;;  %v5662_v63 = vld [vmem:[%s11384_s3 + $0x528] sm:$0xff]  ;;  %v5667_v7 = vld [vmem:[%s11384_s3 + $0x538] sm:$0xff] }
  0xea   :  { %566 = vmatpush2.msra.mxu0 %v5626_v4  ;;  %637 = vmatpush2.msra.mxu1 %v5631_v62  ;;  %12229 = vst [vmem:[#allocation134_spill] sm:$0xff] %v5662_v63  ;;  %12230 = vst [vmem:[#allocation135_spill] sm:$0xff] %v5667_v7  ;;  %v5674_v4 = vld [vmem:[%s11384_s3 + $0x520] sm:$0xff]  ;;  %v5679_v62 = vld [vmem:[%s11384_s3 + $0x530] sm:$0xff] }
  0xeb   :  { %567 = vmatprep.subr.mxu0 %v5638_v60  ;;  %638 = vmatprep.subr.mxu1 %v5643_v2  ;;  %12231 = vst [vmem:[#allocation136_spill] sm:$0xff] %v5674_v4  ;;  %12232 = vst [vmem:[#allocation137_spill] sm:$0xff] %v5679_v62  ;;  %v5686_v60 = vld [vmem:[%s11384_s3 + $0x4e8] sm:$0xff]  ;;  %v5691_v2 = vld [vmem:[%s11384_s3 + $0x4f8] sm:$0xff] }
  0xec   :  { %568 = vmatpush2.msra.mxu0 %v5650_v55  ;;  %639 = vmatpush2.msra.mxu1 %v5655_v0  ;;  %12233 = vst [vmem:[#allocation138_spill] sm:$0xff] %v5686_v60  ;;  %12234 = vst [vmem:[#allocation139_spill] sm:$0xff] %v5691_v2  ;;  %v5698_v55 = vld [vmem:[%s11384_s3 + $0x4e0] sm:$0xff]  ;;  %v5703_v0 = vld [vmem:[%s11384_s3 + $0x4f0] sm:$0xff] }
  0xed   :  { %569 = vmatprep.subr.mxu0 %v5662_v63  ;;  %640 = vmatprep.subr.mxu1 %v5667_v7  ;;  %12235 = vst [vmem:[#allocation140_spill] sm:$0xff] %v5698_v55  ;;  %12236 = vst [vmem:[#allocation141_spill] sm:$0xff] %v5703_v0  ;;  %v5710_v63 = vld [vmem:[%s11384_s3 + $0x4a8] sm:$0xff]  ;;  %v5715_v7 = vld [vmem:[%s11384_s3 + $0x4b8] sm:$0xff] }
  0xee   :  { %570 = vmatpush2.msra.mxu0 %v5674_v4  ;;  %641 = vmatpush2.msra.mxu1 %v5679_v62  ;;  %12237 = vst [vmem:[#allocation142_spill] sm:$0xff] %v5710_v63  ;;  %12238 = vst [vmem:[#allocation143_spill] sm:$0xff] %v5715_v7  ;;  %v5722_v4 = vld [vmem:[%s11384_s3 + $0x4a0] sm:$0xff]  ;;  %v5727_v62 = vld [vmem:[%s11384_s3 + $0x4b0] sm:$0xff] }
  0xef   :  { %571 = vmatprep.subr.mxu0 %v5686_v60  ;;  %642 = vmatprep.subr.mxu1 %v5691_v2  ;;  %12239 = vst [vmem:[#allocation144_spill] sm:$0xff] %v5722_v4  ;;  %12240 = vst [vmem:[#allocation145_spill] sm:$0xff] %v5727_v62  ;;  %v5734_v60 = vld [vmem:[%s11384_s3 + $0x468] sm:$0xff]  ;;  %v5739_v2 = vld [vmem:[%s11384_s3 + $0x478] sm:$0xff] }
  0xf0   :  { %572 = vmatpush2.msra.mxu0 %v5698_v55  ;;  %643 = vmatpush2.msra.mxu1 %v5703_v0  ;;  %12241 = vst [vmem:[#allocation146_spill] sm:$0xff] %v5739_v2  ;;  %v5746_v55 = vld [vmem:[%s11384_s3 + $0x460] sm:$0xff]  ;;  %v5751_v0 = vld [vmem:[%s11384_s3 + $0x470] sm:$0xff] }
  0xf1   :  { %573 = vmatprep.subr.mxu0 %v5710_v63  ;;  %644 = vmatprep.subr.mxu1 %v5715_v7  ;;  %12242 = vst [vmem:[#allocation147_spill] sm:$0xff] %v5751_v0  ;;  %v5758_v63 = vld [vmem:[%s11384_s3 + $0x428] sm:$0xff]  ;;  %v5763_v7 = vld [vmem:[%s11384_s3 + $0x438] sm:$0xff] }
  0xf2   :  { %574 = vmatpush2.msra.mxu0 %v5722_v4  ;;  %645 = vmatpush2.msra.mxu1 %v5727_v62  ;;  %v5770_v4 = vld [vmem:[%s11384_s3 + $0x420] sm:$0xff]  ;;  %v5777_v62 = vld [vmem:[%s11384_s3 + $0x430] sm:$0xff] }
  0xf3   :  { %575 = vmatprep.subr.mxu0 %v5734_v60  ;;  %646 = vmatprep.subr.mxu1 %v5739_v2  ;;  %12243 = vst [vmem:[#allocation148_spill] sm:$0xff] %v5770_v4  ;;  %v12244_v2 = vmov 0.0  }
  0xf4   :  { %576 = vmatpush2.msra.mxu0 %v5746_v55  ;;  %647 = vmatpush2.msra.mxu1 %v5751_v0  ;;  %v5790_v0 = vld [vmem:[%s11384_s3 + $0x3c8] sm:$0xff] }
  0xf5   :  { %577 = vmatprep.subr.mxu0 %v5758_v63  ;;  %648 = vmatprep.subr.mxu1 %v5763_v7  ;;  %12245 = vst [vmem:[#allocation149_spill] sm:$0xff] %v5790_v0 }
  0xf6   :  { %578 = vmatpush2.msra.mxu0 %v5770_v4  ;;  %579 = vmatprep.mubr.f32.mxu0 %v12244_v2  ;;  %v5796_v4 = vld [vmem:[%s11384_s3 + $0x3d8] sm:$0xff] }
  0xf7   :  { %649 = vmatpush2.msra.mxu1 %v5777_v62  ;;  %650 = vmatprep.mubr.f32.mxu1 %v12244_v2  ;;  %12246 = vst [vmem:[#allocation150_spill] sm:$0xff] %v5796_v4  ;;  %v5802_v2 = vld [vmem:[%s11384_s3 + $0x3c0] sm:$0xff] }
  0xf8   :  { %580 = vmatmul.mubr.f32.vlgmr.msra.gmra.mxu0 %v5023_v58  ;;  %651 = vmatmul.mubr.f32.vlgmr.msra.gmra.mxu1 %v5023_v58  ;;  %12247 = vst [vmem:[#allocation151_spill] sm:$0xff] %v5802_v2  ;;  %v5808_v58 = vld [vmem:[%s11384_s3 + $0x3d0] sm:$0xff] }
  0xf9   :  { %757 = vmatprep.subr.mxu0 %v5790_v0  ;;  %828 = vmatprep.subr.mxu1 %v5796_v4  ;;  %12248 = vst [vmem:[#allocation152_spill] sm:$0xff] %v5808_v58  ;;  %v5814_v0 = vld [vmem:[%s11384_s3 + $0x388] sm:$0xff]  ;;  %v5820_v4 = vld [vmem:[%s11384_s3 + $0x398] sm:$0xff] }
  0xfa   :  { %758 = vmatpush1.msra.mxu0 %v5802_v2  ;;  %829 = vmatpush1.msra.mxu1 %v5808_v58  ;;  %12249 = vst [vmem:[#allocation153_spill] sm:$0xff] %v5814_v0  ;;  %12250 = vst [vmem:[#allocation154_spill] sm:$0xff] %v5820_v4  ;;  %v5826_v2 = vld [vmem:[%s11384_s3 + $0x380] sm:$0xff]  ;;  %v5832_v58 = vld [vmem:[%s11384_s3 + $0x390] sm:$0xff] }
  0xfb   :  { %759 = vmatprep.subr.mxu0 %v5814_v0  ;;  %830 = vmatprep.subr.mxu1 %v5820_v4  ;;  %12251 = vst [vmem:[#allocation155_spill] sm:$0xff] %v5826_v2  ;;  %12252 = vst [vmem:[#allocation156_spill] sm:$0xff] %v5832_v58  ;;  %v5838_v0 = vld [vmem:[%s11384_s3 + $0x348] sm:$0xff]  ;;  %v5844_v4 = vld [vmem:[%s11384_s3 + $0x358] sm:$0xff] }
  0xfc   :  { %760 = vmatpush1.msra.mxu0 %v5826_v2  ;;  %831 = vmatpush1.msra.mxu1 %v5832_v58  ;;  %12253 = vst [vmem:[#allocation157_spill] sm:$0xff] %v5838_v0  ;;  %12254 = vst [vmem:[#allocation158_spill] sm:$0xff] %v5844_v4  ;;  %v5850_v2 = vld [vmem:[%s11384_s3 + $0x340] sm:$0xff]  ;;  %v5856_v58 = vld [vmem:[%s11384_s3 + $0x350] sm:$0xff] }
  0xfd   :  { %761 = vmatprep.subr.mxu0 %v5838_v0  ;;  %832 = vmatprep.subr.mxu1 %v5844_v4  ;;  %12255 = vst [vmem:[#allocation159_spill] sm:$0xff] %v5850_v2  ;;  %12256 = vst [vmem:[#allocation160_spill] sm:$0xff] %v5856_v58  ;;  %v5862_v0 = vld [vmem:[%s11384_s3 + $0x308] sm:$0xff]  ;;  %v5868_v4 = vld [vmem:[%s11384_s3 + $0x318] sm:$0xff] }
  0xfe   :  { %762 = vmatpush1.msra.mxu0 %v5850_v2  ;;  %833 = vmatpush1.msra.mxu1 %v5856_v58  ;;  %12257 = vst [vmem:[#allocation161_spill] sm:$0xff] %v5862_v0  ;;  %12258 = vst [vmem:[#allocation162_spill] sm:$0xff] %v5868_v4  ;;  %v5874_v2 = vld [vmem:[%s11384_s3 + $0x300] sm:$0xff]  ;;  %v5880_v58 = vld [vmem:[%s11384_s3 + $0x310] sm:$0xff] }
  0xff   :  { %763 = vmatprep.subr.mxu0 %v5862_v0  ;;  %834 = vmatprep.subr.mxu1 %v5868_v4  ;;  %12259 = vst [vmem:[#allocation163_spill] sm:$0xff] %v5874_v2  ;;  %12260 = vst [vmem:[#allocation164_spill] sm:$0xff] %v5880_v58  ;;  %v5886_v0 = vld [vmem:[%s11384_s3 + $0x2c8] sm:$0xff]  ;;  %v5892_v4 = vld [vmem:[%s11384_s3 + $0x2d8] sm:$0xff] }
 0x100   :  { %764 = vmatpush1.msra.mxu0 %v5874_v2  ;;  %835 = vmatpush1.msra.mxu1 %v5880_v58  ;;  %12261 = vst [vmem:[#allocation165_spill] sm:$0xff] %v5886_v0  ;;  %12262 = vst [vmem:[#allocation166_spill] sm:$0xff] %v5892_v4  ;;  %v5898_v2 = vld [vmem:[%s11384_s3 + $0x2c0] sm:$0xff]  ;;  %v5904_v58 = vld [vmem:[%s11384_s3 + $0x2d0] sm:$0xff] }
 0x101   :  { %765 = vmatprep.subr.mxu0 %v5886_v0  ;;  %836 = vmatprep.subr.mxu1 %v5892_v4  ;;  %12263 = vst [vmem:[#allocation167_spill] sm:$0xff] %v5898_v2  ;;  %12264 = vst [vmem:[#allocation168_spill] sm:$0xff] %v5904_v58  ;;  %v5910_v0 = vld [vmem:[%s11384_s3 + $0x288] sm:$0xff]  ;;  %v5916_v4 = vld [vmem:[%s11384_s3 + $0x298] sm:$0xff] }
 0x102   :  { %766 = vmatpush1.msra.mxu0 %v5898_v2  ;;  %837 = vmatpush1.msra.mxu1 %v5904_v58  ;;  %12265 = vst [vmem:[#allocation169_spill] sm:$0xff] %v5910_v0  ;;  %12266 = vst [vmem:[#allocation170_spill] sm:$0xff] %v5916_v4  ;;  %v5922_v2 = vld [vmem:[%s11384_s3 + $0x280] sm:$0xff]  ;;  %v5928_v58 = vld [vmem:[%s11384_s3 + $0x290] sm:$0xff] }
 0x103   :  { %767 = vmatprep.subr.mxu0 %v5910_v0  ;;  %838 = vmatprep.subr.mxu1 %v5916_v4  ;;  %12267 = vst [vmem:[#allocation171_spill] sm:$0xff] %v5922_v2  ;;  %12268 = vst [vmem:[#allocation172_spill] sm:$0xff] %v5928_v58  ;;  %v5934_v0 = vld [vmem:[%s11384_s3 + $0x248] sm:$0xff]  ;;  %v5940_v4 = vld [vmem:[%s11384_s3 + $0x258] sm:$0xff] }
 0x104   :  { %768 = vmatpush1.msra.mxu0 %v5922_v2  ;;  %839 = vmatpush1.msra.mxu1 %v5928_v58  ;;  %12269 = vst [vmem:[#allocation173_spill] sm:$0xff] %v5934_v0  ;;  %12270 = vst [vmem:[#allocation174_spill] sm:$0xff] %v5940_v4  ;;  %v5946_v2 = vld [vmem:[%s11384_s3 + $0x240] sm:$0xff]  ;;  %v5952_v58 = vld [vmem:[%s11384_s3 + $0x250] sm:$0xff] }
 0x105   :  { %769 = vmatprep.subr.mxu0 %v5934_v0  ;;  %840 = vmatprep.subr.mxu1 %v5940_v4  ;;  %12271 = vst [vmem:[#allocation175_spill] sm:$0xff] %v5946_v2  ;;  %12272 = vst [vmem:[#allocation176_spill] sm:$0xff] %v5952_v58  ;;  %v5958_v0 = vld [vmem:[%s11384_s3 + $0x208] sm:$0xff]  ;;  %v5964_v4 = vld [vmem:[%s11384_s3 + $0x218] sm:$0xff] }
 0x106   :  { %770 = vmatpush1.msra.mxu0 %v5946_v2  ;;  %841 = vmatpush1.msra.mxu1 %v5952_v58  ;;  %12273 = vst [vmem:[#allocation177_spill] sm:$0xff] %v5958_v0  ;;  %12274 = vst [vmem:[#allocation178_spill] sm:$0xff] %v5964_v4  ;;  %v5970_v2 = vld [vmem:[%s11384_s3 + $0x200] sm:$0xff]  ;;  %v5976_v58 = vld [vmem:[%s11384_s3 + $0x210] sm:$0xff] }
 0x107   :  { %771 = vmatprep.subr.mxu0 %v5958_v0  ;;  %842 = vmatprep.subr.mxu1 %v5964_v4  ;;  %12275 = vst [vmem:[#allocation179_spill] sm:$0xff] %v5970_v2  ;;  %12276 = vst [vmem:[#allocation180_spill] sm:$0xff] %v5976_v58  ;;  %v5982_v0 = vld [vmem:[%s11384_s3 + $0x1c8] sm:$0xff]  ;;  %v5988_v4 = vld [vmem:[%s11384_s3 + $0x1d8] sm:$0xff] }
 0x108   :  { %772 = vmatpush1.msra.mxu0 %v5970_v2  ;;  %843 = vmatpush1.msra.mxu1 %v5976_v58  ;;  %12277 = vst [vmem:[#allocation181_spill] sm:$0xff] %v5982_v0  ;;  %12278 = vst [vmem:[#allocation182_spill] sm:$0xff] %v5988_v4  ;;  %v5994_v2 = vld [vmem:[%s11384_s3 + $0x1c0] sm:$0xff]  ;;  %v6000_v58 = vld [vmem:[%s11384_s3 + $0x1d0] sm:$0xff] }
 0x109   :  { %773 = vmatprep.subr.mxu0 %v5982_v0  ;;  %844 = vmatprep.subr.mxu1 %v5988_v4  ;;  %12279 = vst [vmem:[#allocation183_spill] sm:$0xff] %v5994_v2  ;;  %12280 = vst [vmem:[#allocation184_spill] sm:$0xff] %v6000_v58  ;;  %v6006_v0 = vld [vmem:[%s11384_s3 + $0x188] sm:$0xff]  ;;  %v6012_v4 = vld [vmem:[%s11384_s3 + $0x198] sm:$0xff] }
 0x10a   :  { %774 = vmatpush1.msra.mxu0 %v5994_v2  ;;  %845 = vmatpush1.msra.mxu1 %v6000_v58  ;;  %12281 = vst [vmem:[#allocation185_spill] sm:$0xff] %v6006_v0  ;;  %12282 = vst [vmem:[#allocation186_spill] sm:$0xff] %v6012_v4  ;;  %v6018_v2 = vld [vmem:[%s11384_s3 + $0x180] sm:$0xff]  ;;  %v6024_v58 = vld [vmem:[%s11384_s3 + $0x190] sm:$0xff] }
 0x10b   :  { %775 = vmatprep.subr.mxu0 %v6006_v0  ;;  %846 = vmatprep.subr.mxu1 %v6012_v4  ;;  %12283 = vst [vmem:[#allocation187_spill] sm:$0xff] %v6018_v2  ;;  %12284 = vst [vmem:[#allocation188_spill] sm:$0xff] %v6024_v58  ;;  %v6030_v0 = vld [vmem:[%s11384_s3 + $0x148] sm:$0xff]  ;;  %v6036_v4 = vld [vmem:[%s11384_s3 + $0x158] sm:$0xff] }
 0x10c   :  { %776 = vmatpush1.msra.mxu0 %v6018_v2  ;;  %847 = vmatpush1.msra.mxu1 %v6024_v58  ;;  %12285 = vst [vmem:[#allocation189_spill] sm:$0xff] %v6030_v0  ;;  %12286 = vst [vmem:[#allocation190_spill] sm:$0xff] %v6036_v4  ;;  %v6042_v2 = vld [vmem:[%s11384_s3 + $0x140] sm:$0xff]  ;;  %v6048_v58 = vld [vmem:[%s11384_s3 + $0x150] sm:$0xff] }
 0x10d   :  { %777 = vmatprep.subr.mxu0 %v6030_v0  ;;  %848 = vmatprep.subr.mxu1 %v6036_v4  ;;  %12287 = vst [vmem:[#allocation191_spill] sm:$0xff] %v6042_v2  ;;  %12288 = vst [vmem:[#allocation192_spill] sm:$0xff] %v6048_v58  ;;  %v6054_v0 = vld [vmem:[%s11384_s3 + $0x108] sm:$0xff]  ;;  %v6060_v4 = vld [vmem:[%s11384_s3 + $0x118] sm:$0xff] }
 0x10e   :  { %778 = vmatpush1.msra.mxu0 %v6042_v2  ;;  %849 = vmatpush1.msra.mxu1 %v6048_v58  ;;  %12289 = vst [vmem:[#allocation193_spill] sm:$0xff] %v6054_v0  ;;  %12290 = vst [vmem:[#allocation194_spill] sm:$0xff] %v6060_v4  ;;  %v6066_v2 = vld [vmem:[%s11384_s3 + $0x100] sm:$0xff]  ;;  %v6072_v58 = vld [vmem:[%s11384_s3 + $0x110] sm:$0xff] }
 0x10f   :  { %779 = vmatprep.subr.mxu0 %v6054_v0  ;;  %850 = vmatprep.subr.mxu1 %v6060_v4  ;;  %12291 = vst [vmem:[#allocation195_spill] sm:$0xff] %v6066_v2  ;;  %12292 = vst [vmem:[#allocation196_spill] sm:$0xff] %v6072_v58  ;;  %v6078_v0 = vld [vmem:[%s11384_s3 + $0xc8] sm:$0xff]  ;;  %v6084_v4 = vld [vmem:[%s11384_s3 + $0xd8] sm:$0xff] }
 0x110   :  { %780 = vmatpush1.msra.mxu0 %v6066_v2  ;;  %851 = vmatpush1.msra.mxu1 %v6072_v58  ;;  %12293 = vst [vmem:[#allocation197_spill] sm:$0xff] %v6078_v0  ;;  %12294 = vst [vmem:[#allocation198_spill] sm:$0xff] %v6084_v4  ;;  %v6090_v2 = vld [vmem:[%s11384_s3 + $0xc0] sm:$0xff]  ;;  %v6096_v58 = vld [vmem:[%s11384_s3 + $0xd0] sm:$0xff] }
 0x111   :  { %781 = vmatprep.subr.mxu0 %v6078_v0  ;;  %852 = vmatprep.subr.mxu1 %v6084_v4  ;;  %12295 = vst [vmem:[#allocation199_spill] sm:$0xff] %v6090_v2  ;;  %12296 = vst [vmem:[#allocation200_spill] sm:$0xff] %v6096_v58  ;;  %v6102_v0 = vld [vmem:[%s11384_s3 + $0x88] sm:$0xff]  ;;  %v6108_v4 = vld [vmem:[%s11384_s3 + $0x98] sm:$0xff] }
 0x112   :  { %782 = vmatpush1.msra.mxu0 %v6090_v2  ;;  %853 = vmatpush1.msra.mxu1 %v6096_v58  ;;  %12297 = vst [vmem:[#allocation201_spill] sm:$0xff] %v6102_v0  ;;  %12298 = vst [vmem:[#allocation202_spill] sm:$0xff] %v6108_v4  ;;  %v6114_v2 = vld [vmem:[%s11384_s3 + $0x80] sm:$0xff]  ;;  %v6120_v58 = vld [vmem:[%s11384_s3 + $0x90] sm:$0xff] }
 0x113   :  { %783 = vmatprep.subr.mxu0 %v6102_v0  ;;  %854 = vmatprep.subr.mxu1 %v6108_v4  ;;  %12299 = vst [vmem:[#allocation203_spill] sm:$0xff] %v6114_v2  ;;  %12300 = vst [vmem:[#allocation204_spill] sm:$0xff] %v6120_v58  ;;  %v6126_v0 = vld [vmem:[%s11384_s3 + $0x48] sm:$0xff]  ;;  %v6132_v4 = vld [vmem:[%s11384_s3 + $0x58] sm:$0xff] }
 0x114   :  { %784 = vmatpush1.msra.mxu0 %v6114_v2  ;;  %855 = vmatpush1.msra.mxu1 %v6120_v58  ;;  %12301 = vst [vmem:[#allocation205_spill] sm:$0xff] %v6126_v0  ;;  %12302 = vst [vmem:[#allocation206_spill] sm:$0xff] %v6132_v4  ;;  %v6138_v2 = vld [vmem:[%s11384_s3 + $0x40] sm:$0xff]  ;;  %v6144_v58 = vld [vmem:[%s11384_s3 + $0x50] sm:$0xff] }
 0x115   :  { %785 = vmatprep.subr.mxu0 %v6126_v0  ;;  %856 = vmatprep.subr.mxu1 %v6132_v4  ;;  %12303 = vst [vmem:[#allocation207_spill] sm:$0xff] %v6138_v2  ;;  %12304 = vst [vmem:[#allocation208_spill] sm:$0xff] %v6144_v58  ;;  %v6150_v0 = vld [vmem:[%s11384_s3 + $0x8] sm:$0xff]  ;;  %v6156_v4 = vld [vmem:[%s11384_s3 + $0x18] sm:$0xff] }
 0x116   :  { %786 = vmatpush1.msra.mxu0 %v6138_v2  ;;  %857 = vmatpush1.msra.mxu1 %v6144_v58  ;;  %12305 = vst [vmem:[#allocation209_spill] sm:$0xff] %v6150_v0  ;;  %12306 = vst [vmem:[#allocation210_spill] sm:$0xff] %v6156_v4  ;;  %v6162_v2 = vld [vmem:[%s11384_s3] sm:$0xff]  ;;  %v6168_v58 = vld [vmem:[%s11384_s3 + $0x10] sm:$0xff] }
 0x117   :  { %787 = vmatprep.subr.mxu0 %v6150_v0  ;;  %858 = vmatprep.subr.mxu1 %v6156_v4  ;;  %12307 = vst [vmem:[#allocation211_spill] sm:$0xff] %v6162_v2  ;;  %v6174_v0 = vld [vmem:[%s11384_s3 + $0x7c8] sm:$0xff]  ;;  %v6180_v4 = vld [vmem:[%s11384_s3 + $0x7d8] sm:$0xff] }
 0x118   :  { %788 = vmatpush1.msra.mxu0 %v6162_v2  ;;  %859 = vmatpush1.msra.mxu1 %v6168_v58  ;;  %v6186_v2 = vld [vmem:[%s11384_s3 + $0x7c0] sm:$0xff] }
 0x119   :  { %789 = vmatprep.subr.mxu0 %v6174_v0  ;;  %860 = vmatprep.subr.mxu1 %v6180_v4 }
 0x11a   :  { %790 = vmatpush2.msra.mxu0 %v6186_v2  ;;  %861 = vmatpush2.msra.mxu1 %v4597_v8  ;;  %v12308_v8 = vld [vmem:[#allocation5_spill] sm:$0xff] }
 0x11b   :  { %791 = vmatprep.subr.mxu0 %v4602_v9  ;;  %862 = vmatprep.subr.mxu1 %v4607_v10  ;;  %v12309_v9 = vld [vmem:[#allocation6_spill] sm:$0xff]  ;;  %v12310_v10 = vld [vmem:[#allocation7_spill] sm:$0xff] }
 0x11c   :  { %792 = vmatpush2.msra.mxu0 %v4612_v11  ;;  %863 = vmatpush2.msra.mxu1 %v4617_v12  ;;  %v12311_v11 = vld [vmem:[#allocation8_spill] sm:$0xff]  ;;  %v12312_v12 = vld [vmem:[#allocation9_spill] sm:$0xff] }
 0x11d   :  { %793 = vmatprep.subr.mxu0 %v4622_v13  ;;  %864 = vmatprep.subr.mxu1 %v4629_v14  ;;  %v12313_v13 = vld [vmem:[#allocation10_spill] sm:$0xff]  ;;  %v12314_v14 = vld [vmem:[#allocation11_spill] sm:$0xff] }
 0x11e   :  { %794 = vmatpush2.msra.mxu0 %v4634_v15  ;;  %865 = vmatpush2.msra.mxu1 %v4641_v16  ;;  %v12315_v15 = vld [vmem:[#allocation12_spill] sm:$0xff]  ;;  %v12316_v16 = vld [vmem:[#allocation13_spill] sm:$0xff] }
 0x11f   :  { %795 = vmatprep.subr.mxu0 %v4646_v17  ;;  %866 = vmatprep.subr.mxu1 %v4653_v18  ;;  %v12317_v17 = vld [vmem:[#allocation14_spill] sm:$0xff]  ;;  %v12318_v18 = vld [vmem:[#allocation15_spill] sm:$0xff] }
 0x120   :  { %796 = vmatpush2.msra.mxu0 %v4658_v19  ;;  %867 = vmatpush2.msra.mxu1 %v4665_v20  ;;  %v12319_v19 = vld [vmem:[#allocation16_spill] sm:$0xff]  ;;  %v12320_v20 = vld [vmem:[#allocation17_spill] sm:$0xff] }
 0x121   :  { %797 = vmatprep.subr.mxu0 %v4670_v21  ;;  %868 = vmatprep.subr.mxu1 %v4677_v22  ;;  %v12321_v21 = vld [vmem:[#allocation18_spill] sm:$0xff]  ;;  %v12322_v22 = vld [vmem:[#allocation19_spill] sm:$0xff] }
 0x122   :  { %798 = vmatpush2.msra.mxu0 %v4682_v23  ;;  %869 = vmatpush2.msra.mxu1 %v4689_v24  ;;  %v12323_v23 = vld [vmem:[#allocation20_spill] sm:$0xff]  ;;  %v12324_v24 = vld [vmem:[#allocation21_spill] sm:$0xff] }
 0x123   :  { %799 = vmatprep.subr.mxu0 %v4694_v25  ;;  %870 = vmatprep.subr.mxu1 %v4701_v26  ;;  %v12325_v25 = vld [vmem:[#allocation22_spill] sm:$0xff]  ;;  %v662_v26 = vpop.permute.xlu0 %661 }
 0x124   :  { %800 = vmatpush2.msra.mxu0 %v4706_v27  ;;  %871 = vmatpush2.msra.mxu1 %v4713_v28  ;;  %v12326_v28 = vld [vmem:[#allocation26_spill] sm:$0xff] }
 0x125   :  { %801 = vmatprep.subr.mxu0 %v4718_v29  ;;  %872 = vmatprep.subr.mxu1 %v4725_v30  ;;  %v665_v29 = vmul.f32 %v662_v26, %v12326_v28  ;;  %v12327_v30 = vld [vmem:[#allocation25_spill] sm:$0xff] }
 0x126   :  { %802 = vmatpush2.msra.mxu0 %v4730_v31  ;;  %873 = vmatpush2.msra.mxu1 %v4737_v32  ;;  %v664_v31 = vmul.f32 %v662_v26, %v12327_v30 }
 0x127   :  { %803 = vmatprep.subr.mxu0 %v4742_v33  ;;  %874 = vmatprep.subr.mxu1 %v4749_v34  ;;  %v12328_v33 = vld [vmem:[#allocation28_spill] sm:$0xff] }
 0x128   :  { %804 = vmatpush2.msra.mxu0 %v4754_v35  ;;  %875 = vmatpush2.msra.mxu1 %v4761_v36  ;;  %v669_v34 = vadd.f32 %v665_v29, %v12328_v33  ;;  %v12329_v35 = vld [vmem:[#allocation27_spill] sm:$0xff] }
 0x129   :  { %805 = vmatprep.subr.mxu0 %v4766_v37  ;;  %876 = vmatprep.subr.mxu1 %v4773_v38  ;;  %v668_v36 = vadd.f32 %v664_v31, %v12329_v35 }
 0x12a   :  { %806 = vmatpush2.msra.mxu0 %v4778_v39  ;;  %877 = vmatpush2.msra.mxu1 %v4785_v40 }
 0x12b   :  { %807 = vmatprep.subr.mxu0 %v4790_v41  ;;  %878 = vmatprep.subr.mxu1 %v4797_v42  ;;  %v30_v41 = vld [vmem:[%s11387_s4] sm:$0xf]  ;;  %v3211_v42 = vld [vmem:[%s11383_s0 + $0x10] sm:$0xff] }
 0x12c   :  { %808 = vmatpush2.msra.mxu0 %v4802_v43  ;;  %879 = vmatpush2.msra.mxu1 %v4809_v44  ;;  %v12330_v43 = vld [vmem:[#allocation23_spill] sm:$0xff] }
 0x12d   :  { %809 = vmatprep.subr.mxu0 %v4814_v45  ;;  %880 = vmatprep.subr.mxu1 %v4821_v46  ;;  %v6263_v44 = vrot.slane %v30_v41, %v12330_v43  ;;  %v3218_v45 = vld [vmem:[%s11383_s0 + $0x18] sm:$0xff] }
 0x12e   :  { %810 = vmatpush2.msra.mxu0 %v4826_v47  ;;  %881 = vmatpush2.msra.mxu1 %v4833_v48  ;;  %v12332_v47 = vld [vmem:[#allocation24_spill] sm:$0xff] }
 0x12f   :  { %811 = vmatprep.subr.mxu0 %v4838_v49  ;;  %882 = vmatprep.subr.mxu1 %v4845_v50  ;;  %12331 = vst [vmem:[#allocation5_spill] sm:$0xff] %v6263_v44  ;;  %v6269_v48 = vrot.slane %v30_v41, %v12332_v47 }
 0x130   :  { %812 = vmatpush2.msra.mxu0 %v4850_v51  ;;  %883 = vmatpush2.msra.mxu1 %v4857_v52  ;;  %v3232_v51 = vld [vmem:[%s11383_s0 + $0x28] sm:$0xff] }
 0x131   :  { %813 = vmatprep.subr.mxu0 %v12308_v8  ;;  %884 = vmatprep.subr.mxu1 %v12309_v9  ;;  %12333 = vst [vmem:[#allocation6_spill] sm:$0xff] %v6269_v48 }
 0x132   :  { %814 = vmatpush2.msra.mxu0 %v12310_v10  ;;  %885 = vmatpush2.msra.mxu1 %v12311_v11  ;;  %v12334_v11 = vld [vmem:[#allocation30_spill] sm:$0xff] }
 0x133   :  { %815 = vmatprep.subr.mxu0 %v12312_v12  ;;  %886 = vmatprep.subr.mxu1 %v12313_v13  ;;  %v667_v12 = vmul.f32 %v662_v26, %v12334_v11 }
 0x134   :  { %816 = vmatpush2.msra.mxu0 %v12314_v14  ;;  %887 = vmatpush2.msra.mxu1 %v12315_v15  ;;  %v3246_v15 = vld [vmem:[%s11383_s0 + $0x38] sm:$0xff] }
 0x135   :  { %817 = vmatprep.subr.mxu0 %v12316_v16  ;;  %888 = vmatprep.subr.mxu1 %v12317_v17  ;;  %v666_v17 = vmul.f32 %v662_v26, %v5012_v5 }
 0x136   :  { %818 = vmatpush2.msra.mxu0 %v12318_v18  ;;  %889 = vmatpush2.msra.mxu1 %v12319_v19  ;;  %v12335_v18 = vld [vmem:[#allocation29_spill] sm:$0xff] }
 0x137   :  { %819 = vmatprep.subr.mxu0 %v12320_v20  ;;  %890 = vmatprep.subr.mxu1 %v12321_v21  ;;  %v6282_v19 = vrot.slane %v30_v41, %v12335_v18  ;;  %v12337_v20 = vld [vmem:[#allocation32_spill] sm:$0xff] }
 0x138   :  { %820 = vmatpush2.msra.mxu0 %v12322_v22  ;;  %891 = vmatpush2.msra.mxu1 %v12323_v23  ;;  %v671_v21 = vadd.f32 %v667_v12, %v12337_v20 }
 0x139   :  { %899 = vmatprep.subr.mxu0 %v12324_v24  ;;  %970 = vmatprep.subr.mxu1 %v12325_v25  ;;  %12336 = vst [vmem:[#allocation7_spill] sm:$0xff] %v6282_v19 }
 0x13a   :  { %1045 = vperm.xlu1 %3313, %v3211_v42  }
 0x13e   :  { %1408 = vperm.xlu1 %3313, %v3218_v45  }
 0x142   :  { %2134 = vperm.xlu1 %3313, %v3232_v51  }
 0x146   :  { %2860 = vperm.xlu1 %3313, %v3246_v15  }
 0x177   :  { %v439_v27 = vpop.f32.mrf.mxu0  ;;  %v510_v46 = vpop.f32.mrf.mxu1 }
 0x178   :  { %v672_v38 = vadd.f32 %v668_v36, %v439_v27  ;;  %v670_v27 = vadd.f32 %v666_v17, %v5016_v59 }
 0x179   :  { %v441_v32 = vpop.f32.mrf.mxu0  ;;  %v512_v8 = vpop.f32.mrf.mxu1 }
 0x17a   :  { %v673_v37 = vadd.f32 %v669_v34, %v441_v32  ;;  %v3205_v40 = vmul.f32 -1.442695, %v672_v38  ;;  %v675_v25 = vadd.f32 %v671_v21, %v512_v8  ;;  %v674_v32 = vadd.f32 %v670_v27, %v510_v46  ;;  %v12338_v34 = vld [vmem:[#allocation31_spill] sm:$0xff]  ;;  %v12342_v27 = vld [vmem:[#allocation37_spill] sm:$0xff] }
 0x17b   :  { %v6288_v36 = vrot.slane %v30_v41, %v12338_v34  ;;  %v12353_v34 = vld [vmem:[#allocation48_spill] sm:$0xff] }
 0x17c   :  { %v3206_v39 = vmul.f32 -1.442695, %v673_v37  ;;  %v3207_v26 = vmul.f32 -1.442695, %v675_v25  ;;  %v12341_v25 = vld [vmem:[#allocation36_spill] sm:$0xff] }
 0x17d   :  { %12339 = vst [vmem:[#allocation8_spill] sm:$0xff] %v6288_v36 }
 0x17e   :  { %3330 = vpow2.f32 %v3206_v39 }
 0x17f   :  { %3332 = vpow2.f32 %v3205_v40 }
 0x18b   :  { %v3331_v16 = vpop.eup %3330 }
 0x18c   :  { %v3333_v23 = vpop.eup %3332  ;;  %v686_v24 = vadd.f32 1.0, %v3331_v16 }
 0x18d   :  { %v680_v31 = vadd.f32 1.0, %v3333_v23 }
 0x1b8   :  { %v581_v49 = vpop.f32.mrf.mxu0  ;;  %v652_v13 = vpop.f32.mrf.mxu1 }
 0x1b9   :  { %v722_v50 = vadd.f32 %v6263_v44, %v581_v49  ;;  %v724_v39 = vadd.f32 %v6288_v36, %v652_v13 }
 0x1ba   :  { %v583_v52 = vpop.f32.mrf.mxu0  ;;  %v654_v22 = vpop.f32.mrf.mxu1 }
 0x1bb   :  { %v3208_v9 = vmul.f32 -1.442695, %v722_v50  ;;  %v723_v10 = vadd.f32 %v6269_v48, %v583_v52  ;;  %v725_v29 = vadd.f32 %v6282_v19, %v654_v22 }
 0x1bd   :  { %3334 = vpow2.f32 %v3208_v9  ;;  %v3209_v14 = vmul.f32 -1.442695, %v723_v10  ;;  %v3210_v37 = vmul.f32 -1.442695, %v725_v29  ;;  %v12347_v29 = vld [vmem:[#allocation42_spill] sm:$0xff] }
 0x1bf   :  { %3336 = vpow2.f32 %v3209_v14 }
 0x1c0   :  { %3338 = vrcp.f32 %v686_v24  ;;  %v12340_v24 = vld [vmem:[#allocation35_spill] sm:$0xff] }
 0x1c1   :  { %3340 = vrcp.f32 %v680_v31  ;;  %v12351_v31 = vld [vmem:[#allocation46_spill] sm:$0xff] }
 0x1c2   :  { %3342 = vtanh.f32 %v674_v32  ;;  %v12352_v32 = vld [vmem:[#allocation47_spill] sm:$0xff] }
 0x1c3   :  { %3344 = vpow2.f32 %v3207_v26  ;;  %v12354_v26 = vld [vmem:[#allocation49_spill] sm:$0xff] }
 0x1c4   :  { %3346 = vpow2.f32 %v3210_v37  ;;  %v12355_v37 = vld [vmem:[#allocation50_spill] sm:$0xff] }
 0x1ca   :  { %v3335_v38 = vpop.eup %3334 }
 0x1cb   :  { %v730_v40 = vadd.f32 1.0, %v3335_v38  ;;  %v12356_v38 = vld [vmem:[#allocation51_spill] sm:$0xff] }
 0x1cc   :  { %v3337_v42 = vpop.eup %3336 }
 0x1cd   :  { %3348 = vrcp.f32 %v730_v40  ;;  %v736_v43 = vadd.f32 1.0, %v3337_v42  ;;  %v3339_v45 = vpop.eup %3338  ;;  %v12358_v40 = vld [vmem:[#allocation53_spill] sm:$0xff]  ;;  %v12359_v42 = vld [vmem:[#allocation54_spill] sm:$0xff] }
 0x1ce   :  { %3350 = vtanh.f32 %v724_v39  ;;  %v3341_v46 = vpop.eup %3340  ;;  %v696_v47 = vmul.f32 %v3339_v45, %v5020_v53  ;;  %v12357_v39 = vld [vmem:[#allocation52_spill] sm:$0xff] }
 0x1cf   :  { %3352 = vrcp.f32 %v736_v43  ;;  %v3343_v41 = vpop.eup %3342  ;;  %v12360_v43 = vld [vmem:[#allocation55_spill] sm:$0xff]  ;;  %v12361_v45 = vld [vmem:[#allocation56_spill] sm:$0xff] }
 0x1d0   :  { %v3345_v49 = vpop.eup %3344  ;;  %v697_v51 = vmul.f32 %v3343_v41, %v3341_v46  ;;  %v12362_v46 = vld [vmem:[#allocation57_spill] sm:$0xff]  ;;  %v12363_v41 = vld [vmem:[#allocation58_spill] sm:$0xff] }
 0x1d1   :  { %v3347_v50 = vpop.eup %3346  ;;  %v693_v15 = vadd.f32 1.0, %v3345_v49  ;;  %v12365_v49 = vld [vmem:[#allocation60_spill] sm:$0xff] }
 0x1d2   :  { %v6292_v9 = vadd.f32 %v697_v51, %v696_v47  ;;  %v743_v12 = vadd.f32 1.0, %v3347_v50  ;;  %v12364_v47 = vld [vmem:[#allocation59_spill] sm:$0xff]  ;;  %v12366_v50 = vld [vmem:[#allocation61_spill] sm:$0xff]  ;;  %v12367_v51 = vld [vmem:[#allocation62_spill] sm:$0xff] }
 0x1d4   :  { %3354 = vtanh.f32 %v6292_v9 }
 0x1d5   :  { %3356 = vrcp.f32 %v743_v12  ;;  %v12371_v12 = vld [vmem:[#allocation66_spill] sm:$0xff] }
 0x1da   :  { %v3349_v52 = vpop.eup %3348 }
 0x1db   :  { %v3351_v8 = vpop.eup %3350 }
 0x1dc   :  { %v3353_v10 = vpop.eup %3352  ;;  %v747_v14 = vmul.f32 %v3351_v8, %v3349_v52  ;;  %v12368_v52 = vld [vmem:[#allocation63_spill] sm:$0xff]  ;;  %v12369_v8 = vld [vmem:[#allocation64_spill] sm:$0xff] }
 0x1dd   :  { %v746_v13 = vmul.f32 0.0, %v3353_v10  ;;  %v12370_v10 = vld [vmem:[#allocation65_spill] sm:$0xff] }
 0x1df   :  { %v6294_v16 = vadd.f32 %v747_v14, %v746_v13  ;;  %v12372_v13 = vld [vmem:[#allocation67_spill] sm:$0xff]  ;;  %v12373_v14 = vld [vmem:[#allocation68_spill] sm:$0xff] }
 0x1e1   :  { %3358 = vtanh.f32 %v6294_v16  ;;  %v3355_v53 = vpop.eup %3354 }
 0x1e2   :  { %3360 = vrcp.f32 %v693_v15  ;;  %v3357_v17 = vpop.eup %3356  ;;  %v12374_v15 = vld [vmem:[#allocation69_spill] sm:$0xff] }
 0x1ee   :  { %v3359_v18 = vpop.eup %3358 }
 0x1ef   :  { %v3361_v21 = vpop.eup %3360  ;;  %v750_v22 = vmul.f32 %v3359_v18, %v3357_v17  ;;  %v12376_v17 = vld [vmem:[#allocation71_spill] sm:$0xff]  ;;  %v12377_v18 = vld [vmem:[#allocation72_spill] sm:$0xff] }
 0x1f0   :  { %v6298_v23 = vmul.f32 %v3361_v21, %v3355_v53  ;;  %v12375_v53 = vld [vmem:[#allocation70_spill] sm:$0xff]  ;;  %v12378_v21 = vld [vmem:[#allocation73_spill] sm:$0xff] }
 0x1f1   :  { %821 = vmatprep.mubr.f32.mxu0 %v750_v22  ;;  %892 = vmatprep.mubr.f32.mxu1 %v750_v22 }
 0x1f2   :  { %822 = vmatmul.mubr.f32.vlgmr.msra.gmra.mxu0 %v6298_v23  ;;  %893 = vmatmul.mubr.f32.vlgmr.msra.gmra.mxu1 %v6298_v23 }
 0x1f3   :  { %900 = vmatpush1.msra.mxu0 %v5028_v61  ;;  %971 = vmatpush1.msra.mxu1 %v5033_v1  ;;  %v12343_v61 = vld [vmem:[#allocation38_spill] sm:$0xff]  ;;  %v12344_v1 = vld [vmem:[#allocation39_spill] sm:$0xff] }
 0x1f4   :  { %901 = vmatprep.subr.mxu0 %v5038_v54  ;;  %963 = vmatprep.mubr.f32.mxu0 %v750_v22  ;;  %v12345_v54 = vld [vmem:[#allocation40_spill] sm:$0xff] }
 0x1f5   :  { %972 = vmatprep.subr.mxu1 %v5043_v56  ;;  %1034 = vmatprep.mubr.f32.mxu1 %v750_v22  ;;  %v12346_v56 = vld [vmem:[#allocation41_spill] sm:$0xff]  ;;  %v12379_v22 = vld [vmem:[#allocation74_spill] sm:$0xff] }
 0x1f6   :  { %902 = vmatpush1.msra.mxu0 %v5050_v3  ;;  %973 = vmatpush1.msra.mxu1 %v5055_v6  ;;  %v12348_v3 = vld [vmem:[#allocation43_spill] sm:$0xff]  ;;  %v12349_v6 = vld [vmem:[#allocation44_spill] sm:$0xff] }
 0x1f7   :  { %903 = vmatprep.subr.mxu0 %v5062_v57  ;;  %974 = vmatprep.subr.mxu1 %v12340_v24  ;;  %v12350_v57 = vld [vmem:[#allocation45_spill] sm:$0xff]  ;;  %v12380_v24 = vld [vmem:[#allocation75_spill] sm:$0xff] }
 0x1f8   :  { %904 = vmatpush1.msra.mxu0 %v12341_v25  ;;  %975 = vmatpush1.msra.mxu1 %v12342_v27  ;;  %v12381_v25 = vld [vmem:[#allocation76_spill] sm:$0xff]  ;;  %v12382_v27 = vld [vmem:[#allocation77_spill] sm:$0xff] }
 0x1f9   :  { %905 = vmatprep.subr.mxu0 %v12343_v61  ;;  %976 = vmatprep.subr.mxu1 %v12344_v1  ;;  %v12383_v61 = vld [vmem:[#allocation78_spill] sm:$0xff]  ;;  %v12384_v1 = vld [vmem:[#allocation79_spill] sm:$0xff] }
 0x1fa   :  { %906 = vmatpush1.msra.mxu0 %v12345_v54  ;;  %977 = vmatpush1.msra.mxu1 %v12346_v56  ;;  %v12385_v54 = vld [vmem:[#allocation80_spill] sm:$0xff]  ;;  %v12386_v56 = vld [vmem:[#allocation81_spill] sm:$0xff] }
 0x1fb   :  { %907 = vmatprep.subr.mxu0 %v12347_v29  ;;  %978 = vmatprep.subr.mxu1 %v12348_v3  ;;  %v12387_v29 = vld [vmem:[#allocation82_spill] sm:$0xff]  ;;  %v12388_v3 = vld [vmem:[#allocation83_spill] sm:$0xff] }
 0x1fc   :  { %908 = vmatpush1.msra.mxu0 %v12349_v6  ;;  %979 = vmatpush1.msra.mxu1 %v12350_v57  ;;  %v12389_v6 = vld [vmem:[#allocation84_spill] sm:$0xff]  ;;  %v12390_v57 = vld [vmem:[#allocation85_spill] sm:$0xff] }
 0x1fd   :  { %909 = vmatprep.subr.mxu0 %v12351_v31  ;;  %980 = vmatprep.subr.mxu1 %v12352_v32  ;;  %v12391_v31 = vld [vmem:[#allocation86_spill] sm:$0xff]  ;;  %v12392_v32 = vld [vmem:[#allocation87_spill] sm:$0xff] }
 0x1fe   :  { %910 = vmatpush1.msra.mxu0 %v12353_v34  ;;  %981 = vmatpush1.msra.mxu1 %v12354_v26  ;;  %v12393_v34 = vld [vmem:[#allocation88_spill] sm:$0xff]  ;;  %v12394_v26 = vld [vmem:[#allocation89_spill] sm:$0xff] }
 0x1ff   :  { %911 = vmatprep.subr.mxu0 %v12355_v37  ;;  %982 = vmatprep.subr.mxu1 %v12356_v38  ;;  %v12395_v37 = vld [vmem:[#allocation90_spill] sm:$0xff]  ;;  %v12396_v38 = vld [vmem:[#allocation91_spill] sm:$0xff] }
 0x200   :  { %912 = vmatpush1.msra.mxu0 %v12357_v39  ;;  %983 = vmatpush1.msra.mxu1 %v12358_v40  ;;  %v12397_v39 = vld [vmem:[#allocation92_spill] sm:$0xff]  ;;  %v12398_v40 = vld [vmem:[#allocation93_spill] sm:$0xff] }
 0x201   :  { %913 = vmatprep.subr.mxu0 %v12359_v42  ;;  %984 = vmatprep.subr.mxu1 %v12360_v43  ;;  %v12399_v42 = vld [vmem:[#allocation94_spill] sm:$0xff]  ;;  %v12400_v43 = vld [vmem:[#allocation95_spill] sm:$0xff] }
 0x202   :  { %914 = vmatpush1.msra.mxu0 %v12361_v45  ;;  %985 = vmatpush1.msra.mxu1 %v12362_v46  ;;  %v12401_v45 = vld [vmem:[#allocation96_spill] sm:$0xff]  ;;  %v12402_v46 = vld [vmem:[#allocation97_spill] sm:$0xff] }
 0x203   :  { %915 = vmatprep.subr.mxu0 %v12363_v41  ;;  %986 = vmatprep.subr.mxu1 %v12364_v47  ;;  %v12403_v41 = vld [vmem:[#allocation98_spill] sm:$0xff]  ;;  %v12404_v47 = vld [vmem:[#allocation99_spill] sm:$0xff] }
 0x204   :  { %916 = vmatpush1.msra.mxu0 %v12365_v49  ;;  %987 = vmatpush1.msra.mxu1 %v12366_v50  ;;  %v12405_v49 = vld [vmem:[#allocation100_spill] sm:$0xff]  ;;  %v12406_v50 = vld [vmem:[#allocation101_spill] sm:$0xff] }
 0x205   :  { %917 = vmatprep.subr.mxu0 %v12367_v51  ;;  %988 = vmatprep.subr.mxu1 %v12368_v52  ;;  %v12407_v51 = vld [vmem:[#allocation102_spill] sm:$0xff]  ;;  %v12408_v52 = vld [vmem:[#allocation103_spill] sm:$0xff] }
 0x206   :  { %918 = vmatpush1.msra.mxu0 %v12369_v8  ;;  %989 = vmatpush1.msra.mxu1 %v12370_v10  ;;  %v12409_v8 = vld [vmem:[#allocation104_spill] sm:$0xff]  ;;  %v12410_v10 = vld [vmem:[#allocation105_spill] sm:$0xff] }
 0x207   :  { %919 = vmatprep.subr.mxu0 %v12371_v12  ;;  %990 = vmatprep.subr.mxu1 %v12372_v13  ;;  %v12411_v12 = vld [vmem:[#allocation106_spill] sm:$0xff]  ;;  %v12412_v13 = vld [vmem:[#allocation107_spill] sm:$0xff] }
 0x208   :  { %920 = vmatpush1.msra.mxu0 %v12373_v14  ;;  %991 = vmatpush1.msra.mxu1 %v12374_v15  ;;  %v12413_v14 = vld [vmem:[#allocation108_spill] sm:$0xff]  ;;  %v12414_v15 = vld [vmem:[#allocation109_spill] sm:$0xff] }
 0x209   :  { %921 = vmatprep.subr.mxu0 %v12375_v53  ;;  %992 = vmatprep.subr.mxu1 %v12376_v17  ;;  %v12415_v53 = vld [vmem:[#allocation110_spill] sm:$0xff]  ;;  %v12416_v17 = vld [vmem:[#allocation111_spill] sm:$0xff] }
 0x20a   :  { %922 = vmatpush1.msra.mxu0 %v12377_v18  ;;  %993 = vmatpush1.msra.mxu1 %v12378_v21  ;;  %v12417_v18 = vld [vmem:[#allocation112_spill] sm:$0xff]  ;;  %v12418_v21 = vld [vmem:[#allocation113_spill] sm:$0xff] }
 0x20b   :  { %923 = vmatprep.subr.mxu0 %v12379_v22  ;;  %994 = vmatprep.subr.mxu1 %v12380_v24  ;;  %v12419_v22 = vld [vmem:[#allocation114_spill] sm:$0xff]  ;;  %v12420_v24 = vld [vmem:[#allocation115_spill] sm:$0xff] }
 0x20c   :  { %924 = vmatpush1.msra.mxu0 %v12381_v25  ;;  %995 = vmatpush1.msra.mxu1 %v12382_v27  ;;  %v12421_v25 = vld [vmem:[#allocation116_spill] sm:$0xff]  ;;  %v12422_v27 = vld [vmem:[#allocation117_spill] sm:$0xff] }
 0x20d   :  { %925 = vmatprep.subr.mxu0 %v12383_v61  ;;  %996 = vmatprep.subr.mxu1 %v12384_v1  ;;  %v12423_v61 = vld [vmem:[#allocation118_spill] sm:$0xff]  ;;  %v12424_v1 = vld [vmem:[#allocation119_spill] sm:$0xff] }
 0x20e   :  { %926 = vmatpush1.msra.mxu0 %v12385_v54  ;;  %997 = vmatpush1.msra.mxu1 %v12386_v56  ;;  %v12425_v54 = vld [vmem:[#allocation120_spill] sm:$0xff]  ;;  %v12426_v56 = vld [vmem:[#allocation121_spill] sm:$0xff] }
 0x20f   :  { %927 = vmatprep.subr.mxu0 %v12387_v29  ;;  %998 = vmatprep.subr.mxu1 %v12388_v3  ;;  %v12427_v29 = vld [vmem:[#allocation122_spill] sm:$0xff]  ;;  %v12428_v3 = vld [vmem:[#allocation123_spill] sm:$0xff] }
 0x210   :  { %928 = vmatpush1.msra.mxu0 %v12389_v6  ;;  %999 = vmatpush1.msra.mxu1 %v12390_v57  ;;  %v12429_v6 = vld [vmem:[#allocation124_spill] sm:$0xff]  ;;  %v12430_v57 = vld [vmem:[#allocation125_spill] sm:$0xff] }
 0x211   :  { %929 = vmatprep.subr.mxu0 %v12391_v31  ;;  %1000 = vmatprep.subr.mxu1 %v12392_v32  ;;  %v12431_v31 = vld [vmem:[#allocation126_spill] sm:$0xff]  ;;  %v12432_v32 = vld [vmem:[#allocation127_spill] sm:$0xff] }
 0x212   :  { %930 = vmatpush1.msra.mxu0 %v12393_v34  ;;  %1001 = vmatpush1.msra.mxu1 %v12394_v26  ;;  %v12433_v34 = vld [vmem:[#allocation128_spill] sm:$0xff]  ;;  %v12434_v26 = vld [vmem:[#allocation129_spill] sm:$0xff] }
 0x213   :  { %931 = vmatprep.subr.mxu0 %v12395_v37  ;;  %1002 = vmatprep.subr.mxu1 %v12396_v38  ;;  %v12435_v37 = vld [vmem:[#allocation130_spill] sm:$0xff]  ;;  %v12436_v38 = vld [vmem:[#allocation131_spill] sm:$0xff] }
 0x214   :  { %932 = vmatpush2.msra.mxu0 %v12397_v39  ;;  %1003 = vmatpush2.msra.mxu1 %v12398_v40  ;;  %v12437_v39 = vld [vmem:[#allocation132_spill] sm:$0xff]  ;;  %v12438_v40 = vld [vmem:[#allocation133_spill] sm:$0xff] }
 0x215   :  { %933 = vmatprep.subr.mxu0 %v12399_v42  ;;  %1004 = vmatprep.subr.mxu1 %v12400_v43  ;;  %v12439_v42 = vld [vmem:[#allocation134_spill] sm:$0xff]  ;;  %v12440_v43 = vld [vmem:[#allocation135_spill] sm:$0xff] }
 0x216   :  { %934 = vmatpush2.msra.mxu0 %v12401_v45  ;;  %1005 = vmatpush2.msra.mxu1 %v12402_v46  ;;  %v12441_v45 = vld [vmem:[#allocation136_spill] sm:$0xff]  ;;  %v12442_v46 = vld [vmem:[#allocation137_spill] sm:$0xff] }
 0x217   :  { %935 = vmatprep.subr.mxu0 %v12403_v41  ;;  %1006 = vmatprep.subr.mxu1 %v12404_v47  ;;  %v12443_v41 = vld [vmem:[#allocation138_spill] sm:$0xff]  ;;  %v12444_v47 = vld [vmem:[#allocation139_spill] sm:$0xff] }
 0x218   :  { %936 = vmatpush2.msra.mxu0 %v12405_v49  ;;  %1007 = vmatpush2.msra.mxu1 %v12406_v50  ;;  %v12445_v49 = vld [vmem:[#allocation140_spill] sm:$0xff]  ;;  %v12446_v50 = vld [vmem:[#allocation141_spill] sm:$0xff] }
 0x219   :  { %937 = vmatprep.subr.mxu0 %v12407_v51  ;;  %1008 = vmatprep.subr.mxu1 %v12408_v52  ;;  %v12447_v51 = vld [vmem:[#allocation142_spill] sm:$0xff]  ;;  %v12448_v52 = vld [vmem:[#allocation143_spill] sm:$0xff] }
 0x21a   :  { %938 = vmatpush2.msra.mxu0 %v12409_v8  ;;  %1009 = vmatpush2.msra.mxu1 %v12410_v10  ;;  %v12449_v8 = vld [vmem:[#allocation144_spill] sm:$0xff]  ;;  %v12450_v10 = vld [vmem:[#allocation145_spill] sm:$0xff] }
 0x21b   :  { %939 = vmatprep.subr.mxu0 %v12411_v12  ;;  %1010 = vmatprep.subr.mxu1 %v12412_v13  ;;  %v12451_v12 = vld [vmem:[#allocation146_spill] sm:$0xff]  ;;  %v12452_v13 = vld [vmem:[#allocation147_spill] sm:$0xff] }
 0x21c   :  { %940 = vmatpush2.msra.mxu0 %v12413_v14  ;;  %1011 = vmatpush2.msra.mxu1 %v12414_v15  ;;  %v12453_v14 = vld [vmem:[#allocation148_spill] sm:$0xff]  ;;  %v12454_v15 = vld [vmem:[#allocation149_spill] sm:$0xff] }
 0x21d   :  { %941 = vmatprep.subr.mxu0 %v12415_v53  ;;  %1012 = vmatprep.subr.mxu1 %v12416_v17  ;;  %v12456_v53 = vld [vmem:[#allocation151_spill] sm:$0xff]  ;;  %v12458_v17 = vld [vmem:[#allocation153_spill] sm:$0xff] }
 0x21e   :  { %942 = vmatpush2.msra.mxu0 %v12417_v18  ;;  %1013 = vmatpush2.msra.mxu1 %v12418_v21  ;;  %v12461_v18 = vld [vmem:[#allocation156_spill] sm:$0xff]  ;;  %v12463_v21 = vld [vmem:[#allocation158_spill] sm:$0xff] }
 0x21f   :  { %943 = vmatprep.subr.mxu0 %v12419_v22  ;;  %1014 = vmatprep.subr.mxu1 %v12420_v24  ;;  %v12465_v22 = vld [vmem:[#allocation160_spill] sm:$0xff]  ;;  %v12466_v24 = vld [vmem:[#allocation161_spill] sm:$0xff] }
 0x220   :  { %944 = vmatpush2.msra.mxu0 %v12421_v25  ;;  %1015 = vmatpush2.msra.mxu1 %v12422_v27  ;;  %v12467_v25 = vld [vmem:[#allocation162_spill] sm:$0xff]  ;;  %v12468_v27 = vld [vmem:[#allocation163_spill] sm:$0xff] }
 0x221   :  { %945 = vmatprep.subr.mxu0 %v12423_v61  ;;  %1016 = vmatprep.subr.mxu1 %v12424_v1  ;;  %v12469_v61 = vld [vmem:[#allocation164_spill] sm:$0xff]  ;;  %v12470_v1 = vld [vmem:[#allocation165_spill] sm:$0xff] }
 0x222   :  { %946 = vmatpush2.msra.mxu0 %v12425_v54  ;;  %1017 = vmatpush2.msra.mxu1 %v12426_v56  ;;  %v12471_v54 = vld [vmem:[#allocation166_spill] sm:$0xff]  ;;  %v12472_v56 = vld [vmem:[#allocation167_spill] sm:$0xff] }
 0x223   :  { %947 = vmatprep.subr.mxu0 %v12427_v29  ;;  %1018 = vmatprep.subr.mxu1 %v12428_v3  ;;  %v12473_v29 = vld [vmem:[#allocation168_spill] sm:$0xff]  ;;  %v12474_v3 = vld [vmem:[#allocation169_spill] sm:$0xff] }
 0x224   :  { %948 = vmatpush2.msra.mxu0 %v12429_v6  ;;  %1019 = vmatpush2.msra.mxu1 %v12430_v57  ;;  %v12475_v6 = vld [vmem:[#allocation170_spill] sm:$0xff]  ;;  %v12476_v57 = vld [vmem:[#allocation171_spill] sm:$0xff] }
 0x225   :  { %949 = vmatprep.subr.mxu0 %v12431_v31  ;;  %1020 = vmatprep.subr.mxu1 %v12432_v32  ;;  %v12477_v31 = vld [vmem:[#allocation172_spill] sm:$0xff]  ;;  %v12478_v32 = vld [vmem:[#allocation173_spill] sm:$0xff] }
 0x226   :  { %950 = vmatpush2.msra.mxu0 %v12433_v34  ;;  %1021 = vmatpush2.msra.mxu1 %v12434_v26  ;;  %v12479_v34 = vld [vmem:[#allocation174_spill] sm:$0xff]  ;;  %v12480_v26 = vld [vmem:[#allocation175_spill] sm:$0xff] }
 0x227   :  { %951 = vmatprep.subr.mxu0 %v12435_v37  ;;  %1022 = vmatprep.subr.mxu1 %v12436_v38  ;;  %v12481_v37 = vld [vmem:[#allocation176_spill] sm:$0xff]  ;;  %v12482_v38 = vld [vmem:[#allocation177_spill] sm:$0xff] }
 0x228   :  { %952 = vmatpush2.msra.mxu0 %v12437_v39  ;;  %1023 = vmatpush2.msra.mxu1 %v12438_v40  ;;  %v12483_v39 = vld [vmem:[#allocation178_spill] sm:$0xff]  ;;  %v12484_v40 = vld [vmem:[#allocation179_spill] sm:$0xff] }
 0x229   :  { %953 = vmatprep.subr.mxu0 %v12439_v42  ;;  %1024 = vmatprep.subr.mxu1 %v12440_v43  ;;  %v12485_v42 = vld [vmem:[#allocation180_spill] sm:$0xff]  ;;  %v12486_v43 = vld [vmem:[#allocation181_spill] sm:$0xff] }
 0x22a   :  { %954 = vmatpush2.msra.mxu0 %v12441_v45  ;;  %1025 = vmatpush2.msra.mxu1 %v12442_v46  ;;  %v12487_v45 = vld [vmem:[#allocation182_spill] sm:$0xff]  ;;  %v12488_v46 = vld [vmem:[#allocation183_spill] sm:$0xff] }
 0x22b   :  { %955 = vmatprep.subr.mxu0 %v12443_v41  ;;  %1026 = vmatprep.subr.mxu1 %v12444_v47  ;;  %v12489_v41 = vld [vmem:[#allocation184_spill] sm:$0xff]  ;;  %v12490_v47 = vld [vmem:[#allocation185_spill] sm:$0xff] }
 0x22c   :  { %956 = vmatpush2.msra.mxu0 %v12445_v49  ;;  %1027 = vmatpush2.msra.mxu1 %v12446_v50  ;;  %v12491_v49 = vld [vmem:[#allocation186_spill] sm:$0xff]  ;;  %v12492_v50 = vld [vmem:[#allocation187_spill] sm:$0xff] }
 0x22d   :  { %957 = vmatprep.subr.mxu0 %v12447_v51  ;;  %1028 = vmatprep.subr.mxu1 %v12448_v52  ;;  %v12493_v51 = vld [vmem:[#allocation188_spill] sm:$0xff]  ;;  %v12494_v52 = vld [vmem:[#allocation189_spill] sm:$0xff] }
 0x22e   :  { %958 = vmatpush2.msra.mxu0 %v12449_v8  ;;  %1029 = vmatpush2.msra.mxu1 %v12450_v10  ;;  %v12495_v8 = vld [vmem:[#allocation190_spill] sm:$0xff]  ;;  %v12496_v10 = vld [vmem:[#allocation191_spill] sm:$0xff] }
 0x22f   :  { %959 = vmatprep.subr.mxu0 %v5734_v60  ;;  %1030 = vmatprep.subr.mxu1 %v12451_v12  ;;  %v12455_v60 = vld [vmem:[#allocation150_spill] sm:$0xff]  ;;  %v12497_v12 = vld [vmem:[#allocation192_spill] sm:$0xff] }
 0x230   :  { %960 = vmatpush2.msra.mxu0 %v5746_v55  ;;  %1031 = vmatpush2.msra.mxu1 %v12452_v13  ;;  %v12457_v55 = vld [vmem:[#allocation152_spill] sm:$0xff]  ;;  %v12498_v13 = vld [vmem:[#allocation193_spill] sm:$0xff] }
 0x231   :  { %961 = vmatprep.subr.mxu0 %v5758_v63  ;;  %1032 = vmatprep.subr.mxu1 %v5763_v7  ;;  %v12459_v63 = vld [vmem:[#allocation154_spill] sm:$0xff]  ;;  %v12460_v7 = vld [vmem:[#allocation155_spill] sm:$0xff] }
 0x232   :  { %962 = vmatpush2.msra.mxu0 %v12453_v14  ;;  %1033 = vmatpush2.msra.mxu1 %v5777_v62  ;;  %v12462_v62 = vld [vmem:[#allocation157_spill] sm:$0xff]  ;;  %v12499_v14 = vld [vmem:[#allocation194_spill] sm:$0xff] }
 0x233   :  { %964 = vmatmul.mubr.f32.vlgmr.msra.gmra.mxu0 %v6298_v23  ;;  %1035 = vmatmul.mubr.f32.vlgmr.msra.gmra.mxu1 %v6298_v23  ;;  %v12464_v23 = vld [vmem:[#allocation159_spill] sm:$0xff] }
 0x234   :  { %1120 = vmatprep.subr.mxu0 %v12454_v15  ;;  %1191 = vmatprep.subr.mxu1 %v12455_v60  ;;  %v12500_v15 = vld [vmem:[#allocation195_spill] sm:$0xff]  ;;  %v12501_v60 = vld [vmem:[#allocation196_spill] sm:$0xff] }
 0x235   :  { %1121 = vmatpush1.msra.mxu0 %v12456_v53  ;;  %1192 = vmatpush1.msra.mxu1 %v12457_v55  ;;  %v12502_v53 = vld [vmem:[#allocation197_spill] sm:$0xff]  ;;  %v12503_v55 = vld [vmem:[#allocation198_spill] sm:$0xff] }
 0x236   :  { %1122 = vmatprep.subr.mxu0 %v12458_v17  ;;  %1193 = vmatprep.subr.mxu1 %v12459_v63  ;;  %v12504_v17 = vld [vmem:[#allocation199_spill] sm:$0xff]  ;;  %v12505_v63 = vld [vmem:[#allocation200_spill] sm:$0xff] }
 0x237   :  { %1123 = vmatpush1.msra.mxu0 %v12460_v7  ;;  %1194 = vmatpush1.msra.mxu1 %v12461_v18  ;;  %v12506_v7 = vld [vmem:[#allocation201_spill] sm:$0xff]  ;;  %v12507_v18 = vld [vmem:[#allocation202_spill] sm:$0xff] }
 0x238   :  { %1124 = vmatprep.subr.mxu0 %v12462_v62  ;;  %1195 = vmatprep.subr.mxu1 %v12463_v21  ;;  %v12508_v62 = vld [vmem:[#allocation203_spill] sm:$0xff]  ;;  %v12509_v21 = vld [vmem:[#allocation204_spill] sm:$0xff] }
 0x239   :  { %1125 = vmatpush1.msra.mxu0 %v12464_v23  ;;  %1196 = vmatpush1.msra.mxu1 %v12465_v22  ;;  %v12510_v23 = vld [vmem:[#allocation205_spill] sm:$0xff]  ;;  %v12511_v22 = vld [vmem:[#allocation206_spill] sm:$0xff] }
 0x23a   :  { %1126 = vmatprep.subr.mxu0 %v12466_v24  ;;  %1197 = vmatprep.subr.mxu1 %v12467_v25  ;;  %v12512_v24 = vld [vmem:[#allocation207_spill] sm:$0xff]  ;;  %v12513_v25 = vld [vmem:[#allocation208_spill] sm:$0xff] }
 0x23b   :  { %1127 = vmatpush1.msra.mxu0 %v12468_v27  ;;  %1198 = vmatpush1.msra.mxu1 %v12469_v61  ;;  %v12514_v27 = vld [vmem:[#allocation209_spill] sm:$0xff]  ;;  %v12515_v61 = vld [vmem:[#allocation210_spill] sm:$0xff] }
 0x23c   :  { %1128 = vmatprep.subr.mxu0 %v12470_v1  ;;  %1199 = vmatprep.subr.mxu1 %v12471_v54  ;;  %v12516_v1 = vld [vmem:[#allocation211_spill] sm:$0xff] }
 0x23d   :  { %1129 = vmatpush1.msra.mxu0 %v12472_v56  ;;  %1200 = vmatpush1.msra.mxu1 %v12473_v29  ;;  %v6500_v54 = vld [vmem:[%s11384_s3 + $0x7d0] sm:$0xff]  ;;  %v6506_v56 = vld [vmem:[%s11384_s3 + $0x788] sm:$0xff]  ;;  %v6536_v29 = vld [vmem:[%s11384_s3 + $0x758] sm:$0xff] }
 0x23e   :  { %1130 = vmatprep.subr.mxu0 %v12474_v3  ;;  %1201 = vmatprep.subr.mxu1 %v12475_v6  ;;  %v6542_v3 = vld [vmem:[%s11384_s3 + $0x740] sm:$0xff]  ;;  %v6548_v6 = vld [vmem:[%s11384_s3 + $0x750] sm:$0xff] }
 0x23f   :  { %1131 = vmatpush1.msra.mxu0 %v12476_v57  ;;  %1202 = vmatpush1.msra.mxu1 %v12477_v31  ;;  %v6554_v57 = vld [vmem:[%s11384_s3 + $0x708] sm:$0xff]  ;;  %v6560_v31 = vld [vmem:[%s11384_s3 + $0x718] sm:$0xff] }
 0x240   :  { %1132 = vmatprep.subr.mxu0 %v12478_v32  ;;  %1203 = vmatprep.subr.mxu1 %v12479_v34  ;;  %v6566_v32 = vld [vmem:[%s11384_s3 + $0x700] sm:$0xff]  ;;  %v6572_v34 = vld [vmem:[%s11384_s3 + $0x710] sm:$0xff] }
 0x241   :  { %1133 = vmatpush1.msra.mxu0 %v12480_v26  ;;  %1204 = vmatpush1.msra.mxu1 %v12481_v37  ;;  %v6578_v26 = vld [vmem:[%s11384_s3 + $0x6c8] sm:$0xff]  ;;  %v6584_v37 = vld [vmem:[%s11384_s3 + $0x6d8] sm:$0xff] }
 0x242   :  { %1134 = vmatprep.subr.mxu0 %v12482_v38  ;;  %1205 = vmatprep.subr.mxu1 %v12483_v39  ;;  %v6590_v38 = vld [vmem:[%s11384_s3 + $0x6c0] sm:$0xff]  ;;  %v6596_v39 = vld [vmem:[%s11384_s3 + $0x6d0] sm:$0xff] }
 0x243   :  { %1135 = vmatpush1.msra.mxu0 %v12484_v40  ;;  %1206 = vmatpush1.msra.mxu1 %v12485_v42  ;;  %v6602_v40 = vld [vmem:[%s11384_s3 + $0x688] sm:$0xff]  ;;  %v6608_v42 = vld [vmem:[%s11384_s3 + $0x698] sm:$0xff] }
 0x244   :  { %1136 = vmatprep.subr.mxu0 %v12486_v43  ;;  %1207 = vmatprep.subr.mxu1 %v12487_v45  ;;  %v6614_v43 = vld [vmem:[%s11384_s3 + $0x680] sm:$0xff]  ;;  %v6620_v45 = vld [vmem:[%s11384_s3 + $0x690] sm:$0xff] }
 0x245   :  { %1137 = vmatpush1.msra.mxu0 %v12488_v46  ;;  %1208 = vmatpush1.msra.mxu1 %v12489_v41  ;;  %v6626_v46 = vld [vmem:[%s11384_s3 + $0x648] sm:$0xff]  ;;  %v6632_v41 = vld [vmem:[%s11384_s3 + $0x658] sm:$0xff] }
 0x246   :  { %1138 = vmatprep.subr.mxu0 %v12490_v47  ;;  %1209 = vmatprep.subr.mxu1 %v12491_v49  ;;  %v6638_v47 = vld [vmem:[%s11384_s3 + $0x640] sm:$0xff]  ;;  %v6644_v49 = vld [vmem:[%s11384_s3 + $0x650] sm:$0xff] }
 0x247   :  { %1139 = vmatpush1.msra.mxu0 %v12492_v50  ;;  %1210 = vmatpush1.msra.mxu1 %v12493_v51  ;;  %v6650_v50 = vld [vmem:[%s11384_s3 + $0x608] sm:$0xff]  ;;  %v6656_v51 = vld [vmem:[%s11384_s3 + $0x618] sm:$0xff] }
 0x248   :  { %1140 = vmatprep.subr.mxu0 %v12494_v52  ;;  %1211 = vmatprep.subr.mxu1 %v12495_v8  ;;  %v6662_v52 = vld [vmem:[%s11384_s3 + $0x600] sm:$0xff]  ;;  %v6668_v8 = vld [vmem:[%s11384_s3 + $0x610] sm:$0xff] }
 0x249   :  { %1141 = vmatpush1.msra.mxu0 %v12496_v10  ;;  %1212 = vmatpush1.msra.mxu1 %v12497_v12  ;;  %v6674_v10 = vld [vmem:[%s11384_s3 + $0x5c8] sm:$0xff]  ;;  %v6680_v12 = vld [vmem:[%s11384_s3 + $0x5d8] sm:$0xff] }
 0x24a   :  { %1142 = vmatprep.subr.mxu0 %v12498_v13  ;;  %1213 = vmatprep.subr.mxu1 %v12499_v14  ;;  %v6686_v13 = vld [vmem:[%s11384_s3 + $0x5c0] sm:$0xff]  ;;  %v6692_v14 = vld [vmem:[%s11384_s3 + $0x5d0] sm:$0xff] }
 0x24b   :  { %1143 = vmatpush1.msra.mxu0 %v12500_v15  ;;  %1214 = vmatpush1.msra.mxu1 %v12501_v60  ;;  %v6698_v15 = vld [vmem:[%s11384_s3 + $0x588] sm:$0xff]  ;;  %v6704_v60 = vld [vmem:[%s11384_s3 + $0x598] sm:$0xff] }
 0x24c   :  { %1144 = vmatprep.subr.mxu0 %v12502_v53  ;;  %1215 = vmatprep.subr.mxu1 %v12503_v55  ;;  %12517 = vst [vmem:[#allocation9_spill] sm:$0xff] %v6704_v60  ;;  %v6710_v53 = vld [vmem:[%s11384_s3 + $0x580] sm:$0xff]  ;;  %v6716_v55 = vld [vmem:[%s11384_s3 + $0x590] sm:$0xff] }
 0x24d   :  { %1145 = vmatpush1.msra.mxu0 %v12504_v17  ;;  %1216 = vmatpush1.msra.mxu1 %v12505_v63  ;;  %12518 = vst [vmem:[#allocation10_spill] sm:$0xff] %v6710_v53  ;;  %12519 = vst [vmem:[#allocation11_spill] sm:$0xff] %v6716_v55  ;;  %v6722_v17 = vld [vmem:[%s11384_s3 + $0x548] sm:$0xff]  ;;  %v6728_v63 = vld [vmem:[%s11384_s3 + $0x558] sm:$0xff] }
 0x24e   :  { %1146 = vmatprep.subr.mxu0 %v12506_v7  ;;  %1217 = vmatprep.subr.mxu1 %v12507_v18  ;;  %12520 = vst [vmem:[#allocation12_spill] sm:$0xff] %v6722_v17  ;;  %12521 = vst [vmem:[#allocation13_spill] sm:$0xff] %v6728_v63  ;;  %v6734_v7 = vld [vmem:[%s11384_s3 + $0x540] sm:$0xff]  ;;  %v6740_v18 = vld [vmem:[%s11384_s3 + $0x550] sm:$0xff] }
 0x24f   :  { %1147 = vmatpush1.msra.mxu0 %v12508_v62  ;;  %1218 = vmatpush1.msra.mxu1 %v12509_v21  ;;  %12522 = vst [vmem:[#allocation14_spill] sm:$0xff] %v6734_v7  ;;  %12523 = vst [vmem:[#allocation15_spill] sm:$0xff] %v6740_v18  ;;  %v6746_v62 = vld [vmem:[%s11384_s3 + $0x508] sm:$0xff]  ;;  %v6752_v21 = vld [vmem:[%s11384_s3 + $0x518] sm:$0xff] }
 0x250   :  { %1148 = vmatprep.subr.mxu0 %v12510_v23  ;;  %1219 = vmatprep.subr.mxu1 %v12511_v22  ;;  %12524 = vst [vmem:[#allocation16_spill] sm:$0xff] %v6746_v62  ;;  %12525 = vst [vmem:[#allocation17_spill] sm:$0xff] %v6752_v21  ;;  %v6758_v23 = vld [vmem:[%s11384_s3 + $0x500] sm:$0xff]  ;;  %v6764_v22 = vld [vmem:[%s11384_s3 + $0x510] sm:$0xff] }
 0x251   :  { %1149 = vmatpush1.msra.mxu0 %v12512_v24  ;;  %1220 = vmatpush1.msra.mxu1 %v12513_v25  ;;  %12526 = vst [vmem:[#allocation18_spill] sm:$0xff] %v6758_v23  ;;  %12527 = vst [vmem:[#allocation19_spill] sm:$0xff] %v6764_v22  ;;  %v6770_v24 = vld [vmem:[%s11384_s3 + $0x4c8] sm:$0xff]  ;;  %v6776_v25 = vld [vmem:[%s11384_s3 + $0x4d8] sm:$0xff] }
 0x252   :  { %1150 = vmatprep.subr.mxu0 %v12514_v27  ;;  %1221 = vmatprep.subr.mxu1 %v12515_v61  ;;  %12528 = vst [vmem:[#allocation20_spill] sm:$0xff] %v6770_v24  ;;  %12529 = vst [vmem:[#allocation21_spill] sm:$0xff] %v6776_v25  ;;  %v6782_v27 = vld [vmem:[%s11384_s3 + $0x4c0] sm:$0xff]  ;;  %v6788_v61 = vld [vmem:[%s11384_s3 + $0x4d0] sm:$0xff] }
 0x253   :  { %1151 = vmatpush1.msra.mxu0 %v12516_v1  ;;  %1222 = vmatpush1.msra.mxu1 %v6168_v58  ;;  %v6530_v58 = vld [vmem:[%s11384_s3 + $0x748] sm:$0xff]  ;;  %12530 = vst [vmem:[#allocation22_spill] sm:$0xff] %v6782_v27  ;;  %12531 = vst [vmem:[#allocation23_spill] sm:$0xff] %v6788_v61 }
 0x254   :  { %1152 = vmatprep.subr.mxu0 %v6174_v0  ;;  %1223 = vmatprep.subr.mxu1 %v6180_v4  ;;  %v6512_v0 = vld [vmem:[%s11384_s3 + $0x798] sm:$0xff]  ;;  %v6524_v4 = vld [vmem:[%s11384_s3 + $0x790] sm:$0xff]  ;;  %v6794_v1 = vld [vmem:[%s11384_s3 + $0x488] sm:$0xff] }
 0x255   :  { %1153 = vmatpush2.msra.mxu0 %v6186_v2  ;;  %1224 = vmatpush2.msra.mxu1 %v6500_v54  ;;  %v6518_v2 = vld [vmem:[%s11384_s3 + $0x780] sm:$0xff]  ;;  %12532 = vst [vmem:[#allocation24_spill] sm:$0xff] %v6794_v1 }
 0x256   :  { %1154 = vmatprep.subr.mxu0 %v6506_v56  ;;  %1225 = vmatprep.subr.mxu1 %v6512_v0 }
 0x257   :  { %1155 = vmatpush2.msra.mxu0 %v6518_v2  ;;  %1226 = vmatpush2.msra.mxu1 %v6524_v4 }
 0x258   :  { %1156 = vmatprep.subr.mxu0 %v6530_v58  ;;  %1227 = vmatprep.subr.mxu1 %v6536_v29 }
 0x259   :  { %1157 = vmatpush2.msra.mxu0 %v6542_v3  ;;  %1228 = vmatpush2.msra.mxu1 %v6548_v6 }
 0x25a   :  { %1158 = vmatprep.subr.mxu0 %v6554_v57  ;;  %1229 = vmatprep.subr.mxu1 %v6560_v31 }
 0x25b   :  { %1159 = vmatpush2.msra.mxu0 %v6566_v32  ;;  %1230 = vmatpush2.msra.mxu1 %v6572_v34 }
 0x25c   :  { %1160 = vmatprep.subr.mxu0 %v6578_v26  ;;  %1231 = vmatprep.subr.mxu1 %v6584_v37 }
 0x25d   :  { %1161 = vmatpush2.msra.mxu0 %v6590_v38  ;;  %1232 = vmatpush2.msra.mxu1 %v6596_v39 }
 0x25e   :  { %1162 = vmatprep.subr.mxu0 %v6602_v40  ;;  %1233 = vmatprep.subr.mxu1 %v6608_v42 }
 0x25f   :  { %1163 = vmatpush2.msra.mxu0 %v6614_v43  ;;  %1234 = vmatpush2.msra.mxu1 %v6620_v45 }
 0x260   :  { %1164 = vmatprep.subr.mxu0 %v6626_v46  ;;  %1235 = vmatprep.subr.mxu1 %v6632_v41 }
 0x261   :  { %1165 = vmatpush2.msra.mxu0 %v6638_v47  ;;  %1236 = vmatpush2.msra.mxu1 %v6644_v49 }
 0x262   :  { %1166 = vmatprep.subr.mxu0 %v6650_v50  ;;  %1237 = vmatprep.subr.mxu1 %v6656_v51 }
 0x263   :  { %1167 = vmatpush2.msra.mxu0 %v6662_v52  ;;  %1238 = vmatpush2.msra.mxu1 %v6668_v8 }
 0x264   :  { %1168 = vmatprep.subr.mxu0 %v6674_v10  ;;  %1239 = vmatprep.subr.mxu1 %v6680_v12 }
 0x265   :  { %1169 = vmatpush2.msra.mxu0 %v6686_v13  ;;  %1240 = vmatpush2.msra.mxu1 %v6692_v14 }
 0x266   :  { %1170 = vmatprep.subr.mxu0 %v6698_v15  ;;  %1241 = vmatprep.subr.mxu1 %v6704_v60 }
 0x267   :  { %1171 = vmatpush2.msra.mxu0 %v6710_v53  ;;  %1242 = vmatpush2.msra.mxu1 %v6716_v55 }
 0x268   :  { %1172 = vmatprep.subr.mxu0 %v6722_v17  ;;  %1243 = vmatprep.subr.mxu1 %v6728_v63 }
 0x269   :  { %1173 = vmatpush2.msra.mxu0 %v6734_v7  ;;  %1244 = vmatpush2.msra.mxu1 %v6740_v18 }
 0x26a   :  { %1174 = vmatprep.subr.mxu0 %v6746_v62  ;;  %1245 = vmatprep.subr.mxu1 %v6752_v21 }
 0x26b   :  { %1175 = vmatpush2.msra.mxu0 %v6758_v23  ;;  %1246 = vmatpush2.msra.mxu1 %v6764_v22 }
 0x26c   :  { %1176 = vmatprep.subr.mxu0 %v6770_v24  ;;  %1247 = vmatprep.subr.mxu1 %v6776_v25  ;;  %v6800_v25 = vld [vmem:[%s11384_s3 + $0x498] sm:$0xff] }
 0x26d   :  { %1177 = vmatpush2.msra.mxu0 %v6782_v27  ;;  %1248 = vmatpush2.msra.mxu1 %v6788_v61  ;;  %12533 = vst [vmem:[#allocation29_spill] sm:$0xff] %v6800_v25  ;;  %v6806_v27 = vld [vmem:[%s11384_s3 + $0x480] sm:$0xff]  ;;  %v6812_v61 = vld [vmem:[%s11384_s3 + $0x490] sm:$0xff] }
 0x26e   :  { %1178 = vmatprep.subr.mxu0 %v6794_v1  ;;  %1249 = vmatprep.subr.mxu1 %v6800_v25  ;;  %12534 = vst [vmem:[#allocation31_spill] sm:$0xff] %v6806_v27  ;;  %12535 = vst [vmem:[#allocation35_spill] sm:$0xff] %v6812_v61  ;;  %v6818_v1 = vld [vmem:[%s11384_s3 + $0x448] sm:$0xff]  ;;  %v6824_v25 = vld [vmem:[%s11384_s3 + $0x458] sm:$0xff] }
 0x26f   :  { %1179 = vmatpush2.msra.mxu0 %v6806_v27  ;;  %1250 = vmatpush2.msra.mxu1 %v6812_v61  ;;  %12536 = vst [vmem:[#allocation36_spill] sm:$0xff] %v6818_v1  ;;  %12537 = vst [vmem:[#allocation37_spill] sm:$0xff] %v6824_v25  ;;  %v6830_v27 = vld [vmem:[%s11384_s3 + $0x440] sm:$0xff]  ;;  %v6836_v61 = vld [vmem:[%s11384_s3 + $0x450] sm:$0xff] }
 0x270   :  { %1180 = vmatprep.subr.mxu0 %v6818_v1  ;;  %1251 = vmatprep.subr.mxu1 %v6824_v25  ;;  %12538 = vst [vmem:[#allocation38_spill] sm:$0xff] %v6830_v27  ;;  %12539 = vst [vmem:[#allocation39_spill] sm:$0xff] %v6836_v61  ;;  %v6842_v1 = vld [vmem:[%s11384_s3 + $0x408] sm:$0xff]  ;;  %v6848_v25 = vld [vmem:[%s11384_s3 + $0x418] sm:$0xff] }
 0x271   :  { %1181 = vmatpush2.msra.mxu0 %v6830_v27  ;;  %1252 = vmatpush2.msra.mxu1 %v6836_v61  ;;  %12540 = vst [vmem:[#allocation40_spill] sm:$0xff] %v6842_v1  ;;  %12541 = vst [vmem:[#allocation41_spill] sm:$0xff] %v6848_v25  ;;  %v6854_v27 = vld [vmem:[%s11384_s3 + $0x400] sm:$0xff]  ;;  %v6860_v61 = vld [vmem:[%s11384_s3 + $0x410] sm:$0xff] }
 0x272   :  { %1182 = vmatprep.subr.mxu0 %v6842_v1  ;;  %1253 = vmatprep.subr.mxu1 %v6848_v25  ;;  %12542 = vst [vmem:[#allocation42_spill] sm:$0xff] %v6854_v27  ;;  %12543 = vst [vmem:[#allocation43_spill] sm:$0xff] %v6860_v61  ;;  %v6866_v1 = vld [vmem:[%s11384_s3 + $0x3e8] sm:$0xff]  ;;  %v6872_v25 = vld [vmem:[%s11384_s3 + $0x3f8] sm:$0xff] }
 0x273   :  { %1183 = vmatpush2.msra.mxu0 %v6854_v27  ;;  %1254 = vmatpush2.msra.mxu1 %v6860_v61  ;;  %12544 = vst [vmem:[#allocation44_spill] sm:$0xff] %v6866_v1  ;;  %12545 = vst [vmem:[#allocation45_spill] sm:$0xff] %v6872_v25  ;;  %v1046_v27 = vpop.permute.xlu1 %1045 }
 0x274   :  { %1262 = vmatprep.subr.mxu0 %v6866_v1  ;;  %1333 = vmatprep.subr.mxu1 %v6872_v25  ;;  %v1049_v24 = vmul.f32 %v1046_v27, %v12326_v28  ;;  %v1048_v61 = vmul.f32 %v1046_v27, %v12327_v30  ;;  %v1051_v60 = vmul.f32 %v1046_v27, %v12334_v11 }
 0x276   :  { %v1053_v23 = vadd.f32 %v1049_v24, %v12328_v33  ;;  %v1052_v62 = vadd.f32 %v1048_v61, %v12329_v35 }
 0x2b2   :  { %v823_v22 = vpop.f32.mrf.mxu0  ;;  %v894_v17 = vpop.f32.mrf.mxu1 }
 0x2b3   :  { %v1056_v1 = vadd.f32 %v1052_v62, %v823_v22  ;;  %v1050_v62 = vmul.f32 %v1046_v27, %v5012_v5 }
 0x2b4   :  { %v825_v21 = vpop.f32.mrf.mxu0  ;;  %v896_v28 = vpop.f32.mrf.mxu1 }
 0x2b5   :  { %v1057_v18 = vadd.f32 %v1053_v23, %v825_v21  ;;  %v3212_v63 = vmul.f32 -1.442695, %v1056_v1 }
 0x2b7   :  { %v3213_v7 = vmul.f32 -1.442695, %v1057_v18  ;;  %v1055_v18 = vadd.f32 %v1051_v60, %v12337_v20 }
 0x2b9   :  { %3362 = vpow2.f32 %v3213_v7  ;;  %v1059_v22 = vadd.f32 %v1055_v18, %v896_v28 }
 0x2ba   :  { %3364 = vpow2.f32 %v3212_v63 }
 0x2c6   :  { %v3363_v63 = vpop.eup %3362 }
 0x2c7   :  { %v3365_v21 = vpop.eup %3364  ;;  %v1070_v23 = vadd.f32 1.0, %v3363_v63 }
 0x2f3   :  { %v965_v55 = vpop.f32.mrf.mxu0  ;;  %v1036_v33 = vpop.f32.mrf.mxu1 }
 0x2f4   :  { %v1085_v25 = vadd.f32 %v965_v55, %v6263_v44  ;;  %v1054_v55 = vadd.f32 %v1050_v62, %v5016_v59  ;;  %v1087_v60 = vadd.f32 %v1036_v33, %v6288_v36 }
 0x2f5   :  { %v967_v53 = vpop.f32.mrf.mxu0  ;;  %v1038_v7 = vpop.f32.mrf.mxu1 }
 0x2f6   :  { %v3215_v30 = vmul.f32 -1.442695, %v1085_v25  ;;  %v1086_v24 = vadd.f32 %v967_v53, %v6269_v48  ;;  %v1088_v1 = vadd.f32 %v1038_v7, %v6282_v19  ;;  %v1064_v25 = vadd.f32 1.0, %v3365_v21 }
 0x2f7   :  { %v1058_v11 = vadd.f32 %v1054_v55, %v894_v17 }
 0x2f8   :  { %3366 = vpow2.f32 %v3215_v30  ;;  %v3216_v61 = vmul.f32 -1.442695, %v1086_v24  ;;  %v3214_v30 = vmul.f32 -1.442695, %v1059_v22  ;;  %v3217_v53 = vmul.f32 -1.442695, %v1088_v1 }
 0x2fa   :  { %3368 = vpow2.f32 %v3216_v61 }
 0x2fb   :  { %3370 = vrcp.f32 %v1070_v23 }
 0x2fc   :  { %3372 = vrcp.f32 %v1064_v25 }
 0x2fd   :  { %3374 = vtanh.f32 %v1058_v11 }
 0x2fe   :  { %3376 = vpow2.f32 %v3214_v30 }
 0x2ff   :  { %3378 = vpow2.f32 %v3217_v53 }
 0x305   :  { %v3367_v24 = vpop.eup %3366 }
 0x306   :  { %v1093_v27 = vadd.f32 1.0, %v3367_v24 }
 0x307   :  { %v3369_v61 = vpop.eup %3368 }
 0x308   :  { %3380 = vrcp.f32 %v1093_v27  ;;  %v1099_v62 = vadd.f32 1.0, %v3369_v61  ;;  %v3371_v28 = vpop.eup %3370 }
 0x309   :  { %3382 = vtanh.f32 %v1087_v60  ;;  %v3373_v18 = vpop.eup %3372  ;;  %v1080_v17 = vmul.f32 %v3371_v28, %v6292_v9 }
 0x30a   :  { %3384 = vrcp.f32 %v1099_v62  ;;  %v3375_v63 = vpop.eup %3374 }
 0x30b   :  { %v3377_v7 = vpop.eup %3376  ;;  %v1081_v55 = vmul.f32 %v3375_v63, %v3373_v18  ;;  %v6908_v18 = vld [vmem:[%s11384_s3 + $0x3f0] sm:$0xff]  ;;  %v6914_v63 = vld [vmem:[%s11384_s3 + $0x3a8] sm:$0xff] }
 0x30c   :  { %v3379_v21 = vpop.eup %3378  ;;  %v1077_v53 = vadd.f32 1.0, %v3377_v7  ;;  %v6926_v7 = vld [vmem:[%s11384_s3 + $0x3a0] sm:$0xff] }
 0x30d   :  { %v6888_v22 = vadd.f32 %v1081_v55, %v1080_v17  ;;  %v1106_v1 = vadd.f32 1.0, %v3379_v21  ;;  %v6920_v17 = vld [vmem:[%s11384_s3 + $0x3b8] sm:$0xff]  ;;  %v6932_v21 = vld [vmem:[%s11384_s3 + $0x3b0] sm:$0xff]  ;;  %v6938_v55 = vld [vmem:[%s11384_s3 + $0x368] sm:$0xff] }
 0x30f   :  { %3386 = vtanh.f32 %v6888_v22 }
 0x310   :  { %3388 = vrcp.f32 %v1106_v1  ;;  %v6962_v1 = vld [vmem:[%s11384_s3 + $0x328] sm:$0xff] }
 0x315   :  { %v3381_v23 = vpop.eup %3380 }
 0x316   :  { %v3383_v11 = vpop.eup %3382 }
 0x317   :  { %v3385_v33 = vpop.eup %3384  ;;  %v1110_v25 = vmul.f32 %v3383_v11, %v3381_v23  ;;  %v6944_v23 = vld [vmem:[%s11384_s3 + $0x378] sm:$0xff]  ;;  %v6950_v11 = vld [vmem:[%s11384_s3 + $0x360] sm:$0xff] }
 0x318   :  { %v1109_v30 = vmul.f32 %v3385_v33, %v6294_v16  ;;  %v6902_v16 = vld [vmem:[%s11384_s3 + $0x3e0] sm:$0xff]  ;;  %v6956_v33 = vld [vmem:[%s11384_s3 + $0x370] sm:$0xff] }
 0x31a   :  { %v6891_v24 = vadd.f32 %v1110_v25, %v1109_v30  ;;  %v6968_v25 = vld [vmem:[%s11384_s3 + $0x338] sm:$0xff]  ;;  %v6974_v30 = vld [vmem:[%s11384_s3 + $0x320] sm:$0xff] }
 0x31c   :  { %3390 = vtanh.f32 %v6891_v24  ;;  %v3387_v9 = vpop.eup %3386 }
 0x31d   :  { %3392 = vrcp.f32 %v1077_v53  ;;  %v3389_v60 = vpop.eup %3388  ;;  %v6980_v53 = vld [vmem:[%s11384_s3 + $0x330] sm:$0xff] }
 0x329   :  { %v3391_v27 = vpop.eup %3390 }
 0x32a   :  { %v3393_v61 = vpop.eup %3392  ;;  %v1113_v62 = vmul.f32 %v3391_v27, %v3389_v60  ;;  %v6992_v60 = vld [vmem:[%s11384_s3 + $0x2f8] sm:$0xff]  ;;  %v6998_v27 = vld [vmem:[%s11384_s3 + $0x2e0] sm:$0xff] }
 0x32b   :  { %v6895_v28 = vmul.f32 %v3393_v61, %v3387_v9  ;;  %v6986_v9 = vld [vmem:[%s11384_s3 + $0x2e8] sm:$0xff]  ;;  %12546 = vst [vmem:[#allocation46_spill] sm:$0xff] %v6992_v60  ;;  %12547 = vst [vmem:[#allocation47_spill] sm:$0xff] %v6998_v27  ;;  %v7004_v61 = vld [vmem:[%s11384_s3 + $0x2f0] sm:$0xff] }
 0x32c   :  { %1184 = vmatprep.mubr.f32.mxu0 %v1113_v62  ;;  %1255 = vmatprep.mubr.f32.mxu1 %v1113_v62  ;;  %12548 = vst [vmem:[#allocation48_spill] sm:$0xff] %v7004_v61 }
 0x32d   :  { %1185 = vmatmul.mubr.f32.vlgmr.msra.gmra.mxu0 %v6895_v28  ;;  %1256 = vmatmul.mubr.f32.vlgmr.msra.gmra.mxu1 %v6895_v28 }
 0x32e   :  { %1263 = vmatpush1.msra.mxu0 %v6902_v16  ;;  %1334 = vmatpush1.msra.mxu1 %v6908_v18 }
 0x32f   :  { %1264 = vmatprep.subr.mxu0 %v6914_v63  ;;  %1326 = vmatprep.mubr.f32.mxu0 %v1113_v62 }
 0x330   :  { %1335 = vmatprep.subr.mxu1 %v6920_v17  ;;  %1397 = vmatprep.mubr.f32.mxu1 %v1113_v62  ;;  %v7010_v62 = vld [vmem:[%s11384_s3 + $0x2a8] sm:$0xff] }
 0x331   :  { %1265 = vmatpush1.msra.mxu0 %v6926_v7  ;;  %1336 = vmatpush1.msra.mxu1 %v6932_v21  ;;  %12549 = vst [vmem:[#allocation49_spill] sm:$0xff] %v7010_v62 }
 0x332   :  { %1266 = vmatprep.subr.mxu0 %v6938_v55  ;;  %1337 = vmatprep.subr.mxu1 %v6944_v23 }
 0x333   :  { %1267 = vmatpush1.msra.mxu0 %v6950_v11  ;;  %1338 = vmatpush1.msra.mxu1 %v6956_v33 }
 0x334   :  { %1268 = vmatprep.subr.mxu0 %v6962_v1  ;;  %1339 = vmatprep.subr.mxu1 %v6968_v25 }
 0x335   :  { %1269 = vmatpush1.msra.mxu0 %v6974_v30  ;;  %1340 = vmatpush1.msra.mxu1 %v6980_v53 }
 0x336   :  { %1270 = vmatprep.subr.mxu0 %v6986_v9  ;;  %1341 = vmatprep.subr.mxu1 %v6992_v60  ;;  %v7016_v60 = vld [vmem:[%s11384_s3 + $0x2b8] sm:$0xff] }
 0x337   :  { %1271 = vmatpush1.msra.mxu0 %v6998_v27  ;;  %1342 = vmatpush1.msra.mxu1 %v7004_v61  ;;  %12550 = vst [vmem:[#allocation50_spill] sm:$0xff] %v7016_v60  ;;  %v7022_v27 = vld [vmem:[%s11384_s3 + $0x2a0] sm:$0xff]  ;;  %v7028_v61 = vld [vmem:[%s11384_s3 + $0x2b0] sm:$0xff] }
 0x338   :  { %1272 = vmatprep.subr.mxu0 %v7010_v62  ;;  %1343 = vmatprep.subr.mxu1 %v7016_v60  ;;  %12551 = vst [vmem:[#allocation51_spill] sm:$0xff] %v7022_v27  ;;  %12552 = vst [vmem:[#allocation52_spill] sm:$0xff] %v7028_v61  ;;  %v7034_v62 = vld [vmem:[%s11384_s3 + $0x268] sm:$0xff]  ;;  %v7040_v60 = vld [vmem:[%s11384_s3 + $0x278] sm:$0xff] }
 0x339   :  { %1273 = vmatpush1.msra.mxu0 %v7022_v27  ;;  %1344 = vmatpush1.msra.mxu1 %v7028_v61  ;;  %12553 = vst [vmem:[#allocation53_spill] sm:$0xff] %v7034_v62  ;;  %12554 = vst [vmem:[#allocation54_spill] sm:$0xff] %v7040_v60  ;;  %v7046_v27 = vld [vmem:[%s11384_s3 + $0x260] sm:$0xff]  ;;  %v7052_v61 = vld [vmem:[%s11384_s3 + $0x270] sm:$0xff] }
 0x33a   :  { %1274 = vmatprep.subr.mxu0 %v7034_v62  ;;  %1345 = vmatprep.subr.mxu1 %v7040_v60  ;;  %12555 = vst [vmem:[#allocation55_spill] sm:$0xff] %v7046_v27  ;;  %12556 = vst [vmem:[#allocation56_spill] sm:$0xff] %v7052_v61  ;;  %v7058_v62 = vld [vmem:[%s11384_s3 + $0x228] sm:$0xff]  ;;  %v7064_v60 = vld [vmem:[%s11384_s3 + $0x238] sm:$0xff] }
 0x33b   :  { %1275 = vmatpush1.msra.mxu0 %v7046_v27  ;;  %1346 = vmatpush1.msra.mxu1 %v7052_v61  ;;  %12557 = vst [vmem:[#allocation57_spill] sm:$0xff] %v7058_v62  ;;  %12558 = vst [vmem:[#allocation58_spill] sm:$0xff] %v7064_v60  ;;  %v7070_v27 = vld [vmem:[%s11384_s3 + $0x220] sm:$0xff]  ;;  %v7076_v61 = vld [vmem:[%s11384_s3 + $0x230] sm:$0xff] }
 0x33c   :  { %1276 = vmatprep.subr.mxu0 %v7058_v62  ;;  %1347 = vmatprep.subr.mxu1 %v7064_v60  ;;  %12559 = vst [vmem:[#allocation59_spill] sm:$0xff] %v7070_v27  ;;  %12560 = vst [vmem:[#allocation60_spill] sm:$0xff] %v7076_v61  ;;  %v7082_v62 = vld [vmem:[%s11384_s3 + $0x1e8] sm:$0xff]  ;;  %v7088_v60 = vld [vmem:[%s11384_s3 + $0x1f8] sm:$0xff] }
 0x33d   :  { %1277 = vmatpush1.msra.mxu0 %v7070_v27  ;;  %1348 = vmatpush1.msra.mxu1 %v7076_v61  ;;  %12561 = vst [vmem:[#allocation61_spill] sm:$0xff] %v7082_v62  ;;  %12562 = vst [vmem:[#allocation62_spill] sm:$0xff] %v7088_v60  ;;  %v7094_v27 = vld [vmem:[%s11384_s3 + $0x1e0] sm:$0xff]  ;;  %v7100_v61 = vld [vmem:[%s11384_s3 + $0x1f0] sm:$0xff] }
 0x33e   :  { %1278 = vmatprep.subr.mxu0 %v7082_v62  ;;  %1349 = vmatprep.subr.mxu1 %v7088_v60  ;;  %12563 = vst [vmem:[#allocation63_spill] sm:$0xff] %v7094_v27  ;;  %12564 = vst [vmem:[#allocation64_spill] sm:$0xff] %v7100_v61  ;;  %v7106_v62 = vld [vmem:[%s11384_s3 + $0x1a8] sm:$0xff]  ;;  %v7112_v60 = vld [vmem:[%s11384_s3 + $0x1b8] sm:$0xff] }
 0x33f   :  { %1279 = vmatpush1.msra.mxu0 %v7094_v27  ;;  %1350 = vmatpush1.msra.mxu1 %v7100_v61  ;;  %12565 = vst [vmem:[#allocation65_spill] sm:$0xff] %v7106_v62  ;;  %12566 = vst [vmem:[#allocation66_spill] sm:$0xff] %v7112_v60  ;;  %v7118_v27 = vld [vmem:[%s11384_s3 + $0x1a0] sm:$0xff]  ;;  %v7124_v61 = vld [vmem:[%s11384_s3 + $0x1b0] sm:$0xff] }
 0x340   :  { %1280 = vmatprep.subr.mxu0 %v7106_v62  ;;  %1351 = vmatprep.subr.mxu1 %v7112_v60  ;;  %12567 = vst [vmem:[#allocation67_spill] sm:$0xff] %v7118_v27  ;;  %12568 = vst [vmem:[#allocation68_spill] sm:$0xff] %v7124_v61  ;;  %v7130_v62 = vld [vmem:[%s11384_s3 + $0x168] sm:$0xff]  ;;  %v7136_v60 = vld [vmem:[%s11384_s3 + $0x178] sm:$0xff] }
 0x341   :  { %1281 = vmatpush1.msra.mxu0 %v7118_v27  ;;  %1352 = vmatpush1.msra.mxu1 %v7124_v61  ;;  %12569 = vst [vmem:[#allocation69_spill] sm:$0xff] %v7130_v62  ;;  %12570 = vst [vmem:[#allocation70_spill] sm:$0xff] %v7136_v60  ;;  %v7142_v27 = vld [vmem:[%s11384_s3 + $0x160] sm:$0xff]  ;;  %v7148_v61 = vld [vmem:[%s11384_s3 + $0x170] sm:$0xff] }
 0x342   :  { %1282 = vmatprep.subr.mxu0 %v7130_v62  ;;  %1353 = vmatprep.subr.mxu1 %v7136_v60  ;;  %12571 = vst [vmem:[#allocation71_spill] sm:$0xff] %v7142_v27  ;;  %12572 = vst [vmem:[#allocation72_spill] sm:$0xff] %v7148_v61  ;;  %v7154_v62 = vld [vmem:[%s11384_s3 + $0x128] sm:$0xff]  ;;  %v7160_v60 = vld [vmem:[%s11384_s3 + $0x138] sm:$0xff] }
 0x343   :  { %1283 = vmatpush1.msra.mxu0 %v7142_v27  ;;  %1354 = vmatpush1.msra.mxu1 %v7148_v61  ;;  %12573 = vst [vmem:[#allocation73_spill] sm:$0xff] %v7154_v62  ;;  %12574 = vst [vmem:[#allocation74_spill] sm:$0xff] %v7160_v60  ;;  %v7166_v27 = vld [vmem:[%s11384_s3 + $0x120] sm:$0xff]  ;;  %v7172_v61 = vld [vmem:[%s11384_s3 + $0x130] sm:$0xff] }
 0x344   :  { %1284 = vmatprep.subr.mxu0 %v7154_v62  ;;  %1355 = vmatprep.subr.mxu1 %v7160_v60  ;;  %12575 = vst [vmem:[#allocation75_spill] sm:$0xff] %v7166_v27  ;;  %12576 = vst [vmem:[#allocation76_spill] sm:$0xff] %v7172_v61  ;;  %v7178_v62 = vld [vmem:[%s11384_s3 + $0xe8] sm:$0xff]  ;;  %v7184_v60 = vld [vmem:[%s11384_s3 + $0xf8] sm:$0xff] }
 0x345   :  { %1285 = vmatpush1.msra.mxu0 %v7166_v27  ;;  %1356 = vmatpush1.msra.mxu1 %v7172_v61  ;;  %12577 = vst [vmem:[#allocation77_spill] sm:$0xff] %v7178_v62  ;;  %12578 = vst [vmem:[#allocation78_spill] sm:$0xff] %v7184_v60  ;;  %v7190_v27 = vld [vmem:[%s11384_s3 + $0xe0] sm:$0xff]  ;;  %v7196_v61 = vld [vmem:[%s11384_s3 + $0xf0] sm:$0xff] }
 0x346   :  { %1286 = vmatprep.subr.mxu0 %v7178_v62  ;;  %1357 = vmatprep.subr.mxu1 %v7184_v60  ;;  %12579 = vst [vmem:[#allocation79_spill] sm:$0xff] %v7190_v27  ;;  %12580 = vst [vmem:[#allocation80_spill] sm:$0xff] %v7196_v61  ;;  %v7202_v62 = vld [vmem:[%s11384_s3 + $0xa8] sm:$0xff]  ;;  %v7208_v60 = vld [vmem:[%s11384_s3 + $0xb8] sm:$0xff] }
 0x347   :  { %1287 = vmatpush1.msra.mxu0 %v7190_v27  ;;  %1358 = vmatpush1.msra.mxu1 %v7196_v61  ;;  %12581 = vst [vmem:[#allocation81_spill] sm:$0xff] %v7202_v62  ;;  %12582 = vst [vmem:[#allocation82_spill] sm:$0xff] %v7208_v60  ;;  %v7214_v27 = vld [vmem:[%s11384_s3 + $0xa0] sm:$0xff]  ;;  %v7220_v61 = vld [vmem:[%s11384_s3 + $0xb0] sm:$0xff] }
 0x348   :  { %1288 = vmatprep.subr.mxu0 %v7202_v62  ;;  %1359 = vmatprep.subr.mxu1 %v7208_v60  ;;  %12583 = vst [vmem:[#allocation83_spill] sm:$0xff] %v7214_v27  ;;  %12584 = vst [vmem:[#allocation84_spill] sm:$0xff] %v7220_v61  ;;  %v7226_v62 = vld [vmem:[%s11384_s3 + $0x68] sm:$0xff]  ;;  %v7232_v60 = vld [vmem:[%s11384_s3 + $0x78] sm:$0xff] }
 0x349   :  { %1289 = vmatpush1.msra.mxu0 %v7214_v27  ;;  %1360 = vmatpush1.msra.mxu1 %v7220_v61  ;;  %12585 = vst [vmem:[#allocation85_spill] sm:$0xff] %v7226_v62  ;;  %12586 = vst [vmem:[#allocation86_spill] sm:$0xff] %v7232_v60  ;;  %v7238_v27 = vld [vmem:[%s11384_s3 + $0x60] sm:$0xff]  ;;  %v7244_v61 = vld [vmem:[%s11384_s3 + $0x70] sm:$0xff] }
 0x34a   :  { %1290 = vmatprep.subr.mxu0 %v7226_v62  ;;  %1361 = vmatprep.subr.mxu1 %v7232_v60  ;;  %12587 = vst [vmem:[#allocation87_spill] sm:$0xff] %v7238_v27  ;;  %12588 = vst [vmem:[#allocation88_spill] sm:$0xff] %v7244_v61  ;;  %v7250_v62 = vld [vmem:[%s11384_s3 + $0x28] sm:$0xff]  ;;  %v7256_v60 = vld [vmem:[%s11384_s3 + $0x38] sm:$0xff] }
 0x34b   :  { %1291 = vmatpush1.msra.mxu0 %v7238_v27  ;;  %1362 = vmatpush1.msra.mxu1 %v7244_v61  ;;  %12589 = vst [vmem:[#allocation89_spill] sm:$0xff] %v7250_v62  ;;  %12590 = vst [vmem:[#allocation90_spill] sm:$0xff] %v7256_v60  ;;  %v7262_v27 = vld [vmem:[%s11384_s3 + $0x20] sm:$0xff]  ;;  %v7268_v61 = vld [vmem:[%s11384_s3 + $0x30] sm:$0xff] }
 0x34c   :  { %1292 = vmatprep.subr.mxu0 %v7250_v62  ;;  %1363 = vmatprep.subr.mxu1 %v7256_v60  ;;  %12591 = vst [vmem:[#allocation91_spill] sm:$0xff] %v7262_v27  ;;  %12592 = vst [vmem:[#allocation92_spill] sm:$0xff] %v7268_v61  ;;  %v7274_v62 = vld [vmem:[%s11384_s3 + $0x7e8] sm:$0xff]  ;;  %v7280_v60 = vld [vmem:[%s11384_s3 + $0x7f8] sm:$0xff] }
 0x34d   :  { %1293 = vmatpush1.msra.mxu0 %v7262_v27  ;;  %1364 = vmatpush1.msra.mxu1 %v7268_v61  ;;  %12593 = vst [vmem:[#allocation93_spill] sm:$0xff] %v7274_v62  ;;  %12594 = vst [vmem:[#allocation94_spill] sm:$0xff] %v7280_v60  ;;  %v7286_v27 = vld [vmem:[%s11384_s3 + $0x7e0] sm:$0xff]  ;;  %v7292_v61 = vld [vmem:[%s11384_s3 + $0x7f0] sm:$0xff] }
 0x34e   :  { %1294 = vmatprep.subr.mxu0 %v7274_v62  ;;  %1365 = vmatprep.subr.mxu1 %v7280_v60  ;;  %12595 = vst [vmem:[#allocation95_spill] sm:$0xff] %v7286_v27  ;;  %12596 = vst [vmem:[#allocation96_spill] sm:$0xff] %v7292_v61  ;;  %v7298_v62 = vld [vmem:[%s11384_s3 + $0x7a8] sm:$0xff]  ;;  %v7304_v60 = vld [vmem:[%s11384_s3 + $0x7b8] sm:$0xff] }
 0x34f   :  { %1295 = vmatpush2.msra.mxu0 %v7286_v27  ;;  %1366 = vmatpush2.msra.mxu1 %v7292_v61  ;;  %12597 = vst [vmem:[#allocation97_spill] sm:$0xff] %v7298_v62  ;;  %12598 = vst [vmem:[#allocation98_spill] sm:$0xff] %v7304_v60  ;;  %v7310_v27 = vld [vmem:[%s11384_s3 + $0x7a0] sm:$0xff]  ;;  %v7316_v61 = vld [vmem:[%s11384_s3 + $0x7b0] sm:$0xff] }
 0x350   :  { %1296 = vmatprep.subr.mxu0 %v7298_v62  ;;  %1367 = vmatprep.subr.mxu1 %v7304_v60  ;;  %12599 = vst [vmem:[#allocation99_spill] sm:$0xff] %v7310_v27  ;;  %12600 = vst [vmem:[#allocation100_spill] sm:$0xff] %v7316_v61  ;;  %v7322_v62 = vld [vmem:[%s11384_s3 + $0x768] sm:$0xff]  ;;  %v7328_v60 = vld [vmem:[%s11384_s3 + $0x778] sm:$0xff] }
 0x351   :  { %1297 = vmatpush2.msra.mxu0 %v7310_v27  ;;  %1368 = vmatpush2.msra.mxu1 %v7316_v61  ;;  %12601 = vst [vmem:[#allocation101_spill] sm:$0xff] %v7322_v62  ;;  %12602 = vst [vmem:[#allocation102_spill] sm:$0xff] %v7328_v60  ;;  %v7334_v27 = vld [vmem:[%s11384_s3 + $0x760] sm:$0xff]  ;;  %v7340_v61 = vld [vmem:[%s11384_s3 + $0x770] sm:$0xff] }
 0x352   :  { %1298 = vmatprep.subr.mxu0 %v7322_v62  ;;  %1369 = vmatprep.subr.mxu1 %v7328_v60  ;;  %12603 = vst [vmem:[#allocation103_spill] sm:$0xff] %v7334_v27  ;;  %12604 = vst [vmem:[#allocation104_spill] sm:$0xff] %v7340_v61  ;;  %v7346_v62 = vld [vmem:[%s11384_s3 + $0x728] sm:$0xff]  ;;  %v7352_v60 = vld [vmem:[%s11384_s3 + $0x738] sm:$0xff] }
 0x353   :  { %1299 = vmatpush2.msra.mxu0 %v7334_v27  ;;  %1370 = vmatpush2.msra.mxu1 %v7340_v61  ;;  %12605 = vst [vmem:[#allocation105_spill] sm:$0xff] %v7346_v62  ;;  %12606 = vst [vmem:[#allocation106_spill] sm:$0xff] %v7352_v60  ;;  %v7358_v27 = vld [vmem:[%s11384_s3 + $0x720] sm:$0xff]  ;;  %v7364_v61 = vld [vmem:[%s11384_s3 + $0x730] sm:$0xff] }
 0x354   :  { %1300 = vmatprep.subr.mxu0 %v7346_v62  ;;  %1371 = vmatprep.subr.mxu1 %v7352_v60  ;;  %12607 = vst [vmem:[#allocation107_spill] sm:$0xff] %v7358_v27  ;;  %12608 = vst [vmem:[#allocation108_spill] sm:$0xff] %v7364_v61  ;;  %v7370_v62 = vld [vmem:[%s11384_s3 + $0x6e8] sm:$0xff]  ;;  %v7376_v60 = vld [vmem:[%s11384_s3 + $0x6f8] sm:$0xff] }
 0x355   :  { %1301 = vmatpush2.msra.mxu0 %v7358_v27  ;;  %1372 = vmatpush2.msra.mxu1 %v7364_v61  ;;  %12609 = vst [vmem:[#allocation109_spill] sm:$0xff] %v7370_v62  ;;  %12610 = vst [vmem:[#allocation110_spill] sm:$0xff] %v7376_v60  ;;  %v7382_v27 = vld [vmem:[%s11384_s3 + $0x6e0] sm:$0xff]  ;;  %v7388_v61 = vld [vmem:[%s11384_s3 + $0x6f0] sm:$0xff] }
 0x356   :  { %1302 = vmatprep.subr.mxu0 %v7370_v62  ;;  %1373 = vmatprep.subr.mxu1 %v7376_v60  ;;  %12611 = vst [vmem:[#allocation111_spill] sm:$0xff] %v7382_v27  ;;  %12612 = vst [vmem:[#allocation112_spill] sm:$0xff] %v7388_v61  ;;  %v7394_v62 = vld [vmem:[%s11384_s3 + $0x6a8] sm:$0xff]  ;;  %v7400_v60 = vld [vmem:[%s11384_s3 + $0x6b8] sm:$0xff] }
 0x357   :  { %1303 = vmatpush2.msra.mxu0 %v7382_v27  ;;  %1374 = vmatpush2.msra.mxu1 %v7388_v61  ;;  %12613 = vst [vmem:[#allocation113_spill] sm:$0xff] %v7394_v62  ;;  %12614 = vst [vmem:[#allocation114_spill] sm:$0xff] %v7400_v60  ;;  %v7406_v27 = vld [vmem:[%s11384_s3 + $0x6a0] sm:$0xff]  ;;  %v7412_v61 = vld [vmem:[%s11384_s3 + $0x6b0] sm:$0xff] }
 0x358   :  { %1304 = vmatprep.subr.mxu0 %v7394_v62  ;;  %1375 = vmatprep.subr.mxu1 %v7400_v60  ;;  %12615 = vst [vmem:[#allocation115_spill] sm:$0xff] %v7406_v27  ;;  %12616 = vst [vmem:[#allocation116_spill] sm:$0xff] %v7412_v61  ;;  %v7418_v62 = vld [vmem:[%s11384_s3 + $0x668] sm:$0xff]  ;;  %v7424_v60 = vld [vmem:[%s11384_s3 + $0x678] sm:$0xff] }
 0x359   :  { %1305 = vmatpush2.msra.mxu0 %v7406_v27  ;;  %1376 = vmatpush2.msra.mxu1 %v7412_v61  ;;  %12617 = vst [vmem:[#allocation117_spill] sm:$0xff] %v7418_v62  ;;  %12618 = vst [vmem:[#allocation118_spill] sm:$0xff] %v7424_v60  ;;  %v7430_v27 = vld [vmem:[%s11384_s3 + $0x660] sm:$0xff]  ;;  %v7436_v61 = vld [vmem:[%s11384_s3 + $0x670] sm:$0xff] }
 0x35a   :  { %1306 = vmatprep.subr.mxu0 %v7418_v62  ;;  %1377 = vmatprep.subr.mxu1 %v7424_v60  ;;  %12619 = vst [vmem:[#allocation119_spill] sm:$0xff] %v7430_v27  ;;  %12620 = vst [vmem:[#allocation120_spill] sm:$0xff] %v7436_v61  ;;  %v7442_v62 = vld [vmem:[%s11384_s3 + $0x628] sm:$0xff]  ;;  %v7448_v60 = vld [vmem:[%s11384_s3 + $0x638] sm:$0xff] }
 0x35b   :  { %1307 = vmatpush2.msra.mxu0 %v7430_v27  ;;  %1378 = vmatpush2.msra.mxu1 %v7436_v61  ;;  %12621 = vst [vmem:[#allocation121_spill] sm:$0xff] %v7442_v62  ;;  %12622 = vst [vmem:[#allocation122_spill] sm:$0xff] %v7448_v60  ;;  %v7454_v27 = vld [vmem:[%s11384_s3 + $0x620] sm:$0xff]  ;;  %v7460_v61 = vld [vmem:[%s11384_s3 + $0x630] sm:$0xff] }
 0x35c   :  { %1308 = vmatprep.subr.mxu0 %v7442_v62  ;;  %1379 = vmatprep.subr.mxu1 %v7448_v60  ;;  %12623 = vst [vmem:[#allocation123_spill] sm:$0xff] %v7454_v27  ;;  %12624 = vst [vmem:[#allocation124_spill] sm:$0xff] %v7460_v61  ;;  %v7466_v62 = vld [vmem:[%s11384_s3 + $0x5e8] sm:$0xff]  ;;  %v7472_v60 = vld [vmem:[%s11384_s3 + $0x5f8] sm:$0xff] }
 0x35d   :  { %1309 = vmatpush2.msra.mxu0 %v7454_v27  ;;  %1380 = vmatpush2.msra.mxu1 %v7460_v61  ;;  %12625 = vst [vmem:[#allocation125_spill] sm:$0xff] %v7466_v62  ;;  %12626 = vst [vmem:[#allocation126_spill] sm:$0xff] %v7472_v60  ;;  %v7478_v27 = vld [vmem:[%s11384_s3 + $0x5e0] sm:$0xff]  ;;  %v7484_v61 = vld [vmem:[%s11384_s3 + $0x5f0] sm:$0xff] }
 0x35e   :  { %1310 = vmatprep.subr.mxu0 %v7466_v62  ;;  %1381 = vmatprep.subr.mxu1 %v7472_v60  ;;  %12627 = vst [vmem:[#allocation127_spill] sm:$0xff] %v7478_v27  ;;  %12628 = vst [vmem:[#allocation128_spill] sm:$0xff] %v7484_v61  ;;  %v7490_v62 = vld [vmem:[%s11384_s3 + $0x5a8] sm:$0xff]  ;;  %v7496_v60 = vld [vmem:[%s11384_s3 + $0x5b8] sm:$0xff] }
 0x35f   :  { %1311 = vmatpush2.msra.mxu0 %v7478_v27  ;;  %1382 = vmatpush2.msra.mxu1 %v7484_v61  ;;  %12629 = vst [vmem:[#allocation129_spill] sm:$0xff] %v7490_v62  ;;  %12630 = vst [vmem:[#allocation130_spill] sm:$0xff] %v7496_v60  ;;  %v7502_v27 = vld [vmem:[%s11384_s3 + $0x5a0] sm:$0xff]  ;;  %v7508_v61 = vld [vmem:[%s11384_s3 + $0x5b0] sm:$0xff] }
 0x360   :  { %1312 = vmatprep.subr.mxu0 %v7490_v62  ;;  %1383 = vmatprep.subr.mxu1 %v7496_v60  ;;  %12631 = vst [vmem:[#allocation131_spill] sm:$0xff] %v7502_v27  ;;  %12632 = vst [vmem:[#allocation132_spill] sm:$0xff] %v7508_v61  ;;  %v7514_v62 = vld [vmem:[%s11384_s3 + $0x568] sm:$0xff]  ;;  %v7520_v60 = vld [vmem:[%s11384_s3 + $0x578] sm:$0xff] }
 0x361   :  { %1313 = vmatpush2.msra.mxu0 %v7502_v27  ;;  %1384 = vmatpush2.msra.mxu1 %v7508_v61  ;;  %12633 = vst [vmem:[#allocation133_spill] sm:$0xff] %v7514_v62  ;;  %12634 = vst [vmem:[#allocation134_spill] sm:$0xff] %v7520_v60  ;;  %v7526_v27 = vld [vmem:[%s11384_s3 + $0x560] sm:$0xff]  ;;  %v7532_v61 = vld [vmem:[%s11384_s3 + $0x570] sm:$0xff] }
 0x362   :  { %1314 = vmatprep.subr.mxu0 %v7514_v62  ;;  %1385 = vmatprep.subr.mxu1 %v7520_v60  ;;  %12635 = vst [vmem:[#allocation135_spill] sm:$0xff] %v7526_v27  ;;  %12636 = vst [vmem:[#allocation136_spill] sm:$0xff] %v7532_v61  ;;  %v7538_v62 = vld [vmem:[%s11384_s3 + $0x528] sm:$0xff]  ;;  %v7544_v60 = vld [vmem:[%s11384_s3 + $0x538] sm:$0xff] }
 0x363   :  { %1315 = vmatpush2.msra.mxu0 %v7526_v27  ;;  %1386 = vmatpush2.msra.mxu1 %v7532_v61  ;;  %12637 = vst [vmem:[#allocation137_spill] sm:$0xff] %v7538_v62  ;;  %12638 = vst [vmem:[#allocation138_spill] sm:$0xff] %v7544_v60  ;;  %v7550_v27 = vld [vmem:[%s11384_s3 + $0x520] sm:$0xff]  ;;  %v7556_v61 = vld [vmem:[%s11384_s3 + $0x530] sm:$0xff] }
 0x364   :  { %1316 = vmatprep.subr.mxu0 %v7538_v62  ;;  %1387 = vmatprep.subr.mxu1 %v7544_v60  ;;  %12639 = vst [vmem:[#allocation139_spill] sm:$0xff] %v7550_v27  ;;  %12640 = vst [vmem:[#allocation140_spill] sm:$0xff] %v7556_v61  ;;  %v7562_v62 = vld [vmem:[%s11384_s3 + $0x4e8] sm:$0xff]  ;;  %v7568_v60 = vld [vmem:[%s11384_s3 + $0x4f8] sm:$0xff] }
 0x365   :  { %1317 = vmatpush2.msra.mxu0 %v7550_v27  ;;  %1388 = vmatpush2.msra.mxu1 %v7556_v61  ;;  %12641 = vst [vmem:[#allocation141_spill] sm:$0xff] %v7562_v62  ;;  %12642 = vst [vmem:[#allocation142_spill] sm:$0xff] %v7568_v60  ;;  %v7574_v27 = vld [vmem:[%s11384_s3 + $0x4e0] sm:$0xff]  ;;  %v7580_v61 = vld [vmem:[%s11384_s3 + $0x4f0] sm:$0xff] }
 0x366   :  { %1318 = vmatprep.subr.mxu0 %v7562_v62  ;;  %1389 = vmatprep.subr.mxu1 %v7568_v60  ;;  %12643 = vst [vmem:[#allocation143_spill] sm:$0xff] %v7574_v27  ;;  %12644 = vst [vmem:[#allocation144_spill] sm:$0xff] %v7580_v61  ;;  %v7586_v62 = vld [vmem:[%s11384_s3 + $0x4a8] sm:$0xff]  ;;  %v7592_v60 = vld [vmem:[%s11384_s3 + $0x4b8] sm:$0xff] }
 0x367   :  { %1319 = vmatpush2.msra.mxu0 %v7574_v27  ;;  %1390 = vmatpush2.msra.mxu1 %v7580_v61  ;;  %12645 = vst [vmem:[#allocation145_spill] sm:$0xff] %v7586_v62  ;;  %12646 = vst [vmem:[#allocation146_spill] sm:$0xff] %v7592_v60  ;;  %v7598_v27 = vld [vmem:[%s11384_s3 + $0x4a0] sm:$0xff]  ;;  %v7604_v61 = vld [vmem:[%s11384_s3 + $0x4b0] sm:$0xff] }
 0x368   :  { %1320 = vmatprep.subr.mxu0 %v7586_v62  ;;  %1391 = vmatprep.subr.mxu1 %v7592_v60  ;;  %12647 = vst [vmem:[#allocation147_spill] sm:$0xff] %v7598_v27  ;;  %12648 = vst [vmem:[#allocation148_spill] sm:$0xff] %v7604_v61  ;;  %v7610_v62 = vld [vmem:[%s11384_s3 + $0x468] sm:$0xff]  ;;  %v7616_v60 = vld [vmem:[%s11384_s3 + $0x478] sm:$0xff] }
 0x369   :  { %1321 = vmatpush2.msra.mxu0 %v7598_v27  ;;  %1392 = vmatpush2.msra.mxu1 %v7604_v61  ;;  %12649 = vst [vmem:[#allocation149_spill] sm:$0xff] %v7610_v62  ;;  %12650 = vst [vmem:[#allocation150_spill] sm:$0xff] %v7616_v60  ;;  %v7622_v27 = vld [vmem:[%s11384_s3 + $0x460] sm:$0xff]  ;;  %v7628_v61 = vld [vmem:[%s11384_s3 + $0x470] sm:$0xff] }
 0x36a   :  { %1322 = vmatprep.subr.mxu0 %v7610_v62  ;;  %1393 = vmatprep.subr.mxu1 %v7616_v60  ;;  %12651 = vst [vmem:[#allocation151_spill] sm:$0xff] %v7622_v27  ;;  %12652 = vst [vmem:[#allocation152_spill] sm:$0xff] %v7628_v61  ;;  %v7634_v62 = vld [vmem:[%s11384_s3 + $0x428] sm:$0xff]  ;;  %v7640_v60 = vld [vmem:[%s11384_s3 + $0x438] sm:$0xff] }
 0x36b   :  { %1323 = vmatpush2.msra.mxu0 %v7622_v27  ;;  %1394 = vmatpush2.msra.mxu1 %v7628_v61  ;;  %12653 = vst [vmem:[#allocation153_spill] sm:$0xff] %v7640_v60  ;;  %v7646_v27 = vld [vmem:[%s11384_s3 + $0x420] sm:$0xff]  ;;  %v7652_v61 = vld [vmem:[%s11384_s3 + $0x430] sm:$0xff] }
 0x36c   :  { %1324 = vmatprep.subr.mxu0 %v7634_v62  ;;  %1395 = vmatprep.subr.mxu1 %v7640_v60  ;;  %12654 = vst [vmem:[#allocation154_spill] sm:$0xff] %v7646_v27  ;;  %12655 = vst [vmem:[#allocation155_spill] sm:$0xff] %v7652_v61  ;;  %v7660_v60 = vld [vmem:[%s11384_s3 + $0x3c8] sm:$0xff] }
 0x36d   :  { %1325 = vmatpush2.msra.mxu0 %v7646_v27  ;;  %1396 = vmatpush2.msra.mxu1 %v7652_v61  ;;  %12656 = vst [vmem:[#allocation156_spill] sm:$0xff] %v7660_v60  ;;  %v7666_v27 = vld [vmem:[%s11384_s3 + $0x3d8] sm:$0xff]  ;;  %v7672_v61 = vld [vmem:[%s11384_s3 + $0x3c0] sm:$0xff] }
 0x36e   :  { %1327 = vmatmul.mubr.f32.vlgmr.msra.gmra.mxu0 %v6895_v28  ;;  %1398 = vmatmul.mubr.f32.vlgmr.msra.gmra.mxu1 %v6895_v28  ;;  %12657 = vst [vmem:[#allocation157_spill] sm:$0xff] %v7666_v27  ;;  %12658 = vst [vmem:[#allocation158_spill] sm:$0xff] %v7672_v61  ;;  %v7678_v28 = vld [vmem:[%s11384_s3 + $0x3d0] sm:$0xff] }
 0x36f   :  { %1483 = vmatprep.subr.mxu0 %v7660_v60  ;;  %1554 = vmatprep.subr.mxu1 %v7666_v27  ;;  %12659 = vst [vmem:[#allocation159_spill] sm:$0xff] %v7678_v28  ;;  %v7684_v60 = vld [vmem:[%s11384_s3 + $0x388] sm:$0xff]  ;;  %v7690_v27 = vld [vmem:[%s11384_s3 + $0x398] sm:$0xff] }
 0x370   :  { %1484 = vmatpush1.msra.mxu0 %v7672_v61  ;;  %1555 = vmatpush1.msra.mxu1 %v7678_v28  ;;  %12660 = vst [vmem:[#allocation160_spill] sm:$0xff] %v7684_v60  ;;  %12661 = vst [vmem:[#allocation161_spill] sm:$0xff] %v7690_v27  ;;  %v7696_v61 = vld [vmem:[%s11384_s3 + $0x380] sm:$0xff]  ;;  %v7702_v28 = vld [vmem:[%s11384_s3 + $0x390] sm:$0xff] }
 0x371   :  { %1485 = vmatprep.subr.mxu0 %v7684_v60  ;;  %1556 = vmatprep.subr.mxu1 %v7690_v27  ;;  %12662 = vst [vmem:[#allocation162_spill] sm:$0xff] %v7696_v61  ;;  %12663 = vst [vmem:[#allocation163_spill] sm:$0xff] %v7702_v28  ;;  %v7708_v60 = vld [vmem:[%s11384_s3 + $0x348] sm:$0xff]  ;;  %v7714_v27 = vld [vmem:[%s11384_s3 + $0x358] sm:$0xff] }
 0x372   :  { %1486 = vmatpush1.msra.mxu0 %v7696_v61  ;;  %1557 = vmatpush1.msra.mxu1 %v7702_v28  ;;  %12664 = vst [vmem:[#allocation164_spill] sm:$0xff] %v7708_v60  ;;  %12665 = vst [vmem:[#allocation165_spill] sm:$0xff] %v7714_v27  ;;  %v7720_v61 = vld [vmem:[%s11384_s3 + $0x340] sm:$0xff]  ;;  %v7726_v28 = vld [vmem:[%s11384_s3 + $0x350] sm:$0xff] }
 0x373   :  { %1487 = vmatprep.subr.mxu0 %v7708_v60  ;;  %1558 = vmatprep.subr.mxu1 %v7714_v27  ;;  %12666 = vst [vmem:[#allocation166_spill] sm:$0xff] %v7720_v61  ;;  %12667 = vst [vmem:[#allocation167_spill] sm:$0xff] %v7726_v28  ;;  %v7732_v60 = vld [vmem:[%s11384_s3 + $0x308] sm:$0xff]  ;;  %v7738_v27 = vld [vmem:[%s11384_s3 + $0x318] sm:$0xff] }
 0x374   :  { %1488 = vmatpush1.msra.mxu0 %v7720_v61  ;;  %1559 = vmatpush1.msra.mxu1 %v7726_v28  ;;  %12668 = vst [vmem:[#allocation168_spill] sm:$0xff] %v7732_v60  ;;  %12669 = vst [vmem:[#allocation169_spill] sm:$0xff] %v7738_v27  ;;  %v7744_v61 = vld [vmem:[%s11384_s3 + $0x300] sm:$0xff]  ;;  %v7750_v28 = vld [vmem:[%s11384_s3 + $0x310] sm:$0xff] }
 0x375   :  { %1489 = vmatprep.subr.mxu0 %v7732_v60  ;;  %1560 = vmatprep.subr.mxu1 %v7738_v27  ;;  %12670 = vst [vmem:[#allocation170_spill] sm:$0xff] %v7744_v61  ;;  %12671 = vst [vmem:[#allocation171_spill] sm:$0xff] %v7750_v28  ;;  %v7756_v60 = vld [vmem:[%s11384_s3 + $0x2c8] sm:$0xff]  ;;  %v7762_v27 = vld [vmem:[%s11384_s3 + $0x2d8] sm:$0xff] }
 0x376   :  { %1490 = vmatpush1.msra.mxu0 %v7744_v61  ;;  %1561 = vmatpush1.msra.mxu1 %v7750_v28  ;;  %12672 = vst [vmem:[#allocation172_spill] sm:$0xff] %v7756_v60  ;;  %12673 = vst [vmem:[#allocation173_spill] sm:$0xff] %v7762_v27  ;;  %v7768_v61 = vld [vmem:[%s11384_s3 + $0x2c0] sm:$0xff]  ;;  %v7774_v28 = vld [vmem:[%s11384_s3 + $0x2d0] sm:$0xff] }
 0x377   :  { %1491 = vmatprep.subr.mxu0 %v7756_v60  ;;  %1562 = vmatprep.subr.mxu1 %v7762_v27  ;;  %12674 = vst [vmem:[#allocation174_spill] sm:$0xff] %v7768_v61  ;;  %12675 = vst [vmem:[#allocation175_spill] sm:$0xff] %v7774_v28  ;;  %v7780_v60 = vld [vmem:[%s11384_s3 + $0x288] sm:$0xff]  ;;  %v7786_v27 = vld [vmem:[%s11384_s3 + $0x298] sm:$0xff] }
 0x378   :  { %1492 = vmatpush1.msra.mxu0 %v7768_v61  ;;  %1563 = vmatpush1.msra.mxu1 %v7774_v28  ;;  %12676 = vst [vmem:[#allocation176_spill] sm:$0xff] %v7780_v60  ;;  %12677 = vst [vmem:[#allocation177_spill] sm:$0xff] %v7786_v27  ;;  %v7792_v61 = vld [vmem:[%s11384_s3 + $0x280] sm:$0xff]  ;;  %v7798_v28 = vld [vmem:[%s11384_s3 + $0x290] sm:$0xff] }
 0x379   :  { %1493 = vmatprep.subr.mxu0 %v7780_v60  ;;  %1564 = vmatprep.subr.mxu1 %v7786_v27  ;;  %12678 = vst [vmem:[#allocation178_spill] sm:$0xff] %v7792_v61  ;;  %12679 = vst [vmem:[#allocation179_spill] sm:$0xff] %v7798_v28  ;;  %v7804_v60 = vld [vmem:[%s11384_s3 + $0x248] sm:$0xff]  ;;  %v7810_v27 = vld [vmem:[%s11384_s3 + $0x258] sm:$0xff] }
 0x37a   :  { %1494 = vmatpush1.msra.mxu0 %v7792_v61  ;;  %1565 = vmatpush1.msra.mxu1 %v7798_v28  ;;  %12680 = vst [vmem:[#allocation180_spill] sm:$0xff] %v7804_v60  ;;  %12681 = vst [vmem:[#allocation181_spill] sm:$0xff] %v7810_v27  ;;  %v7816_v61 = vld [vmem:[%s11384_s3 + $0x240] sm:$0xff]  ;;  %v7822_v28 = vld [vmem:[%s11384_s3 + $0x250] sm:$0xff] }
 0x37b   :  { %1495 = vmatprep.subr.mxu0 %v7804_v60  ;;  %1566 = vmatprep.subr.mxu1 %v7810_v27  ;;  %12682 = vst [vmem:[#allocation182_spill] sm:$0xff] %v7816_v61  ;;  %12683 = vst [vmem:[#allocation183_spill] sm:$0xff] %v7822_v28  ;;  %v7828_v60 = vld [vmem:[%s11384_s3 + $0x208] sm:$0xff]  ;;  %v7834_v27 = vld [vmem:[%s11384_s3 + $0x218] sm:$0xff] }
 0x37c   :  { %1496 = vmatpush1.msra.mxu0 %v7816_v61  ;;  %1567 = vmatpush1.msra.mxu1 %v7822_v28  ;;  %12684 = vst [vmem:[#allocation184_spill] sm:$0xff] %v7828_v60  ;;  %12685 = vst [vmem:[#allocation185_spill] sm:$0xff] %v7834_v27  ;;  %v7840_v61 = vld [vmem:[%s11384_s3 + $0x200] sm:$0xff]  ;;  %v7846_v28 = vld [vmem:[%s11384_s3 + $0x210] sm:$0xff] }
 0x37d   :  { %1497 = vmatprep.subr.mxu0 %v7828_v60  ;;  %1568 = vmatprep.subr.mxu1 %v7834_v27  ;;  %12686 = vst [vmem:[#allocation186_spill] sm:$0xff] %v7840_v61  ;;  %12687 = vst [vmem:[#allocation187_spill] sm:$0xff] %v7846_v28  ;;  %v7852_v60 = vld [vmem:[%s11384_s3 + $0x1c8] sm:$0xff]  ;;  %v7858_v27 = vld [vmem:[%s11384_s3 + $0x1d8] sm:$0xff] }
 0x37e   :  { %1498 = vmatpush1.msra.mxu0 %v7840_v61  ;;  %1569 = vmatpush1.msra.mxu1 %v7846_v28  ;;  %12688 = vst [vmem:[#allocation188_spill] sm:$0xff] %v7852_v60  ;;  %12689 = vst [vmem:[#allocation189_spill] sm:$0xff] %v7858_v27  ;;  %v7864_v61 = vld [vmem:[%s11384_s3 + $0x1c0] sm:$0xff]  ;;  %v7870_v28 = vld [vmem:[%s11384_s3 + $0x1d0] sm:$0xff] }
 0x37f   :  { %1499 = vmatprep.subr.mxu0 %v7852_v60  ;;  %1570 = vmatprep.subr.mxu1 %v7858_v27  ;;  %12690 = vst [vmem:[#allocation190_spill] sm:$0xff] %v7864_v61  ;;  %12691 = vst [vmem:[#allocation191_spill] sm:$0xff] %v7870_v28  ;;  %v7876_v60 = vld [vmem:[%s11384_s3 + $0x188] sm:$0xff]  ;;  %v7882_v27 = vld [vmem:[%s11384_s3 + $0x198] sm:$0xff] }
 0x380   :  { %1500 = vmatpush1.msra.mxu0 %v7864_v61  ;;  %1571 = vmatpush1.msra.mxu1 %v7870_v28  ;;  %12692 = vst [vmem:[#allocation192_spill] sm:$0xff] %v7876_v60  ;;  %12693 = vst [vmem:[#allocation193_spill] sm:$0xff] %v7882_v27  ;;  %v7888_v61 = vld [vmem:[%s11384_s3 + $0x180] sm:$0xff]  ;;  %v7894_v28 = vld [vmem:[%s11384_s3 + $0x190] sm:$0xff] }
 0x381   :  { %1501 = vmatprep.subr.mxu0 %v7876_v60  ;;  %1572 = vmatprep.subr.mxu1 %v7882_v27  ;;  %12694 = vst [vmem:[#allocation194_spill] sm:$0xff] %v7888_v61  ;;  %12695 = vst [vmem:[#allocation195_spill] sm:$0xff] %v7894_v28  ;;  %v7900_v60 = vld [vmem:[%s11384_s3 + $0x148] sm:$0xff]  ;;  %v7906_v27 = vld [vmem:[%s11384_s3 + $0x158] sm:$0xff] }
 0x382   :  { %1502 = vmatpush1.msra.mxu0 %v7888_v61  ;;  %1573 = vmatpush1.msra.mxu1 %v7894_v28  ;;  %12696 = vst [vmem:[#allocation196_spill] sm:$0xff] %v7900_v60  ;;  %12697 = vst [vmem:[#allocation197_spill] sm:$0xff] %v7906_v27  ;;  %v7912_v61 = vld [vmem:[%s11384_s3 + $0x140] sm:$0xff]  ;;  %v7918_v28 = vld [vmem:[%s11384_s3 + $0x150] sm:$0xff] }
 0x383   :  { %1503 = vmatprep.subr.mxu0 %v7900_v60  ;;  %1574 = vmatprep.subr.mxu1 %v7906_v27  ;;  %12698 = vst [vmem:[#allocation198_spill] sm:$0xff] %v7912_v61  ;;  %12699 = vst [vmem:[#allocation199_spill] sm:$0xff] %v7918_v28  ;;  %v7924_v60 = vld [vmem:[%s11384_s3 + $0x108] sm:$0xff]  ;;  %v7930_v27 = vld [vmem:[%s11384_s3 + $0x118] sm:$0xff] }
 0x384   :  { %1504 = vmatpush1.msra.mxu0 %v7912_v61  ;;  %1575 = vmatpush1.msra.mxu1 %v7918_v28  ;;  %12700 = vst [vmem:[#allocation200_spill] sm:$0xff] %v7924_v60  ;;  %12701 = vst [vmem:[#allocation201_spill] sm:$0xff] %v7930_v27  ;;  %v7936_v61 = vld [vmem:[%s11384_s3 + $0x100] sm:$0xff]  ;;  %v7942_v28 = vld [vmem:[%s11384_s3 + $0x110] sm:$0xff] }
 0x385   :  { %1505 = vmatprep.subr.mxu0 %v7924_v60  ;;  %1576 = vmatprep.subr.mxu1 %v7930_v27  ;;  %12702 = vst [vmem:[#allocation202_spill] sm:$0xff] %v7936_v61  ;;  %12703 = vst [vmem:[#allocation203_spill] sm:$0xff] %v7942_v28  ;;  %v7948_v60 = vld [vmem:[%s11384_s3 + $0xc8] sm:$0xff]  ;;  %v7954_v27 = vld [vmem:[%s11384_s3 + $0xd8] sm:$0xff] }
 0x386   :  { %1506 = vmatpush1.msra.mxu0 %v7936_v61  ;;  %1577 = vmatpush1.msra.mxu1 %v7942_v28  ;;  %12704 = vst [vmem:[#allocation204_spill] sm:$0xff] %v7948_v60  ;;  %12705 = vst [vmem:[#allocation205_spill] sm:$0xff] %v7954_v27  ;;  %v7960_v61 = vld [vmem:[%s11384_s3 + $0xc0] sm:$0xff]  ;;  %v7966_v28 = vld [vmem:[%s11384_s3 + $0xd0] sm:$0xff] }
 0x387   :  { %1507 = vmatprep.subr.mxu0 %v7948_v60  ;;  %1578 = vmatprep.subr.mxu1 %v7954_v27  ;;  %12706 = vst [vmem:[#allocation206_spill] sm:$0xff] %v7960_v61  ;;  %12707 = vst [vmem:[#allocation207_spill] sm:$0xff] %v7966_v28  ;;  %v7972_v60 = vld [vmem:[%s11384_s3 + $0x88] sm:$0xff]  ;;  %v7978_v27 = vld [vmem:[%s11384_s3 + $0x98] sm:$0xff] }
 0x388   :  { %1508 = vmatpush1.msra.mxu0 %v7960_v61  ;;  %1579 = vmatpush1.msra.mxu1 %v7966_v28  ;;  %12708 = vst [vmem:[#allocation208_spill] sm:$0xff] %v7972_v60  ;;  %12709 = vst [vmem:[#allocation209_spill] sm:$0xff] %v7978_v27  ;;  %v7984_v61 = vld [vmem:[%s11384_s3 + $0x80] sm:$0xff]  ;;  %v7990_v28 = vld [vmem:[%s11384_s3 + $0x90] sm:$0xff] }
 0x389   :  { %1509 = vmatprep.subr.mxu0 %v7972_v60  ;;  %1580 = vmatprep.subr.mxu1 %v7978_v27  ;;  %12710 = vst [vmem:[#allocation210_spill] sm:$0xff] %v7984_v61  ;;  %12711 = vst [vmem:[#allocation211_spill] sm:$0xff] %v7990_v28  ;;  %v7996_v60 = vld [vmem:[%s11384_s3 + $0x48] sm:$0xff]  ;;  %v8002_v27 = vld [vmem:[%s11384_s3 + $0x58] sm:$0xff] }
 0x38a   :  { %1510 = vmatpush1.msra.mxu0 %v7984_v61  ;;  %1581 = vmatpush1.msra.mxu1 %v7990_v28  ;;  %12712 = vst [vmem:[#allocation212_spill] sm:$0xff] %v7996_v60  ;;  %12713 = vst [vmem:[#allocation213_spill] sm:$0xff] %v8002_v27  ;;  %v8008_v61 = vld [vmem:[%s11384_s3 + $0x40] sm:$0xff]  ;;  %v8014_v28 = vld [vmem:[%s11384_s3 + $0x50] sm:$0xff] }
 0x38b   :  { %1511 = vmatprep.subr.mxu0 %v7996_v60  ;;  %1582 = vmatprep.subr.mxu1 %v8002_v27  ;;  %12714 = vst [vmem:[#allocation214_spill] sm:$0xff] %v8008_v61  ;;  %12715 = vst [vmem:[#allocation215_spill] sm:$0xff] %v8014_v28  ;;  %v8020_v60 = vld [vmem:[%s11384_s3 + $0x8] sm:$0xff]  ;;  %v8026_v27 = vld [vmem:[%s11384_s3 + $0x18] sm:$0xff] }
 0x38c   :  { %1512 = vmatpush1.msra.mxu0 %v8008_v61  ;;  %1583 = vmatpush1.msra.mxu1 %v8014_v28  ;;  %12716 = vst [vmem:[#allocation216_spill] sm:$0xff] %v8020_v60  ;;  %12717 = vst [vmem:[#allocation217_spill] sm:$0xff] %v8026_v27  ;;  %v8032_v61 = vld [vmem:[%s11384_s3] sm:$0xff]  ;;  %v8038_v28 = vld [vmem:[%s11384_s3 + $0x10] sm:$0xff] }
 0x38d   :  { %1513 = vmatprep.subr.mxu0 %v8020_v60  ;;  %1584 = vmatprep.subr.mxu1 %v8026_v27  ;;  %12718 = vst [vmem:[#allocation218_spill] sm:$0xff] %v8032_v61  ;;  %v8044_v60 = vld [vmem:[%s11384_s3 + $0x7c8] sm:$0xff]  ;;  %v8050_v27 = vld [vmem:[%s11384_s3 + $0x7d8] sm:$0xff] }
 0x38e   :  { %1514 = vmatpush1.msra.mxu0 %v8032_v61  ;;  %1585 = vmatpush1.msra.mxu1 %v8038_v28  ;;  %v8056_v61 = vld [vmem:[%s11384_s3 + $0x7c0] sm:$0xff] }
 0x38f   :  { %1515 = vmatprep.subr.mxu0 %v8044_v60  ;;  %1586 = vmatprep.subr.mxu1 %v8050_v27 }
 0x390   :  { %1516 = vmatpush2.msra.mxu0 %v8056_v61  ;;  %1587 = vmatpush2.msra.mxu1 %v6500_v54  ;;  %v12719_v54 = vld [vmem:[#allocation9_spill] sm:$0xff] }
 0x391   :  { %1517 = vmatprep.subr.mxu0 %v6506_v56  ;;  %1588 = vmatprep.subr.mxu1 %v6512_v0  ;;  %v12720_v56 = vld [vmem:[#allocation10_spill] sm:$0xff]  ;;  %v12721_v0 = vld [vmem:[#allocation11_spill] sm:$0xff] }
 0x392   :  { %1518 = vmatpush2.msra.mxu0 %v6518_v2  ;;  %1589 = vmatpush2.msra.mxu1 %v6524_v4  ;;  %v12722_v2 = vld [vmem:[#allocation12_spill] sm:$0xff]  ;;  %v12723_v4 = vld [vmem:[#allocation13_spill] sm:$0xff] }
 0x393   :  { %1519 = vmatprep.subr.mxu0 %v6530_v58  ;;  %1590 = vmatprep.subr.mxu1 %v6536_v29  ;;  %v12724_v58 = vld [vmem:[#allocation14_spill] sm:$0xff]  ;;  %v12725_v29 = vld [vmem:[#allocation15_spill] sm:$0xff] }
 0x394   :  { %1520 = vmatpush2.msra.mxu0 %v6542_v3  ;;  %1591 = vmatpush2.msra.mxu1 %v6548_v6  ;;  %v12726_v3 = vld [vmem:[#allocation16_spill] sm:$0xff]  ;;  %v12727_v6 = vld [vmem:[#allocation17_spill] sm:$0xff] }
 0x395   :  { %1521 = vmatprep.subr.mxu0 %v6554_v57  ;;  %1592 = vmatprep.subr.mxu1 %v6560_v31  ;;  %v12728_v57 = vld [vmem:[#allocation18_spill] sm:$0xff]  ;;  %v12729_v31 = vld [vmem:[#allocation19_spill] sm:$0xff] }
 0x396   :  { %1522 = vmatpush2.msra.mxu0 %v6566_v32  ;;  %1593 = vmatpush2.msra.mxu1 %v6572_v34  ;;  %v12730_v32 = vld [vmem:[#allocation20_spill] sm:$0xff]  ;;  %v12731_v34 = vld [vmem:[#allocation21_spill] sm:$0xff] }
 0x397   :  { %1523 = vmatprep.subr.mxu0 %v6578_v26  ;;  %1594 = vmatprep.subr.mxu1 %v6584_v37  ;;  %v12732_v26 = vld [vmem:[#allocation22_spill] sm:$0xff]  ;;  %v12733_v37 = vld [vmem:[#allocation23_spill] sm:$0xff] }
 0x398   :  { %1524 = vmatpush2.msra.mxu0 %v6590_v38  ;;  %1595 = vmatpush2.msra.mxu1 %v6596_v39  ;;  %v12734_v38 = vld [vmem:[#allocation24_spill] sm:$0xff]  ;;  %v12735_v39 = vld [vmem:[#allocation29_spill] sm:$0xff] }
 0x399   :  { %1525 = vmatprep.subr.mxu0 %v6602_v40  ;;  %1596 = vmatprep.subr.mxu1 %v6608_v42  ;;  %v12736_v40 = vld [vmem:[#allocation31_spill] sm:$0xff] }
 0x39a   :  { %1526 = vmatpush2.msra.mxu0 %v6614_v43  ;;  %1597 = vmatpush2.msra.mxu1 %v6620_v45  ;;  %v12737_v42 = vld [vmem:[#allocation35_spill] sm:$0xff]  ;;  %v12738_v43 = vld [vmem:[#allocation36_spill] sm:$0xff]  ;;  %v12739_v45 = vld [vmem:[#allocation37_spill] sm:$0xff] }
 0x39b   :  { %1527 = vmatprep.subr.mxu0 %v6626_v46  ;;  %1598 = vmatprep.subr.mxu1 %v6632_v41  ;;  %v12740_v46 = vld [vmem:[#allocation38_spill] sm:$0xff]  ;;  %v12741_v41 = vld [vmem:[#allocation39_spill] sm:$0xff] }
 0x39c   :  { %1528 = vmatpush2.msra.mxu0 %v6638_v47  ;;  %1599 = vmatpush2.msra.mxu1 %v6644_v49  ;;  %v12742_v47 = vld [vmem:[#allocation40_spill] sm:$0xff]  ;;  %v12743_v49 = vld [vmem:[#allocation41_spill] sm:$0xff] }
 0x39d   :  { %1529 = vmatprep.subr.mxu0 %v6650_v50  ;;  %1600 = vmatprep.subr.mxu1 %v6656_v51  ;;  %v12744_v50 = vld [vmem:[#allocation42_spill] sm:$0xff]  ;;  %v12745_v51 = vld [vmem:[#allocation43_spill] sm:$0xff] }
 0x39e   :  { %1530 = vmatpush2.msra.mxu0 %v6662_v52  ;;  %1601 = vmatpush2.msra.mxu1 %v6668_v8  ;;  %v12746_v52 = vld [vmem:[#allocation44_spill] sm:$0xff]  ;;  %v12747_v8 = vld [vmem:[#allocation45_spill] sm:$0xff] }
 0x39f   :  { %1531 = vmatprep.subr.mxu0 %v6674_v10  ;;  %1602 = vmatprep.subr.mxu1 %v6680_v12  ;;  %v1409_v10 = vpop.permute.xlu1 %1408 }
 0x3a0   :  { %1532 = vmatpush2.msra.mxu0 %v6686_v13  ;;  %1603 = vmatpush2.msra.mxu1 %v6692_v14  ;;  %v12748_v13 = vld [vmem:[#allocation26_spill] sm:$0xff] }
 0x3a1   :  { %1533 = vmatprep.subr.mxu0 %v6698_v15  ;;  %1604 = vmatprep.subr.mxu1 %v12719_v54  ;;  %v1412_v14 = vmul.f32 %v1409_v10, %v12748_v13  ;;  %v12749_v15 = vld [vmem:[#allocation25_spill] sm:$0xff] }
 0x3a2   :  { %1534 = vmatpush2.msra.mxu0 %v12720_v56  ;;  %1605 = vmatpush2.msra.mxu1 %v12721_v0  ;;  %v1411_v54 = vmul.f32 %v1409_v10, %v12749_v15  ;;  %v12750_v0 = vld [vmem:[#allocation28_spill] sm:$0xff] }
 0x3a3   :  { %1535 = vmatprep.subr.mxu0 %v12722_v2  ;;  %1606 = vmatprep.subr.mxu1 %v12723_v4  ;;  %v1416_v2 = vadd.f32 %v1412_v14, %v12750_v0 }
 0x3a4   :  { %1536 = vmatpush2.msra.mxu0 %v12724_v58  ;;  %1607 = vmatpush2.msra.mxu1 %v12725_v29  ;;  %v1415_v4 = vadd.f32 %v1411_v54, %v12329_v35 }
 0x3a5   :  { %1537 = vmatprep.subr.mxu0 %v12726_v3  ;;  %1608 = vmatprep.subr.mxu1 %v12727_v6 }
 0x3a6   :  { %1538 = vmatpush2.msra.mxu0 %v12728_v57  ;;  %1609 = vmatpush2.msra.mxu1 %v12729_v31 }
 0x3a7   :  { %1539 = vmatprep.subr.mxu0 %v12730_v32  ;;  %1610 = vmatprep.subr.mxu1 %v12731_v34 }
 0x3a8   :  { %1540 = vmatpush2.msra.mxu0 %v12732_v26  ;;  %1611 = vmatpush2.msra.mxu1 %v12733_v37 }
 0x3a9   :  { %1541 = vmatprep.subr.mxu0 %v12734_v38  ;;  %1612 = vmatprep.subr.mxu1 %v12735_v39  ;;  %v12751_v39 = vld [vmem:[#allocation30_spill] sm:$0xff] }
 0x3aa   :  { %1542 = vmatpush2.msra.mxu0 %v12736_v40  ;;  %1613 = vmatpush2.msra.mxu1 %v12737_v42  ;;  %v1414_v40 = vmul.f32 %v1409_v10, %v12751_v39 }
 0x3ab   :  { %1543 = vmatprep.subr.mxu0 %v12738_v43  ;;  %1614 = vmatprep.subr.mxu1 %v12739_v45 }
 0x3ac   :  { %1544 = vmatpush2.msra.mxu0 %v12740_v46  ;;  %1615 = vmatpush2.msra.mxu1 %v12741_v41  ;;  %v1413_v46 = vmul.f32 %v1409_v10, %v5012_v5  ;;  %v1418_v41 = vadd.f32 %v1414_v40, %v12337_v20 }
 0x3ad   :  { %1545 = vmatprep.subr.mxu0 %v12742_v47  ;;  %1616 = vmatprep.subr.mxu1 %v12743_v49 }
 0x3ae   :  { %1546 = vmatpush2.msra.mxu0 %v12744_v50  ;;  %1617 = vmatpush2.msra.mxu1 %v12745_v51 }
 0x3af   :  { %1625 = vmatprep.subr.mxu0 %v12746_v52  ;;  %1696 = vmatprep.subr.mxu1 %v12747_v8  ;;  %v1417_v52 = vadd.f32 %v1413_v46, %v5016_v59 }
 0x3ed   :  { %v1186_v12 = vpop.f32.mrf.mxu0  ;;  %v1257_v57 = vpop.f32.mrf.mxu1 }
 0x3ee   :  { %v1419_v29 = vadd.f32 %v1415_v4, %v1186_v12  ;;  %v1421_v14 = vadd.f32 %v1417_v52, %v1257_v57 }
 0x3ef   :  { %v1188_v56 = vpop.f32.mrf.mxu0  ;;  %v1259_v26 = vpop.f32.mrf.mxu1 }
 0x3f0   :  { %v1420_v58 = vadd.f32 %v1416_v2, %v1188_v56  ;;  %v3219_v6 = vmul.f32 -1.442695, %v1419_v29  ;;  %v1422_v51 = vadd.f32 %v1418_v41, %v1259_v26 }
 0x3f2   :  { %v3220_v3 = vmul.f32 -1.442695, %v1420_v58  ;;  %v3221_v54 = vmul.f32 -1.442695, %v1422_v51 }
 0x3f4   :  { %3394 = vpow2.f32 %v3220_v3 }
 0x3f5   :  { %3396 = vpow2.f32 %v3219_v6 }
 0x401   :  { %v3395_v45 = vpop.eup %3394 }
 0x402   :  { %v3397_v49 = vpop.eup %3396  ;;  %v1433_v50 = vadd.f32 1.0, %v3395_v45 }
 0x403   :  { %v1427_v12 = vadd.f32 1.0, %v3397_v49 }
 0x42e   :  { %v1328_v31 = vpop.f32.mrf.mxu0  ;;  %v1399_v42 = vpop.f32.mrf.mxu1 }
 0x42f   :  { %v1448_v32 = vadd.f32 %v1328_v31, %v6263_v44  ;;  %v1450_v10 = vadd.f32 %v1399_v42, %v6288_v36 }
 0x430   :  { %v1330_v34 = vpop.f32.mrf.mxu0  ;;  %v1401_v47 = vpop.f32.mrf.mxu1 }
 0x431   :  { %v3222_v37 = vmul.f32 -1.442695, %v1448_v32  ;;  %v1449_v38 = vadd.f32 %v1330_v34, %v6269_v48  ;;  %v1451_v8 = vadd.f32 %v1401_v47, %v6282_v19 }
 0x433   :  { %3398 = vpow2.f32 %v3222_v37  ;;  %v3223_v43 = vmul.f32 -1.442695, %v1449_v38  ;;  %v3224_v56 = vmul.f32 -1.442695, %v1451_v8 }
 0x435   :  { %3400 = vpow2.f32 %v3223_v43 }
 0x436   :  { %3402 = vrcp.f32 %v1433_v50 }
 0x437   :  { %3404 = vrcp.f32 %v1427_v12  ;;  %v12768_v12 = vld [vmem:[#allocation62_spill] sm:$0xff] }
 0x438   :  { %3406 = vtanh.f32 %v1421_v14  ;;  %v12769_v14 = vld [vmem:[#allocation63_spill] sm:$0xff] }
 0x439   :  { %3408 = vpow2.f32 %v3221_v54  ;;  %v12770_v54 = vld [vmem:[#allocation64_spill] sm:$0xff] }
 0x43a   :  { %3410 = vpow2.f32 %v3224_v56  ;;  %v12771_v56 = vld [vmem:[#allocation65_spill] sm:$0xff] }
 0x440   :  { %v3399_v2 = vpop.eup %3398 }
 0x441   :  { %v1456_v4 = vadd.f32 1.0, %v3399_v2  ;;  %v12772_v2 = vld [vmem:[#allocation66_spill] sm:$0xff] }
 0x442   :  { %v3401_v58 = vpop.eup %3400 }
 0x443   :  { %3412 = vrcp.f32 %v1456_v4  ;;  %v1462_v29 = vadd.f32 1.0, %v3401_v58  ;;  %v3403_v3 = vpop.eup %3402  ;;  %v12774_v4 = vld [vmem:[#allocation68_spill] sm:$0xff]  ;;  %v12775_v58 = vld [vmem:[#allocation69_spill] sm:$0xff] }
 0x444   :  { %3414 = vtanh.f32 %v1450_v10  ;;  %v3405_v6 = vpop.eup %3404  ;;  %v1443_v57 = vmul.f32 %v3403_v3, %v6888_v22  ;;  %v12773_v10 = vld [vmem:[#allocation67_spill] sm:$0xff] }
 0x445   :  { %3416 = vrcp.f32 %v1462_v29  ;;  %v3407_v31 = vpop.eup %3406  ;;  %v12776_v29 = vld [vmem:[#allocation70_spill] sm:$0xff]  ;;  %v12777_v3 = vld [vmem:[#allocation71_spill] sm:$0xff] }
 0x446   :  { %v3409_v32 = vpop.eup %3408  ;;  %v1444_v26 = vmul.f32 %v3407_v31, %v3405_v6  ;;  %v12778_v6 = vld [vmem:[#allocation72_spill] sm:$0xff]  ;;  %v12779_v31 = vld [vmem:[#allocation73_spill] sm:$0xff] }
 0x447   :  { %v3411_v34 = vpop.eup %3410  ;;  %v1440_v41 = vadd.f32 1.0, %v3409_v32  ;;  %v12781_v32 = vld [vmem:[#allocation75_spill] sm:$0xff] }
 0x448   :  { %v8135_v40 = vadd.f32 %v1444_v26, %v1443_v57  ;;  %v1469_v43 = vadd.f32 1.0, %v3411_v34  ;;  %v12780_v57 = vld [vmem:[#allocation74_spill] sm:$0xff]  ;;  %v12782_v34 = vld [vmem:[#allocation76_spill] sm:$0xff]  ;;  %v12783_v26 = vld [vmem:[#allocation77_spill] sm:$0xff] }
 0x44a   :  { %3418 = vtanh.f32 %v8135_v40 }
 0x44b   :  { %3420 = vrcp.f32 %v1469_v43  ;;  %v12787_v43 = vld [vmem:[#allocation81_spill] sm:$0xff] }
 0x450   :  { %v3413_v37 = vpop.eup %3412 }
 0x451   :  { %v3415_v38 = vpop.eup %3414 }
 0x452   :  { %v3417_v42 = vpop.eup %3416  ;;  %v1473_v45 = vmul.f32 %v3415_v38, %v3413_v37  ;;  %v12784_v37 = vld [vmem:[#allocation78_spill] sm:$0xff]  ;;  %v12785_v38 = vld [vmem:[#allocation79_spill] sm:$0xff] }
 0x453   :  { %v1472_v46 = vmul.f32 %v3417_v42, %v6891_v24  ;;  %v12752_v24 = vld [vmem:[#allocation46_spill] sm:$0xff]  ;;  %v12786_v42 = vld [vmem:[#allocation80_spill] sm:$0xff] }
 0x455   :  { %v8138_v47 = vadd.f32 %v1473_v45, %v1472_v46  ;;  %v12788_v45 = vld [vmem:[#allocation82_spill] sm:$0xff]  ;;  %v12789_v46 = vld [vmem:[#allocation83_spill] sm:$0xff] }
 0x457   :  { %3422 = vtanh.f32 %v8138_v47  ;;  %v3419_v22 = vpop.eup %3418 }
 0x458   :  { %3424 = vrcp.f32 %v1440_v41  ;;  %v3421_v49 = vpop.eup %3420  ;;  %v12790_v41 = vld [vmem:[#allocation84_spill] sm:$0xff] }
 0x464   :  { %v3423_v50 = vpop.eup %3422 }
 0x465   :  { %v3425_v51 = vpop.eup %3424  ;;  %v1476_v52 = vmul.f32 %v3423_v50, %v3421_v49  ;;  %v12792_v49 = vld [vmem:[#allocation86_spill] sm:$0xff]  ;;  %v12793_v50 = vld [vmem:[#allocation87_spill] sm:$0xff] }
 0x466   :  { %v8142_v8 = vmul.f32 %v3425_v51, %v3419_v22  ;;  %v12791_v22 = vld [vmem:[#allocation85_spill] sm:$0xff]  ;;  %v12794_v51 = vld [vmem:[#allocation88_spill] sm:$0xff] }
 0x467   :  { %1547 = vmatprep.mubr.f32.mxu0 %v1476_v52  ;;  %1618 = vmatprep.mubr.f32.mxu1 %v1476_v52 }
 0x468   :  { %1548 = vmatmul.mubr.f32.vlgmr.msra.gmra.mxu0 %v8142_v8  ;;  %1619 = vmatmul.mubr.f32.vlgmr.msra.gmra.mxu1 %v8142_v8 }
 0x469   :  { %1626 = vmatpush1.msra.mxu0 %v6902_v16  ;;  %1697 = vmatpush1.msra.mxu1 %v6908_v18  ;;  %v12753_v16 = vld [vmem:[#allocation47_spill] sm:$0xff]  ;;  %v12754_v18 = vld [vmem:[#allocation48_spill] sm:$0xff] }
 0x46a   :  { %1627 = vmatprep.subr.mxu0 %v6914_v63  ;;  %1689 = vmatprep.mubr.f32.mxu0 %v1476_v52  ;;  %v12755_v63 = vld [vmem:[#allocation49_spill] sm:$0xff] }
 0x46b   :  { %1698 = vmatprep.subr.mxu1 %v6920_v17  ;;  %1760 = vmatprep.mubr.f32.mxu1 %v1476_v52  ;;  %v12756_v17 = vld [vmem:[#allocation50_spill] sm:$0xff]  ;;  %v12795_v52 = vld [vmem:[#allocation89_spill] sm:$0xff] }
 0x46c   :  { %1628 = vmatpush1.msra.mxu0 %v6926_v7  ;;  %1699 = vmatpush1.msra.mxu1 %v6932_v21  ;;  %v12757_v7 = vld [vmem:[#allocation51_spill] sm:$0xff]  ;;  %v12758_v21 = vld [vmem:[#allocation52_spill] sm:$0xff] }
 0x46d   :  { %1629 = vmatprep.subr.mxu0 %v6938_v55  ;;  %1700 = vmatprep.subr.mxu1 %v6944_v23  ;;  %v12759_v55 = vld [vmem:[#allocation53_spill] sm:$0xff]  ;;  %v12760_v23 = vld [vmem:[#allocation54_spill] sm:$0xff] }
 0x46e   :  { %1630 = vmatpush1.msra.mxu0 %v6950_v11  ;;  %1701 = vmatpush1.msra.mxu1 %v6956_v33  ;;  %v12761_v11 = vld [vmem:[#allocation55_spill] sm:$0xff]  ;;  %v12762_v33 = vld [vmem:[#allocation56_spill] sm:$0xff] }
 0x46f   :  { %1631 = vmatprep.subr.mxu0 %v6962_v1  ;;  %1702 = vmatprep.subr.mxu1 %v6968_v25  ;;  %v12763_v1 = vld [vmem:[#allocation57_spill] sm:$0xff]  ;;  %v12764_v25 = vld [vmem:[#allocation58_spill] sm:$0xff] }
 0x470   :  { %1632 = vmatpush1.msra.mxu0 %v6974_v30  ;;  %1703 = vmatpush1.msra.mxu1 %v6980_v53  ;;  %v12765_v30 = vld [vmem:[#allocation59_spill] sm:$0xff]  ;;  %v12766_v53 = vld [vmem:[#allocation60_spill] sm:$0xff] }
 0x471   :  { %1633 = vmatprep.subr.mxu0 %v6986_v9  ;;  %1704 = vmatprep.subr.mxu1 %v12752_v24  ;;  %v12767_v9 = vld [vmem:[#allocation61_spill] sm:$0xff]  ;;  %v12796_v24 = vld [vmem:[#allocation90_spill] sm:$0xff] }
 0x472   :  { %1634 = vmatpush1.msra.mxu0 %v12753_v16  ;;  %1705 = vmatpush1.msra.mxu1 %v12754_v18  ;;  %v12797_v16 = vld [vmem:[#allocation91_spill] sm:$0xff]  ;;  %v12798_v18 = vld [vmem:[#allocation92_spill] sm:$0xff] }
 0x473   :  { %1635 = vmatprep.subr.mxu0 %v12755_v63  ;;  %1706 = vmatprep.subr.mxu1 %v12756_v17  ;;  %v12799_v63 = vld [vmem:[#allocation93_spill] sm:$0xff]  ;;  %v12800_v17 = vld [vmem:[#allocation94_spill] sm:$0xff] }
 0x474   :  { %1636 = vmatpush1.msra.mxu0 %v12757_v7  ;;  %1707 = vmatpush1.msra.mxu1 %v12758_v21  ;;  %v12801_v7 = vld [vmem:[#allocation95_spill] sm:$0xff]  ;;  %v12802_v21 = vld [vmem:[#allocation96_spill] sm:$0xff] }
 0x475   :  { %1637 = vmatprep.subr.mxu0 %v12759_v55  ;;  %1708 = vmatprep.subr.mxu1 %v12760_v23  ;;  %v12803_v55 = vld [vmem:[#allocation97_spill] sm:$0xff]  ;;  %v12804_v23 = vld [vmem:[#allocation98_spill] sm:$0xff] }
 0x476   :  { %1638 = vmatpush1.msra.mxu0 %v12761_v11  ;;  %1709 = vmatpush1.msra.mxu1 %v12762_v33  ;;  %v12805_v11 = vld [vmem:[#allocation99_spill] sm:$0xff]  ;;  %v12806_v33 = vld [vmem:[#allocation100_spill] sm:$0xff] }
 0x477   :  { %1639 = vmatprep.subr.mxu0 %v12763_v1  ;;  %1710 = vmatprep.subr.mxu1 %v12764_v25  ;;  %v12807_v1 = vld [vmem:[#allocation101_spill] sm:$0xff]  ;;  %v12808_v25 = vld [vmem:[#allocation102_spill] sm:$0xff] }
 0x478   :  { %1640 = vmatpush1.msra.mxu0 %v12765_v30  ;;  %1711 = vmatpush1.msra.mxu1 %v12766_v53  ;;  %v12809_v30 = vld [vmem:[#allocation103_spill] sm:$0xff]  ;;  %v12810_v53 = vld [vmem:[#allocation104_spill] sm:$0xff] }
 0x479   :  { %1641 = vmatprep.subr.mxu0 %v12767_v9  ;;  %1712 = vmatprep.subr.mxu1 %v12768_v12  ;;  %v12811_v9 = vld [vmem:[#allocation105_spill] sm:$0xff]  ;;  %v12812_v12 = vld [vmem:[#allocation106_spill] sm:$0xff] }
 0x47a   :  { %1642 = vmatpush1.msra.mxu0 %v12769_v14  ;;  %1713 = vmatpush1.msra.mxu1 %v12770_v54  ;;  %v12813_v14 = vld [vmem:[#allocation107_spill] sm:$0xff]  ;;  %v12814_v54 = vld [vmem:[#allocation108_spill] sm:$0xff] }
 0x47b   :  { %1643 = vmatprep.subr.mxu0 %v12771_v56  ;;  %1714 = vmatprep.subr.mxu1 %v12772_v2  ;;  %v12815_v56 = vld [vmem:[#allocation109_spill] sm:$0xff]  ;;  %v12816_v2 = vld [vmem:[#allocation110_spill] sm:$0xff] }
 0x47c   :  { %1644 = vmatpush1.msra.mxu0 %v12773_v10  ;;  %1715 = vmatpush1.msra.mxu1 %v12774_v4  ;;  %v12817_v10 = vld [vmem:[#allocation111_spill] sm:$0xff]  ;;  %v12818_v4 = vld [vmem:[#allocation112_spill] sm:$0xff] }
 0x47d   :  { %1645 = vmatprep.subr.mxu0 %v12775_v58  ;;  %1716 = vmatprep.subr.mxu1 %v12776_v29  ;;  %v12819_v58 = vld [vmem:[#allocation113_spill] sm:$0xff]  ;;  %v12820_v29 = vld [vmem:[#allocation114_spill] sm:$0xff] }
 0x47e   :  { %1646 = vmatpush1.msra.mxu0 %v12777_v3  ;;  %1717 = vmatpush1.msra.mxu1 %v12778_v6  ;;  %v12821_v3 = vld [vmem:[#allocation115_spill] sm:$0xff]  ;;  %v12822_v6 = vld [vmem:[#allocation116_spill] sm:$0xff] }
 0x47f   :  { %1647 = vmatprep.subr.mxu0 %v12779_v31  ;;  %1718 = vmatprep.subr.mxu1 %v12780_v57  ;;  %v12823_v31 = vld [vmem:[#allocation117_spill] sm:$0xff]  ;;  %v12824_v57 = vld [vmem:[#allocation118_spill] sm:$0xff] }
 0x480   :  { %1648 = vmatpush1.msra.mxu0 %v12781_v32  ;;  %1719 = vmatpush1.msra.mxu1 %v12782_v34  ;;  %v12825_v32 = vld [vmem:[#allocation119_spill] sm:$0xff]  ;;  %v12826_v34 = vld [vmem:[#allocation120_spill] sm:$0xff] }
 0x481   :  { %1649 = vmatprep.subr.mxu0 %v12783_v26  ;;  %1720 = vmatprep.subr.mxu1 %v12784_v37  ;;  %v12827_v26 = vld [vmem:[#allocation121_spill] sm:$0xff]  ;;  %v12828_v37 = vld [vmem:[#allocation122_spill] sm:$0xff] }
 0x482   :  { %1650 = vmatpush1.msra.mxu0 %v12785_v38  ;;  %1721 = vmatpush1.msra.mxu1 %v12786_v42  ;;  %v12829_v38 = vld [vmem:[#allocation123_spill] sm:$0xff]  ;;  %v12830_v42 = vld [vmem:[#allocation124_spill] sm:$0xff] }
 0x483   :  { %1651 = vmatprep.subr.mxu0 %v12787_v43  ;;  %1722 = vmatprep.subr.mxu1 %v12788_v45  ;;  %v12831_v43 = vld [vmem:[#allocation125_spill] sm:$0xff]  ;;  %v12832_v45 = vld [vmem:[#allocation126_spill] sm:$0xff] }
 0x484   :  { %1652 = vmatpush1.msra.mxu0 %v12789_v46  ;;  %1723 = vmatpush1.msra.mxu1 %v12790_v41  ;;  %v12833_v46 = vld [vmem:[#allocation127_spill] sm:$0xff]  ;;  %v12834_v41 = vld [vmem:[#allocation128_spill] sm:$0xff] }
 0x485   :  { %1653 = vmatprep.subr.mxu0 %v12791_v22  ;;  %1724 = vmatprep.subr.mxu1 %v12792_v49  ;;  %v12835_v22 = vld [vmem:[#allocation129_spill] sm:$0xff]  ;;  %v12836_v49 = vld [vmem:[#allocation130_spill] sm:$0xff] }
 0x486   :  { %1654 = vmatpush1.msra.mxu0 %v12793_v50  ;;  %1725 = vmatpush1.msra.mxu1 %v12794_v51  ;;  %v12837_v50 = vld [vmem:[#allocation131_spill] sm:$0xff]  ;;  %v12838_v51 = vld [vmem:[#allocation132_spill] sm:$0xff] }
 0x487   :  { %1655 = vmatprep.subr.mxu0 %v12795_v52  ;;  %1726 = vmatprep.subr.mxu1 %v12796_v24  ;;  %v12839_v52 = vld [vmem:[#allocation133_spill] sm:$0xff]  ;;  %v12840_v24 = vld [vmem:[#allocation134_spill] sm:$0xff] }
 0x488   :  { %1656 = vmatpush1.msra.mxu0 %v12797_v16  ;;  %1727 = vmatpush1.msra.mxu1 %v12798_v18  ;;  %v12841_v16 = vld [vmem:[#allocation135_spill] sm:$0xff]  ;;  %v12842_v18 = vld [vmem:[#allocation136_spill] sm:$0xff] }
 0x489   :  { %1657 = vmatprep.subr.mxu0 %v12799_v63  ;;  %1728 = vmatprep.subr.mxu1 %v12800_v17  ;;  %v12843_v63 = vld [vmem:[#allocation137_spill] sm:$0xff]  ;;  %v12844_v17 = vld [vmem:[#allocation138_spill] sm:$0xff] }
 0x48a   :  { %1658 = vmatpush2.msra.mxu0 %v12801_v7  ;;  %1729 = vmatpush2.msra.mxu1 %v12802_v21  ;;  %v12845_v7 = vld [vmem:[#allocation139_spill] sm:$0xff]  ;;  %v12846_v21 = vld [vmem:[#allocation140_spill] sm:$0xff] }
 0x48b   :  { %1659 = vmatprep.subr.mxu0 %v12803_v55  ;;  %1730 = vmatprep.subr.mxu1 %v12804_v23  ;;  %v12847_v55 = vld [vmem:[#allocation141_spill] sm:$0xff]  ;;  %v12848_v23 = vld [vmem:[#allocation142_spill] sm:$0xff] }
 0x48c   :  { %1660 = vmatpush2.msra.mxu0 %v12805_v11  ;;  %1731 = vmatpush2.msra.mxu1 %v12806_v33  ;;  %v12849_v11 = vld [vmem:[#allocation143_spill] sm:$0xff]  ;;  %v12850_v33 = vld [vmem:[#allocation144_spill] sm:$0xff] }
 0x48d   :  { %1661 = vmatprep.subr.mxu0 %v12807_v1  ;;  %1732 = vmatprep.subr.mxu1 %v12808_v25  ;;  %v12851_v1 = vld [vmem:[#allocation145_spill] sm:$0xff]  ;;  %v12852_v25 = vld [vmem:[#allocation146_spill] sm:$0xff] }
 0x48e   :  { %1662 = vmatpush2.msra.mxu0 %v12809_v30  ;;  %1733 = vmatpush2.msra.mxu1 %v12810_v53  ;;  %v12853_v30 = vld [vmem:[#allocation147_spill] sm:$0xff]  ;;  %v12854_v53 = vld [vmem:[#allocation148_spill] sm:$0xff] }
 0x48f   :  { %1663 = vmatprep.subr.mxu0 %v12811_v9  ;;  %1734 = vmatprep.subr.mxu1 %v12812_v12  ;;  %v12855_v9 = vld [vmem:[#allocation149_spill] sm:$0xff]  ;;  %v12856_v12 = vld [vmem:[#allocation150_spill] sm:$0xff] }
 0x490   :  { %1664 = vmatpush2.msra.mxu0 %v12813_v14  ;;  %1735 = vmatpush2.msra.mxu1 %v12814_v54  ;;  %v12857_v14 = vld [vmem:[#allocation151_spill] sm:$0xff]  ;;  %v12858_v54 = vld [vmem:[#allocation152_spill] sm:$0xff] }
 0x491   :  { %1665 = vmatprep.subr.mxu0 %v12815_v56  ;;  %1736 = vmatprep.subr.mxu1 %v12816_v2  ;;  %v12859_v56 = vld [vmem:[#allocation153_spill] sm:$0xff]  ;;  %v12860_v2 = vld [vmem:[#allocation154_spill] sm:$0xff] }
 0x492   :  { %1666 = vmatpush2.msra.mxu0 %v12817_v10  ;;  %1737 = vmatpush2.msra.mxu1 %v12818_v4  ;;  %v12861_v10 = vld [vmem:[#allocation155_spill] sm:$0xff]  ;;  %v12862_v4 = vld [vmem:[#allocation156_spill] sm:$0xff] }
 0x493   :  { %1667 = vmatprep.subr.mxu0 %v12819_v58  ;;  %1738 = vmatprep.subr.mxu1 %v12820_v29  ;;  %v12863_v58 = vld [vmem:[#allocation157_spill] sm:$0xff]  ;;  %v12864_v29 = vld [vmem:[#allocation158_spill] sm:$0xff] }
 0x494   :  { %1668 = vmatpush2.msra.mxu0 %v12821_v3  ;;  %1739 = vmatpush2.msra.mxu1 %v12822_v6  ;;  %v12865_v3 = vld [vmem:[#allocation159_spill] sm:$0xff]  ;;  %v12866_v6 = vld [vmem:[#allocation160_spill] sm:$0xff] }
 0x495   :  { %1669 = vmatprep.subr.mxu0 %v12823_v31  ;;  %1740 = vmatprep.subr.mxu1 %v12824_v57  ;;  %v12868_v31 = vld [vmem:[#allocation162_spill] sm:$0xff]  ;;  %v12869_v57 = vld [vmem:[#allocation163_spill] sm:$0xff] }
 0x496   :  { %1670 = vmatpush2.msra.mxu0 %v12825_v32  ;;  %1741 = vmatpush2.msra.mxu1 %v12826_v34  ;;  %v12870_v32 = vld [vmem:[#allocation164_spill] sm:$0xff]  ;;  %v12871_v34 = vld [vmem:[#allocation165_spill] sm:$0xff] }
 0x497   :  { %1671 = vmatprep.subr.mxu0 %v12827_v26  ;;  %1742 = vmatprep.subr.mxu1 %v12828_v37  ;;  %v12873_v26 = vld [vmem:[#allocation167_spill] sm:$0xff]  ;;  %v12874_v37 = vld [vmem:[#allocation168_spill] sm:$0xff] }
 0x498   :  { %1672 = vmatpush2.msra.mxu0 %v12829_v38  ;;  %1743 = vmatpush2.msra.mxu1 %v12830_v42  ;;  %v12875_v38 = vld [vmem:[#allocation169_spill] sm:$0xff]  ;;  %v12876_v42 = vld [vmem:[#allocation170_spill] sm:$0xff] }
 0x499   :  { %1673 = vmatprep.subr.mxu0 %v12831_v43  ;;  %1744 = vmatprep.subr.mxu1 %v12832_v45  ;;  %v12877_v43 = vld [vmem:[#allocation171_spill] sm:$0xff]  ;;  %v12878_v45 = vld [vmem:[#allocation172_spill] sm:$0xff] }
 0x49a   :  { %1674 = vmatpush2.msra.mxu0 %v12833_v46  ;;  %1745 = vmatpush2.msra.mxu1 %v12834_v41  ;;  %v12879_v46 = vld [vmem:[#allocation173_spill] sm:$0xff]  ;;  %v12880_v41 = vld [vmem:[#allocation174_spill] sm:$0xff] }
 0x49b   :  { %1675 = vmatprep.subr.mxu0 %v12835_v22  ;;  %1746 = vmatprep.subr.mxu1 %v12836_v49  ;;  %v12881_v22 = vld [vmem:[#allocation175_spill] sm:$0xff]  ;;  %v12882_v49 = vld [vmem:[#allocation176_spill] sm:$0xff] }
 0x49c   :  { %1676 = vmatpush2.msra.mxu0 %v12837_v50  ;;  %1747 = vmatpush2.msra.mxu1 %v12838_v51  ;;  %v12883_v50 = vld [vmem:[#allocation177_spill] sm:$0xff]  ;;  %v12884_v51 = vld [vmem:[#allocation178_spill] sm:$0xff] }
 0x49d   :  { %1677 = vmatprep.subr.mxu0 %v12839_v52  ;;  %1748 = vmatprep.subr.mxu1 %v12840_v24  ;;  %v12885_v52 = vld [vmem:[#allocation179_spill] sm:$0xff]  ;;  %v12886_v24 = vld [vmem:[#allocation180_spill] sm:$0xff] }
 0x49e   :  { %1678 = vmatpush2.msra.mxu0 %v12841_v16  ;;  %1749 = vmatpush2.msra.mxu1 %v12842_v18  ;;  %v12887_v16 = vld [vmem:[#allocation181_spill] sm:$0xff]  ;;  %v12888_v18 = vld [vmem:[#allocation182_spill] sm:$0xff] }
 0x49f   :  { %1679 = vmatprep.subr.mxu0 %v12843_v63  ;;  %1750 = vmatprep.subr.mxu1 %v12844_v17  ;;  %v12889_v63 = vld [vmem:[#allocation183_spill] sm:$0xff]  ;;  %v12890_v17 = vld [vmem:[#allocation184_spill] sm:$0xff] }
 0x4a0   :  { %1680 = vmatpush2.msra.mxu0 %v12845_v7  ;;  %1751 = vmatpush2.msra.mxu1 %v12846_v21  ;;  %v12891_v7 = vld [vmem:[#allocation185_spill] sm:$0xff]  ;;  %v12892_v21 = vld [vmem:[#allocation186_spill] sm:$0xff] }
 0x4a1   :  { %1681 = vmatprep.subr.mxu0 %v12847_v55  ;;  %1752 = vmatprep.subr.mxu1 %v12848_v23  ;;  %v12893_v55 = vld [vmem:[#allocation187_spill] sm:$0xff]  ;;  %v12894_v23 = vld [vmem:[#allocation188_spill] sm:$0xff] }
 0x4a2   :  { %1682 = vmatpush2.msra.mxu0 %v12849_v11  ;;  %1753 = vmatpush2.msra.mxu1 %v12850_v33  ;;  %v12895_v11 = vld [vmem:[#allocation189_spill] sm:$0xff]  ;;  %v12896_v33 = vld [vmem:[#allocation190_spill] sm:$0xff] }
 0x4a3   :  { %1683 = vmatprep.subr.mxu0 %v12851_v1  ;;  %1754 = vmatprep.subr.mxu1 %v12852_v25  ;;  %v12897_v1 = vld [vmem:[#allocation191_spill] sm:$0xff]  ;;  %v12898_v25 = vld [vmem:[#allocation192_spill] sm:$0xff] }
 0x4a4   :  { %1684 = vmatpush2.msra.mxu0 %v12853_v30  ;;  %1755 = vmatpush2.msra.mxu1 %v12854_v53  ;;  %v12899_v30 = vld [vmem:[#allocation193_spill] sm:$0xff]  ;;  %v12900_v53 = vld [vmem:[#allocation194_spill] sm:$0xff] }
 0x4a5   :  { %1685 = vmatprep.subr.mxu0 %v12855_v9  ;;  %1756 = vmatprep.subr.mxu1 %v12856_v12  ;;  %v12901_v9 = vld [vmem:[#allocation195_spill] sm:$0xff]  ;;  %v12902_v12 = vld [vmem:[#allocation196_spill] sm:$0xff] }
 0x4a6   :  { %1686 = vmatpush2.msra.mxu0 %v12857_v14  ;;  %1757 = vmatpush2.msra.mxu1 %v12858_v54  ;;  %v12903_v14 = vld [vmem:[#allocation197_spill] sm:$0xff]  ;;  %v12904_v54 = vld [vmem:[#allocation198_spill] sm:$0xff] }
 0x4a7   :  { %1687 = vmatprep.subr.mxu0 %v7634_v62  ;;  %1758 = vmatprep.subr.mxu1 %v12859_v56  ;;  %v12867_v62 = vld [vmem:[#allocation161_spill] sm:$0xff]  ;;  %v12905_v56 = vld [vmem:[#allocation199_spill] sm:$0xff] }
 0x4a8   :  { %1688 = vmatpush2.msra.mxu0 %v12860_v2  ;;  %1759 = vmatpush2.msra.mxu1 %v12861_v10  ;;  %v12906_v2 = vld [vmem:[#allocation200_spill] sm:$0xff]  ;;  %v12907_v10 = vld [vmem:[#allocation201_spill] sm:$0xff] }
 0x4a9   :  { %1690 = vmatmul.mubr.f32.vlgmr.msra.gmra.mxu0 %v8142_v8  ;;  %1761 = vmatmul.mubr.f32.vlgmr.msra.gmra.mxu1 %v8142_v8  ;;  %v12872_v8 = vld [vmem:[#allocation166_spill] sm:$0xff] }
 0x4aa   :  { %1846 = vmatprep.subr.mxu0 %v12862_v4  ;;  %1917 = vmatprep.subr.mxu1 %v12863_v58  ;;  %v12908_v4 = vld [vmem:[#allocation202_spill] sm:$0xff]  ;;  %v12909_v58 = vld [vmem:[#allocation203_spill] sm:$0xff] }
 0x4ab   :  { %1847 = vmatpush1.msra.mxu0 %v12864_v29  ;;  %1918 = vmatpush1.msra.mxu1 %v12865_v3  ;;  %v12910_v29 = vld [vmem:[#allocation204_spill] sm:$0xff]  ;;  %v12911_v3 = vld [vmem:[#allocation205_spill] sm:$0xff] }
 0x4ac   :  { %1848 = vmatprep.subr.mxu0 %v12866_v6  ;;  %1919 = vmatprep.subr.mxu1 %v12867_v62  ;;  %v12912_v6 = vld [vmem:[#allocation206_spill] sm:$0xff]  ;;  %v12913_v62 = vld [vmem:[#allocation207_spill] sm:$0xff] }
 0x4ad   :  { %1849 = vmatpush1.msra.mxu0 %v12868_v31  ;;  %1920 = vmatpush1.msra.mxu1 %v12869_v57  ;;  %v12914_v31 = vld [vmem:[#allocation208_spill] sm:$0xff]  ;;  %v12915_v57 = vld [vmem:[#allocation209_spill] sm:$0xff] }
 0x4ae   :  { %1850 = vmatprep.subr.mxu0 %v12870_v32  ;;  %1921 = vmatprep.subr.mxu1 %v12871_v34  ;;  %v12916_v32 = vld [vmem:[#allocation210_spill] sm:$0xff]  ;;  %v12917_v34 = vld [vmem:[#allocation211_spill] sm:$0xff] }
 0x4af   :  { %1851 = vmatpush1.msra.mxu0 %v12872_v8  ;;  %1922 = vmatpush1.msra.mxu1 %v12873_v26  ;;  %v12918_v8 = vld [vmem:[#allocation212_spill] sm:$0xff]  ;;  %v12919_v26 = vld [vmem:[#allocation213_spill] sm:$0xff] }
 0x4b0   :  { %1852 = vmatprep.subr.mxu0 %v12874_v37  ;;  %1923 = vmatprep.subr.mxu1 %v12875_v38  ;;  %v12920_v37 = vld [vmem:[#allocation214_spill] sm:$0xff]  ;;  %v12921_v38 = vld [vmem:[#allocation215_spill] sm:$0xff] }
 0x4b1   :  { %1853 = vmatpush1.msra.mxu0 %v12876_v42  ;;  %1924 = vmatpush1.msra.mxu1 %v12877_v43  ;;  %v12922_v42 = vld [vmem:[#allocation216_spill] sm:$0xff]  ;;  %v12923_v43 = vld [vmem:[#allocation217_spill] sm:$0xff] }
 0x4b2   :  { %1854 = vmatprep.subr.mxu0 %v12878_v45  ;;  %1925 = vmatprep.subr.mxu1 %v12879_v46  ;;  %v12924_v45 = vld [vmem:[#allocation218_spill] sm:$0xff] }
 0x4b3   :  { %1855 = vmatpush1.msra.mxu0 %v12880_v41  ;;  %1926 = vmatpush1.msra.mxu1 %v12881_v22  ;;  %v8344_v46 = vld [vmem:[%s11384_s3 + $0x7d0] sm:$0xff]  ;;  %v8350_v41 = vld [vmem:[%s11384_s3 + $0x788] sm:$0xff]  ;;  %v8380_v22 = vld [vmem:[%s11384_s3 + $0x758] sm:$0xff] }
 0x4b4   :  { %1856 = vmatprep.subr.mxu0 %v12882_v49  ;;  %1927 = vmatprep.subr.mxu1 %v12883_v50  ;;  %v8386_v49 = vld [vmem:[%s11384_s3 + $0x740] sm:$0xff]  ;;  %v8392_v50 = vld [vmem:[%s11384_s3 + $0x750] sm:$0xff] }
 0x4b5   :  { %1857 = vmatpush1.msra.mxu0 %v12884_v51  ;;  %1928 = vmatpush1.msra.mxu1 %v12885_v52  ;;  %v8398_v51 = vld [vmem:[%s11384_s3 + $0x708] sm:$0xff]  ;;  %v8404_v52 = vld [vmem:[%s11384_s3 + $0x718] sm:$0xff] }
 0x4b6   :  { %1858 = vmatprep.subr.mxu0 %v12886_v24  ;;  %1929 = vmatprep.subr.mxu1 %v12887_v16  ;;  %v8410_v24 = vld [vmem:[%s11384_s3 + $0x700] sm:$0xff]  ;;  %v8416_v16 = vld [vmem:[%s11384_s3 + $0x710] sm:$0xff] }
 0x4b7   :  { %1859 = vmatpush1.msra.mxu0 %v12888_v18  ;;  %1930 = vmatpush1.msra.mxu1 %v12889_v63  ;;  %v8422_v18 = vld [vmem:[%s11384_s3 + $0x6c8] sm:$0xff]  ;;  %v8428_v63 = vld [vmem:[%s11384_s3 + $0x6d8] sm:$0xff] }
 0x4b8   :  { %1860 = vmatprep.subr.mxu0 %v12890_v17  ;;  %1931 = vmatprep.subr.mxu1 %v12891_v7  ;;  %v8434_v17 = vld [vmem:[%s11384_s3 + $0x6c0] sm:$0xff]  ;;  %v8440_v7 = vld [vmem:[%s11384_s3 + $0x6d0] sm:$0xff] }
 0x4b9   :  { %1861 = vmatpush1.msra.mxu0 %v12892_v21  ;;  %1932 = vmatpush1.msra.mxu1 %v12893_v55  ;;  %v8446_v21 = vld [vmem:[%s11384_s3 + $0x688] sm:$0xff]  ;;  %v8452_v55 = vld [vmem:[%s11384_s3 + $0x698] sm:$0xff] }
 0x4ba   :  { %1862 = vmatprep.subr.mxu0 %v12894_v23  ;;  %1933 = vmatprep.subr.mxu1 %v12895_v11  ;;  %v8458_v23 = vld [vmem:[%s11384_s3 + $0x680] sm:$0xff]  ;;  %v8464_v11 = vld [vmem:[%s11384_s3 + $0x690] sm:$0xff] }
 0x4bb   :  { %1863 = vmatpush1.msra.mxu0 %v12896_v33  ;;  %1934 = vmatpush1.msra.mxu1 %v12897_v1  ;;  %v8470_v33 = vld [vmem:[%s11384_s3 + $0x648] sm:$0xff]  ;;  %v8476_v1 = vld [vmem:[%s11384_s3 + $0x658] sm:$0xff] }
 0x4bc   :  { %1864 = vmatprep.subr.mxu0 %v12898_v25  ;;  %1935 = vmatprep.subr.mxu1 %v12899_v30  ;;  %v8482_v25 = vld [vmem:[%s11384_s3 + $0x640] sm:$0xff]  ;;  %v8488_v30 = vld [vmem:[%s11384_s3 + $0x650] sm:$0xff] }
 0x4bd   :  { %1865 = vmatpush1.msra.mxu0 %v12900_v53  ;;  %1936 = vmatpush1.msra.mxu1 %v12901_v9  ;;  %v8494_v53 = vld [vmem:[%s11384_s3 + $0x608] sm:$0xff]  ;;  %v8500_v9 = vld [vmem:[%s11384_s3 + $0x618] sm:$0xff] }
 0x4be   :  { %1866 = vmatprep.subr.mxu0 %v12902_v12  ;;  %1937 = vmatprep.subr.mxu1 %v12903_v14  ;;  %v8506_v12 = vld [vmem:[%s11384_s3 + $0x600] sm:$0xff]  ;;  %v8512_v14 = vld [vmem:[%s11384_s3 + $0x610] sm:$0xff] }
 0x4bf   :  { %1867 = vmatpush1.msra.mxu0 %v12904_v54  ;;  %1938 = vmatpush1.msra.mxu1 %v12905_v56  ;;  %v8518_v54 = vld [vmem:[%s11384_s3 + $0x5c8] sm:$0xff]  ;;  %v8524_v56 = vld [vmem:[%s11384_s3 + $0x5d8] sm:$0xff] }
 0x4c0   :  { %1868 = vmatprep.subr.mxu0 %v12906_v2  ;;  %1939 = vmatprep.subr.mxu1 %v12907_v10  ;;  %v8530_v2 = vld [vmem:[%s11384_s3 + $0x5c0] sm:$0xff]  ;;  %v8536_v10 = vld [vmem:[%s11384_s3 + $0x5d0] sm:$0xff] }
 0x4c1   :  { %1869 = vmatpush1.msra.mxu0 %v12908_v4  ;;  %1940 = vmatpush1.msra.mxu1 %v12909_v58  ;;  %v8542_v4 = vld [vmem:[%s11384_s3 + $0x588] sm:$0xff]  ;;  %v8548_v58 = vld [vmem:[%s11384_s3 + $0x598] sm:$0xff] }
 0x4c2   :  { %1870 = vmatprep.subr.mxu0 %v12910_v29  ;;  %1941 = vmatprep.subr.mxu1 %v12911_v3  ;;  %12925 = vst [vmem:[#allocation9_spill] sm:$0xff] %v8542_v4  ;;  %12926 = vst [vmem:[#allocation10_spill] sm:$0xff] %v8548_v58  ;;  %v8554_v29 = vld [vmem:[%s11384_s3 + $0x580] sm:$0xff]  ;;  %v8560_v3 = vld [vmem:[%s11384_s3 + $0x590] sm:$0xff] }
 0x4c3   :  { %1871 = vmatpush1.msra.mxu0 %v12912_v6  ;;  %1942 = vmatpush1.msra.mxu1 %v12913_v62  ;;  %12927 = vst [vmem:[#allocation11_spill] sm:$0xff] %v8554_v29  ;;  %12928 = vst [vmem:[#allocation12_spill] sm:$0xff] %v8560_v3  ;;  %v8566_v6 = vld [vmem:[%s11384_s3 + $0x548] sm:$0xff]  ;;  %v8572_v62 = vld [vmem:[%s11384_s3 + $0x558] sm:$0xff] }
 0x4c4   :  { %1872 = vmatprep.subr.mxu0 %v12914_v31  ;;  %1943 = vmatprep.subr.mxu1 %v12915_v57  ;;  %12929 = vst [vmem:[#allocation13_spill] sm:$0xff] %v8566_v6  ;;  %12930 = vst [vmem:[#allocation14_spill] sm:$0xff] %v8572_v62  ;;  %v8578_v31 = vld [vmem:[%s11384_s3 + $0x540] sm:$0xff]  ;;  %v8584_v57 = vld [vmem:[%s11384_s3 + $0x550] sm:$0xff] }
 0x4c5   :  { %1873 = vmatpush1.msra.mxu0 %v12916_v32  ;;  %1944 = vmatpush1.msra.mxu1 %v12917_v34  ;;  %12931 = vst [vmem:[#allocation15_spill] sm:$0xff] %v8578_v31  ;;  %12932 = vst [vmem:[#allocation16_spill] sm:$0xff] %v8584_v57  ;;  %v8590_v32 = vld [vmem:[%s11384_s3 + $0x508] sm:$0xff]  ;;  %v8596_v34 = vld [vmem:[%s11384_s3 + $0x518] sm:$0xff] }
 0x4c6   :  { %1874 = vmatprep.subr.mxu0 %v12918_v8  ;;  %1945 = vmatprep.subr.mxu1 %v12919_v26  ;;  %12933 = vst [vmem:[#allocation17_spill] sm:$0xff] %v8590_v32  ;;  %12934 = vst [vmem:[#allocation18_spill] sm:$0xff] %v8596_v34  ;;  %v8602_v8 = vld [vmem:[%s11384_s3 + $0x500] sm:$0xff]  ;;  %v8608_v26 = vld [vmem:[%s11384_s3 + $0x510] sm:$0xff] }
 0x4c7   :  { %1875 = vmatpush1.msra.mxu0 %v12920_v37  ;;  %1946 = vmatpush1.msra.mxu1 %v12921_v38  ;;  %12935 = vst [vmem:[#allocation19_spill] sm:$0xff] %v8602_v8  ;;  %12936 = vst [vmem:[#allocation20_spill] sm:$0xff] %v8608_v26  ;;  %v8614_v37 = vld [vmem:[%s11384_s3 + $0x4c8] sm:$0xff]  ;;  %v8620_v38 = vld [vmem:[%s11384_s3 + $0x4d8] sm:$0xff] }
 0x4c8   :  { %1876 = vmatprep.subr.mxu0 %v12922_v42  ;;  %1947 = vmatprep.subr.mxu1 %v12923_v43  ;;  %12937 = vst [vmem:[#allocation21_spill] sm:$0xff] %v8614_v37  ;;  %12938 = vst [vmem:[#allocation22_spill] sm:$0xff] %v8620_v38  ;;  %v8626_v42 = vld [vmem:[%s11384_s3 + $0x4c0] sm:$0xff]  ;;  %v8632_v43 = vld [vmem:[%s11384_s3 + $0x4d0] sm:$0xff] }
 0x4c9   :  { %1877 = vmatpush1.msra.mxu0 %v12924_v45  ;;  %1948 = vmatpush1.msra.mxu1 %v8038_v28  ;;  %v8374_v28 = vld [vmem:[%s11384_s3 + $0x748] sm:$0xff]  ;;  %12939 = vst [vmem:[#allocation23_spill] sm:$0xff] %v8626_v42  ;;  %12940 = vst [vmem:[#allocation24_spill] sm:$0xff] %v8632_v43 }
 0x4ca   :  { %1878 = vmatprep.subr.mxu0 %v8044_v60  ;;  %1949 = vmatprep.subr.mxu1 %v8050_v27  ;;  %v8356_v60 = vld [vmem:[%s11384_s3 + $0x798] sm:$0xff]  ;;  %v8362_v27 = vld [vmem:[%s11384_s3 + $0x780] sm:$0xff]  ;;  %v8638_v45 = vld [vmem:[%s11384_s3 + $0x488] sm:$0xff] }
 0x4cb   :  { %1879 = vmatpush2.msra.mxu0 %v8056_v61  ;;  %1950 = vmatpush2.msra.mxu1 %v8344_v46  ;;  %v8368_v61 = vld [vmem:[%s11384_s3 + $0x790] sm:$0xff]  ;;  %12941 = vst [vmem:[#allocation29_spill] sm:$0xff] %v8638_v45 }
 0x4cc   :  { %1880 = vmatprep.subr.mxu0 %v8350_v41  ;;  %1951 = vmatprep.subr.mxu1 %v8356_v60 }
 0x4cd   :  { %1881 = vmatpush2.msra.mxu0 %v8362_v27  ;;  %1952 = vmatpush2.msra.mxu1 %v8368_v61 }
 0x4ce   :  { %1882 = vmatprep.subr.mxu0 %v8374_v28  ;;  %1953 = vmatprep.subr.mxu1 %v8380_v22 }
 0x4cf   :  { %1883 = vmatpush2.msra.mxu0 %v8386_v49  ;;  %1954 = vmatpush2.msra.mxu1 %v8392_v50 }
 0x4d0   :  { %1884 = vmatprep.subr.mxu0 %v8398_v51  ;;  %1955 = vmatprep.subr.mxu1 %v8404_v52 }
 0x4d1   :  { %1885 = vmatpush2.msra.mxu0 %v8410_v24  ;;  %1956 = vmatpush2.msra.mxu1 %v8416_v16 }
 0x4d2   :  { %1886 = vmatprep.subr.mxu0 %v8422_v18  ;;  %1957 = vmatprep.subr.mxu1 %v8428_v63 }
 0x4d3   :  { %1887 = vmatpush2.msra.mxu0 %v8434_v17  ;;  %1958 = vmatpush2.msra.mxu1 %v8440_v7 }
 0x4d4   :  { %1888 = vmatprep.subr.mxu0 %v8446_v21  ;;  %1959 = vmatprep.subr.mxu1 %v8452_v55 }
 0x4d5   :  { %1889 = vmatpush2.msra.mxu0 %v8458_v23  ;;  %1960 = vmatpush2.msra.mxu1 %v8464_v11 }
 0x4d6   :  { %1890 = vmatprep.subr.mxu0 %v8470_v33  ;;  %1961 = vmatprep.subr.mxu1 %v8476_v1 }
 0x4d7   :  { %1891 = vmatpush2.msra.mxu0 %v8482_v25  ;;  %1962 = vmatpush2.msra.mxu1 %v8488_v30 }
 0x4d8   :  { %1892 = vmatprep.subr.mxu0 %v8494_v53  ;;  %1963 = vmatprep.subr.mxu1 %v8500_v9 }
 0x4d9   :  { %1893 = vmatpush2.msra.mxu0 %v8506_v12  ;;  %1964 = vmatpush2.msra.mxu1 %v8512_v14 }
 0x4da   :  { %1894 = vmatprep.subr.mxu0 %v8518_v54  ;;  %1965 = vmatprep.subr.mxu1 %v8524_v56 }
 0x4db   :  { %1895 = vmatpush2.msra.mxu0 %v8530_v2  ;;  %1966 = vmatpush2.msra.mxu1 %v8536_v10 }
 0x4dc   :  { %1896 = vmatprep.subr.mxu0 %v8542_v4  ;;  %1967 = vmatprep.subr.mxu1 %v8548_v58 }
 0x4dd   :  { %1897 = vmatpush2.msra.mxu0 %v8554_v29  ;;  %1968 = vmatpush2.msra.mxu1 %v8560_v3 }
 0x4de   :  { %1898 = vmatprep.subr.mxu0 %v8566_v6  ;;  %1969 = vmatprep.subr.mxu1 %v8572_v62 }
 0x4df   :  { %1899 = vmatpush2.msra.mxu0 %v8578_v31  ;;  %1970 = vmatpush2.msra.mxu1 %v8584_v57 }
 0x4e0   :  { %1900 = vmatprep.subr.mxu0 %v8590_v32  ;;  %1971 = vmatprep.subr.mxu1 %v8596_v34 }
 0x4e1   :  { %1901 = vmatpush2.msra.mxu0 %v8602_v8  ;;  %1972 = vmatpush2.msra.mxu1 %v8608_v26 }
 0x4e2   :  { %1902 = vmatprep.subr.mxu0 %v8614_v37  ;;  %1973 = vmatprep.subr.mxu1 %v8620_v38  ;;  %v8644_v38 = vld [vmem:[%s11384_s3 + $0x498] sm:$0xff] }
 0x4e3   :  { %1903 = vmatpush2.msra.mxu0 %v8626_v42  ;;  %1974 = vmatpush2.msra.mxu1 %v8632_v43  ;;  %12942 = vst [vmem:[#allocation31_spill] sm:$0xff] %v8644_v38  ;;  %v8650_v42 = vld [vmem:[%s11384_s3 + $0x480] sm:$0xff]  ;;  %v8656_v43 = vld [vmem:[%s11384_s3 + $0x490] sm:$0xff] }
 0x4e4   :  { %1904 = vmatprep.subr.mxu0 %v8638_v45  ;;  %1975 = vmatprep.subr.mxu1 %v8644_v38  ;;  %12943 = vst [vmem:[#allocation35_spill] sm:$0xff] %v8650_v42  ;;  %12944 = vst [vmem:[#allocation36_spill] sm:$0xff] %v8656_v43  ;;  %v8662_v45 = vld [vmem:[%s11384_s3 + $0x448] sm:$0xff]  ;;  %v8668_v38 = vld [vmem:[%s11384_s3 + $0x458] sm:$0xff] }
 0x4e5   :  { %1905 = vmatpush2.msra.mxu0 %v8650_v42  ;;  %1976 = vmatpush2.msra.mxu1 %v8656_v43  ;;  %12945 = vst [vmem:[#allocation37_spill] sm:$0xff] %v8662_v45  ;;  %12946 = vst [vmem:[#allocation38_spill] sm:$0xff] %v8668_v38  ;;  %v8674_v42 = vld [vmem:[%s11384_s3 + $0x440] sm:$0xff]  ;;  %v8680_v43 = vld [vmem:[%s11384_s3 + $0x450] sm:$0xff] }
 0x4e6   :  { %1906 = vmatprep.subr.mxu0 %v8662_v45  ;;  %1977 = vmatprep.subr.mxu1 %v8668_v38  ;;  %12947 = vst [vmem:[#allocation39_spill] sm:$0xff] %v8674_v42  ;;  %12948 = vst [vmem:[#allocation40_spill] sm:$0xff] %v8680_v43  ;;  %v8686_v45 = vld [vmem:[%s11384_s3 + $0x408] sm:$0xff]  ;;  %v8692_v38 = vld [vmem:[%s11384_s3 + $0x418] sm:$0xff] }
 0x4e7   :  { %1907 = vmatpush2.msra.mxu0 %v8674_v42  ;;  %1978 = vmatpush2.msra.mxu1 %v8680_v43  ;;  %12949 = vst [vmem:[#allocation41_spill] sm:$0xff] %v8686_v45  ;;  %12950 = vst [vmem:[#allocation42_spill] sm:$0xff] %v8692_v38  ;;  %v8698_v42 = vld [vmem:[%s11384_s3 + $0x400] sm:$0xff]  ;;  %v8704_v43 = vld [vmem:[%s11384_s3 + $0x410] sm:$0xff] }
 0x4e8   :  { %1908 = vmatprep.subr.mxu0 %v8686_v45  ;;  %1979 = vmatprep.subr.mxu1 %v8692_v38  ;;  %12951 = vst [vmem:[#allocation43_spill] sm:$0xff] %v8698_v42  ;;  %12952 = vst [vmem:[#allocation44_spill] sm:$0xff] %v8704_v43  ;;  %v8710_v45 = vld [vmem:[%s11384_s3 + $0x3e8] sm:$0xff]  ;;  %v8716_v38 = vld [vmem:[%s11384_s3 + $0x3f8] sm:$0xff] }
 0x4e9   :  { %1909 = vmatpush2.msra.mxu0 %v8698_v42  ;;  %1980 = vmatpush2.msra.mxu1 %v8704_v43  ;;  %12953 = vst [vmem:[#allocation45_spill] sm:$0xff] %v8710_v45  ;;  %12954 = vst [vmem:[#allocation46_spill] sm:$0xff] %v8716_v38  ;;  %v1772_v42 = vpop.permute.xlu0 %1771 }
 0x4ea   :  { %1988 = vmatprep.subr.mxu0 %v8710_v45  ;;  %2059 = vmatprep.subr.mxu1 %v8716_v38  ;;  %v1775_v26 = vmul.f32 %v1772_v42, %v12748_v13  ;;  %v1774_v43 = vmul.f32 %v1772_v42, %v12749_v15  ;;  %v1777_v4 = vmul.f32 %v1772_v42, %v12751_v39 }
 0x4ec   :  { %v1779_v34 = vadd.f32 %v1775_v26, %v12750_v0  ;;  %v1778_v32 = vadd.f32 %v1774_v43, %v12329_v35 }
 0x528   :  { %v1549_v37 = vpop.f32.mrf.mxu0  ;;  %v1620_v6 = vpop.f32.mrf.mxu1 }
 0x529   :  { %v1782_v45 = vadd.f32 %v1778_v32, %v1549_v37 }
 0x52a   :  { %v1551_v8 = vpop.f32.mrf.mxu0  ;;  %v1622_v58 = vpop.f32.mrf.mxu1 }
 0x52b   :  { %v1783_v57 = vadd.f32 %v1779_v34, %v1551_v8  ;;  %v3226_v62 = vmul.f32 -1.442695, %v1782_v45 }
 0x52d   :  { %v3227_v31 = vmul.f32 -1.442695, %v1783_v57  ;;  %v1776_v57 = vmul.f32 %v1772_v42, %v5012_v5 }
 0x52f   :  { %3426 = vpow2.f32 %v3227_v31  ;;  %v1780_v37 = vadd.f32 %v1776_v57, %v5016_v59 }
 0x530   :  { %3428 = vpow2.f32 %v3226_v62  ;;  %v1781_v62 = vadd.f32 %v1777_v4, %v12337_v20 }
 0x531   :  { %v1784_v45 = vadd.f32 %v1780_v37, %v1620_v6 }
 0x53c   :  { %v3427_v32 = vpop.eup %3426 }
 0x53d   :  { %v3429_v34 = vpop.eup %3428  ;;  %v1796_v8 = vadd.f32 1.0, %v3427_v32 }
 0x569   :  { %v1691_v3 = vpop.f32.mrf.mxu0  ;;  %v1762_v26 = vpop.f32.mrf.mxu1 }
 0x56a   :  { %v1811_v38 = vadd.f32 %v1691_v3, %v6263_v44  ;;  %v1785_v3 = vadd.f32 %v1781_v62, %v1622_v58  ;;  %v1813_v42 = vadd.f32 %v1762_v26, %v6288_v36 }
 0x56b   :  { %v1693_v29 = vpop.f32.mrf.mxu0  ;;  %v1764_v31 = vpop.f32.mrf.mxu1 }
 0x56c   :  { %v3229_v13 = vmul.f32 -1.442695, %v1811_v38  ;;  %v1812_v15 = vadd.f32 %v1693_v29, %v6269_v48  ;;  %v1814_v38 = vadd.f32 %v1764_v31, %v6282_v19  ;;  %v1790_v29 = vadd.f32 1.0, %v3429_v34 }
 0x56e   :  { %3430 = vpow2.f32 %v3229_v13  ;;  %v3230_v43 = vmul.f32 -1.442695, %v1812_v15  ;;  %v3228_v13 = vmul.f32 -1.442695, %v1785_v3  ;;  %v3231_v39 = vmul.f32 -1.442695, %v1814_v38 }
 0x570   :  { %3432 = vpow2.f32 %v3230_v43 }
 0x571   :  { %3434 = vrcp.f32 %v1796_v8 }
 0x572   :  { %3436 = vrcp.f32 %v1790_v29 }
 0x573   :  { %3438 = vtanh.f32 %v1784_v45 }
 0x574   :  { %3440 = vpow2.f32 %v3228_v13 }
 0x575   :  { %3442 = vpow2.f32 %v3231_v39 }
 0x57b   :  { %v3431_v15 = vpop.eup %3430 }
 0x57c   :  { %v1819_v4 = vadd.f32 1.0, %v3431_v15 }
 0x57d   :  { %v3433_v43 = vpop.eup %3432 }
 0x57e   :  { %3444 = vrcp.f32 %v1819_v4  ;;  %v1825_v58 = vadd.f32 1.0, %v3433_v43  ;;  %v3435_v32 = vpop.eup %3434 }
 0x57f   :  { %3446 = vtanh.f32 %v1813_v42  ;;  %v3437_v57 = vpop.eup %3436  ;;  %v1806_v6 = vmul.f32 %v3435_v32, %v8135_v40 }
 0x580   :  { %3448 = vrcp.f32 %v1825_v58  ;;  %v3439_v62 = vpop.eup %3438 }
 0x581   :  { %v3441_v31 = vpop.eup %3440  ;;  %v1807_v8 = vmul.f32 %v3439_v62, %v3437_v57  ;;  %v8752_v57 = vld [vmem:[%s11384_s3 + $0x3f0] sm:$0xff]  ;;  %v8758_v62 = vld [vmem:[%s11384_s3 + $0x3a8] sm:$0xff] }
 0x582   :  { %v3443_v34 = vpop.eup %3442  ;;  %v1803_v13 = vadd.f32 1.0, %v3441_v31  ;;  %v8770_v31 = vld [vmem:[%s11384_s3 + $0x3a0] sm:$0xff] }
 0x583   :  { %v8732_v38 = vadd.f32 %v1807_v8, %v1806_v6  ;;  %v1832_v29 = vadd.f32 1.0, %v3443_v34  ;;  %v8764_v6 = vld [vmem:[%s11384_s3 + $0x3b8] sm:$0xff]  ;;  %v8776_v34 = vld [vmem:[%s11384_s3 + $0x3b0] sm:$0xff]  ;;  %v8782_v8 = vld [vmem:[%s11384_s3 + $0x368] sm:$0xff] }
 0x585   :  { %3450 = vtanh.f32 %v8732_v38 }
 0x586   :  { %3452 = vrcp.f32 %v1832_v29  ;;  %v8806_v29 = vld [vmem:[%s11384_s3 + $0x328] sm:$0xff] }
 0x58b   :  { %v3445_v3 = vpop.eup %3444 }
 0x58c   :  { %v3447_v37 = vpop.eup %3446 }
 0x58d   :  { %v3449_v26 = vpop.eup %3448  ;;  %v1836_v45 = vmul.f32 %v3447_v37, %v3445_v3  ;;  %v8788_v3 = vld [vmem:[%s11384_s3 + $0x378] sm:$0xff]  ;;  %v8794_v37 = vld [vmem:[%s11384_s3 + $0x360] sm:$0xff] }
 0x58e   :  { %v1835_v39 = vmul.f32 %v3449_v26, %v8138_v47  ;;  %v8746_v47 = vld [vmem:[%s11384_s3 + $0x3e0] sm:$0xff]  ;;  %v8800_v26 = vld [vmem:[%s11384_s3 + $0x370] sm:$0xff] }
 0x590   :  { %v8735_v15 = vadd.f32 %v1836_v45, %v1835_v39  ;;  %v8812_v45 = vld [vmem:[%s11384_s3 + $0x338] sm:$0xff]  ;;  %v8818_v39 = vld [vmem:[%s11384_s3 + $0x320] sm:$0xff] }
 0x592   :  { %3454 = vtanh.f32 %v8735_v15  ;;  %v3451_v40 = vpop.eup %3450 }
 0x593   :  { %3456 = vrcp.f32 %v1803_v13  ;;  %v3453_v42 = vpop.eup %3452  ;;  %v8824_v13 = vld [vmem:[%s11384_s3 + $0x330] sm:$0xff] }
 0x59f   :  { %v3455_v4 = vpop.eup %3454 }
 0x5a0   :  { %v3457_v43 = vpop.eup %3456  ;;  %v1839_v58 = vmul.f32 %v3455_v4, %v3453_v42  ;;  %v8836_v42 = vld [vmem:[%s11384_s3 + $0x2f8] sm:$0xff]  ;;  %v8842_v4 = vld [vmem:[%s11384_s3 + $0x2e0] sm:$0xff] }
 0x5a1   :  { %v8739_v32 = vmul.f32 %v3457_v43, %v3451_v40  ;;  %v8830_v40 = vld [vmem:[%s11384_s3 + $0x2e8] sm:$0xff]  ;;  %12955 = vst [vmem:[#allocation47_spill] sm:$0xff] %v8836_v42  ;;  %12956 = vst [vmem:[#allocation48_spill] sm:$0xff] %v8842_v4  ;;  %v8848_v43 = vld [vmem:[%s11384_s3 + $0x2f0] sm:$0xff] }
 0x5a2   :  { %1910 = vmatprep.mubr.f32.mxu0 %v1839_v58  ;;  %1981 = vmatprep.mubr.f32.mxu1 %v1839_v58  ;;  %12957 = vst [vmem:[#allocation49_spill] sm:$0xff] %v8848_v43 }
 0x5a3   :  { %1911 = vmatmul.mubr.f32.vlgmr.msra.gmra.mxu0 %v8739_v32  ;;  %1982 = vmatmul.mubr.f32.vlgmr.msra.gmra.mxu1 %v8739_v32 }
 0x5a4   :  { %1989 = vmatpush1.msra.mxu0 %v8746_v47  ;;  %2060 = vmatpush1.msra.mxu1 %v8752_v57 }
 0x5a5   :  { %1990 = vmatprep.subr.mxu0 %v8758_v62  ;;  %2052 = vmatprep.mubr.f32.mxu0 %v1839_v58 }
 0x5a6   :  { %2061 = vmatprep.subr.mxu1 %v8764_v6  ;;  %2123 = vmatprep.mubr.f32.mxu1 %v1839_v58  ;;  %v8854_v58 = vld [vmem:[%s11384_s3 + $0x2a8] sm:$0xff] }
 0x5a7   :  { %1991 = vmatpush1.msra.mxu0 %v8770_v31  ;;  %2062 = vmatpush1.msra.mxu1 %v8776_v34  ;;  %12958 = vst [vmem:[#allocation50_spill] sm:$0xff] %v8854_v58 }
 0x5a8   :  { %1992 = vmatprep.subr.mxu0 %v8782_v8  ;;  %2063 = vmatprep.subr.mxu1 %v8788_v3 }
 0x5a9   :  { %1993 = vmatpush1.msra.mxu0 %v8794_v37  ;;  %2064 = vmatpush1.msra.mxu1 %v8800_v26 }
 0x5aa   :  { %1994 = vmatprep.subr.mxu0 %v8806_v29  ;;  %2065 = vmatprep.subr.mxu1 %v8812_v45 }
 0x5ab   :  { %1995 = vmatpush1.msra.mxu0 %v8818_v39  ;;  %2066 = vmatpush1.msra.mxu1 %v8824_v13 }
 0x5ac   :  { %1996 = vmatprep.subr.mxu0 %v8830_v40  ;;  %2067 = vmatprep.subr.mxu1 %v8836_v42  ;;  %v8860_v42 = vld [vmem:[%s11384_s3 + $0x2b8] sm:$0xff] }
 0x5ad   :  { %1997 = vmatpush1.msra.mxu0 %v8842_v4  ;;  %2068 = vmatpush1.msra.mxu1 %v8848_v43  ;;  %12959 = vst [vmem:[#allocation51_spill] sm:$0xff] %v8860_v42  ;;  %v8866_v4 = vld [vmem:[%s11384_s3 + $0x2a0] sm:$0xff]  ;;  %v8872_v43 = vld [vmem:[%s11384_s3 + $0x2b0] sm:$0xff] }
 0x5ae   :  { %1998 = vmatprep.subr.mxu0 %v8854_v58  ;;  %2069 = vmatprep.subr.mxu1 %v8860_v42  ;;  %12960 = vst [vmem:[#allocation52_spill] sm:$0xff] %v8866_v4  ;;  %12961 = vst [vmem:[#allocation53_spill] sm:$0xff] %v8872_v43  ;;  %v8878_v58 = vld [vmem:[%s11384_s3 + $0x268] sm:$0xff]  ;;  %v8884_v42 = vld [vmem:[%s11384_s3 + $0x278] sm:$0xff] }
 0x5af   :  { %1999 = vmatpush1.msra.mxu0 %v8866_v4  ;;  %2070 = vmatpush1.msra.mxu1 %v8872_v43  ;;  %12962 = vst [vmem:[#allocation54_spill] sm:$0xff] %v8878_v58  ;;  %12963 = vst [vmem:[#allocation55_spill] sm:$0xff] %v8884_v42  ;;  %v8890_v4 = vld [vmem:[%s11384_s3 + $0x260] sm:$0xff]  ;;  %v8896_v43 = vld [vmem:[%s11384_s3 + $0x270] sm:$0xff] }
 0x5b0   :  { %2000 = vmatprep.subr.mxu0 %v8878_v58  ;;  %2071 = vmatprep.subr.mxu1 %v8884_v42  ;;  %12964 = vst [vmem:[#allocation56_spill] sm:$0xff] %v8890_v4  ;;  %12965 = vst [vmem:[#allocation57_spill] sm:$0xff] %v8896_v43  ;;  %v8902_v58 = vld [vmem:[%s11384_s3 + $0x228] sm:$0xff]  ;;  %v8908_v42 = vld [vmem:[%s11384_s3 + $0x238] sm:$0xff] }
 0x5b1   :  { %2001 = vmatpush1.msra.mxu0 %v8890_v4  ;;  %2072 = vmatpush1.msra.mxu1 %v8896_v43  ;;  %12966 = vst [vmem:[#allocation58_spill] sm:$0xff] %v8902_v58  ;;  %12967 = vst [vmem:[#allocation59_spill] sm:$0xff] %v8908_v42  ;;  %v8914_v4 = vld [vmem:[%s11384_s3 + $0x220] sm:$0xff]  ;;  %v8920_v43 = vld [vmem:[%s11384_s3 + $0x230] sm:$0xff] }
 0x5b2   :  { %2002 = vmatprep.subr.mxu0 %v8902_v58  ;;  %2073 = vmatprep.subr.mxu1 %v8908_v42  ;;  %12968 = vst [vmem:[#allocation60_spill] sm:$0xff] %v8914_v4  ;;  %12969 = vst [vmem:[#allocation61_spill] sm:$0xff] %v8920_v43  ;;  %v8926_v58 = vld [vmem:[%s11384_s3 + $0x1e8] sm:$0xff]  ;;  %v8932_v42 = vld [vmem:[%s11384_s3 + $0x1f8] sm:$0xff] }
 0x5b3   :  { %2003 = vmatpush1.msra.mxu0 %v8914_v4  ;;  %2074 = vmatpush1.msra.mxu1 %v8920_v43  ;;  %12970 = vst [vmem:[#allocation62_spill] sm:$0xff] %v8926_v58  ;;  %12971 = vst [vmem:[#allocation63_spill] sm:$0xff] %v8932_v42  ;;  %v8938_v4 = vld [vmem:[%s11384_s3 + $0x1e0] sm:$0xff]  ;;  %v8944_v43 = vld [vmem:[%s11384_s3 + $0x1f0] sm:$0xff] }
 0x5b4   :  { %2004 = vmatprep.subr.mxu0 %v8926_v58  ;;  %2075 = vmatprep.subr.mxu1 %v8932_v42  ;;  %12972 = vst [vmem:[#allocation64_spill] sm:$0xff] %v8938_v4  ;;  %12973 = vst [vmem:[#allocation65_spill] sm:$0xff] %v8944_v43  ;;  %v8950_v58 = vld [vmem:[%s11384_s3 + $0x1a8] sm:$0xff]  ;;  %v8956_v42 = vld [vmem:[%s11384_s3 + $0x1b8] sm:$0xff] }
 0x5b5   :  { %2005 = vmatpush1.msra.mxu0 %v8938_v4  ;;  %2076 = vmatpush1.msra.mxu1 %v8944_v43  ;;  %12974 = vst [vmem:[#allocation66_spill] sm:$0xff] %v8950_v58  ;;  %12975 = vst [vmem:[#allocation67_spill] sm:$0xff] %v8956_v42  ;;  %v8962_v4 = vld [vmem:[%s11384_s3 + $0x1a0] sm:$0xff]  ;;  %v8968_v43 = vld [vmem:[%s11384_s3 + $0x1b0] sm:$0xff] }
 0x5b6   :  { %2006 = vmatprep.subr.mxu0 %v8950_v58  ;;  %2077 = vmatprep.subr.mxu1 %v8956_v42  ;;  %12976 = vst [vmem:[#allocation68_spill] sm:$0xff] %v8962_v4  ;;  %12977 = vst [vmem:[#allocation69_spill] sm:$0xff] %v8968_v43  ;;  %v8974_v58 = vld [vmem:[%s11384_s3 + $0x168] sm:$0xff]  ;;  %v8980_v42 = vld [vmem:[%s11384_s3 + $0x178] sm:$0xff] }
 0x5b7   :  { %2007 = vmatpush1.msra.mxu0 %v8962_v4  ;;  %2078 = vmatpush1.msra.mxu1 %v8968_v43  ;;  %12978 = vst [vmem:[#allocation70_spill] sm:$0xff] %v8974_v58  ;;  %12979 = vst [vmem:[#allocation71_spill] sm:$0xff] %v8980_v42  ;;  %v8986_v4 = vld [vmem:[%s11384_s3 + $0x160] sm:$0xff]  ;;  %v8992_v43 = vld [vmem:[%s11384_s3 + $0x170] sm:$0xff] }
 0x5b8   :  { %2008 = vmatprep.subr.mxu0 %v8974_v58  ;;  %2079 = vmatprep.subr.mxu1 %v8980_v42  ;;  %12980 = vst [vmem:[#allocation72_spill] sm:$0xff] %v8986_v4  ;;  %12981 = vst [vmem:[#allocation73_spill] sm:$0xff] %v8992_v43  ;;  %v8998_v58 = vld [vmem:[%s11384_s3 + $0x128] sm:$0xff]  ;;  %v9004_v42 = vld [vmem:[%s11384_s3 + $0x138] sm:$0xff] }
 0x5b9   :  { %2009 = vmatpush1.msra.mxu0 %v8986_v4  ;;  %2080 = vmatpush1.msra.mxu1 %v8992_v43  ;;  %12982 = vst [vmem:[#allocation74_spill] sm:$0xff] %v8998_v58  ;;  %12983 = vst [vmem:[#allocation75_spill] sm:$0xff] %v9004_v42  ;;  %v9010_v4 = vld [vmem:[%s11384_s3 + $0x120] sm:$0xff]  ;;  %v9016_v43 = vld [vmem:[%s11384_s3 + $0x130] sm:$0xff] }
 0x5ba   :  { %2010 = vmatprep.subr.mxu0 %v8998_v58  ;;  %2081 = vmatprep.subr.mxu1 %v9004_v42  ;;  %12984 = vst [vmem:[#allocation76_spill] sm:$0xff] %v9010_v4  ;;  %12985 = vst [vmem:[#allocation77_spill] sm:$0xff] %v9016_v43  ;;  %v9022_v58 = vld [vmem:[%s11384_s3 + $0xe8] sm:$0xff]  ;;  %v9028_v42 = vld [vmem:[%s11384_s3 + $0xf8] sm:$0xff] }
 0x5bb   :  { %2011 = vmatpush1.msra.mxu0 %v9010_v4  ;;  %2082 = vmatpush1.msra.mxu1 %v9016_v43  ;;  %12986 = vst [vmem:[#allocation78_spill] sm:$0xff] %v9022_v58  ;;  %12987 = vst [vmem:[#allocation79_spill] sm:$0xff] %v9028_v42  ;;  %v9034_v4 = vld [vmem:[%s11384_s3 + $0xe0] sm:$0xff]  ;;  %v9040_v43 = vld [vmem:[%s11384_s3 + $0xf0] sm:$0xff] }
 0x5bc   :  { %2012 = vmatprep.subr.mxu0 %v9022_v58  ;;  %2083 = vmatprep.subr.mxu1 %v9028_v42  ;;  %12988 = vst [vmem:[#allocation80_spill] sm:$0xff] %v9034_v4  ;;  %12989 = vst [vmem:[#allocation81_spill] sm:$0xff] %v9040_v43  ;;  %v9046_v58 = vld [vmem:[%s11384_s3 + $0xa8] sm:$0xff]  ;;  %v9052_v42 = vld [vmem:[%s11384_s3 + $0xb8] sm:$0xff] }
 0x5bd   :  { %2013 = vmatpush1.msra.mxu0 %v9034_v4  ;;  %2084 = vmatpush1.msra.mxu1 %v9040_v43  ;;  %12990 = vst [vmem:[#allocation82_spill] sm:$0xff] %v9046_v58  ;;  %12991 = vst [vmem:[#allocation83_spill] sm:$0xff] %v9052_v42  ;;  %v9058_v4 = vld [vmem:[%s11384_s3 + $0xa0] sm:$0xff]  ;;  %v9064_v43 = vld [vmem:[%s11384_s3 + $0xb0] sm:$0xff] }
 0x5be   :  { %2014 = vmatprep.subr.mxu0 %v9046_v58  ;;  %2085 = vmatprep.subr.mxu1 %v9052_v42  ;;  %12992 = vst [vmem:[#allocation84_spill] sm:$0xff] %v9058_v4  ;;  %12993 = vst [vmem:[#allocation85_spill] sm:$0xff] %v9064_v43  ;;  %v9070_v58 = vld [vmem:[%s11384_s3 + $0x68] sm:$0xff]  ;;  %v9076_v42 = vld [vmem:[%s11384_s3 + $0x78] sm:$0xff] }
 0x5bf   :  { %2015 = vmatpush1.msra.mxu0 %v9058_v4  ;;  %2086 = vmatpush1.msra.mxu1 %v9064_v43  ;;  %12994 = vst [vmem:[#allocation86_spill] sm:$0xff] %v9070_v58  ;;  %12995 = vst [vmem:[#allocation87_spill] sm:$0xff] %v9076_v42  ;;  %v9082_v4 = vld [vmem:[%s11384_s3 + $0x60] sm:$0xff]  ;;  %v9088_v43 = vld [vmem:[%s11384_s3 + $0x70] sm:$0xff] }
 0x5c0   :  { %2016 = vmatprep.subr.mxu0 %v9070_v58  ;;  %2087 = vmatprep.subr.mxu1 %v9076_v42  ;;  %12996 = vst [vmem:[#allocation88_spill] sm:$0xff] %v9082_v4  ;;  %12997 = vst [vmem:[#allocation89_spill] sm:$0xff] %v9088_v43  ;;  %v9094_v58 = vld [vmem:[%s11384_s3 + $0x28] sm:$0xff]  ;;  %v9100_v42 = vld [vmem:[%s11384_s3 + $0x38] sm:$0xff] }
 0x5c1   :  { %2017 = vmatpush1.msra.mxu0 %v9082_v4  ;;  %2088 = vmatpush1.msra.mxu1 %v9088_v43  ;;  %12998 = vst [vmem:[#allocation90_spill] sm:$0xff] %v9094_v58  ;;  %12999 = vst [vmem:[#allocation91_spill] sm:$0xff] %v9100_v42  ;;  %v9106_v4 = vld [vmem:[%s11384_s3 + $0x20] sm:$0xff]  ;;  %v9112_v43 = vld [vmem:[%s11384_s3 + $0x30] sm:$0xff] }
 0x5c2   :  { %2018 = vmatprep.subr.mxu0 %v9094_v58  ;;  %2089 = vmatprep.subr.mxu1 %v9100_v42  ;;  %13000 = vst [vmem:[#allocation92_spill] sm:$0xff] %v9106_v4  ;;  %13001 = vst [vmem:[#allocation93_spill] sm:$0xff] %v9112_v43  ;;  %v9118_v58 = vld [vmem:[%s11384_s3 + $0x7e8] sm:$0xff]  ;;  %v9124_v42 = vld [vmem:[%s11384_s3 + $0x7f8] sm:$0xff] }
 0x5c3   :  { %2019 = vmatpush1.msra.mxu0 %v9106_v4  ;;  %2090 = vmatpush1.msra.mxu1 %v9112_v43  ;;  %13002 = vst [vmem:[#allocation94_spill] sm:$0xff] %v9118_v58  ;;  %13003 = vst [vmem:[#allocation95_spill] sm:$0xff] %v9124_v42  ;;  %v9130_v4 = vld [vmem:[%s11384_s3 + $0x7e0] sm:$0xff]  ;;  %v9136_v43 = vld [vmem:[%s11384_s3 + $0x7f0] sm:$0xff] }
 0x5c4   :  { %2020 = vmatprep.subr.mxu0 %v9118_v58  ;;  %2091 = vmatprep.subr.mxu1 %v9124_v42  ;;  %13004 = vst [vmem:[#allocation96_spill] sm:$0xff] %v9130_v4  ;;  %13005 = vst [vmem:[#allocation97_spill] sm:$0xff] %v9136_v43  ;;  %v9142_v58 = vld [vmem:[%s11384_s3 + $0x7a8] sm:$0xff]  ;;  %v9148_v42 = vld [vmem:[%s11384_s3 + $0x7b8] sm:$0xff] }
 0x5c5   :  { %2021 = vmatpush2.msra.mxu0 %v9130_v4  ;;  %2092 = vmatpush2.msra.mxu1 %v9136_v43  ;;  %13006 = vst [vmem:[#allocation98_spill] sm:$0xff] %v9142_v58  ;;  %13007 = vst [vmem:[#allocation99_spill] sm:$0xff] %v9148_v42  ;;  %v9154_v4 = vld [vmem:[%s11384_s3 + $0x7a0] sm:$0xff]  ;;  %v9160_v43 = vld [vmem:[%s11384_s3 + $0x7b0] sm:$0xff] }
 0x5c6   :  { %2022 = vmatprep.subr.mxu0 %v9142_v58  ;;  %2093 = vmatprep.subr.mxu1 %v9148_v42  ;;  %13008 = vst [vmem:[#allocation100_spill] sm:$0xff] %v9154_v4  ;;  %13009 = vst [vmem:[#allocation101_spill] sm:$0xff] %v9160_v43  ;;  %v9166_v58 = vld [vmem:[%s11384_s3 + $0x768] sm:$0xff]  ;;  %v9172_v42 = vld [vmem:[%s11384_s3 + $0x778] sm:$0xff] }
 0x5c7   :  { %2023 = vmatpush2.msra.mxu0 %v9154_v4  ;;  %2094 = vmatpush2.msra.mxu1 %v9160_v43  ;;  %13010 = vst [vmem:[#allocation102_spill] sm:$0xff] %v9166_v58  ;;  %13011 = vst [vmem:[#allocation103_spill] sm:$0xff] %v9172_v42  ;;  %v9178_v4 = vld [vmem:[%s11384_s3 + $0x760] sm:$0xff]  ;;  %v9184_v43 = vld [vmem:[%s11384_s3 + $0x770] sm:$0xff] }
 0x5c8   :  { %2024 = vmatprep.subr.mxu0 %v9166_v58  ;;  %2095 = vmatprep.subr.mxu1 %v9172_v42  ;;  %13012 = vst [vmem:[#allocation104_spill] sm:$0xff] %v9178_v4  ;;  %13013 = vst [vmem:[#allocation105_spill] sm:$0xff] %v9184_v43  ;;  %v9190_v58 = vld [vmem:[%s11384_s3 + $0x728] sm:$0xff]  ;;  %v9196_v42 = vld [vmem:[%s11384_s3 + $0x738] sm:$0xff] }
 0x5c9   :  { %2025 = vmatpush2.msra.mxu0 %v9178_v4  ;;  %2096 = vmatpush2.msra.mxu1 %v9184_v43  ;;  %13014 = vst [vmem:[#allocation106_spill] sm:$0xff] %v9190_v58  ;;  %13015 = vst [vmem:[#allocation107_spill] sm:$0xff] %v9196_v42  ;;  %v9202_v4 = vld [vmem:[%s11384_s3 + $0x720] sm:$0xff]  ;;  %v9208_v43 = vld [vmem:[%s11384_s3 + $0x730] sm:$0xff] }
 0x5ca   :  { %2026 = vmatprep.subr.mxu0 %v9190_v58  ;;  %2097 = vmatprep.subr.mxu1 %v9196_v42  ;;  %13016 = vst [vmem:[#allocation108_spill] sm:$0xff] %v9202_v4  ;;  %13017 = vst [vmem:[#allocation109_spill] sm:$0xff] %v9208_v43  ;;  %v9214_v58 = vld [vmem:[%s11384_s3 + $0x6e8] sm:$0xff]  ;;  %v9220_v42 = vld [vmem:[%s11384_s3 + $0x6f8] sm:$0xff] }
 0x5cb   :  { %2027 = vmatpush2.msra.mxu0 %v9202_v4  ;;  %2098 = vmatpush2.msra.mxu1 %v9208_v43  ;;  %13018 = vst [vmem:[#allocation110_spill] sm:$0xff] %v9214_v58  ;;  %13019 = vst [vmem:[#allocation111_spill] sm:$0xff] %v9220_v42  ;;  %v9226_v4 = vld [vmem:[%s11384_s3 + $0x6e0] sm:$0xff]  ;;  %v9232_v43 = vld [vmem:[%s11384_s3 + $0x6f0] sm:$0xff] }
 0x5cc   :  { %2028 = vmatprep.subr.mxu0 %v9214_v58  ;;  %2099 = vmatprep.subr.mxu1 %v9220_v42  ;;  %13020 = vst [vmem:[#allocation112_spill] sm:$0xff] %v9226_v4  ;;  %13021 = vst [vmem:[#allocation113_spill] sm:$0xff] %v9232_v43  ;;  %v9238_v58 = vld [vmem:[%s11384_s3 + $0x6a8] sm:$0xff]  ;;  %v9244_v42 = vld [vmem:[%s11384_s3 + $0x6b8] sm:$0xff] }
 0x5cd   :  { %2029 = vmatpush2.msra.mxu0 %v9226_v4  ;;  %2100 = vmatpush2.msra.mxu1 %v9232_v43  ;;  %13022 = vst [vmem:[#allocation114_spill] sm:$0xff] %v9238_v58  ;;  %13023 = vst [vmem:[#allocation115_spill] sm:$0xff] %v9244_v42  ;;  %v9250_v4 = vld [vmem:[%s11384_s3 + $0x6a0] sm:$0xff]  ;;  %v9256_v43 = vld [vmem:[%s11384_s3 + $0x6b0] sm:$0xff] }
 0x5ce   :  { %2030 = vmatprep.subr.mxu0 %v9238_v58  ;;  %2101 = vmatprep.subr.mxu1 %v9244_v42  ;;  %13024 = vst [vmem:[#allocation116_spill] sm:$0xff] %v9250_v4  ;;  %13025 = vst [vmem:[#allocation117_spill] sm:$0xff] %v9256_v43  ;;  %v9262_v58 = vld [vmem:[%s11384_s3 + $0x668] sm:$0xff]  ;;  %v9268_v42 = vld [vmem:[%s11384_s3 + $0x678] sm:$0xff] }
 0x5cf   :  { %2031 = vmatpush2.msra.mxu0 %v9250_v4  ;;  %2102 = vmatpush2.msra.mxu1 %v9256_v43  ;;  %13026 = vst [vmem:[#allocation118_spill] sm:$0xff] %v9262_v58  ;;  %13027 = vst [vmem:[#allocation119_spill] sm:$0xff] %v9268_v42  ;;  %v9274_v4 = vld [vmem:[%s11384_s3 + $0x660] sm:$0xff]  ;;  %v9280_v43 = vld [vmem:[%s11384_s3 + $0x670] sm:$0xff] }
 0x5d0   :  { %2032 = vmatprep.subr.mxu0 %v9262_v58  ;;  %2103 = vmatprep.subr.mxu1 %v9268_v42  ;;  %13028 = vst [vmem:[#allocation120_spill] sm:$0xff] %v9274_v4  ;;  %13029 = vst [vmem:[#allocation121_spill] sm:$0xff] %v9280_v43  ;;  %v9286_v58 = vld [vmem:[%s11384_s3 + $0x628] sm:$0xff]  ;;  %v9292_v42 = vld [vmem:[%s11384_s3 + $0x638] sm:$0xff] }
 0x5d1   :  { %2033 = vmatpush2.msra.mxu0 %v9274_v4  ;;  %2104 = vmatpush2.msra.mxu1 %v9280_v43  ;;  %13030 = vst [vmem:[#allocation122_spill] sm:$0xff] %v9286_v58  ;;  %13031 = vst [vmem:[#allocation123_spill] sm:$0xff] %v9292_v42  ;;  %v9298_v4 = vld [vmem:[%s11384_s3 + $0x620] sm:$0xff]  ;;  %v9304_v43 = vld [vmem:[%s11384_s3 + $0x630] sm:$0xff] }
 0x5d2   :  { %2034 = vmatprep.subr.mxu0 %v9286_v58  ;;  %2105 = vmatprep.subr.mxu1 %v9292_v42  ;;  %13032 = vst [vmem:[#allocation124_spill] sm:$0xff] %v9298_v4  ;;  %13033 = vst [vmem:[#allocation125_spill] sm:$0xff] %v9304_v43  ;;  %v9310_v58 = vld [vmem:[%s11384_s3 + $0x5e8] sm:$0xff]  ;;  %v9316_v42 = vld [vmem:[%s11384_s3 + $0x5f8] sm:$0xff] }
 0x5d3   :  { %2035 = vmatpush2.msra.mxu0 %v9298_v4  ;;  %2106 = vmatpush2.msra.mxu1 %v9304_v43  ;;  %13034 = vst [vmem:[#allocation126_spill] sm:$0xff] %v9310_v58  ;;  %13035 = vst [vmem:[#allocation127_spill] sm:$0xff] %v9316_v42  ;;  %v9322_v4 = vld [vmem:[%s11384_s3 + $0x5e0] sm:$0xff]  ;;  %v9328_v43 = vld [vmem:[%s11384_s3 + $0x5f0] sm:$0xff] }
 0x5d4   :  { %2036 = vmatprep.subr.mxu0 %v9310_v58  ;;  %2107 = vmatprep.subr.mxu1 %v9316_v42  ;;  %13036 = vst [vmem:[#allocation128_spill] sm:$0xff] %v9322_v4  ;;  %13037 = vst [vmem:[#allocation129_spill] sm:$0xff] %v9328_v43  ;;  %v9334_v58 = vld [vmem:[%s11384_s3 + $0x5a8] sm:$0xff]  ;;  %v9340_v42 = vld [vmem:[%s11384_s3 + $0x5b8] sm:$0xff] }
 0x5d5   :  { %2037 = vmatpush2.msra.mxu0 %v9322_v4  ;;  %2108 = vmatpush2.msra.mxu1 %v9328_v43  ;;  %13038 = vst [vmem:[#allocation130_spill] sm:$0xff] %v9334_v58  ;;  %13039 = vst [vmem:[#allocation131_spill] sm:$0xff] %v9340_v42  ;;  %v9346_v4 = vld [vmem:[%s11384_s3 + $0x5a0] sm:$0xff]  ;;  %v9352_v43 = vld [vmem:[%s11384_s3 + $0x5b0] sm:$0xff] }
 0x5d6   :  { %2038 = vmatprep.subr.mxu0 %v9334_v58  ;;  %2109 = vmatprep.subr.mxu1 %v9340_v42  ;;  %13040 = vst [vmem:[#allocation132_spill] sm:$0xff] %v9346_v4  ;;  %13041 = vst [vmem:[#allocation133_spill] sm:$0xff] %v9352_v43  ;;  %v9358_v58 = vld [vmem:[%s11384_s3 + $0x568] sm:$0xff]  ;;  %v9364_v42 = vld [vmem:[%s11384_s3 + $0x578] sm:$0xff] }
 0x5d7   :  { %2039 = vmatpush2.msra.mxu0 %v9346_v4  ;;  %2110 = vmatpush2.msra.mxu1 %v9352_v43  ;;  %13042 = vst [vmem:[#allocation134_spill] sm:$0xff] %v9358_v58  ;;  %13043 = vst [vmem:[#allocation135_spill] sm:$0xff] %v9364_v42  ;;  %v9370_v4 = vld [vmem:[%s11384_s3 + $0x560] sm:$0xff]  ;;  %v9376_v43 = vld [vmem:[%s11384_s3 + $0x570] sm:$0xff] }
 0x5d8   :  { %2040 = vmatprep.subr.mxu0 %v9358_v58  ;;  %2111 = vmatprep.subr.mxu1 %v9364_v42  ;;  %13044 = vst [vmem:[#allocation136_spill] sm:$0xff] %v9370_v4  ;;  %13045 = vst [vmem:[#allocation137_spill] sm:$0xff] %v9376_v43  ;;  %v9382_v58 = vld [vmem:[%s11384_s3 + $0x528] sm:$0xff]  ;;  %v9388_v42 = vld [vmem:[%s11384_s3 + $0x538] sm:$0xff] }
 0x5d9   :  { %2041 = vmatpush2.msra.mxu0 %v9370_v4  ;;  %2112 = vmatpush2.msra.mxu1 %v9376_v43  ;;  %13046 = vst [vmem:[#allocation138_spill] sm:$0xff] %v9382_v58  ;;  %13047 = vst [vmem:[#allocation139_spill] sm:$0xff] %v9388_v42  ;;  %v9394_v4 = vld [vmem:[%s11384_s3 + $0x520] sm:$0xff]  ;;  %v9400_v43 = vld [vmem:[%s11384_s3 + $0x530] sm:$0xff] }
 0x5da   :  { %2042 = vmatprep.subr.mxu0 %v9382_v58  ;;  %2113 = vmatprep.subr.mxu1 %v9388_v42  ;;  %13048 = vst [vmem:[#allocation140_spill] sm:$0xff] %v9394_v4  ;;  %13049 = vst [vmem:[#allocation141_spill] sm:$0xff] %v9400_v43  ;;  %v9406_v58 = vld [vmem:[%s11384_s3 + $0x4e8] sm:$0xff]  ;;  %v9412_v42 = vld [vmem:[%s11384_s3 + $0x4f8] sm:$0xff] }
 0x5db   :  { %2043 = vmatpush2.msra.mxu0 %v9394_v4  ;;  %2114 = vmatpush2.msra.mxu1 %v9400_v43  ;;  %13050 = vst [vmem:[#allocation142_spill] sm:$0xff] %v9406_v58  ;;  %13051 = vst [vmem:[#allocation143_spill] sm:$0xff] %v9412_v42  ;;  %v9418_v4 = vld [vmem:[%s11384_s3 + $0x4e0] sm:$0xff]  ;;  %v9424_v43 = vld [vmem:[%s11384_s3 + $0x4f0] sm:$0xff] }
 0x5dc   :  { %2044 = vmatprep.subr.mxu0 %v9406_v58  ;;  %2115 = vmatprep.subr.mxu1 %v9412_v42  ;;  %13052 = vst [vmem:[#allocation144_spill] sm:$0xff] %v9418_v4  ;;  %13053 = vst [vmem:[#allocation145_spill] sm:$0xff] %v9424_v43  ;;  %v9430_v58 = vld [vmem:[%s11384_s3 + $0x4a8] sm:$0xff]  ;;  %v9436_v42 = vld [vmem:[%s11384_s3 + $0x4b8] sm:$0xff] }
 0x5dd   :  { %2045 = vmatpush2.msra.mxu0 %v9418_v4  ;;  %2116 = vmatpush2.msra.mxu1 %v9424_v43  ;;  %13054 = vst [vmem:[#allocation146_spill] sm:$0xff] %v9430_v58  ;;  %13055 = vst [vmem:[#allocation147_spill] sm:$0xff] %v9436_v42  ;;  %v9442_v4 = vld [vmem:[%s11384_s3 + $0x4a0] sm:$0xff]  ;;  %v9448_v43 = vld [vmem:[%s11384_s3 + $0x4b0] sm:$0xff] }
 0x5de   :  { %2046 = vmatprep.subr.mxu0 %v9430_v58  ;;  %2117 = vmatprep.subr.mxu1 %v9436_v42  ;;  %13056 = vst [vmem:[#allocation148_spill] sm:$0xff] %v9442_v4  ;;  %13057 = vst [vmem:[#allocation149_spill] sm:$0xff] %v9448_v43  ;;  %v9454_v58 = vld [vmem:[%s11384_s3 + $0x468] sm:$0xff]  ;;  %v9460_v42 = vld [vmem:[%s11384_s3 + $0x478] sm:$0xff] }
 0x5df   :  { %2047 = vmatpush2.msra.mxu0 %v9442_v4  ;;  %2118 = vmatpush2.msra.mxu1 %v9448_v43  ;;  %13058 = vst [vmem:[#allocation150_spill] sm:$0xff] %v9454_v58  ;;  %13059 = vst [vmem:[#allocation151_spill] sm:$0xff] %v9460_v42  ;;  %v9466_v4 = vld [vmem:[%s11384_s3 + $0x460] sm:$0xff]  ;;  %v9472_v43 = vld [vmem:[%s11384_s3 + $0x470] sm:$0xff] }
 0x5e0   :  { %2048 = vmatprep.subr.mxu0 %v9454_v58  ;;  %2119 = vmatprep.subr.mxu1 %v9460_v42  ;;  %13060 = vst [vmem:[#allocation152_spill] sm:$0xff] %v9466_v4  ;;  %13061 = vst [vmem:[#allocation153_spill] sm:$0xff] %v9472_v43  ;;  %v9478_v58 = vld [vmem:[%s11384_s3 + $0x428] sm:$0xff]  ;;  %v9484_v42 = vld [vmem:[%s11384_s3 + $0x438] sm:$0xff] }
 0x5e1   :  { %2049 = vmatpush2.msra.mxu0 %v9466_v4  ;;  %2120 = vmatpush2.msra.mxu1 %v9472_v43  ;;  %13062 = vst [vmem:[#allocation154_spill] sm:$0xff] %v9484_v42  ;;  %v9490_v4 = vld [vmem:[%s11384_s3 + $0x420] sm:$0xff]  ;;  %v9496_v43 = vld [vmem:[%s11384_s3 + $0x430] sm:$0xff] }
 0x5e2   :  { %2050 = vmatprep.subr.mxu0 %v9478_v58  ;;  %2121 = vmatprep.subr.mxu1 %v9484_v42  ;;  %13063 = vst [vmem:[#allocation155_spill] sm:$0xff] %v9490_v4  ;;  %13064 = vst [vmem:[#allocation156_spill] sm:$0xff] %v9496_v43  ;;  %v9504_v42 = vld [vmem:[%s11384_s3 + $0x3c8] sm:$0xff] }
 0x5e3   :  { %2051 = vmatpush2.msra.mxu0 %v9490_v4  ;;  %2122 = vmatpush2.msra.mxu1 %v9496_v43  ;;  %13065 = vst [vmem:[#allocation157_spill] sm:$0xff] %v9504_v42  ;;  %v9510_v4 = vld [vmem:[%s11384_s3 + $0x3d8] sm:$0xff]  ;;  %v9516_v43 = vld [vmem:[%s11384_s3 + $0x3c0] sm:$0xff] }
 0x5e4   :  { %2053 = vmatmul.mubr.f32.vlgmr.msra.gmra.mxu0 %v8739_v32  ;;  %2124 = vmatmul.mubr.f32.vlgmr.msra.gmra.mxu1 %v8739_v32  ;;  %13066 = vst [vmem:[#allocation158_spill] sm:$0xff] %v9510_v4  ;;  %13067 = vst [vmem:[#allocation159_spill] sm:$0xff] %v9516_v43  ;;  %v9522_v32 = vld [vmem:[%s11384_s3 + $0x3d0] sm:$0xff] }
 0x5e5   :  { %2209 = vmatprep.subr.mxu0 %v9504_v42  ;;  %2280 = vmatprep.subr.mxu1 %v9510_v4  ;;  %13068 = vst [vmem:[#allocation160_spill] sm:$0xff] %v9522_v32  ;;  %v9528_v42 = vld [vmem:[%s11384_s3 + $0x388] sm:$0xff]  ;;  %v9534_v4 = vld [vmem:[%s11384_s3 + $0x398] sm:$0xff] }
 0x5e6   :  { %2210 = vmatpush1.msra.mxu0 %v9516_v43  ;;  %2281 = vmatpush1.msra.mxu1 %v9522_v32  ;;  %13069 = vst [vmem:[#allocation161_spill] sm:$0xff] %v9528_v42  ;;  %13070 = vst [vmem:[#allocation162_spill] sm:$0xff] %v9534_v4  ;;  %v9540_v43 = vld [vmem:[%s11384_s3 + $0x380] sm:$0xff]  ;;  %v9546_v32 = vld [vmem:[%s11384_s3 + $0x390] sm:$0xff] }
 0x5e7   :  { %2211 = vmatprep.subr.mxu0 %v9528_v42  ;;  %2282 = vmatprep.subr.mxu1 %v9534_v4  ;;  %13071 = vst [vmem:[#allocation163_spill] sm:$0xff] %v9540_v43  ;;  %13072 = vst [vmem:[#allocation164_spill] sm:$0xff] %v9546_v32  ;;  %v9552_v42 = vld [vmem:[%s11384_s3 + $0x348] sm:$0xff]  ;;  %v9558_v4 = vld [vmem:[%s11384_s3 + $0x358] sm:$0xff] }
 0x5e8   :  { %2212 = vmatpush1.msra.mxu0 %v9540_v43  ;;  %2283 = vmatpush1.msra.mxu1 %v9546_v32  ;;  %13073 = vst [vmem:[#allocation165_spill] sm:$0xff] %v9552_v42  ;;  %13074 = vst [vmem:[#allocation166_spill] sm:$0xff] %v9558_v4  ;;  %v9564_v43 = vld [vmem:[%s11384_s3 + $0x340] sm:$0xff]  ;;  %v9570_v32 = vld [vmem:[%s11384_s3 + $0x350] sm:$0xff] }
 0x5e9   :  { %2213 = vmatprep.subr.mxu0 %v9552_v42  ;;  %2284 = vmatprep.subr.mxu1 %v9558_v4  ;;  %13075 = vst [vmem:[#allocation167_spill] sm:$0xff] %v9564_v43  ;;  %13076 = vst [vmem:[#allocation168_spill] sm:$0xff] %v9570_v32  ;;  %v9576_v42 = vld [vmem:[%s11384_s3 + $0x308] sm:$0xff]  ;;  %v9582_v4 = vld [vmem:[%s11384_s3 + $0x318] sm:$0xff] }
 0x5ea   :  { %2214 = vmatpush1.msra.mxu0 %v9564_v43  ;;  %2285 = vmatpush1.msra.mxu1 %v9570_v32  ;;  %13077 = vst [vmem:[#allocation169_spill] sm:$0xff] %v9576_v42  ;;  %13078 = vst [vmem:[#allocation170_spill] sm:$0xff] %v9582_v4  ;;  %v9588_v43 = vld [vmem:[%s11384_s3 + $0x300] sm:$0xff]  ;;  %v9594_v32 = vld [vmem:[%s11384_s3 + $0x310] sm:$0xff] }
 0x5eb   :  { %2215 = vmatprep.subr.mxu0 %v9576_v42  ;;  %2286 = vmatprep.subr.mxu1 %v9582_v4  ;;  %13079 = vst [vmem:[#allocation171_spill] sm:$0xff] %v9588_v43  ;;  %13080 = vst [vmem:[#allocation172_spill] sm:$0xff] %v9594_v32  ;;  %v9600_v42 = vld [vmem:[%s11384_s3 + $0x2c8] sm:$0xff]  ;;  %v9606_v4 = vld [vmem:[%s11384_s3 + $0x2d8] sm:$0xff] }
 0x5ec   :  { %2216 = vmatpush1.msra.mxu0 %v9588_v43  ;;  %2287 = vmatpush1.msra.mxu1 %v9594_v32  ;;  %13081 = vst [vmem:[#allocation173_spill] sm:$0xff] %v9600_v42  ;;  %13082 = vst [vmem:[#allocation174_spill] sm:$0xff] %v9606_v4  ;;  %v9612_v43 = vld [vmem:[%s11384_s3 + $0x2c0] sm:$0xff]  ;;  %v9618_v32 = vld [vmem:[%s11384_s3 + $0x2d0] sm:$0xff] }
 0x5ed   :  { %2217 = vmatprep.subr.mxu0 %v9600_v42  ;;  %2288 = vmatprep.subr.mxu1 %v9606_v4  ;;  %13083 = vst [vmem:[#allocation175_spill] sm:$0xff] %v9612_v43  ;;  %13084 = vst [vmem:[#allocation176_spill] sm:$0xff] %v9618_v32  ;;  %v9624_v42 = vld [vmem:[%s11384_s3 + $0x288] sm:$0xff]  ;;  %v9630_v4 = vld [vmem:[%s11384_s3 + $0x298] sm:$0xff] }
 0x5ee   :  { %2218 = vmatpush1.msra.mxu0 %v9612_v43  ;;  %2289 = vmatpush1.msra.mxu1 %v9618_v32  ;;  %13085 = vst [vmem:[#allocation177_spill] sm:$0xff] %v9624_v42  ;;  %13086 = vst [vmem:[#allocation178_spill] sm:$0xff] %v9630_v4  ;;  %v9636_v43 = vld [vmem:[%s11384_s3 + $0x280] sm:$0xff]  ;;  %v9642_v32 = vld [vmem:[%s11384_s3 + $0x290] sm:$0xff] }
 0x5ef   :  { %2219 = vmatprep.subr.mxu0 %v9624_v42  ;;  %2290 = vmatprep.subr.mxu1 %v9630_v4  ;;  %13087 = vst [vmem:[#allocation179_spill] sm:$0xff] %v9636_v43  ;;  %13088 = vst [vmem:[#allocation180_spill] sm:$0xff] %v9642_v32  ;;  %v9648_v42 = vld [vmem:[%s11384_s3 + $0x248] sm:$0xff]  ;;  %v9654_v4 = vld [vmem:[%s11384_s3 + $0x258] sm:$0xff] }
 0x5f0   :  { %2220 = vmatpush1.msra.mxu0 %v9636_v43  ;;  %2291 = vmatpush1.msra.mxu1 %v9642_v32  ;;  %13089 = vst [vmem:[#allocation181_spill] sm:$0xff] %v9648_v42  ;;  %13090 = vst [vmem:[#allocation182_spill] sm:$0xff] %v9654_v4  ;;  %v9660_v43 = vld [vmem:[%s11384_s3 + $0x240] sm:$0xff]  ;;  %v9666_v32 = vld [vmem:[%s11384_s3 + $0x250] sm:$0xff] }
 0x5f1   :  { %2221 = vmatprep.subr.mxu0 %v9648_v42  ;;  %2292 = vmatprep.subr.mxu1 %v9654_v4  ;;  %13091 = vst [vmem:[#allocation183_spill] sm:$0xff] %v9660_v43  ;;  %13092 = vst [vmem:[#allocation184_spill] sm:$0xff] %v9666_v32  ;;  %v9672_v42 = vld [vmem:[%s11384_s3 + $0x208] sm:$0xff]  ;;  %v9678_v4 = vld [vmem:[%s11384_s3 + $0x218] sm:$0xff] }
 0x5f2   :  { %2222 = vmatpush1.msra.mxu0 %v9660_v43  ;;  %2293 = vmatpush1.msra.mxu1 %v9666_v32  ;;  %13093 = vst [vmem:[#allocation185_spill] sm:$0xff] %v9672_v42  ;;  %13094 = vst [vmem:[#allocation186_spill] sm:$0xff] %v9678_v4  ;;  %v9684_v43 = vld [vmem:[%s11384_s3 + $0x200] sm:$0xff]  ;;  %v9690_v32 = vld [vmem:[%s11384_s3 + $0x210] sm:$0xff] }
 0x5f3   :  { %2223 = vmatprep.subr.mxu0 %v9672_v42  ;;  %2294 = vmatprep.subr.mxu1 %v9678_v4  ;;  %13095 = vst [vmem:[#allocation187_spill] sm:$0xff] %v9684_v43  ;;  %13096 = vst [vmem:[#allocation188_spill] sm:$0xff] %v9690_v32  ;;  %v9696_v42 = vld [vmem:[%s11384_s3 + $0x1c8] sm:$0xff]  ;;  %v9702_v4 = vld [vmem:[%s11384_s3 + $0x1d8] sm:$0xff] }
 0x5f4   :  { %2224 = vmatpush1.msra.mxu0 %v9684_v43  ;;  %2295 = vmatpush1.msra.mxu1 %v9690_v32  ;;  %13097 = vst [vmem:[#allocation189_spill] sm:$0xff] %v9696_v42  ;;  %13098 = vst [vmem:[#allocation190_spill] sm:$0xff] %v9702_v4  ;;  %v9708_v43 = vld [vmem:[%s11384_s3 + $0x1c0] sm:$0xff]  ;;  %v9714_v32 = vld [vmem:[%s11384_s3 + $0x1d0] sm:$0xff] }
 0x5f5   :  { %2225 = vmatprep.subr.mxu0 %v9696_v42  ;;  %2296 = vmatprep.subr.mxu1 %v9702_v4  ;;  %13099 = vst [vmem:[#allocation191_spill] sm:$0xff] %v9708_v43  ;;  %13100 = vst [vmem:[#allocation192_spill] sm:$0xff] %v9714_v32  ;;  %v9720_v42 = vld [vmem:[%s11384_s3 + $0x188] sm:$0xff]  ;;  %v9726_v4 = vld [vmem:[%s11384_s3 + $0x198] sm:$0xff] }
 0x5f6   :  { %2226 = vmatpush1.msra.mxu0 %v9708_v43  ;;  %2297 = vmatpush1.msra.mxu1 %v9714_v32  ;;  %13101 = vst [vmem:[#allocation193_spill] sm:$0xff] %v9720_v42  ;;  %13102 = vst [vmem:[#allocation194_spill] sm:$0xff] %v9726_v4  ;;  %v9732_v43 = vld [vmem:[%s11384_s3 + $0x180] sm:$0xff]  ;;  %v9738_v32 = vld [vmem:[%s11384_s3 + $0x190] sm:$0xff] }
 0x5f7   :  { %2227 = vmatprep.subr.mxu0 %v9720_v42  ;;  %2298 = vmatprep.subr.mxu1 %v9726_v4  ;;  %13103 = vst [vmem:[#allocation195_spill] sm:$0xff] %v9732_v43  ;;  %13104 = vst [vmem:[#allocation196_spill] sm:$0xff] %v9738_v32  ;;  %v9744_v42 = vld [vmem:[%s11384_s3 + $0x148] sm:$0xff]  ;;  %v9750_v4 = vld [vmem:[%s11384_s3 + $0x158] sm:$0xff] }
 0x5f8   :  { %2228 = vmatpush1.msra.mxu0 %v9732_v43  ;;  %2299 = vmatpush1.msra.mxu1 %v9738_v32  ;;  %13105 = vst [vmem:[#allocation197_spill] sm:$0xff] %v9744_v42  ;;  %13106 = vst [vmem:[#allocation198_spill] sm:$0xff] %v9750_v4  ;;  %v9756_v43 = vld [vmem:[%s11384_s3 + $0x140] sm:$0xff]  ;;  %v9762_v32 = vld [vmem:[%s11384_s3 + $0x150] sm:$0xff] }
 0x5f9   :  { %2229 = vmatprep.subr.mxu0 %v9744_v42  ;;  %2300 = vmatprep.subr.mxu1 %v9750_v4  ;;  %13107 = vst [vmem:[#allocation199_spill] sm:$0xff] %v9756_v43  ;;  %13108 = vst [vmem:[#allocation200_spill] sm:$0xff] %v9762_v32  ;;  %v9768_v42 = vld [vmem:[%s11384_s3 + $0x108] sm:$0xff]  ;;  %v9774_v4 = vld [vmem:[%s11384_s3 + $0x118] sm:$0xff] }
 0x5fa   :  { %2230 = vmatpush1.msra.mxu0 %v9756_v43  ;;  %2301 = vmatpush1.msra.mxu1 %v9762_v32  ;;  %13109 = vst [vmem:[#allocation201_spill] sm:$0xff] %v9768_v42  ;;  %13110 = vst [vmem:[#allocation202_spill] sm:$0xff] %v9774_v4  ;;  %v9780_v43 = vld [vmem:[%s11384_s3 + $0x100] sm:$0xff]  ;;  %v9786_v32 = vld [vmem:[%s11384_s3 + $0x110] sm:$0xff] }
 0x5fb   :  { %2231 = vmatprep.subr.mxu0 %v9768_v42  ;;  %2302 = vmatprep.subr.mxu1 %v9774_v4  ;;  %13111 = vst [vmem:[#allocation203_spill] sm:$0xff] %v9780_v43  ;;  %13112 = vst [vmem:[#allocation204_spill] sm:$0xff] %v9786_v32  ;;  %v9792_v42 = vld [vmem:[%s11384_s3 + $0xc8] sm:$0xff]  ;;  %v9798_v4 = vld [vmem:[%s11384_s3 + $0xd8] sm:$0xff] }
 0x5fc   :  { %2232 = vmatpush1.msra.mxu0 %v9780_v43  ;;  %2303 = vmatpush1.msra.mxu1 %v9786_v32  ;;  %13113 = vst [vmem:[#allocation205_spill] sm:$0xff] %v9792_v42  ;;  %13114 = vst [vmem:[#allocation206_spill] sm:$0xff] %v9798_v4  ;;  %v9804_v43 = vld [vmem:[%s11384_s3 + $0xc0] sm:$0xff]  ;;  %v9810_v32 = vld [vmem:[%s11384_s3 + $0xd0] sm:$0xff] }
 0x5fd   :  { %2233 = vmatprep.subr.mxu0 %v9792_v42  ;;  %2304 = vmatprep.subr.mxu1 %v9798_v4  ;;  %13115 = vst [vmem:[#allocation207_spill] sm:$0xff] %v9804_v43  ;;  %13116 = vst [vmem:[#allocation208_spill] sm:$0xff] %v9810_v32  ;;  %v9816_v42 = vld [vmem:[%s11384_s3 + $0x88] sm:$0xff]  ;;  %v9822_v4 = vld [vmem:[%s11384_s3 + $0x98] sm:$0xff] }
 0x5fe   :  { %2234 = vmatpush1.msra.mxu0 %v9804_v43  ;;  %2305 = vmatpush1.msra.mxu1 %v9810_v32  ;;  %13117 = vst [vmem:[#allocation209_spill] sm:$0xff] %v9816_v42  ;;  %13118 = vst [vmem:[#allocation210_spill] sm:$0xff] %v9822_v4  ;;  %v9828_v43 = vld [vmem:[%s11384_s3 + $0x80] sm:$0xff]  ;;  %v9834_v32 = vld [vmem:[%s11384_s3 + $0x90] sm:$0xff] }
 0x5ff   :  { %2235 = vmatprep.subr.mxu0 %v9816_v42  ;;  %2306 = vmatprep.subr.mxu1 %v9822_v4  ;;  %13119 = vst [vmem:[#allocation211_spill] sm:$0xff] %v9828_v43  ;;  %13120 = vst [vmem:[#allocation212_spill] sm:$0xff] %v9834_v32  ;;  %v9840_v42 = vld [vmem:[%s11384_s3 + $0x48] sm:$0xff]  ;;  %v9846_v4 = vld [vmem:[%s11384_s3 + $0x58] sm:$0xff] }
 0x600   :  { %2236 = vmatpush1.msra.mxu0 %v9828_v43  ;;  %2307 = vmatpush1.msra.mxu1 %v9834_v32  ;;  %13121 = vst [vmem:[#allocation213_spill] sm:$0xff] %v9840_v42  ;;  %13122 = vst [vmem:[#allocation214_spill] sm:$0xff] %v9846_v4  ;;  %v9852_v43 = vld [vmem:[%s11384_s3 + $0x40] sm:$0xff]  ;;  %v9858_v32 = vld [vmem:[%s11384_s3 + $0x50] sm:$0xff] }
 0x601   :  { %2237 = vmatprep.subr.mxu0 %v9840_v42  ;;  %2308 = vmatprep.subr.mxu1 %v9846_v4  ;;  %13123 = vst [vmem:[#allocation215_spill] sm:$0xff] %v9852_v43  ;;  %13124 = vst [vmem:[#allocation216_spill] sm:$0xff] %v9858_v32  ;;  %v9864_v42 = vld [vmem:[%s11384_s3 + $0x8] sm:$0xff]  ;;  %v9870_v4 = vld [vmem:[%s11384_s3 + $0x18] sm:$0xff] }
 0x602   :  { %2238 = vmatpush1.msra.mxu0 %v9852_v43  ;;  %2309 = vmatpush1.msra.mxu1 %v9858_v32  ;;  %13125 = vst [vmem:[#allocation217_spill] sm:$0xff] %v9864_v42  ;;  %13126 = vst [vmem:[#allocation218_spill] sm:$0xff] %v9870_v4  ;;  %v9876_v43 = vld [vmem:[%s11384_s3] sm:$0xff]  ;;  %v9882_v32 = vld [vmem:[%s11384_s3 + $0x10] sm:$0xff] }
 0x603   :  { %2239 = vmatprep.subr.mxu0 %v9864_v42  ;;  %2310 = vmatprep.subr.mxu1 %v9870_v4  ;;  %13127 = vst [vmem:[#allocation219_spill] sm:$0xff] %v9876_v43  ;;  %v9888_v42 = vld [vmem:[%s11384_s3 + $0x7c8] sm:$0xff]  ;;  %v9894_v4 = vld [vmem:[%s11384_s3 + $0x7d8] sm:$0xff] }
 0x604   :  { %2240 = vmatpush1.msra.mxu0 %v9876_v43  ;;  %2311 = vmatpush1.msra.mxu1 %v9882_v32  ;;  %v9900_v43 = vld [vmem:[%s11384_s3 + $0x7c0] sm:$0xff] }
 0x605   :  { %2241 = vmatprep.subr.mxu0 %v9888_v42  ;;  %2312 = vmatprep.subr.mxu1 %v9894_v4 }
 0x606   :  { %2242 = vmatpush2.msra.mxu0 %v9900_v43  ;;  %2313 = vmatpush2.msra.mxu1 %v8344_v46  ;;  %v13128_v46 = vld [vmem:[#allocation9_spill] sm:$0xff] }
 0x607   :  { %2243 = vmatprep.subr.mxu0 %v8350_v41  ;;  %2314 = vmatprep.subr.mxu1 %v8356_v60  ;;  %v13129_v41 = vld [vmem:[#allocation10_spill] sm:$0xff]  ;;  %v13130_v60 = vld [vmem:[#allocation11_spill] sm:$0xff] }
 0x608   :  { %2244 = vmatpush2.msra.mxu0 %v8362_v27  ;;  %2315 = vmatpush2.msra.mxu1 %v8368_v61  ;;  %v13131_v27 = vld [vmem:[#allocation12_spill] sm:$0xff]  ;;  %v13132_v61 = vld [vmem:[#allocation13_spill] sm:$0xff] }
 0x609   :  { %2245 = vmatprep.subr.mxu0 %v8374_v28  ;;  %2316 = vmatprep.subr.mxu1 %v8380_v22  ;;  %v13133_v28 = vld [vmem:[#allocation14_spill] sm:$0xff]  ;;  %v13134_v22 = vld [vmem:[#allocation15_spill] sm:$0xff] }
 0x60a   :  { %2246 = vmatpush2.msra.mxu0 %v8386_v49  ;;  %2317 = vmatpush2.msra.mxu1 %v8392_v50  ;;  %v13135_v49 = vld [vmem:[#allocation16_spill] sm:$0xff]  ;;  %v13136_v50 = vld [vmem:[#allocation17_spill] sm:$0xff] }
 0x60b   :  { %2247 = vmatprep.subr.mxu0 %v8398_v51  ;;  %2318 = vmatprep.subr.mxu1 %v8404_v52  ;;  %v13137_v51 = vld [vmem:[#allocation18_spill] sm:$0xff]  ;;  %v13138_v52 = vld [vmem:[#allocation19_spill] sm:$0xff] }
 0x60c   :  { %2248 = vmatpush2.msra.mxu0 %v8410_v24  ;;  %2319 = vmatpush2.msra.mxu1 %v8416_v16  ;;  %v13139_v24 = vld [vmem:[#allocation20_spill] sm:$0xff]  ;;  %v13140_v16 = vld [vmem:[#allocation21_spill] sm:$0xff] }
 0x60d   :  { %2249 = vmatprep.subr.mxu0 %v8422_v18  ;;  %2320 = vmatprep.subr.mxu1 %v8428_v63  ;;  %v13141_v18 = vld [vmem:[#allocation22_spill] sm:$0xff]  ;;  %v13142_v63 = vld [vmem:[#allocation23_spill] sm:$0xff] }
 0x60e   :  { %2250 = vmatpush2.msra.mxu0 %v8434_v17  ;;  %2321 = vmatpush2.msra.mxu1 %v8440_v7  ;;  %v13143_v17 = vld [vmem:[#allocation24_spill] sm:$0xff]  ;;  %v13144_v7 = vld [vmem:[#allocation29_spill] sm:$0xff] }
 0x60f   :  { %2251 = vmatprep.subr.mxu0 %v8446_v21  ;;  %2322 = vmatprep.subr.mxu1 %v8452_v55  ;;  %v13145_v21 = vld [vmem:[#allocation31_spill] sm:$0xff] }
 0x610   :  { %2252 = vmatpush2.msra.mxu0 %v8458_v23  ;;  %2323 = vmatpush2.msra.mxu1 %v8464_v11  ;;  %v13146_v55 = vld [vmem:[#allocation35_spill] sm:$0xff]  ;;  %v13147_v23 = vld [vmem:[#allocation36_spill] sm:$0xff]  ;;  %v13148_v11 = vld [vmem:[#allocation37_spill] sm:$0xff] }
 0x611   :  { %2253 = vmatprep.subr.mxu0 %v8470_v33  ;;  %2324 = vmatprep.subr.mxu1 %v8476_v1  ;;  %v13149_v33 = vld [vmem:[#allocation38_spill] sm:$0xff]  ;;  %v13150_v1 = vld [vmem:[#allocation39_spill] sm:$0xff] }
 0x612   :  { %2254 = vmatpush2.msra.mxu0 %v8482_v25  ;;  %2325 = vmatpush2.msra.mxu1 %v8488_v30  ;;  %v13151_v25 = vld [vmem:[#allocation40_spill] sm:$0xff]  ;;  %v13152_v30 = vld [vmem:[#allocation41_spill] sm:$0xff] }
 0x613   :  { %2255 = vmatprep.subr.mxu0 %v8494_v53  ;;  %2326 = vmatprep.subr.mxu1 %v8500_v9  ;;  %v13153_v53 = vld [vmem:[#allocation42_spill] sm:$0xff]  ;;  %v13154_v9 = vld [vmem:[#allocation43_spill] sm:$0xff] }
 0x614   :  { %2256 = vmatpush2.msra.mxu0 %v8506_v12  ;;  %2327 = vmatpush2.msra.mxu1 %v8512_v14  ;;  %v13155_v12 = vld [vmem:[#allocation44_spill] sm:$0xff]  ;;  %v13156_v14 = vld [vmem:[#allocation45_spill] sm:$0xff] }
 0x615   :  { %2257 = vmatprep.subr.mxu0 %v8518_v54  ;;  %2328 = vmatprep.subr.mxu1 %v8524_v56  ;;  %v13157_v54 = vld [vmem:[#allocation46_spill] sm:$0xff]  ;;  %v2135_v56 = vpop.permute.xlu1 %2134 }
 0x616   :  { %2258 = vmatpush2.msra.mxu0 %v8530_v2  ;;  %2329 = vmatpush2.msra.mxu1 %v8536_v10  ;;  %v13158_v10 = vld [vmem:[#allocation26_spill] sm:$0xff] }
 0x617   :  { %2259 = vmatprep.subr.mxu0 %v13128_v46  ;;  %2330 = vmatprep.subr.mxu1 %v13129_v41  ;;  %v2138_v46 = vmul.f32 %v2135_v56, %v13158_v10  ;;  %v13159_v41 = vld [vmem:[#allocation25_spill] sm:$0xff] }
 0x618   :  { %2260 = vmatpush2.msra.mxu0 %v13130_v60  ;;  %2331 = vmatpush2.msra.mxu1 %v13131_v27  ;;  %v2137_v60 = vmul.f32 %v2135_v56, %v13159_v41 }
 0x619   :  { %2261 = vmatprep.subr.mxu0 %v13132_v61  ;;  %2332 = vmatprep.subr.mxu1 %v13133_v28  ;;  %v2142_v61 = vadd.f32 %v2138_v46, %v12750_v0 }
 0x61a   :  { %2262 = vmatpush2.msra.mxu0 %v13134_v22  ;;  %2333 = vmatpush2.msra.mxu1 %v13135_v49  ;;  %v2141_v28 = vadd.f32 %v2137_v60, %v12329_v35 }
 0x61b   :  { %2263 = vmatprep.subr.mxu0 %v13136_v50  ;;  %2334 = vmatprep.subr.mxu1 %v13137_v51 }
 0x61c   :  { %2264 = vmatpush2.msra.mxu0 %v13138_v52  ;;  %2335 = vmatpush2.msra.mxu1 %v13139_v24 }
 0x61d   :  { %2265 = vmatprep.subr.mxu0 %v13140_v16  ;;  %2336 = vmatprep.subr.mxu1 %v13141_v18 }
 0x61e   :  { %2266 = vmatpush2.msra.mxu0 %v13142_v63  ;;  %2337 = vmatpush2.msra.mxu1 %v13143_v17 }
 0x61f   :  { %2267 = vmatprep.subr.mxu0 %v13144_v7  ;;  %2338 = vmatprep.subr.mxu1 %v13145_v21  ;;  %v13160_v21 = vld [vmem:[#allocation30_spill] sm:$0xff] }
 0x620   :  { %2268 = vmatpush2.msra.mxu0 %v13146_v55  ;;  %2339 = vmatpush2.msra.mxu1 %v13147_v23  ;;  %v2140_v55 = vmul.f32 %v2135_v56, %v13160_v21 }
 0x621   :  { %2269 = vmatprep.subr.mxu0 %v13148_v11  ;;  %2340 = vmatprep.subr.mxu1 %v13149_v33 }
 0x622   :  { %2270 = vmatpush2.msra.mxu0 %v13150_v1  ;;  %2341 = vmatpush2.msra.mxu1 %v13151_v25  ;;  %v2139_v1 = vmul.f32 %v2135_v56, %v5012_v5  ;;  %v2144_v25 = vadd.f32 %v2140_v55, %v12337_v20 }
 0x623   :  { %2271 = vmatprep.subr.mxu0 %v13152_v30  ;;  %2342 = vmatprep.subr.mxu1 %v13153_v53 }
 0x624   :  { %2272 = vmatpush2.msra.mxu0 %v13154_v9  ;;  %2343 = vmatpush2.msra.mxu1 %v13155_v12 }
 0x625   :  { %2351 = vmatprep.subr.mxu0 %v13156_v14  ;;  %2422 = vmatprep.subr.mxu1 %v13157_v54  ;;  %v2143_v14 = vadd.f32 %v2139_v1, %v5016_v59 }
 0x663   :  { %v1912_v2 = vpop.f32.mrf.mxu0  ;;  %v1983_v52 = vpop.f32.mrf.mxu1 }
 0x664   :  { %v2145_v49 = vadd.f32 %v2141_v28, %v1912_v2  ;;  %v2147_v46 = vadd.f32 %v2143_v14, %v1983_v52 }
 0x665   :  { %v1914_v27 = vpop.f32.mrf.mxu0  ;;  %v1985_v63 = vpop.f32.mrf.mxu1 }
 0x666   :  { %v2146_v22 = vadd.f32 %v2142_v61, %v1914_v27  ;;  %v3233_v51 = vmul.f32 -1.442695, %v2145_v49  ;;  %v2148_v12 = vadd.f32 %v2144_v25, %v1985_v63 }
 0x668   :  { %v3234_v50 = vmul.f32 -1.442695, %v2146_v22  ;;  %v3235_v60 = vmul.f32 -1.442695, %v2148_v12 }
 0x66a   :  { %3458 = vpow2.f32 %v3234_v50 }
 0x66b   :  { %3460 = vpow2.f32 %v3233_v51 }
 0x677   :  { %v3459_v33 = vpop.eup %3458 }
 0x678   :  { %v3461_v53 = vpop.eup %3460  ;;  %v2159_v9 = vadd.f32 1.0, %v3459_v33 }
 0x679   :  { %v2153_v2 = vadd.f32 1.0, %v3461_v53 }
 0x6a4   :  { %v2054_v24 = vpop.f32.mrf.mxu0  ;;  %v2125_v23 = vpop.f32.mrf.mxu1 }
 0x6a5   :  { %v2174_v16 = vadd.f32 %v2054_v24, %v6263_v44  ;;  %v2176_v56 = vadd.f32 %v2125_v23, %v6288_v36 }
 0x6a6   :  { %v2056_v18 = vpop.f32.mrf.mxu0  ;;  %v2127_v30 = vpop.f32.mrf.mxu1 }
 0x6a7   :  { %v3236_v17 = vmul.f32 -1.442695, %v2174_v16  ;;  %v2175_v7 = vadd.f32 %v2056_v18, %v6269_v48  ;;  %v2177_v54 = vadd.f32 %v2127_v30, %v6282_v19 }
 0x6a9   :  { %3462 = vpow2.f32 %v3236_v17  ;;  %v3237_v11 = vmul.f32 -1.442695, %v2175_v7  ;;  %v3238_v27 = vmul.f32 -1.442695, %v2177_v54 }
 0x6ab   :  { %3464 = vpow2.f32 %v3237_v11 }
 0x6ac   :  { %3466 = vrcp.f32 %v2159_v9 }
 0x6ad   :  { %3468 = vrcp.f32 %v2153_v2  ;;  %v13177_v2 = vld [vmem:[#allocation63_spill] sm:$0xff] }
 0x6ae   :  { %3470 = vtanh.f32 %v2147_v46  ;;  %v13178_v46 = vld [vmem:[#allocation64_spill] sm:$0xff] }
 0x6af   :  { %3472 = vpow2.f32 %v3235_v60  ;;  %v13179_v60 = vld [vmem:[#allocation65_spill] sm:$0xff] }
 0x6b0   :  { %3474 = vpow2.f32 %v3238_v27  ;;  %v13180_v27 = vld [vmem:[#allocation66_spill] sm:$0xff] }
 0x6b6   :  { %v3463_v61 = vpop.eup %3462 }
 0x6b7   :  { %v2182_v28 = vadd.f32 1.0, %v3463_v61  ;;  %v13181_v61 = vld [vmem:[#allocation67_spill] sm:$0xff] }
 0x6b8   :  { %v3465_v22 = vpop.eup %3464 }
 0x6b9   :  { %3476 = vrcp.f32 %v2182_v28  ;;  %v2188_v49 = vadd.f32 1.0, %v3465_v22  ;;  %v3467_v50 = vpop.eup %3466  ;;  %v13183_v28 = vld [vmem:[#allocation69_spill] sm:$0xff]  ;;  %v13184_v22 = vld [vmem:[#allocation70_spill] sm:$0xff] }
 0x6ba   :  { %3478 = vtanh.f32 %v2176_v56  ;;  %v3469_v51 = vpop.eup %3468  ;;  %v2169_v52 = vmul.f32 %v3467_v50, %v8732_v38  ;;  %v13182_v56 = vld [vmem:[#allocation68_spill] sm:$0xff] }
 0x6bb   :  { %3480 = vrcp.f32 %v2188_v49  ;;  %v3471_v24 = vpop.eup %3470  ;;  %v13185_v49 = vld [vmem:[#allocation71_spill] sm:$0xff]  ;;  %v13186_v50 = vld [vmem:[#allocation72_spill] sm:$0xff] }
 0x6bc   :  { %v3473_v16 = vpop.eup %3472  ;;  %v2170_v63 = vmul.f32 %v3471_v24, %v3469_v51  ;;  %v13187_v51 = vld [vmem:[#allocation73_spill] sm:$0xff]  ;;  %v13188_v24 = vld [vmem:[#allocation74_spill] sm:$0xff] }
 0x6bd   :  { %v3475_v18 = vpop.eup %3474  ;;  %v2166_v25 = vadd.f32 1.0, %v3473_v16  ;;  %v13190_v16 = vld [vmem:[#allocation76_spill] sm:$0xff] }
 0x6be   :  { %v9979_v55 = vadd.f32 %v2170_v63, %v2169_v52  ;;  %v2195_v11 = vadd.f32 1.0, %v3475_v18  ;;  %v13189_v52 = vld [vmem:[#allocation75_spill] sm:$0xff]  ;;  %v13191_v18 = vld [vmem:[#allocation77_spill] sm:$0xff]  ;;  %v13192_v63 = vld [vmem:[#allocation78_spill] sm:$0xff] }
 0x6c0   :  { %3482 = vtanh.f32 %v9979_v55 }
 0x6c1   :  { %3484 = vrcp.f32 %v2195_v11  ;;  %v13196_v11 = vld [vmem:[#allocation82_spill] sm:$0xff] }
 0x6c6   :  { %v3477_v17 = vpop.eup %3476 }
 0x6c7   :  { %v3479_v7 = vpop.eup %3478 }
 0x6c8   :  { %v3481_v23 = vpop.eup %3480  ;;  %v2199_v33 = vmul.f32 %v3479_v7, %v3477_v17  ;;  %v13193_v17 = vld [vmem:[#allocation79_spill] sm:$0xff]  ;;  %v13194_v7 = vld [vmem:[#allocation80_spill] sm:$0xff] }
 0x6c9   :  { %v2198_v1 = vmul.f32 %v3481_v23, %v8735_v15  ;;  %v13161_v15 = vld [vmem:[#allocation47_spill] sm:$0xff]  ;;  %v13195_v23 = vld [vmem:[#allocation81_spill] sm:$0xff] }
 0x6cb   :  { %v9982_v30 = vadd.f32 %v2199_v33, %v2198_v1  ;;  %v13197_v33 = vld [vmem:[#allocation83_spill] sm:$0xff]  ;;  %v13198_v1 = vld [vmem:[#allocation84_spill] sm:$0xff] }
 0x6cd   :  { %3486 = vtanh.f32 %v9982_v30  ;;  %v3483_v38 = vpop.eup %3482 }
 0x6ce   :  { %3488 = vrcp.f32 %v2166_v25  ;;  %v3485_v53 = vpop.eup %3484  ;;  %v13199_v25 = vld [vmem:[#allocation85_spill] sm:$0xff] }
 0x6da   :  { %v3487_v9 = vpop.eup %3486 }
 0x6db   :  { %v3489_v12 = vpop.eup %3488  ;;  %v2202_v14 = vmul.f32 %v3487_v9, %v3485_v53  ;;  %v13201_v53 = vld [vmem:[#allocation87_spill] sm:$0xff]  ;;  %v13202_v9 = vld [vmem:[#allocation88_spill] sm:$0xff] }
 0x6dc   :  { %v9986_v54 = vmul.f32 %v3489_v12, %v3483_v38  ;;  %v13200_v38 = vld [vmem:[#allocation86_spill] sm:$0xff]  ;;  %v13203_v12 = vld [vmem:[#allocation89_spill] sm:$0xff] }
 0x6dd   :  { %2273 = vmatprep.mubr.f32.mxu0 %v2202_v14  ;;  %2344 = vmatprep.mubr.f32.mxu1 %v2202_v14 }
 0x6de   :  { %2274 = vmatmul.mubr.f32.vlgmr.msra.gmra.mxu0 %v9986_v54  ;;  %2345 = vmatmul.mubr.f32.vlgmr.msra.gmra.mxu1 %v9986_v54 }
 0x6df   :  { %2352 = vmatpush1.msra.mxu0 %v8746_v47  ;;  %2423 = vmatpush1.msra.mxu1 %v8752_v57  ;;  %v13162_v47 = vld [vmem:[#allocation48_spill] sm:$0xff]  ;;  %v13163_v57 = vld [vmem:[#allocation49_spill] sm:$0xff] }
 0x6e0   :  { %2353 = vmatprep.subr.mxu0 %v8758_v62  ;;  %2415 = vmatprep.mubr.f32.mxu0 %v2202_v14  ;;  %v13164_v62 = vld [vmem:[#allocation50_spill] sm:$0xff] }
 0x6e1   :  { %2424 = vmatprep.subr.mxu1 %v8764_v6  ;;  %2486 = vmatprep.mubr.f32.mxu1 %v2202_v14  ;;  %v13165_v6 = vld [vmem:[#allocation51_spill] sm:$0xff]  ;;  %v13204_v14 = vld [vmem:[#allocation90_spill] sm:$0xff] }
 0x6e2   :  { %2354 = vmatpush1.msra.mxu0 %v8770_v31  ;;  %2425 = vmatpush1.msra.mxu1 %v8776_v34  ;;  %v13166_v31 = vld [vmem:[#allocation52_spill] sm:$0xff]  ;;  %v13167_v34 = vld [vmem:[#allocation53_spill] sm:$0xff] }
 0x6e3   :  { %2355 = vmatprep.subr.mxu0 %v8782_v8  ;;  %2426 = vmatprep.subr.mxu1 %v8788_v3  ;;  %v13168_v8 = vld [vmem:[#allocation54_spill] sm:$0xff]  ;;  %v13169_v3 = vld [vmem:[#allocation55_spill] sm:$0xff] }
 0x6e4   :  { %2356 = vmatpush1.msra.mxu0 %v8794_v37  ;;  %2427 = vmatpush1.msra.mxu1 %v8800_v26  ;;  %v13170_v37 = vld [vmem:[#allocation56_spill] sm:$0xff]  ;;  %v13171_v26 = vld [vmem:[#allocation57_spill] sm:$0xff] }
 0x6e5   :  { %2357 = vmatprep.subr.mxu0 %v8806_v29  ;;  %2428 = vmatprep.subr.mxu1 %v8812_v45  ;;  %v13172_v29 = vld [vmem:[#allocation58_spill] sm:$0xff]  ;;  %v13173_v45 = vld [vmem:[#allocation59_spill] sm:$0xff] }
 0x6e6   :  { %2358 = vmatpush1.msra.mxu0 %v8818_v39  ;;  %2429 = vmatpush1.msra.mxu1 %v8824_v13  ;;  %v13174_v39 = vld [vmem:[#allocation60_spill] sm:$0xff]  ;;  %v13175_v13 = vld [vmem:[#allocation61_spill] sm:$0xff] }
 0x6e7   :  { %2359 = vmatprep.subr.mxu0 %v8830_v40  ;;  %2430 = vmatprep.subr.mxu1 %v13161_v15  ;;  %v13176_v40 = vld [vmem:[#allocation62_spill] sm:$0xff]  ;;  %v13205_v15 = vld [vmem:[#allocation91_spill] sm:$0xff] }
 0x6e8   :  { %2360 = vmatpush1.msra.mxu0 %v13162_v47  ;;  %2431 = vmatpush1.msra.mxu1 %v13163_v57  ;;  %v13206_v47 = vld [vmem:[#allocation92_spill] sm:$0xff]  ;;  %v13207_v57 = vld [vmem:[#allocation93_spill] sm:$0xff] }
 0x6e9   :  { %2361 = vmatprep.subr.mxu0 %v13164_v62  ;;  %2432 = vmatprep.subr.mxu1 %v13165_v6  ;;  %v13208_v62 = vld [vmem:[#allocation94_spill] sm:$0xff]  ;;  %v13209_v6 = vld [vmem:[#allocation95_spill] sm:$0xff] }
 0x6ea   :  { %2362 = vmatpush1.msra.mxu0 %v13166_v31  ;;  %2433 = vmatpush1.msra.mxu1 %v13167_v34  ;;  %v13210_v31 = vld [vmem:[#allocation96_spill] sm:$0xff]  ;;  %v13211_v34 = vld [vmem:[#allocation97_spill] sm:$0xff] }
 0x6eb   :  { %2363 = vmatprep.subr.mxu0 %v13168_v8  ;;  %2434 = vmatprep.subr.mxu1 %v13169_v3  ;;  %v13212_v8 = vld [vmem:[#allocation98_spill] sm:$0xff]  ;;  %v13213_v3 = vld [vmem:[#allocation99_spill] sm:$0xff] }
 0x6ec   :  { %2364 = vmatpush1.msra.mxu0 %v13170_v37  ;;  %2435 = vmatpush1.msra.mxu1 %v13171_v26  ;;  %v13214_v37 = vld [vmem:[#allocation100_spill] sm:$0xff]  ;;  %v13215_v26 = vld [vmem:[#allocation101_spill] sm:$0xff] }
 0x6ed   :  { %2365 = vmatprep.subr.mxu0 %v13172_v29  ;;  %2436 = vmatprep.subr.mxu1 %v13173_v45  ;;  %v13216_v29 = vld [vmem:[#allocation102_spill] sm:$0xff]  ;;  %v13217_v45 = vld [vmem:[#allocation103_spill] sm:$0xff] }
 0x6ee   :  { %2366 = vmatpush1.msra.mxu0 %v13174_v39  ;;  %2437 = vmatpush1.msra.mxu1 %v13175_v13  ;;  %v13218_v39 = vld [vmem:[#allocation104_spill] sm:$0xff]  ;;  %v13219_v13 = vld [vmem:[#allocation105_spill] sm:$0xff] }
 0x6ef   :  { %2367 = vmatprep.subr.mxu0 %v13176_v40  ;;  %2438 = vmatprep.subr.mxu1 %v13177_v2  ;;  %v13220_v40 = vld [vmem:[#allocation106_spill] sm:$0xff]  ;;  %v13221_v2 = vld [vmem:[#allocation107_spill] sm:$0xff] }
 0x6f0   :  { %2368 = vmatpush1.msra.mxu0 %v13178_v46  ;;  %2439 = vmatpush1.msra.mxu1 %v13179_v60  ;;  %v13222_v46 = vld [vmem:[#allocation108_spill] sm:$0xff]  ;;  %v13223_v60 = vld [vmem:[#allocation109_spill] sm:$0xff] }
 0x6f1   :  { %2369 = vmatprep.subr.mxu0 %v13180_v27  ;;  %2440 = vmatprep.subr.mxu1 %v13181_v61  ;;  %v13224_v27 = vld [vmem:[#allocation110_spill] sm:$0xff]  ;;  %v13225_v61 = vld [vmem:[#allocation111_spill] sm:$0xff] }
 0x6f2   :  { %2370 = vmatpush1.msra.mxu0 %v13182_v56  ;;  %2441 = vmatpush1.msra.mxu1 %v13183_v28  ;;  %v13226_v56 = vld [vmem:[#allocation112_spill] sm:$0xff]  ;;  %v13227_v28 = vld [vmem:[#allocation113_spill] sm:$0xff] }
 0x6f3   :  { %2371 = vmatprep.subr.mxu0 %v13184_v22  ;;  %2442 = vmatprep.subr.mxu1 %v13185_v49  ;;  %v13228_v22 = vld [vmem:[#allocation114_spill] sm:$0xff]  ;;  %v13229_v49 = vld [vmem:[#allocation115_spill] sm:$0xff] }
 0x6f4   :  { %2372 = vmatpush1.msra.mxu0 %v13186_v50  ;;  %2443 = vmatpush1.msra.mxu1 %v13187_v51  ;;  %v13230_v50 = vld [vmem:[#allocation116_spill] sm:$0xff]  ;;  %v13231_v51 = vld [vmem:[#allocation117_spill] sm:$0xff] }
 0x6f5   :  { %2373 = vmatprep.subr.mxu0 %v13188_v24  ;;  %2444 = vmatprep.subr.mxu1 %v13189_v52  ;;  %v13232_v24 = vld [vmem:[#allocation118_spill] sm:$0xff]  ;;  %v13233_v52 = vld [vmem:[#allocation119_spill] sm:$0xff] }
 0x6f6   :  { %2374 = vmatpush1.msra.mxu0 %v13190_v16  ;;  %2445 = vmatpush1.msra.mxu1 %v13191_v18  ;;  %v13234_v16 = vld [vmem:[#allocation120_spill] sm:$0xff]  ;;  %v13235_v18 = vld [vmem:[#allocation121_spill] sm:$0xff] }
 0x6f7   :  { %2375 = vmatprep.subr.mxu0 %v13192_v63  ;;  %2446 = vmatprep.subr.mxu1 %v13193_v17  ;;  %v13236_v63 = vld [vmem:[#allocation122_spill] sm:$0xff]  ;;  %v13237_v17 = vld [vmem:[#allocation123_spill] sm:$0xff] }
 0x6f8   :  { %2376 = vmatpush1.msra.mxu0 %v13194_v7  ;;  %2447 = vmatpush1.msra.mxu1 %v13195_v23  ;;  %v13238_v7 = vld [vmem:[#allocation124_spill] sm:$0xff]  ;;  %v13239_v23 = vld [vmem:[#allocation125_spill] sm:$0xff] }
 0x6f9   :  { %2377 = vmatprep.subr.mxu0 %v13196_v11  ;;  %2448 = vmatprep.subr.mxu1 %v13197_v33  ;;  %v13240_v11 = vld [vmem:[#allocation126_spill] sm:$0xff]  ;;  %v13241_v33 = vld [vmem:[#allocation127_spill] sm:$0xff] }
 0x6fa   :  { %2378 = vmatpush1.msra.mxu0 %v13198_v1  ;;  %2449 = vmatpush1.msra.mxu1 %v13199_v25  ;;  %v13242_v1 = vld [vmem:[#allocation128_spill] sm:$0xff]  ;;  %v13243_v25 = vld [vmem:[#allocation129_spill] sm:$0xff] }
 0x6fb   :  { %2379 = vmatprep.subr.mxu0 %v13200_v38  ;;  %2450 = vmatprep.subr.mxu1 %v13201_v53  ;;  %v13244_v38 = vld [vmem:[#allocation130_spill] sm:$0xff]  ;;  %v13245_v53 = vld [vmem:[#allocation131_spill] sm:$0xff] }
 0x6fc   :  { %2380 = vmatpush1.msra.mxu0 %v13202_v9  ;;  %2451 = vmatpush1.msra.mxu1 %v13203_v12  ;;  %v13246_v9 = vld [vmem:[#allocation132_spill] sm:$0xff]  ;;  %v13247_v12 = vld [vmem:[#allocation133_spill] sm:$0xff] }
 0x6fd   :  { %2381 = vmatprep.subr.mxu0 %v13204_v14  ;;  %2452 = vmatprep.subr.mxu1 %v13205_v15  ;;  %v13248_v14 = vld [vmem:[#allocation134_spill] sm:$0xff]  ;;  %v13249_v15 = vld [vmem:[#allocation135_spill] sm:$0xff] }
 0x6fe   :  { %2382 = vmatpush1.msra.mxu0 %v13206_v47  ;;  %2453 = vmatpush1.msra.mxu1 %v13207_v57  ;;  %v13250_v47 = vld [vmem:[#allocation136_spill] sm:$0xff]  ;;  %v13251_v57 = vld [vmem:[#allocation137_spill] sm:$0xff] }
 0x6ff   :  { %2383 = vmatprep.subr.mxu0 %v13208_v62  ;;  %2454 = vmatprep.subr.mxu1 %v13209_v6  ;;  %v13252_v62 = vld [vmem:[#allocation138_spill] sm:$0xff]  ;;  %v13253_v6 = vld [vmem:[#allocation139_spill] sm:$0xff] }
 0x700   :  { %2384 = vmatpush2.msra.mxu0 %v13210_v31  ;;  %2455 = vmatpush2.msra.mxu1 %v13211_v34  ;;  %v13254_v31 = vld [vmem:[#allocation140_spill] sm:$0xff]  ;;  %v13255_v34 = vld [vmem:[#allocation141_spill] sm:$0xff] }
 0x701   :  { %2385 = vmatprep.subr.mxu0 %v13212_v8  ;;  %2456 = vmatprep.subr.mxu1 %v13213_v3  ;;  %v13256_v8 = vld [vmem:[#allocation142_spill] sm:$0xff]  ;;  %v13257_v3 = vld [vmem:[#allocation143_spill] sm:$0xff] }
 0x702   :  { %2386 = vmatpush2.msra.mxu0 %v13214_v37  ;;  %2457 = vmatpush2.msra.mxu1 %v13215_v26  ;;  %v13258_v37 = vld [vmem:[#allocation144_spill] sm:$0xff]  ;;  %v13259_v26 = vld [vmem:[#allocation145_spill] sm:$0xff] }
 0x703   :  { %2387 = vmatprep.subr.mxu0 %v13216_v29  ;;  %2458 = vmatprep.subr.mxu1 %v13217_v45  ;;  %v13260_v29 = vld [vmem:[#allocation146_spill] sm:$0xff]  ;;  %v13261_v45 = vld [vmem:[#allocation147_spill] sm:$0xff] }
 0x704   :  { %2388 = vmatpush2.msra.mxu0 %v13218_v39  ;;  %2459 = vmatpush2.msra.mxu1 %v13219_v13  ;;  %v13262_v39 = vld [vmem:[#allocation148_spill] sm:$0xff]  ;;  %v13263_v13 = vld [vmem:[#allocation149_spill] sm:$0xff] }
 0x705   :  { %2389 = vmatprep.subr.mxu0 %v13220_v40  ;;  %2460 = vmatprep.subr.mxu1 %v13221_v2  ;;  %v13264_v40 = vld [vmem:[#allocation150_spill] sm:$0xff]  ;;  %v13265_v2 = vld [vmem:[#allocation151_spill] sm:$0xff] }
 0x706   :  { %2390 = vmatpush2.msra.mxu0 %v13222_v46  ;;  %2461 = vmatpush2.msra.mxu1 %v13223_v60  ;;  %v13266_v46 = vld [vmem:[#allocation152_spill] sm:$0xff]  ;;  %v13267_v60 = vld [vmem:[#allocation153_spill] sm:$0xff] }
 0x707   :  { %2391 = vmatprep.subr.mxu0 %v13224_v27  ;;  %2462 = vmatprep.subr.mxu1 %v13225_v61  ;;  %v13268_v27 = vld [vmem:[#allocation154_spill] sm:$0xff]  ;;  %v13269_v61 = vld [vmem:[#allocation155_spill] sm:$0xff] }
 0x708   :  { %2392 = vmatpush2.msra.mxu0 %v13226_v56  ;;  %2463 = vmatpush2.msra.mxu1 %v13227_v28  ;;  %v13270_v56 = vld [vmem:[#allocation156_spill] sm:$0xff]  ;;  %v13271_v28 = vld [vmem:[#allocation157_spill] sm:$0xff] }
 0x709   :  { %2393 = vmatprep.subr.mxu0 %v13228_v22  ;;  %2464 = vmatprep.subr.mxu1 %v13229_v49  ;;  %v13272_v22 = vld [vmem:[#allocation158_spill] sm:$0xff]  ;;  %v13273_v49 = vld [vmem:[#allocation159_spill] sm:$0xff] }
 0x70a   :  { %2394 = vmatpush2.msra.mxu0 %v13230_v50  ;;  %2465 = vmatpush2.msra.mxu1 %v13231_v51  ;;  %v13274_v50 = vld [vmem:[#allocation160_spill] sm:$0xff]  ;;  %v13275_v51 = vld [vmem:[#allocation161_spill] sm:$0xff] }
 0x70b   :  { %2395 = vmatprep.subr.mxu0 %v13232_v24  ;;  %2466 = vmatprep.subr.mxu1 %v13233_v52  ;;  %v13277_v24 = vld [vmem:[#allocation163_spill] sm:$0xff]  ;;  %v13278_v52 = vld [vmem:[#allocation164_spill] sm:$0xff] }
 0x70c   :  { %2396 = vmatpush2.msra.mxu0 %v13234_v16  ;;  %2467 = vmatpush2.msra.mxu1 %v13235_v18  ;;  %v13279_v16 = vld [vmem:[#allocation165_spill] sm:$0xff]  ;;  %v13280_v18 = vld [vmem:[#allocation166_spill] sm:$0xff] }
 0x70d   :  { %2397 = vmatprep.subr.mxu0 %v13236_v63  ;;  %2468 = vmatprep.subr.mxu1 %v13237_v17  ;;  %v13282_v63 = vld [vmem:[#allocation168_spill] sm:$0xff]  ;;  %v13283_v17 = vld [vmem:[#allocation169_spill] sm:$0xff] }
 0x70e   :  { %2398 = vmatpush2.msra.mxu0 %v13238_v7  ;;  %2469 = vmatpush2.msra.mxu1 %v13239_v23  ;;  %v13284_v7 = vld [vmem:[#allocation170_spill] sm:$0xff]  ;;  %v13285_v23 = vld [vmem:[#allocation171_spill] sm:$0xff] }
 0x70f   :  { %2399 = vmatprep.subr.mxu0 %v13240_v11  ;;  %2470 = vmatprep.subr.mxu1 %v13241_v33  ;;  %v13286_v11 = vld [vmem:[#allocation172_spill] sm:$0xff]  ;;  %v13287_v33 = vld [vmem:[#allocation173_spill] sm:$0xff] }
 0x710   :  { %2400 = vmatpush2.msra.mxu0 %v13242_v1  ;;  %2471 = vmatpush2.msra.mxu1 %v13243_v25  ;;  %v13288_v1 = vld [vmem:[#allocation174_spill] sm:$0xff]  ;;  %v13289_v25 = vld [vmem:[#allocation175_spill] sm:$0xff] }
 0x711   :  { %2401 = vmatprep.subr.mxu0 %v13244_v38  ;;  %2472 = vmatprep.subr.mxu1 %v13245_v53  ;;  %v13290_v38 = vld [vmem:[#allocation176_spill] sm:$0xff]  ;;  %v13291_v53 = vld [vmem:[#allocation177_spill] sm:$0xff] }
 0x712   :  { %2402 = vmatpush2.msra.mxu0 %v13246_v9  ;;  %2473 = vmatpush2.msra.mxu1 %v13247_v12  ;;  %v13292_v9 = vld [vmem:[#allocation178_spill] sm:$0xff]  ;;  %v13293_v12 = vld [vmem:[#allocation179_spill] sm:$0xff] }
 0x713   :  { %2403 = vmatprep.subr.mxu0 %v13248_v14  ;;  %2474 = vmatprep.subr.mxu1 %v13249_v15  ;;  %v13294_v14 = vld [vmem:[#allocation180_spill] sm:$0xff]  ;;  %v13295_v15 = vld [vmem:[#allocation181_spill] sm:$0xff] }
 0x714   :  { %2404 = vmatpush2.msra.mxu0 %v13250_v47  ;;  %2475 = vmatpush2.msra.mxu1 %v13251_v57  ;;  %v13296_v47 = vld [vmem:[#allocation182_spill] sm:$0xff]  ;;  %v13297_v57 = vld [vmem:[#allocation183_spill] sm:$0xff] }
 0x715   :  { %2405 = vmatprep.subr.mxu0 %v13252_v62  ;;  %2476 = vmatprep.subr.mxu1 %v13253_v6  ;;  %v13298_v62 = vld [vmem:[#allocation184_spill] sm:$0xff]  ;;  %v13299_v6 = vld [vmem:[#allocation185_spill] sm:$0xff] }
 0x716   :  { %2406 = vmatpush2.msra.mxu0 %v13254_v31  ;;  %2477 = vmatpush2.msra.mxu1 %v13255_v34  ;;  %v13300_v31 = vld [vmem:[#allocation186_spill] sm:$0xff]  ;;  %v13301_v34 = vld [vmem:[#allocation187_spill] sm:$0xff] }
 0x717   :  { %2407 = vmatprep.subr.mxu0 %v13256_v8  ;;  %2478 = vmatprep.subr.mxu1 %v13257_v3  ;;  %v13302_v8 = vld [vmem:[#allocation188_spill] sm:$0xff]  ;;  %v13303_v3 = vld [vmem:[#allocation189_spill] sm:$0xff] }
 0x718   :  { %2408 = vmatpush2.msra.mxu0 %v13258_v37  ;;  %2479 = vmatpush2.msra.mxu1 %v13259_v26  ;;  %v13304_v37 = vld [vmem:[#allocation190_spill] sm:$0xff]  ;;  %v13305_v26 = vld [vmem:[#allocation191_spill] sm:$0xff] }
 0x719   :  { %2409 = vmatprep.subr.mxu0 %v13260_v29  ;;  %2480 = vmatprep.subr.mxu1 %v13261_v45  ;;  %v13306_v29 = vld [vmem:[#allocation192_spill] sm:$0xff]  ;;  %v13307_v45 = vld [vmem:[#allocation193_spill] sm:$0xff] }
 0x71a   :  { %2410 = vmatpush2.msra.mxu0 %v13262_v39  ;;  %2481 = vmatpush2.msra.mxu1 %v13263_v13  ;;  %v13308_v39 = vld [vmem:[#allocation194_spill] sm:$0xff]  ;;  %v13309_v13 = vld [vmem:[#allocation195_spill] sm:$0xff] }
 0x71b   :  { %2411 = vmatprep.subr.mxu0 %v13264_v40  ;;  %2482 = vmatprep.subr.mxu1 %v13265_v2  ;;  %v13310_v40 = vld [vmem:[#allocation196_spill] sm:$0xff]  ;;  %v13311_v2 = vld [vmem:[#allocation197_spill] sm:$0xff] }
 0x71c   :  { %2412 = vmatpush2.msra.mxu0 %v13266_v46  ;;  %2483 = vmatpush2.msra.mxu1 %v13267_v60  ;;  %v13312_v46 = vld [vmem:[#allocation198_spill] sm:$0xff]  ;;  %v13313_v60 = vld [vmem:[#allocation199_spill] sm:$0xff] }
 0x71d   :  { %2413 = vmatprep.subr.mxu0 %v9478_v58  ;;  %2484 = vmatprep.subr.mxu1 %v13268_v27  ;;  %v13276_v58 = vld [vmem:[#allocation162_spill] sm:$0xff]  ;;  %v13314_v27 = vld [vmem:[#allocation200_spill] sm:$0xff] }
 0x71e   :  { %2414 = vmatpush2.msra.mxu0 %v13269_v61  ;;  %2485 = vmatpush2.msra.mxu1 %v13270_v56  ;;  %v13315_v61 = vld [vmem:[#allocation201_spill] sm:$0xff]  ;;  %v13316_v56 = vld [vmem:[#allocation202_spill] sm:$0xff] }
 0x71f   :  { %2416 = vmatmul.mubr.f32.vlgmr.msra.gmra.mxu0 %v9986_v54  ;;  %2487 = vmatmul.mubr.f32.vlgmr.msra.gmra.mxu1 %v9986_v54  ;;  %v13281_v54 = vld [vmem:[#allocation167_spill] sm:$0xff] }
 0x720   :  { %2572 = vmatprep.subr.mxu0 %v13271_v28  ;;  %2643 = vmatprep.subr.mxu1 %v13272_v22  ;;  %v13317_v28 = vld [vmem:[#allocation203_spill] sm:$0xff]  ;;  %v13318_v22 = vld [vmem:[#allocation204_spill] sm:$0xff] }
 0x721   :  { %2573 = vmatpush1.msra.mxu0 %v13273_v49  ;;  %2644 = vmatpush1.msra.mxu1 %v13274_v50  ;;  %v13319_v49 = vld [vmem:[#allocation205_spill] sm:$0xff]  ;;  %v13320_v50 = vld [vmem:[#allocation206_spill] sm:$0xff] }
 0x722   :  { %2574 = vmatprep.subr.mxu0 %v13275_v51  ;;  %2645 = vmatprep.subr.mxu1 %v13276_v58  ;;  %v13321_v51 = vld [vmem:[#allocation207_spill] sm:$0xff]  ;;  %v13322_v58 = vld [vmem:[#allocation208_spill] sm:$0xff] }
 0x723   :  { %2575 = vmatpush1.msra.mxu0 %v13277_v24  ;;  %2646 = vmatpush1.msra.mxu1 %v13278_v52  ;;  %v13323_v24 = vld [vmem:[#allocation209_spill] sm:$0xff]  ;;  %v13324_v52 = vld [vmem:[#allocation210_spill] sm:$0xff] }
 0x724   :  { %2576 = vmatprep.subr.mxu0 %v13279_v16  ;;  %2647 = vmatprep.subr.mxu1 %v13280_v18  ;;  %v13325_v16 = vld [vmem:[#allocation211_spill] sm:$0xff]  ;;  %v13326_v18 = vld [vmem:[#allocation212_spill] sm:$0xff] }
 0x725   :  { %2577 = vmatpush1.msra.mxu0 %v13281_v54  ;;  %2648 = vmatpush1.msra.mxu1 %v13282_v63  ;;  %v13327_v54 = vld [vmem:[#allocation213_spill] sm:$0xff]  ;;  %v13328_v63 = vld [vmem:[#allocation214_spill] sm:$0xff] }
 0x726   :  { %2578 = vmatprep.subr.mxu0 %v13283_v17  ;;  %2649 = vmatprep.subr.mxu1 %v13284_v7  ;;  %v13329_v17 = vld [vmem:[#allocation215_spill] sm:$0xff]  ;;  %v13330_v7 = vld [vmem:[#allocation216_spill] sm:$0xff] }
 0x727   :  { %2579 = vmatpush1.msra.mxu0 %v13285_v23  ;;  %2650 = vmatpush1.msra.mxu1 %v13286_v11  ;;  %v13331_v23 = vld [vmem:[#allocation217_spill] sm:$0xff]  ;;  %v13332_v11 = vld [vmem:[#allocation218_spill] sm:$0xff] }
 0x728   :  { %2580 = vmatprep.subr.mxu0 %v13287_v33  ;;  %2651 = vmatprep.subr.mxu1 %v13288_v1  ;;  %v13333_v33 = vld [vmem:[#allocation219_spill] sm:$0xff] }
 0x729   :  { %2581 = vmatpush1.msra.mxu0 %v13289_v25  ;;  %2652 = vmatpush1.msra.mxu1 %v13290_v38  ;;  %v4149_v1 = vld [vmem:[%s11384_s3 + $0x7d0] sm:$0xff]  ;;  %v4150_v25 = vld [vmem:[%s11384_s3 + $0x788] sm:$0xff]  ;;  %v4155_v38 = vld [vmem:[%s11384_s3 + $0x758] sm:$0xff] }
 0x72a   :  { %2582 = vmatprep.subr.mxu0 %v13291_v53  ;;  %2653 = vmatprep.subr.mxu1 %v13292_v9  ;;  %v4156_v53 = vld [vmem:[%s11384_s3 + $0x740] sm:$0xff]  ;;  %v4157_v9 = vld [vmem:[%s11384_s3 + $0x750] sm:$0xff] }
 0x72b   :  { %2583 = vmatpush1.msra.mxu0 %v13293_v12  ;;  %2654 = vmatpush1.msra.mxu1 %v13294_v14  ;;  %v4158_v12 = vld [vmem:[%s11384_s3 + $0x708] sm:$0xff]  ;;  %v4159_v14 = vld [vmem:[%s11384_s3 + $0x718] sm:$0xff] }
 0x72c   :  { %2584 = vmatprep.subr.mxu0 %v13295_v15  ;;  %2655 = vmatprep.subr.mxu1 %v13296_v47  ;;  %v4160_v15 = vld [vmem:[%s11384_s3 + $0x700] sm:$0xff]  ;;  %v4161_v47 = vld [vmem:[%s11384_s3 + $0x710] sm:$0xff] }
 0x72d   :  { %2585 = vmatpush1.msra.mxu0 %v13297_v57  ;;  %2656 = vmatpush1.msra.mxu1 %v13298_v62  ;;  %v4162_v57 = vld [vmem:[%s11384_s3 + $0x6c8] sm:$0xff]  ;;  %v4163_v62 = vld [vmem:[%s11384_s3 + $0x6d8] sm:$0xff] }
 0x72e   :  { %2586 = vmatprep.subr.mxu0 %v13299_v6  ;;  %2657 = vmatprep.subr.mxu1 %v13300_v31  ;;  %v4164_v6 = vld [vmem:[%s11384_s3 + $0x6c0] sm:$0xff]  ;;  %v4165_v31 = vld [vmem:[%s11384_s3 + $0x6d0] sm:$0xff] }
 0x72f   :  { %2587 = vmatpush1.msra.mxu0 %v13301_v34  ;;  %2658 = vmatpush1.msra.mxu1 %v13302_v8  ;;  %v4166_v34 = vld [vmem:[%s11384_s3 + $0x688] sm:$0xff]  ;;  %v4167_v8 = vld [vmem:[%s11384_s3 + $0x698] sm:$0xff] }
 0x730   :  { %2588 = vmatprep.subr.mxu0 %v13303_v3  ;;  %2659 = vmatprep.subr.mxu1 %v13304_v37  ;;  %v4168_v3 = vld [vmem:[%s11384_s3 + $0x680] sm:$0xff]  ;;  %v4169_v37 = vld [vmem:[%s11384_s3 + $0x690] sm:$0xff] }
 0x731   :  { %2589 = vmatpush1.msra.mxu0 %v13305_v26  ;;  %2660 = vmatpush1.msra.mxu1 %v13306_v29  ;;  %v4170_v26 = vld [vmem:[%s11384_s3 + $0x648] sm:$0xff]  ;;  %v4171_v29 = vld [vmem:[%s11384_s3 + $0x658] sm:$0xff] }
 0x732   :  { %2590 = vmatprep.subr.mxu0 %v13307_v45  ;;  %2661 = vmatprep.subr.mxu1 %v13308_v39  ;;  %v4172_v45 = vld [vmem:[%s11384_s3 + $0x640] sm:$0xff]  ;;  %v4173_v39 = vld [vmem:[%s11384_s3 + $0x650] sm:$0xff] }
 0x733   :  { %2591 = vmatpush1.msra.mxu0 %v13309_v13  ;;  %2662 = vmatpush1.msra.mxu1 %v13310_v40  ;;  %v4174_v13 = vld [vmem:[%s11384_s3 + $0x608] sm:$0xff]  ;;  %v4175_v40 = vld [vmem:[%s11384_s3 + $0x618] sm:$0xff] }
 0x734   :  { %2592 = vmatprep.subr.mxu0 %v13311_v2  ;;  %2663 = vmatprep.subr.mxu1 %v13312_v46  ;;  %v4176_v2 = vld [vmem:[%s11384_s3 + $0x600] sm:$0xff]  ;;  %v4177_v46 = vld [vmem:[%s11384_s3 + $0x610] sm:$0xff] }
 0x735   :  { %2593 = vmatpush1.msra.mxu0 %v13313_v60  ;;  %2664 = vmatpush1.msra.mxu1 %v13314_v27  ;;  %v4178_v60 = vld [vmem:[%s11384_s3 + $0x5c8] sm:$0xff]  ;;  %v4179_v27 = vld [vmem:[%s11384_s3 + $0x5d8] sm:$0xff] }
 0x736   :  { %2594 = vmatprep.subr.mxu0 %v13315_v61  ;;  %2665 = vmatprep.subr.mxu1 %v13316_v56  ;;  %v4180_v61 = vld [vmem:[%s11384_s3 + $0x5c0] sm:$0xff]  ;;  %v4181_v56 = vld [vmem:[%s11384_s3 + $0x5d0] sm:$0xff] }
 0x737   :  { %2595 = vmatpush1.msra.mxu0 %v13317_v28  ;;  %2666 = vmatpush1.msra.mxu1 %v13318_v22  ;;  %v4182_v28 = vld [vmem:[%s11384_s3 + $0x588] sm:$0xff]  ;;  %v4183_v22 = vld [vmem:[%s11384_s3 + $0x598] sm:$0xff] }
 0x738   :  { %2596 = vmatprep.subr.mxu0 %v13319_v49  ;;  %2667 = vmatprep.subr.mxu1 %v13320_v50  ;;  %v4184_v49 = vld [vmem:[%s11384_s3 + $0x580] sm:$0xff]  ;;  %v4185_v50 = vld [vmem:[%s11384_s3 + $0x590] sm:$0xff] }
 0x739   :  { %2597 = vmatpush1.msra.mxu0 %v13321_v51  ;;  %2668 = vmatpush1.msra.mxu1 %v13322_v58  ;;  %v4186_v51 = vld [vmem:[%s11384_s3 + $0x548] sm:$0xff]  ;;  %v4187_v58 = vld [vmem:[%s11384_s3 + $0x558] sm:$0xff] }
 0x73a   :  { %2598 = vmatprep.subr.mxu0 %v13323_v24  ;;  %2669 = vmatprep.subr.mxu1 %v13324_v52  ;;  %v4188_v24 = vld [vmem:[%s11384_s3 + $0x540] sm:$0xff]  ;;  %v4189_v52 = vld [vmem:[%s11384_s3 + $0x550] sm:$0xff] }
 0x73b   :  { %2599 = vmatpush1.msra.mxu0 %v13325_v16  ;;  %2670 = vmatpush1.msra.mxu1 %v13326_v18  ;;  %v4190_v16 = vld [vmem:[%s11384_s3 + $0x508] sm:$0xff]  ;;  %v4191_v18 = vld [vmem:[%s11384_s3 + $0x518] sm:$0xff] }
 0x73c   :  { %2600 = vmatprep.subr.mxu0 %v13327_v54  ;;  %2671 = vmatprep.subr.mxu1 %v13328_v63  ;;  %v4192_v54 = vld [vmem:[%s11384_s3 + $0x500] sm:$0xff]  ;;  %v4193_v63 = vld [vmem:[%s11384_s3 + $0x510] sm:$0xff] }
 0x73d   :  { %2601 = vmatpush1.msra.mxu0 %v13329_v17  ;;  %2672 = vmatpush1.msra.mxu1 %v13330_v7  ;;  %v4194_v17 = vld [vmem:[%s11384_s3 + $0x4c8] sm:$0xff]  ;;  %v4195_v7 = vld [vmem:[%s11384_s3 + $0x4d8] sm:$0xff] }
 0x73e   :  { %2602 = vmatprep.subr.mxu0 %v13331_v23  ;;  %2673 = vmatprep.subr.mxu1 %v13332_v11  ;;  %v4196_v23 = vld [vmem:[%s11384_s3 + $0x4c0] sm:$0xff]  ;;  %v4197_v11 = vld [vmem:[%s11384_s3 + $0x4d0] sm:$0xff] }
 0x73f   :  { %2603 = vmatpush1.msra.mxu0 %v13333_v33  ;;  %2674 = vmatpush1.msra.mxu1 %v9882_v32  ;;  %v4151_v32 = vld [vmem:[%s11384_s3 + $0x798] sm:$0xff]  ;;  %v4198_v33 = vld [vmem:[%s11384_s3 + $0x488] sm:$0xff] }
 0x740   :  { %2604 = vmatprep.subr.mxu0 %v9888_v42  ;;  %2675 = vmatprep.subr.mxu1 %v9894_v4  ;;  %v4152_v42 = vld [vmem:[%s11384_s3 + $0x780] sm:$0xff]  ;;  %v4153_v4 = vld [vmem:[%s11384_s3 + $0x790] sm:$0xff] }
 0x741   :  { %2605 = vmatpush2.msra.mxu0 %v9900_v43  ;;  %2676 = vmatpush2.msra.mxu1 %v4149_v1  ;;  %v4154_v43 = vld [vmem:[%s11384_s3 + $0x748] sm:$0xff]  ;;  %v4199_v1 = vld [vmem:[%s11384_s3 + $0x498] sm:$0xff] }
 0x742   :  { %2606 = vmatprep.subr.mxu0 %v4150_v25  ;;  %2677 = vmatprep.subr.mxu1 %v4151_v32  ;;  %v4200_v25 = vld [vmem:[%s11384_s3 + $0x480] sm:$0xff]  ;;  %v4201_v32 = vld [vmem:[%s11384_s3 + $0x490] sm:$0xff] }
 0x743   :  { %2607 = vmatpush2.msra.mxu0 %v4152_v42  ;;  %2678 = vmatpush2.msra.mxu1 %v4153_v4  ;;  %v4202_v42 = vld [vmem:[%s11384_s3 + $0x448] sm:$0xff]  ;;  %v4203_v4 = vld [vmem:[%s11384_s3 + $0x458] sm:$0xff] }
 0x744   :  { %2608 = vmatprep.subr.mxu0 %v4154_v43  ;;  %2679 = vmatprep.subr.mxu1 %v4155_v38  ;;  %v4204_v43 = vld [vmem:[%s11384_s3 + $0x440] sm:$0xff]  ;;  %v4205_v38 = vld [vmem:[%s11384_s3 + $0x450] sm:$0xff] }
 0x745   :  { %2609 = vmatpush2.msra.mxu0 %v4156_v53  ;;  %2680 = vmatpush2.msra.mxu1 %v4157_v9  ;;  %v4206_v53 = vld [vmem:[%s11384_s3 + $0x408] sm:$0xff]  ;;  %v4207_v9 = vld [vmem:[%s11384_s3 + $0x418] sm:$0xff] }
 0x746   :  { %2610 = vmatprep.subr.mxu0 %v4158_v12  ;;  %2681 = vmatprep.subr.mxu1 %v4159_v14  ;;  %v4208_v12 = vld [vmem:[%s11384_s3 + $0x400] sm:$0xff]  ;;  %v4209_v14 = vld [vmem:[%s11384_s3 + $0x410] sm:$0xff] }
 0x747   :  { %2611 = vmatpush2.msra.mxu0 %v4160_v15  ;;  %2682 = vmatpush2.msra.mxu1 %v4161_v47  ;;  %v10371_v15 = vld [vmem:[%s11384_s3 + $0x3e8] sm:$0xff]  ;;  %v10377_v47 = vld [vmem:[%s11384_s3 + $0x3f8] sm:$0xff] }
 0x748   :  { %2612 = vmatprep.subr.mxu0 %v4162_v57  ;;  %2683 = vmatprep.subr.mxu1 %v4163_v62  ;;  %v2498_v57 = vpop.permute.xlu0 %2497 }
 0x749   :  { %2613 = vmatpush2.msra.mxu0 %v4164_v6  ;;  %2684 = vmatpush2.msra.mxu1 %v4165_v31  ;;  %v2501_v6 = vmul.f32 %v2498_v57, %v13158_v10  ;;  %v2500_v31 = vmul.f32 %v2498_v57, %v13159_v41  ;;  %v10761_v41 = vld [vmem:[%s11384_s3 + $0x38] sm:$0xff]  ;;  %v10767_v10 = vld [vmem:[%s11384_s3 + $0x20] sm:$0xff] }
 0x74a   :  { %2614 = vmatprep.subr.mxu0 %v4166_v34  ;;  %2685 = vmatprep.subr.mxu1 %v4167_v8  ;;  %13338 = vst [vmem:[#allocation13_spill] sm:$0xff] %v10761_v41  ;;  %13339 = vst [vmem:[#allocation14_spill] sm:$0xff] %v10767_v10 }
 0x74b   :  { %2615 = vmatpush2.msra.mxu0 %v4168_v3  ;;  %2686 = vmatpush2.msra.mxu1 %v4169_v37  ;;  %v2505_v8 = vadd.f32 %v2501_v6, %v12750_v0  ;;  %v2504_v3 = vadd.f32 %v2500_v31, %v12329_v35  ;;  %v10749_v35 = vld [vmem:[%s11384_s3 + $0x70] sm:$0xff]  ;;  %v10755_v0 = vld [vmem:[%s11384_s3 + $0x28] sm:$0xff] }
 0x74c   :  { %2616 = vmatprep.subr.mxu0 %v4170_v26  ;;  %2687 = vmatprep.subr.mxu1 %v4171_v29  ;;  %13336 = vst [vmem:[#allocation11_spill] sm:$0xff] %v10749_v35  ;;  %13337 = vst [vmem:[#allocation12_spill] sm:$0xff] %v10755_v0 }
 0x74d   :  { %2617 = vmatpush2.msra.mxu0 %v4172_v45  ;;  %2688 = vmatpush2.msra.mxu1 %v4173_v39 }
 0x74e   :  { %2618 = vmatprep.subr.mxu0 %v4174_v13  ;;  %2689 = vmatprep.subr.mxu1 %v4175_v40 }
 0x74f   :  { %2619 = vmatpush2.msra.mxu0 %v4176_v2  ;;  %2690 = vmatpush2.msra.mxu1 %v4177_v46 }
 0x750   :  { %2620 = vmatprep.subr.mxu0 %v4178_v60  ;;  %2691 = vmatprep.subr.mxu1 %v4179_v27 }
 0x751   :  { %2621 = vmatpush2.msra.mxu0 %v4180_v61  ;;  %2692 = vmatpush2.msra.mxu1 %v4181_v56  ;;  %v2503_v61 = vmul.f32 %v2498_v57, %v13160_v21  ;;  %v10731_v21 = vld [vmem:[%s11384_s3 + $0x68] sm:$0xff] }
 0x752   :  { %2622 = vmatprep.subr.mxu0 %v4182_v28  ;;  %2693 = vmatprep.subr.mxu1 %v4183_v22 }
 0x753   :  { %2623 = vmatpush2.msra.mxu0 %v4184_v49  ;;  %2694 = vmatpush2.msra.mxu1 %v4185_v50  ;;  %v2502_v49 = vmul.f32 %v2498_v57, %v5012_v5  ;;  %v2507_v50 = vadd.f32 %v2503_v61, %v12337_v20  ;;  %v10449_v61 = vld [vmem:[%s11384_s3 + $0x378] sm:$0xff]  ;;  %v10719_v20 = vld [vmem:[%s11384_s3 + $0xa0] sm:$0xff]  ;;  %v10725_v5 = vld [vmem:[%s11384_s3 + $0xb0] sm:$0xff] }
 0x754   :  { %2624 = vmatprep.subr.mxu0 %v4186_v51  ;;  %2695 = vmatprep.subr.mxu1 %v4187_v58 }
 0x755   :  { %2625 = vmatpush2.msra.mxu0 %v4188_v24  ;;  %2696 = vmatpush2.msra.mxu1 %v4189_v52 }
 0x756   :  { %2626 = vmatprep.subr.mxu0 %v4190_v16  ;;  %2697 = vmatprep.subr.mxu1 %v4191_v18  ;;  %v2506_v16 = vadd.f32 %v2502_v49, %v5016_v59  ;;  %v10473_v49 = vld [vmem:[%s11384_s3 + $0x338] sm:$0xff] }
 0x757   :  { %2627 = vmatpush2.msra.mxu0 %v4192_v54  ;;  %2698 = vmatpush2.msra.mxu1 %v4193_v63  ;;  %v10713_v59 = vld [vmem:[%s11384_s3 + $0xb8] sm:$0xff] }
 0x758   :  { %2628 = vmatprep.subr.mxu0 %v4194_v17  ;;  %2699 = vmatprep.subr.mxu1 %v4195_v7 }
 0x759   :  { %2629 = vmatpush2.msra.mxu0 %v4196_v23  ;;  %2700 = vmatpush2.msra.mxu1 %v4197_v11 }
 0x75a   :  { %2630 = vmatprep.subr.mxu0 %v4198_v33  ;;  %2701 = vmatprep.subr.mxu1 %v4199_v1 }
 0x75b   :  { %2631 = vmatpush2.msra.mxu0 %v4200_v25  ;;  %2702 = vmatpush2.msra.mxu1 %v4201_v32 }
 0x75c   :  { %2632 = vmatprep.subr.mxu0 %v4202_v42  ;;  %2703 = vmatprep.subr.mxu1 %v4203_v4 }
 0x75d   :  { %2633 = vmatpush2.msra.mxu0 %v4204_v43  ;;  %2704 = vmatpush2.msra.mxu1 %v4205_v38 }
 0x75e   :  { %2634 = vmatprep.subr.mxu0 %v4206_v53  ;;  %2705 = vmatprep.subr.mxu1 %v4207_v9 }
 0x75f   :  { %2635 = vmatpush2.msra.mxu0 %v4208_v12  ;;  %2706 = vmatpush2.msra.mxu1 %v4209_v14 }
 0x760   :  { %2714 = vmatprep.subr.mxu0 %v10371_v15  ;;  %2785 = vmatprep.subr.mxu1 %v10377_v47 }
 0x79e   :  { %v2275_v62 = vpop.f32.mrf.mxu0  ;;  %v2346_v39 = vpop.f32.mrf.mxu1 }
 0x79f   :  { %v2508_v26 = vadd.f32 %v2504_v3, %v2275_v62  ;;  %v2510_v63 = vadd.f32 %v2506_v16, %v2346_v39  ;;  %v10509_v16 = vld [vmem:[%s11384_s3 + $0x2f0] sm:$0xff] }
 0x7a0   :  { %v2277_v34 = vpop.f32.mrf.mxu0  ;;  %v2348_v46 = vpop.f32.mrf.mxu1 }
 0x7a1   :  { %v2509_v37 = vadd.f32 %v2505_v8, %v2277_v34  ;;  %v3240_v45 = vmul.f32 -1.442695, %v2508_v26  ;;  %v2511_v52 = vadd.f32 %v2507_v50, %v2348_v46  ;;  %v10431_v46 = vld [vmem:[%s11384_s3 + $0x3a0] sm:$0xff] }
 0x7a2   :  { %v10479_v50 = vld [vmem:[%s11384_s3 + $0x320] sm:$0xff] }
 0x7a3   :  { %v3241_v29 = vmul.f32 -1.442695, %v2509_v37  ;;  %v3242_v17 = vmul.f32 -1.442695, %v2511_v52  ;;  %v10503_v52 = vld [vmem:[%s11384_s3 + $0x2e0] sm:$0xff] }
 0x7a5   :  { %3490 = vpow2.f32 %v3241_v29 }
 0x7a6   :  { %3492 = vpow2.f32 %v3240_v45 }
 0x7b2   :  { %v3491_v22 = vpop.eup %3490 }
 0x7b3   :  { %v3493_v58 = vpop.eup %3492  ;;  %v2522_v24 = vadd.f32 1.0, %v3491_v22  ;;  %v10467_v22 = vld [vmem:[%s11384_s3 + $0x328] sm:$0xff] }
 0x7b4   :  { %v2516_v54 = vadd.f32 1.0, %v3493_v58  ;;  %v10491_v58 = vld [vmem:[%s11384_s3 + $0x2e8] sm:$0xff] }
 0x7df   :  { %v2417_v13 = vpop.f32.mrf.mxu0  ;;  %v2488_v56 = vpop.f32.mrf.mxu1 }
 0x7e0   :  { %v2537_v40 = vadd.f32 %v2417_v13, %v6263_v44  ;;  %v2539_v11 = vadd.f32 %v2488_v56, %v6288_v36  ;;  %v10413_v13 = vld [vmem:[%s11384_s3 + $0x3f0] sm:$0xff]  ;;  %v10455_v56 = vld [vmem:[%s11384_s3 + $0x360] sm:$0xff] }
 0x7e1   :  { %v2419_v2 = vpop.f32.mrf.mxu0  ;;  %v2490_v51 = vpop.f32.mrf.mxu1  ;;  %v10701_v36 = vld [vmem:[%s11384_s3 + $0xf0] sm:$0xff]  ;;  %v10743_v44 = vld [vmem:[%s11384_s3 + $0x60] sm:$0xff] }
 0x7e2   :  { %v3243_v60 = vmul.f32 -1.442695, %v2537_v40  ;;  %v2538_v27 = vadd.f32 %v2419_v2, %v6269_v48  ;;  %v2540_v18 = vadd.f32 %v2490_v51, %v6282_v19  ;;  %v10419_v40 = vld [vmem:[%s11384_s3 + $0x3a8] sm:$0xff]  ;;  %v10425_v2 = vld [vmem:[%s11384_s3 + $0x3b8] sm:$0xff]  ;;  %v10485_v51 = vld [vmem:[%s11384_s3 + $0x330] sm:$0xff] }
 0x7e3   :  { %v10707_v19 = vld [vmem:[%s11384_s3 + $0xa8] sm:$0xff]  ;;  %v10737_v48 = vld [vmem:[%s11384_s3 + $0x78] sm:$0xff] }
 0x7e4   :  { %3494 = vpow2.f32 %v3243_v60  ;;  %v3244_v28 = vmul.f32 -1.442695, %v2538_v27  ;;  %v3245_v7 = vmul.f32 -1.442695, %v2540_v18  ;;  %v10437_v60 = vld [vmem:[%s11384_s3 + $0x3b0] sm:$0xff]  ;;  %v10443_v27 = vld [vmem:[%s11384_s3 + $0x368] sm:$0xff] }
 0x7e5   :  { %v10515_v18 = vld [vmem:[%s11384_s3 + $0x2a8] sm:$0xff] }
 0x7e6   :  { %3496 = vpow2.f32 %v3244_v28  ;;  %v10461_v28 = vld [vmem:[%s11384_s3 + $0x370] sm:$0xff] }
 0x7e7   :  { %3498 = vrcp.f32 %v2522_v24  ;;  %v10497_v24 = vld [vmem:[%s11384_s3 + $0x2f8] sm:$0xff] }
 0x7e8   :  { %3500 = vrcp.f32 %v2516_v54  ;;  %v10521_v54 = vld [vmem:[%s11384_s3 + $0x2b8] sm:$0xff] }
 0x7e9   :  { %3502 = vtanh.f32 %v2510_v63  ;;  %v10527_v63 = vld [vmem:[%s11384_s3 + $0x2a0] sm:$0xff] }
 0x7ea   :  { %3504 = vpow2.f32 %v3242_v17  ;;  %v10533_v17 = vld [vmem:[%s11384_s3 + $0x2b0] sm:$0xff] }
 0x7eb   :  { %3506 = vpow2.f32 %v3245_v7  ;;  %v10539_v7 = vld [vmem:[%s11384_s3 + $0x268] sm:$0xff] }
 0x7f1   :  { %v3495_v23 = vpop.eup %3494 }
 0x7f2   :  { %v2545_v33 = vadd.f32 1.0, %v3495_v23  ;;  %v10545_v23 = vld [vmem:[%s11384_s3 + $0x278] sm:$0xff] }
 0x7f3   :  { %v3497_v1 = vpop.eup %3496 }
 0x7f4   :  { %3508 = vrcp.f32 %v2545_v33  ;;  %v2551_v25 = vadd.f32 1.0, %v3497_v1  ;;  %v3499_v32 = vpop.eup %3498  ;;  %v10557_v33 = vld [vmem:[%s11384_s3 + $0x270] sm:$0xff]  ;;  %v10563_v1 = vld [vmem:[%s11384_s3 + $0x228] sm:$0xff] }
 0x7f5   :  { %3510 = vtanh.f32 %v2539_v11  ;;  %v3501_v42 = vpop.eup %3500  ;;  %v2532_v43 = vmul.f32 %v3499_v32, %v9979_v55  ;;  %v10551_v11 = vld [vmem:[%s11384_s3 + $0x260] sm:$0xff] }
 0x7f6   :  { %3512 = vrcp.f32 %v2551_v25  ;;  %v3503_v4 = vpop.eup %3502  ;;  %v10569_v25 = vld [vmem:[%s11384_s3 + $0x238] sm:$0xff]  ;;  %v10575_v32 = vld [vmem:[%s11384_s3 + $0x220] sm:$0xff] }
 0x7f7   :  { %v3505_v38 = vpop.eup %3504  ;;  %v2533_v9 = vmul.f32 %v3503_v4, %v3501_v42  ;;  %v10581_v42 = vld [vmem:[%s11384_s3 + $0x230] sm:$0xff]  ;;  %v10587_v4 = vld [vmem:[%s11384_s3 + $0x1e8] sm:$0xff] }
 0x7f8   :  { %v3507_v53 = vpop.eup %3506  ;;  %v2529_v8 = vadd.f32 1.0, %v3505_v38  ;;  %v10599_v38 = vld [vmem:[%s11384_s3 + $0x1e0] sm:$0xff] }
 0x7f9   :  { %v10393_v57 = vadd.f32 %v2533_v9, %v2532_v43  ;;  %v2558_v6 = vadd.f32 1.0, %v3507_v53  ;;  %v10593_v43 = vld [vmem:[%s11384_s3 + $0x1f8] sm:$0xff]  ;;  %v10605_v53 = vld [vmem:[%s11384_s3 + $0x1f0] sm:$0xff]  ;;  %v10611_v9 = vld [vmem:[%s11384_s3 + $0x1a8] sm:$0xff] }
 0x7fb   :  { %13334 = vst [vmem:[#allocation9_spill] sm:$0xff] %v10393_v57  ;;  %3514 = vtanh.f32 %v10393_v57  ;;  %v10695_v57 = vld [vmem:[%s11384_s3 + $0xe0] sm:$0xff] }
 0x7fc   :  { %3516 = vrcp.f32 %v2558_v6  ;;  %v10635_v6 = vld [vmem:[%s11384_s3 + $0x168] sm:$0xff] }
 0x801   :  { %v3509_v12 = vpop.eup %3508 }
 0x802   :  { %v3511_v14 = vpop.eup %3510 }
 0x803   :  { %v3513_v62 = vpop.eup %3512  ;;  %v2562_v31 = vmul.f32 %v3511_v14, %v3509_v12  ;;  %v10617_v12 = vld [vmem:[%s11384_s3 + $0x1b8] sm:$0xff]  ;;  %v10623_v14 = vld [vmem:[%s11384_s3 + $0x1a0] sm:$0xff] }
 0x804   :  { %v2561_v34 = vmul.f32 %v3513_v62, %v9982_v30  ;;  %v10407_v30 = vld [vmem:[%s11384_s3 + $0x3e0] sm:$0xff]  ;;  %v10629_v62 = vld [vmem:[%s11384_s3 + $0x1b0] sm:$0xff] }
 0x806   :  { %v10396_v3 = vadd.f32 %v2562_v31, %v2561_v34  ;;  %v10641_v31 = vld [vmem:[%s11384_s3 + $0x178] sm:$0xff]  ;;  %v10647_v34 = vld [vmem:[%s11384_s3 + $0x160] sm:$0xff] }
 0x808   :  { %13335 = vst [vmem:[#allocation10_spill] sm:$0xff] %v10396_v3  ;;  %3518 = vtanh.f32 %v10396_v3  ;;  %v3515_v55 = vpop.eup %3514  ;;  %v10689_v3 = vld [vmem:[%s11384_s3 + $0xf8] sm:$0xff] }
 0x809   :  { %3520 = vrcp.f32 %v2529_v8  ;;  %v3517_v37 = vpop.eup %3516  ;;  %v10653_v8 = vld [vmem:[%s11384_s3 + $0x170] sm:$0xff] }
 0x815   :  { %v3519_v26 = vpop.eup %3518 }
 0x816   :  { %v3521_v29 = vpop.eup %3520  ;;  %v2565_v45 = vmul.f32 %v3519_v26, %v3517_v37  ;;  %v10665_v37 = vld [vmem:[%s11384_s3 + $0x138] sm:$0xff]  ;;  %v10671_v26 = vld [vmem:[%s11384_s3 + $0x120] sm:$0xff] }
 0x817   :  { %v10400_v39 = vmul.f32 %v3521_v29, %v3515_v55  ;;  %v10659_v55 = vld [vmem:[%s11384_s3 + $0x128] sm:$0xff]  ;;  %v10677_v29 = vld [vmem:[%s11384_s3 + $0x130] sm:$0xff] }
 0x818   :  { %2636 = vmatprep.mubr.f32.mxu0 %v2565_v45  ;;  %2707 = vmatprep.mubr.f32.mxu1 %v2565_v45 }
 0x819   :  { %2637 = vmatmul.mubr.f32.vlgmr.msra.gmra.mxu0 %v10400_v39  ;;  %2708 = vmatmul.mubr.f32.vlgmr.msra.gmra.mxu1 %v10400_v39 }
 0x81a   :  { %2715 = vmatpush1.msra.mxu0 %v10407_v30  ;;  %2786 = vmatpush1.msra.mxu1 %v10413_v13 }
 0x81b   :  { %2716 = vmatprep.subr.mxu0 %v10419_v40  ;;  %2778 = vmatprep.mubr.f32.mxu0 %v2565_v45 }
 0x81c   :  { %2787 = vmatprep.subr.mxu1 %v10425_v2  ;;  %2849 = vmatprep.mubr.f32.mxu1 %v2565_v45  ;;  %v10683_v45 = vld [vmem:[%s11384_s3 + $0xe8] sm:$0xff] }
 0x81d   :  { %2717 = vmatpush1.msra.mxu0 %v10431_v46  ;;  %2788 = vmatpush1.msra.mxu1 %v10437_v60 }
 0x81e   :  { %2718 = vmatprep.subr.mxu0 %v10443_v27  ;;  %2789 = vmatprep.subr.mxu1 %v10449_v61 }
 0x81f   :  { %2719 = vmatpush1.msra.mxu0 %v10455_v56  ;;  %2790 = vmatpush1.msra.mxu1 %v10461_v28 }
 0x820   :  { %2720 = vmatprep.subr.mxu0 %v10467_v22  ;;  %2791 = vmatprep.subr.mxu1 %v10473_v49 }
 0x821   :  { %2721 = vmatpush1.msra.mxu0 %v10479_v50  ;;  %2792 = vmatpush1.msra.mxu1 %v10485_v51 }
 0x822   :  { %2722 = vmatprep.subr.mxu0 %v10491_v58  ;;  %2793 = vmatprep.subr.mxu1 %v10497_v24 }
 0x823   :  { %2723 = vmatpush1.msra.mxu0 %v10503_v52  ;;  %2794 = vmatpush1.msra.mxu1 %v10509_v16 }
 0x824   :  { %2724 = vmatprep.subr.mxu0 %v10515_v18  ;;  %2795 = vmatprep.subr.mxu1 %v10521_v54 }
 0x825   :  { %2725 = vmatpush1.msra.mxu0 %v10527_v63  ;;  %2796 = vmatpush1.msra.mxu1 %v10533_v17 }
 0x826   :  { %2726 = vmatprep.subr.mxu0 %v10539_v7  ;;  %2797 = vmatprep.subr.mxu1 %v10545_v23 }
 0x827   :  { %2727 = vmatpush1.msra.mxu0 %v10551_v11  ;;  %2798 = vmatpush1.msra.mxu1 %v10557_v33 }
 0x828   :  { %2728 = vmatprep.subr.mxu0 %v10563_v1  ;;  %2799 = vmatprep.subr.mxu1 %v10569_v25 }
 0x829   :  { %2729 = vmatpush1.msra.mxu0 %v10575_v32  ;;  %2800 = vmatpush1.msra.mxu1 %v10581_v42 }
 0x82a   :  { %2730 = vmatprep.subr.mxu0 %v10587_v4  ;;  %2801 = vmatprep.subr.mxu1 %v10593_v43 }
 0x82b   :  { %2731 = vmatpush1.msra.mxu0 %v10599_v38  ;;  %2802 = vmatpush1.msra.mxu1 %v10605_v53 }
 0x82c   :  { %2732 = vmatprep.subr.mxu0 %v10611_v9  ;;  %2803 = vmatprep.subr.mxu1 %v10617_v12 }
 0x82d   :  { %2733 = vmatpush1.msra.mxu0 %v10623_v14  ;;  %2804 = vmatpush1.msra.mxu1 %v10629_v62 }
 0x82e   :  { %2734 = vmatprep.subr.mxu0 %v10635_v6  ;;  %2805 = vmatprep.subr.mxu1 %v10641_v31 }
 0x82f   :  { %2735 = vmatpush1.msra.mxu0 %v10647_v34  ;;  %2806 = vmatpush1.msra.mxu1 %v10653_v8 }
 0x830   :  { %2736 = vmatprep.subr.mxu0 %v10659_v55  ;;  %2807 = vmatprep.subr.mxu1 %v10665_v37 }
 0x831   :  { %2737 = vmatpush1.msra.mxu0 %v10671_v26  ;;  %2808 = vmatpush1.msra.mxu1 %v10677_v29 }
 0x832   :  { %2738 = vmatprep.subr.mxu0 %v10683_v45  ;;  %2809 = vmatprep.subr.mxu1 %v10689_v3 }
 0x833   :  { %2739 = vmatpush1.msra.mxu0 %v10695_v57  ;;  %2810 = vmatpush1.msra.mxu1 %v10701_v36 }
 0x834   :  { %2740 = vmatprep.subr.mxu0 %v10707_v19  ;;  %2811 = vmatprep.subr.mxu1 %v10713_v59 }
 0x835   :  { %2741 = vmatpush1.msra.mxu0 %v10719_v20  ;;  %2812 = vmatpush1.msra.mxu1 %v10725_v5 }
 0x836   :  { %2742 = vmatprep.subr.mxu0 %v10731_v21  ;;  %2813 = vmatprep.subr.mxu1 %v10737_v48 }
 0x837   :  { %2743 = vmatpush1.msra.mxu0 %v10743_v44  ;;  %2814 = vmatpush1.msra.mxu1 %v10749_v35  ;;  %v10773_v35 = vld [vmem:[%s11384_s3 + $0x30] sm:$0xff] }
 0x838   :  { %2744 = vmatprep.subr.mxu0 %v10755_v0  ;;  %2815 = vmatprep.subr.mxu1 %v10761_v41  ;;  %13340 = vst [vmem:[#allocation15_spill] sm:$0xff] %v10773_v35  ;;  %v10779_v0 = vld [vmem:[%s11384_s3 + $0x7e8] sm:$0xff]  ;;  %v10785_v41 = vld [vmem:[%s11384_s3 + $0x7f8] sm:$0xff] }
 0x839   :  { %2745 = vmatpush1.msra.mxu0 %v10767_v10  ;;  %2816 = vmatpush1.msra.mxu1 %v10773_v35  ;;  %13341 = vst [vmem:[#allocation16_spill] sm:$0xff] %v10779_v0  ;;  %13342 = vst [vmem:[#allocation17_spill] sm:$0xff] %v10785_v41  ;;  %v10791_v10 = vld [vmem:[%s11384_s3 + $0x7e0] sm:$0xff]  ;;  %v10797_v35 = vld [vmem:[%s11384_s3 + $0x7f0] sm:$0xff] }
 0x83a   :  { %2746 = vmatprep.subr.mxu0 %v10779_v0  ;;  %2817 = vmatprep.subr.mxu1 %v10785_v41  ;;  %13343 = vst [vmem:[#allocation18_spill] sm:$0xff] %v10791_v10  ;;  %13344 = vst [vmem:[#allocation19_spill] sm:$0xff] %v10797_v35  ;;  %v10803_v0 = vld [vmem:[%s11384_s3 + $0x7a8] sm:$0xff]  ;;  %v10809_v41 = vld [vmem:[%s11384_s3 + $0x7b8] sm:$0xff] }
 0x83b   :  { %2747 = vmatpush2.msra.mxu0 %v10791_v10  ;;  %2818 = vmatpush2.msra.mxu1 %v10797_v35  ;;  %13345 = vst [vmem:[#allocation20_spill] sm:$0xff] %v10803_v0  ;;  %13346 = vst [vmem:[#allocation21_spill] sm:$0xff] %v10809_v41  ;;  %v10815_v10 = vld [vmem:[%s11384_s3 + $0x7a0] sm:$0xff]  ;;  %v10821_v35 = vld [vmem:[%s11384_s3 + $0x7b0] sm:$0xff] }
 0x83c   :  { %2748 = vmatprep.subr.mxu0 %v10803_v0  ;;  %2819 = vmatprep.subr.mxu1 %v10809_v41  ;;  %13347 = vst [vmem:[#allocation22_spill] sm:$0xff] %v10815_v10  ;;  %13348 = vst [vmem:[#allocation23_spill] sm:$0xff] %v10821_v35  ;;  %v10827_v0 = vld [vmem:[%s11384_s3 + $0x768] sm:$0xff]  ;;  %v10833_v41 = vld [vmem:[%s11384_s3 + $0x778] sm:$0xff] }
 0x83d   :  { %2749 = vmatpush2.msra.mxu0 %v10815_v10  ;;  %2820 = vmatpush2.msra.mxu1 %v10821_v35  ;;  %13349 = vst [vmem:[#allocation24_spill] sm:$0xff] %v10827_v0  ;;  %13350 = vst [vmem:[#allocation29_spill] sm:$0xff] %v10833_v41  ;;  %v10839_v10 = vld [vmem:[%s11384_s3 + $0x760] sm:$0xff]  ;;  %v10845_v35 = vld [vmem:[%s11384_s3 + $0x770] sm:$0xff] }
 0x83e   :  { %2750 = vmatprep.subr.mxu0 %v10827_v0  ;;  %2821 = vmatprep.subr.mxu1 %v10833_v41  ;;  %13351 = vst [vmem:[#allocation31_spill] sm:$0xff] %v10839_v10  ;;  %13352 = vst [vmem:[#allocation35_spill] sm:$0xff] %v10845_v35  ;;  %v10851_v0 = vld [vmem:[%s11384_s3 + $0x728] sm:$0xff]  ;;  %v10857_v41 = vld [vmem:[%s11384_s3 + $0x738] sm:$0xff] }
 0x83f   :  { %2751 = vmatpush2.msra.mxu0 %v10839_v10  ;;  %2822 = vmatpush2.msra.mxu1 %v10845_v35  ;;  %13353 = vst [vmem:[#allocation36_spill] sm:$0xff] %v10851_v0  ;;  %13354 = vst [vmem:[#allocation37_spill] sm:$0xff] %v10857_v41  ;;  %v10863_v10 = vld [vmem:[%s11384_s3 + $0x720] sm:$0xff]  ;;  %v10869_v35 = vld [vmem:[%s11384_s3 + $0x730] sm:$0xff] }
 0x840   :  { %2752 = vmatprep.subr.mxu0 %v10851_v0  ;;  %2823 = vmatprep.subr.mxu1 %v10857_v41  ;;  %13355 = vst [vmem:[#allocation38_spill] sm:$0xff] %v10863_v10  ;;  %13356 = vst [vmem:[#allocation39_spill] sm:$0xff] %v10869_v35  ;;  %v10875_v0 = vld [vmem:[%s11384_s3 + $0x6e8] sm:$0xff]  ;;  %v10881_v41 = vld [vmem:[%s11384_s3 + $0x6f8] sm:$0xff] }
 0x841   :  { %2753 = vmatpush2.msra.mxu0 %v10863_v10  ;;  %2824 = vmatpush2.msra.mxu1 %v10869_v35  ;;  %13357 = vst [vmem:[#allocation40_spill] sm:$0xff] %v10875_v0  ;;  %13358 = vst [vmem:[#allocation41_spill] sm:$0xff] %v10881_v41  ;;  %v10887_v10 = vld [vmem:[%s11384_s3 + $0x6e0] sm:$0xff]  ;;  %v10893_v35 = vld [vmem:[%s11384_s3 + $0x6f0] sm:$0xff] }
 0x842   :  { %2754 = vmatprep.subr.mxu0 %v10875_v0  ;;  %2825 = vmatprep.subr.mxu1 %v10881_v41  ;;  %13359 = vst [vmem:[#allocation42_spill] sm:$0xff] %v10887_v10  ;;  %13360 = vst [vmem:[#allocation43_spill] sm:$0xff] %v10893_v35  ;;  %v10899_v0 = vld [vmem:[%s11384_s3 + $0x6a8] sm:$0xff]  ;;  %v10905_v41 = vld [vmem:[%s11384_s3 + $0x6b8] sm:$0xff] }
 0x843   :  { %2755 = vmatpush2.msra.mxu0 %v10887_v10  ;;  %2826 = vmatpush2.msra.mxu1 %v10893_v35  ;;  %13361 = vst [vmem:[#allocation44_spill] sm:$0xff] %v10899_v0  ;;  %13362 = vst [vmem:[#allocation45_spill] sm:$0xff] %v10905_v41  ;;  %v10911_v10 = vld [vmem:[%s11384_s3 + $0x6a0] sm:$0xff]  ;;  %v10917_v35 = vld [vmem:[%s11384_s3 + $0x6b0] sm:$0xff] }
 0x844   :  { %2756 = vmatprep.subr.mxu0 %v10899_v0  ;;  %2827 = vmatprep.subr.mxu1 %v10905_v41  ;;  %13363 = vst [vmem:[#allocation46_spill] sm:$0xff] %v10911_v10  ;;  %13364 = vst [vmem:[#allocation47_spill] sm:$0xff] %v10917_v35  ;;  %v10923_v0 = vld [vmem:[%s11384_s3 + $0x668] sm:$0xff]  ;;  %v10929_v41 = vld [vmem:[%s11384_s3 + $0x678] sm:$0xff] }
 0x845   :  { %2757 = vmatpush2.msra.mxu0 %v10911_v10  ;;  %2828 = vmatpush2.msra.mxu1 %v10917_v35  ;;  %13365 = vst [vmem:[#allocation48_spill] sm:$0xff] %v10923_v0  ;;  %13366 = vst [vmem:[#allocation49_spill] sm:$0xff] %v10929_v41  ;;  %v10935_v10 = vld [vmem:[%s11384_s3 + $0x660] sm:$0xff]  ;;  %v10941_v35 = vld [vmem:[%s11384_s3 + $0x670] sm:$0xff] }
 0x846   :  { %2758 = vmatprep.subr.mxu0 %v10923_v0  ;;  %2829 = vmatprep.subr.mxu1 %v10929_v41  ;;  %13367 = vst [vmem:[#allocation50_spill] sm:$0xff] %v10935_v10  ;;  %13368 = vst [vmem:[#allocation51_spill] sm:$0xff] %v10941_v35  ;;  %v10947_v0 = vld [vmem:[%s11384_s3 + $0x628] sm:$0xff]  ;;  %v10953_v41 = vld [vmem:[%s11384_s3 + $0x638] sm:$0xff] }
 0x847   :  { %2759 = vmatpush2.msra.mxu0 %v10935_v10  ;;  %2830 = vmatpush2.msra.mxu1 %v10941_v35  ;;  %13369 = vst [vmem:[#allocation52_spill] sm:$0xff] %v10947_v0  ;;  %13370 = vst [vmem:[#allocation53_spill] sm:$0xff] %v10953_v41  ;;  %v10959_v10 = vld [vmem:[%s11384_s3 + $0x620] sm:$0xff]  ;;  %v10965_v35 = vld [vmem:[%s11384_s3 + $0x630] sm:$0xff] }
 0x848   :  { %2760 = vmatprep.subr.mxu0 %v10947_v0  ;;  %2831 = vmatprep.subr.mxu1 %v10953_v41  ;;  %13371 = vst [vmem:[#allocation54_spill] sm:$0xff] %v10959_v10  ;;  %13372 = vst [vmem:[#allocation55_spill] sm:$0xff] %v10965_v35  ;;  %v10971_v0 = vld [vmem:[%s11384_s3 + $0x5e8] sm:$0xff]  ;;  %v10977_v41 = vld [vmem:[%s11384_s3 + $0x5f8] sm:$0xff] }
 0x849   :  { %2761 = vmatpush2.msra.mxu0 %v10959_v10  ;;  %2832 = vmatpush2.msra.mxu1 %v10965_v35  ;;  %13373 = vst [vmem:[#allocation56_spill] sm:$0xff] %v10971_v0  ;;  %13374 = vst [vmem:[#allocation57_spill] sm:$0xff] %v10977_v41  ;;  %v10983_v10 = vld [vmem:[%s11384_s3 + $0x5e0] sm:$0xff]  ;;  %v10989_v35 = vld [vmem:[%s11384_s3 + $0x5f0] sm:$0xff] }
 0x84a   :  { %2762 = vmatprep.subr.mxu0 %v10971_v0  ;;  %2833 = vmatprep.subr.mxu1 %v10977_v41  ;;  %13375 = vst [vmem:[#allocation58_spill] sm:$0xff] %v10983_v10  ;;  %13376 = vst [vmem:[#allocation59_spill] sm:$0xff] %v10989_v35  ;;  %v10995_v0 = vld [vmem:[%s11384_s3 + $0x5a8] sm:$0xff]  ;;  %v11001_v41 = vld [vmem:[%s11384_s3 + $0x5b8] sm:$0xff] }
 0x84b   :  { %2763 = vmatpush2.msra.mxu0 %v10983_v10  ;;  %2834 = vmatpush2.msra.mxu1 %v10989_v35  ;;  %13377 = vst [vmem:[#allocation60_spill] sm:$0xff] %v10995_v0  ;;  %13378 = vst [vmem:[#allocation61_spill] sm:$0xff] %v11001_v41  ;;  %v11007_v10 = vld [vmem:[%s11384_s3 + $0x5a0] sm:$0xff]  ;;  %v11013_v35 = vld [vmem:[%s11384_s3 + $0x5b0] sm:$0xff] }
 0x84c   :  { %2764 = vmatprep.subr.mxu0 %v10995_v0  ;;  %2835 = vmatprep.subr.mxu1 %v11001_v41  ;;  %13379 = vst [vmem:[#allocation62_spill] sm:$0xff] %v11007_v10  ;;  %13380 = vst [vmem:[#allocation63_spill] sm:$0xff] %v11013_v35  ;;  %v11019_v0 = vld [vmem:[%s11384_s3 + $0x568] sm:$0xff]  ;;  %v11025_v41 = vld [vmem:[%s11384_s3 + $0x578] sm:$0xff] }
 0x84d   :  { %2765 = vmatpush2.msra.mxu0 %v11007_v10  ;;  %2836 = vmatpush2.msra.mxu1 %v11013_v35  ;;  %13381 = vst [vmem:[#allocation64_spill] sm:$0xff] %v11019_v0  ;;  %13382 = vst [vmem:[#allocation65_spill] sm:$0xff] %v11025_v41  ;;  %v11031_v10 = vld [vmem:[%s11384_s3 + $0x560] sm:$0xff]  ;;  %v11037_v35 = vld [vmem:[%s11384_s3 + $0x570] sm:$0xff] }
 0x84e   :  { %2766 = vmatprep.subr.mxu0 %v11019_v0  ;;  %2837 = vmatprep.subr.mxu1 %v11025_v41  ;;  %13383 = vst [vmem:[#allocation66_spill] sm:$0xff] %v11031_v10  ;;  %13384 = vst [vmem:[#allocation67_spill] sm:$0xff] %v11037_v35  ;;  %v11043_v0 = vld [vmem:[%s11384_s3 + $0x528] sm:$0xff]  ;;  %v11049_v41 = vld [vmem:[%s11384_s3 + $0x538] sm:$0xff] }
 0x84f   :  { %2767 = vmatpush2.msra.mxu0 %v11031_v10  ;;  %2838 = vmatpush2.msra.mxu1 %v11037_v35  ;;  %13385 = vst [vmem:[#allocation68_spill] sm:$0xff] %v11043_v0  ;;  %13386 = vst [vmem:[#allocation69_spill] sm:$0xff] %v11049_v41  ;;  %v11055_v10 = vld [vmem:[%s11384_s3 + $0x520] sm:$0xff]  ;;  %v11061_v35 = vld [vmem:[%s11384_s3 + $0x530] sm:$0xff] }
 0x850   :  { %2768 = vmatprep.subr.mxu0 %v11043_v0  ;;  %2839 = vmatprep.subr.mxu1 %v11049_v41  ;;  %13387 = vst [vmem:[#allocation70_spill] sm:$0xff] %v11055_v10  ;;  %13388 = vst [vmem:[#allocation71_spill] sm:$0xff] %v11061_v35  ;;  %v11067_v0 = vld [vmem:[%s11384_s3 + $0x4e8] sm:$0xff]  ;;  %v11073_v41 = vld [vmem:[%s11384_s3 + $0x4f8] sm:$0xff] }
 0x851   :  { %2769 = vmatpush2.msra.mxu0 %v11055_v10  ;;  %2840 = vmatpush2.msra.mxu1 %v11061_v35  ;;  %13389 = vst [vmem:[#allocation72_spill] sm:$0xff] %v11067_v0  ;;  %13390 = vst [vmem:[#allocation73_spill] sm:$0xff] %v11073_v41  ;;  %v11079_v10 = vld [vmem:[%s11384_s3 + $0x4e0] sm:$0xff]  ;;  %v11085_v35 = vld [vmem:[%s11384_s3 + $0x4f0] sm:$0xff] }
 0x852   :  { %2770 = vmatprep.subr.mxu0 %v11067_v0  ;;  %2841 = vmatprep.subr.mxu1 %v11073_v41  ;;  %13391 = vst [vmem:[#allocation74_spill] sm:$0xff] %v11079_v10  ;;  %13392 = vst [vmem:[#allocation75_spill] sm:$0xff] %v11085_v35  ;;  %v11091_v0 = vld [vmem:[%s11384_s3 + $0x4a8] sm:$0xff]  ;;  %v11097_v41 = vld [vmem:[%s11384_s3 + $0x4b8] sm:$0xff] }
 0x853   :  { %2771 = vmatpush2.msra.mxu0 %v11079_v10  ;;  %2842 = vmatpush2.msra.mxu1 %v11085_v35  ;;  %13393 = vst [vmem:[#allocation76_spill] sm:$0xff] %v11091_v0  ;;  %13394 = vst [vmem:[#allocation77_spill] sm:$0xff] %v11097_v41  ;;  %v11103_v10 = vld [vmem:[%s11384_s3 + $0x4a0] sm:$0xff]  ;;  %v11109_v35 = vld [vmem:[%s11384_s3 + $0x4b0] sm:$0xff] }
 0x854   :  { %2772 = vmatprep.subr.mxu0 %v11091_v0  ;;  %2843 = vmatprep.subr.mxu1 %v11097_v41  ;;  %13395 = vst [vmem:[#allocation78_spill] sm:$0xff] %v11103_v10  ;;  %13396 = vst [vmem:[#allocation79_spill] sm:$0xff] %v11109_v35  ;;  %v11115_v0 = vld [vmem:[%s11384_s3 + $0x468] sm:$0xff]  ;;  %v11121_v41 = vld [vmem:[%s11384_s3 + $0x478] sm:$0xff] }
 0x855   :  { %2773 = vmatpush2.msra.mxu0 %v11103_v10  ;;  %2844 = vmatpush2.msra.mxu1 %v11109_v35  ;;  %13397 = vst [vmem:[#allocation80_spill] sm:$0xff] %v11115_v0  ;;  %13398 = vst [vmem:[#allocation81_spill] sm:$0xff] %v11121_v41  ;;  %v11127_v10 = vld [vmem:[%s11384_s3 + $0x460] sm:$0xff]  ;;  %v11133_v35 = vld [vmem:[%s11384_s3 + $0x470] sm:$0xff] }
 0x856   :  { %2774 = vmatprep.subr.mxu0 %v11115_v0  ;;  %2845 = vmatprep.subr.mxu1 %v11121_v41  ;;  %13399 = vst [vmem:[#allocation82_spill] sm:$0xff] %v11127_v10  ;;  %13400 = vst [vmem:[#allocation83_spill] sm:$0xff] %v11133_v35  ;;  %v11139_v0 = vld [vmem:[%s11384_s3 + $0x428] sm:$0xff]  ;;  %v11145_v41 = vld [vmem:[%s11384_s3 + $0x438] sm:$0xff] }
 0x857   :  { %2775 = vmatpush2.msra.mxu0 %v11127_v10  ;;  %2846 = vmatpush2.msra.mxu1 %v11133_v35  ;;  %v11151_v10 = vld [vmem:[%s11384_s3 + $0x420] sm:$0xff]  ;;  %v11157_v35 = vld [vmem:[%s11384_s3 + $0x430] sm:$0xff] }
 0x858   :  { %2776 = vmatprep.subr.mxu0 %v11139_v0  ;;  %2847 = vmatprep.subr.mxu1 %v11145_v41 }
 0x859   :  { %2777 = vmatpush2.msra.mxu0 %v11151_v10  ;;  %2848 = vmatpush2.msra.mxu1 %v11157_v35 }
 0x85a   :  { %2779 = vmatmul.mubr.f32.vlgmr.msra.gmra.mxu0 %v10400_v39  ;;  %2850 = vmatmul.mubr.f32.vlgmr.msra.gmra.mxu1 %v10400_v39  ;;  %v13413_v39 = vld [vmem:[#allocation23_spill] sm:$0xff] }
 0x85b   :  { %2935 = vmatprep.subr.mxu0 %v10371_v15  ;;  %3006 = vmatprep.subr.mxu1 %v10377_v47  ;;  %v13401_v15 = vld [vmem:[#allocation11_spill] sm:$0xff]  ;;  %v13402_v47 = vld [vmem:[#allocation12_spill] sm:$0xff] }
 0x85c   :  { %2936 = vmatpush1.msra.mxu0 %v10407_v30  ;;  %3007 = vmatpush1.msra.mxu1 %v10413_v13  ;;  %v13414_v30 = vld [vmem:[#allocation24_spill] sm:$0xff]  ;;  %v13415_v13 = vld [vmem:[#allocation29_spill] sm:$0xff] }
 0x85d   :  { %2937 = vmatprep.subr.mxu0 %v10419_v40  ;;  %3008 = vmatprep.subr.mxu1 %v10425_v2  ;;  %v13416_v40 = vld [vmem:[#allocation31_spill] sm:$0xff] }
 0x85e   :  { %2938 = vmatpush1.msra.mxu0 %v10431_v46  ;;  %3009 = vmatpush1.msra.mxu1 %v10437_v60  ;;  %v13417_v2 = vld [vmem:[#allocation35_spill] sm:$0xff]  ;;  %v13418_v46 = vld [vmem:[#allocation36_spill] sm:$0xff]  ;;  %v13419_v60 = vld [vmem:[#allocation37_spill] sm:$0xff] }
 0x85f   :  { %2939 = vmatprep.subr.mxu0 %v10443_v27  ;;  %3010 = vmatprep.subr.mxu1 %v10449_v61  ;;  %v13420_v27 = vld [vmem:[#allocation38_spill] sm:$0xff]  ;;  %v13421_v61 = vld [vmem:[#allocation39_spill] sm:$0xff] }
 0x860   :  { %2940 = vmatpush1.msra.mxu0 %v10455_v56  ;;  %3011 = vmatpush1.msra.mxu1 %v10461_v28  ;;  %v13422_v56 = vld [vmem:[#allocation40_spill] sm:$0xff]  ;;  %v13423_v28 = vld [vmem:[#allocation41_spill] sm:$0xff] }
 0x861   :  { %2941 = vmatprep.subr.mxu0 %v10467_v22  ;;  %3012 = vmatprep.subr.mxu1 %v10473_v49  ;;  %v13424_v22 = vld [vmem:[#allocation42_spill] sm:$0xff]  ;;  %v13425_v49 = vld [vmem:[#allocation43_spill] sm:$0xff] }
 0x862   :  { %2942 = vmatpush1.msra.mxu0 %v10479_v50  ;;  %3013 = vmatpush1.msra.mxu1 %v10485_v51  ;;  %v13426_v50 = vld [vmem:[#allocation44_spill] sm:$0xff]  ;;  %v13427_v51 = vld [vmem:[#allocation45_spill] sm:$0xff] }
 0x863   :  { %2943 = vmatprep.subr.mxu0 %v10491_v58  ;;  %3014 = vmatprep.subr.mxu1 %v10497_v24  ;;  %v13428_v58 = vld [vmem:[#allocation46_spill] sm:$0xff]  ;;  %v13429_v24 = vld [vmem:[#allocation47_spill] sm:$0xff] }
 0x864   :  { %2944 = vmatpush1.msra.mxu0 %v10503_v52  ;;  %3015 = vmatpush1.msra.mxu1 %v10509_v16  ;;  %v13430_v52 = vld [vmem:[#allocation48_spill] sm:$0xff]  ;;  %v13431_v16 = vld [vmem:[#allocation49_spill] sm:$0xff] }
 0x865   :  { %2945 = vmatprep.subr.mxu0 %v10515_v18  ;;  %3016 = vmatprep.subr.mxu1 %v10521_v54  ;;  %v13432_v18 = vld [vmem:[#allocation50_spill] sm:$0xff]  ;;  %v13433_v54 = vld [vmem:[#allocation51_spill] sm:$0xff] }
 0x866   :  { %2946 = vmatpush1.msra.mxu0 %v10527_v63  ;;  %3017 = vmatpush1.msra.mxu1 %v10533_v17  ;;  %v13434_v63 = vld [vmem:[#allocation52_spill] sm:$0xff]  ;;  %v13435_v17 = vld [vmem:[#allocation53_spill] sm:$0xff] }
 0x867   :  { %2947 = vmatprep.subr.mxu0 %v10539_v7  ;;  %3018 = vmatprep.subr.mxu1 %v10545_v23  ;;  %v13436_v7 = vld [vmem:[#allocation54_spill] sm:$0xff]  ;;  %v13437_v23 = vld [vmem:[#allocation55_spill] sm:$0xff] }
 0x868   :  { %2948 = vmatpush1.msra.mxu0 %v10551_v11  ;;  %3019 = vmatpush1.msra.mxu1 %v10557_v33  ;;  %v13438_v11 = vld [vmem:[#allocation56_spill] sm:$0xff]  ;;  %v13439_v33 = vld [vmem:[#allocation57_spill] sm:$0xff] }
 0x869   :  { %2949 = vmatprep.subr.mxu0 %v10563_v1  ;;  %3020 = vmatprep.subr.mxu1 %v10569_v25  ;;  %v13440_v1 = vld [vmem:[#allocation58_spill] sm:$0xff]  ;;  %v13441_v25 = vld [vmem:[#allocation59_spill] sm:$0xff] }
 0x86a   :  { %2950 = vmatpush1.msra.mxu0 %v10575_v32  ;;  %3021 = vmatpush1.msra.mxu1 %v10581_v42  ;;  %v13442_v32 = vld [vmem:[#allocation60_spill] sm:$0xff]  ;;  %v13443_v42 = vld [vmem:[#allocation61_spill] sm:$0xff] }
 0x86b   :  { %2951 = vmatprep.subr.mxu0 %v10587_v4  ;;  %3022 = vmatprep.subr.mxu1 %v10593_v43  ;;  %v13444_v4 = vld [vmem:[#allocation62_spill] sm:$0xff]  ;;  %v13445_v43 = vld [vmem:[#allocation63_spill] sm:$0xff] }
 0x86c   :  { %2952 = vmatpush1.msra.mxu0 %v10599_v38  ;;  %3023 = vmatpush1.msra.mxu1 %v10605_v53  ;;  %v13446_v38 = vld [vmem:[#allocation64_spill] sm:$0xff]  ;;  %v13447_v53 = vld [vmem:[#allocation65_spill] sm:$0xff] }
 0x86d   :  { %2953 = vmatprep.subr.mxu0 %v10611_v9  ;;  %3024 = vmatprep.subr.mxu1 %v10617_v12  ;;  %v13448_v9 = vld [vmem:[#allocation66_spill] sm:$0xff]  ;;  %v13449_v12 = vld [vmem:[#allocation67_spill] sm:$0xff] }
 0x86e   :  { %2954 = vmatpush1.msra.mxu0 %v10623_v14  ;;  %3025 = vmatpush1.msra.mxu1 %v10629_v62  ;;  %v13450_v14 = vld [vmem:[#allocation68_spill] sm:$0xff]  ;;  %v13451_v62 = vld [vmem:[#allocation69_spill] sm:$0xff] }
 0x86f   :  { %2955 = vmatprep.subr.mxu0 %v10635_v6  ;;  %3026 = vmatprep.subr.mxu1 %v10641_v31  ;;  %v13452_v6 = vld [vmem:[#allocation70_spill] sm:$0xff]  ;;  %v13453_v31 = vld [vmem:[#allocation71_spill] sm:$0xff] }
 0x870   :  { %2956 = vmatpush1.msra.mxu0 %v10647_v34  ;;  %3027 = vmatpush1.msra.mxu1 %v10653_v8  ;;  %v13454_v34 = vld [vmem:[#allocation72_spill] sm:$0xff]  ;;  %v13455_v8 = vld [vmem:[#allocation73_spill] sm:$0xff] }
 0x871   :  { %2957 = vmatprep.subr.mxu0 %v10659_v55  ;;  %3028 = vmatprep.subr.mxu1 %v10665_v37  ;;  %v13456_v55 = vld [vmem:[#allocation74_spill] sm:$0xff]  ;;  %v13457_v37 = vld [vmem:[#allocation75_spill] sm:$0xff] }
 0x872   :  { %2958 = vmatpush1.msra.mxu0 %v10671_v26  ;;  %3029 = vmatpush1.msra.mxu1 %v10677_v29  ;;  %v13458_v26 = vld [vmem:[#allocation76_spill] sm:$0xff]  ;;  %v13459_v29 = vld [vmem:[#allocation77_spill] sm:$0xff] }
 0x873   :  { %2959 = vmatprep.subr.mxu0 %v10683_v45  ;;  %3030 = vmatprep.subr.mxu1 %v10689_v3  ;;  %v13412_v3 = vld [vmem:[#allocation22_spill] sm:$0xff] }
 0x874   :  { %2960 = vmatpush1.msra.mxu0 %v10695_v57  ;;  %3031 = vmatpush1.msra.mxu1 %v10701_v36  ;;  %v13403_v57 = vld [vmem:[#allocation13_spill] sm:$0xff]  ;;  %v13404_v36 = vld [vmem:[#allocation14_spill] sm:$0xff] }
 0x875   :  { %2961 = vmatprep.subr.mxu0 %v10707_v19  ;;  %3032 = vmatprep.subr.mxu1 %v10713_v59  ;;  %v13405_v19 = vld [vmem:[#allocation15_spill] sm:$0xff]  ;;  %v13406_v59 = vld [vmem:[#allocation16_spill] sm:$0xff]  ;;  %v13460_v45 = vld [vmem:[#allocation78_spill] sm:$0xff] }
 0x876   :  { %2962 = vmatpush1.msra.mxu0 %v10719_v20  ;;  %3033 = vmatpush1.msra.mxu1 %v10725_v5  ;;  %v13407_v20 = vld [vmem:[#allocation17_spill] sm:$0xff]  ;;  %v13408_v5 = vld [vmem:[#allocation18_spill] sm:$0xff] }
 0x877   :  { %2963 = vmatprep.subr.mxu0 %v10731_v21  ;;  %3034 = vmatprep.subr.mxu1 %v10737_v48  ;;  %v13409_v21 = vld [vmem:[#allocation19_spill] sm:$0xff]  ;;  %v13410_v48 = vld [vmem:[#allocation20_spill] sm:$0xff] }
 0x878   :  { %2964 = vmatpush1.msra.mxu0 %v10743_v44  ;;  %3035 = vmatpush1.msra.mxu1 %v13401_v15  ;;  %v13411_v44 = vld [vmem:[#allocation21_spill] sm:$0xff]  ;;  %v13461_v15 = vld [vmem:[#allocation79_spill] sm:$0xff] }
 0x879   :  { %2965 = vmatprep.subr.mxu0 %v13402_v47  ;;  %3036 = vmatprep.subr.mxu1 %v13403_v57  ;;  %v13462_v47 = vld [vmem:[#allocation80_spill] sm:$0xff]  ;;  %v13463_v57 = vld [vmem:[#allocation81_spill] sm:$0xff] }
 0x87a   :  { %2966 = vmatpush1.msra.mxu0 %v13404_v36  ;;  %3037 = vmatpush1.msra.mxu1 %v13405_v19  ;;  %v13464_v36 = vld [vmem:[#allocation82_spill] sm:$0xff]  ;;  %v13465_v19 = vld [vmem:[#allocation83_spill] sm:$0xff] }
 0x87b   :  { %2967 = vmatprep.subr.mxu0 %v13406_v59  ;;  %3038 = vmatprep.subr.mxu1 %v13407_v20  ;;  %v13466_v59 = vmov 0.0   ;;  %v2861_v20 = vpop.permute.xlu1 %2860 }
 0x87c   :  { %2968 = vmatpush2.msra.mxu0 %v13408_v5  ;;  %3039 = vmatpush2.msra.mxu1 %v13409_v21  ;;  %v13467_v21 = vld [vmem:[#allocation26_spill] sm:$0xff] }
 0x87d   :  { %2969 = vmatprep.subr.mxu0 %v13410_v48  ;;  %3040 = vmatprep.subr.mxu1 %v13411_v44  ;;  %v2864_v48 = vmul.f32 %v2861_v20, %v13467_v21  ;;  %v13468_v44 = vld [vmem:[#allocation25_spill] sm:$0xff]  ;;  %v13480_v21 = vld [vmem:[#allocation10_spill] sm:$0xff] }
 0x87e   :  { %2970 = vmatpush2.msra.mxu0 %v13412_v3  ;;  %3041 = vmatpush2.msra.mxu1 %v13413_v39  ;;  %v2863_v3 = vmul.f32 %v2861_v20, %v13468_v44 }
 0x87f   :  { %2971 = vmatprep.subr.mxu0 %v13414_v30  ;;  %3042 = vmatprep.subr.mxu1 %v13415_v13  ;;  %v13469_v30 = vld [vmem:[#allocation28_spill] sm:$0xff] }
 0x880   :  { %2972 = vmatpush2.msra.mxu0 %v13416_v40  ;;  %3043 = vmatpush2.msra.mxu1 %v13417_v2  ;;  %v2868_v13 = vadd.f32 %v2864_v48, %v13469_v30  ;;  %v13470_v40 = vld [vmem:[#allocation27_spill] sm:$0xff] }
 0x881   :  { %2973 = vmatprep.subr.mxu0 %v13418_v46  ;;  %3044 = vmatprep.subr.mxu1 %v13419_v60  ;;  %v2867_v2 = vadd.f32 %v2863_v3, %v13470_v40 }
 0x882   :  { %2974 = vmatpush2.msra.mxu0 %v13420_v27  ;;  %3045 = vmatpush2.msra.mxu1 %v13421_v61  ;;  %v13471_v27 = vld [vmem:[#allocation5_spill] sm:$0xff] }
 0x883   :  { %2975 = vmatprep.subr.mxu0 %v13422_v56  ;;  %3046 = vmatprep.subr.mxu1 %v13423_v28 }
 0x884   :  { %2976 = vmatpush2.msra.mxu0 %v13424_v22  ;;  %3047 = vmatpush2.msra.mxu1 %v13425_v49  ;;  %v13472_v49 = vld [vmem:[#allocation6_spill] sm:$0xff] }
 0x885   :  { %2977 = vmatprep.subr.mxu0 %v13426_v50  ;;  %3048 = vmatprep.subr.mxu1 %v13427_v51  ;;  %v13473_v51 = vld [vmem:[#allocation30_spill] sm:$0xff] }
 0x886   :  { %2978 = vmatpush2.msra.mxu0 %v13428_v58  ;;  %3049 = vmatpush2.msra.mxu1 %v13429_v24  ;;  %v2866_v58 = vmul.f32 %v2861_v20, %v13473_v51  ;;  %v3107_v51 = vld [vmem:[%s11388_s5 + $0x28] sm:$0xff] }
 0x887   :  { %2979 = vmatprep.subr.mxu0 %v13430_v52  ;;  %3050 = vmatprep.subr.mxu1 %v13431_v16 }
 0x888   :  { %2980 = vmatpush2.msra.mxu0 %v13432_v18  ;;  %3051 = vmatpush2.msra.mxu1 %v13433_v54  ;;  %v13474_v18 = vld [vmem:[#allocation33_spill] sm:$0xff] }
 0x889   :  { %2981 = vmatprep.subr.mxu0 %v13434_v63  ;;  %3052 = vmatprep.subr.mxu1 %v13435_v17  ;;  %v2865_v54 = vmul.f32 %v2861_v20, %v13474_v18  ;;  %v13475_v63 = vld [vmem:[#allocation32_spill] sm:$0xff] }
 0x88a   :  { %2982 = vmatpush2.msra.mxu0 %v13436_v7  ;;  %3053 = vmatpush2.msra.mxu1 %v13437_v23  ;;  %v2870_v17 = vadd.f32 %v2866_v58, %v13475_v63  ;;  %v3106_v58 = vld [vmem:[%s11388_s5 + $0x20] sm:$0xff] }
 0x88b   :  { %2983 = vmatprep.subr.mxu0 %v13438_v11  ;;  %3054 = vmatprep.subr.mxu1 %v13439_v33  ;;  %v3102_v18 = vld [vmem:[%s11388_s5] sm:$0xff] }
 0x88c   :  { %2984 = vmatpush2.msra.mxu0 %v13440_v1  ;;  %3055 = vmatpush2.msra.mxu1 %v13441_v25  ;;  %v13476_v1 = vld [vmem:[#allocation34_spill] sm:$0xff] }
 0x88d   :  { %2985 = vmatprep.subr.mxu0 %v13442_v32  ;;  %3056 = vmatprep.subr.mxu1 %v13443_v42  ;;  %v2869_v25 = vadd.f32 %v2865_v54, %v13476_v1  ;;  %v13477_v32 = vld [vmem:[#allocation7_spill] sm:$0xff]  ;;  %v12_v54 = vstv %s11389_s6 }
 0x88e   :  { %2986 = vmatpush2.msra.mxu0 %v13444_v4  ;;  %3057 = vmatpush2.msra.mxu1 %v13445_v43  ;;  %13 = vst [vmem:[#allocation4] sm:$0x1] %v12_v54 }
 0x88f   :  { %2987 = vmatprep.subr.mxu0 %v13446_v38  ;;  %3058 = vmatprep.subr.mxu1 %v13447_v53 }
 0x890   :  { %2988 = vmatpush2.msra.mxu0 %v13448_v9  ;;  %3059 = vmatpush2.msra.mxu1 %v13449_v12  ;;  %v13478_v12 = vld [vmem:[#allocation8_spill] sm:$0xff] }
 0x891   :  { %2989 = vmatprep.subr.mxu0 %v13450_v14  ;;  %3060 = vmatprep.subr.mxu1 %v13451_v62 }
 0x892   :  { %2990 = vmatpush2.msra.mxu0 %v13452_v6  ;;  %3061 = vmatpush2.msra.mxu1 %v13453_v31 }
 0x893   :  { %2991 = vmatprep.subr.mxu0 %v13454_v34  ;;  %3062 = vmatprep.subr.mxu1 %v13455_v8 }
 0x894   :  { %2992 = vmatpush2.msra.mxu0 %v13456_v55  ;;  %3063 = vmatpush2.msra.mxu1 %v13457_v37  ;;  %v13479_v37 = vld [vmem:[#allocation9_spill] sm:$0xff] }
 0x895   :  { %2993 = vmatprep.subr.mxu0 %v13458_v26  ;;  %3064 = vmatprep.subr.mxu1 %v13459_v29 }
 0x896   :  { %2994 = vmatpush2.msra.mxu0 %v13460_v45  ;;  %3065 = vmatpush2.msra.mxu1 %v13461_v15 }
 0x897   :  { %2995 = vmatprep.subr.mxu0 %v13462_v47  ;;  %3066 = vmatprep.subr.mxu1 %v13463_v57 }
 0x898   :  { %2996 = vmatpush2.msra.mxu0 %v13464_v36  ;;  %3067 = vmatpush2.msra.mxu1 %v13465_v19 }
 0x899   :  { %2997 = vmatprep.subr.mxu0 %v11139_v0  ;;  %3068 = vmatprep.subr.mxu1 %v11145_v41 }
 0x89a   :  { %2998 = vmatpush2.msra.mxu0 %v11151_v10  ;;  %3069 = vmatpush2.msra.mxu1 %v11157_v35 }
 0x89b   :  { %3274 = vmatprep.subr.mxu0 %v13466_v59 }
 0x8d9   :  { %v2638_v5 = vpop.f32.mrf.mxu0  ;;  %v2709_v35 = vpop.f32.mrf.mxu1 }
 0x8da   :  { %v2871_v46 = vadd.f32 %v2867_v2, %v2638_v5  ;;  %v2873_v43 = vadd.f32 %v2869_v25, %v2709_v35  ;;  %v3114_v35 = vld [vmem:[%s11388_s5 + $0x60] sm:$0xff] }
 0x8db   :  { %v2640_v39 = vpop.f32.mrf.mxu0  ;;  %v2711_v28 = vpop.f32.mrf.mxu1 }
 0x8dc   :  { %v2872_v0 = vadd.f32 %v2868_v13, %v2640_v39  ;;  %v3247_v60 = vmul.f32 -1.442695, %v2871_v46  ;;  %v2874_v33 = vadd.f32 %v2870_v17, %v2711_v28  ;;  %v3117_v46 = vld [vmem:[%s11388_s5 + $0x78] sm:$0xff]  ;;  %v3110_v28 = vld [vmem:[%s11388_s5 + $0x40] sm:$0xff] }
 0x8de   :  { %v3248_v41 = vmul.f32 -1.442695, %v2872_v0  ;;  %v3249_v38 = vmul.f32 -1.442695, %v2874_v33 }
 0x8e0   :  { %3522 = vpow2.f32 %v3248_v41  ;;  %v3116_v41 = vld [vmem:[%s11388_s5 + $0x70] sm:$0xff] }
 0x8e1   :  { %3524 = vpow2.f32 %v3247_v60  ;;  %v3115_v60 = vld [vmem:[%s11388_s5 + $0x68] sm:$0xff] }
 0x8ed   :  { %v3523_v16 = vpop.eup %3522 }
 0x8ee   :  { %v3525_v23 = vpop.eup %3524  ;;  %v2885_v11 = vadd.f32 1.0, %v3523_v16  ;;  %v3103_v16 = vld [vmem:[%s11388_s5 + $0x8] sm:$0xff] }
 0x8ef   :  { %v2879_v4 = vadd.f32 1.0, %v3525_v23 }
 0x91a   :  { %v2780_v10 = vpop.f32.mrf.mxu0  ;;  %v2851_v24 = vpop.f32.mrf.mxu1 }
 0x91b   :  { %v2900_v61 = vadd.f32 %v2780_v10, %v13471_v27  ;;  %v2902_v14 = vadd.f32 %v2851_v24, %v13478_v12  ;;  %v3113_v10 = vld [vmem:[%s11388_s5 + $0x58] sm:$0xff] }
 0x91c   :  { %v2782_v56 = vpop.f32.mrf.mxu0  ;;  %v2853_v7 = vpop.f32.mrf.mxu1  ;;  %v3105_v24 = vld [vmem:[%s11388_s5 + $0x18] sm:$0xff] }
 0x91d   :  { %v3250_v22 = vmul.f32 -1.442695, %v2900_v61  ;;  %v2901_v50 = vadd.f32 %v2782_v56, %v13472_v49  ;;  %v2903_v42 = vadd.f32 %v2853_v7, %v13477_v32  ;;  %v3112_v61 = vld [vmem:[%s11388_s5 + $0x50] sm:$0xff]  ;;  %v3111_v56 = vld [vmem:[%s11388_s5 + $0x48] sm:$0xff] }
 0x91f   :  { %3526 = vpow2.f32 %v3250_v22  ;;  %v3251_v52 = vmul.f32 -1.442695, %v2901_v50  ;;  %v3252_v53 = vmul.f32 -1.442695, %v2903_v42  ;;  %v3109_v22 = vld [vmem:[%s11388_s5 + $0x38] sm:$0xff]  ;;  %v3108_v50 = vld [vmem:[%s11388_s5 + $0x30] sm:$0xff] }
 0x921   :  { %3528 = vpow2.f32 %v3251_v52  ;;  %v3104_v52 = vld [vmem:[%s11388_s5 + $0x10] sm:$0xff] }
 0x922   :  { %3530 = vrcp.f32 %v2885_v11 }
 0x923   :  { %3532 = vrcp.f32 %v2879_v4 }
 0x924   :  { %3534 = vtanh.f32 %v2873_v43 }
 0x925   :  { %3536 = vpow2.f32 %v3249_v38 }
 0x926   :  { %3538 = vpow2.f32 %v3252_v53 }
 0x92c   :  { %v3527_v9 = vpop.eup %3526 }
 0x92d   :  { %v2908_v62 = vadd.f32 1.0, %v3527_v9 }
 0x92e   :  { %v3529_v6 = vpop.eup %3528 }
 0x92f   :  { %3540 = vrcp.f32 %v2908_v62  ;;  %v2914_v31 = vadd.f32 1.0, %v3529_v6  ;;  %v3531_v34 = vpop.eup %3530 }
 0x930   :  { %3542 = vtanh.f32 %v2902_v14  ;;  %v3533_v8 = vpop.eup %3532  ;;  %v2895_v26 = vmul.f32 %v3531_v34, %v13479_v37  ;;  %v3256_v37 = vld [vmem:[#allocation4] ss:$0 sm:$0xff] }
 0x931   :  { %3544 = vrcp.f32 %v2914_v31  ;;  %v3535_v55 = vpop.eup %3534 }
 0x932   :  { %v3537_v29 = vpop.eup %3536  ;;  %v2896_v15 = vmul.f32 %v3535_v55, %v3533_v8 }
 0x933   :  { %v3539_v45 = vpop.eup %3538  ;;  %v2892_v44 = vadd.f32 1.0, %v3537_v29 }
 0x934   :  { %v2897_v36 = vadd.f32 %v2896_v15, %v2895_v26  ;;  %v2921_v20 = vadd.f32 1.0, %v3539_v45 }
 0x936   :  { %3546 = vtanh.f32 %v2897_v36 }
 0x937   :  { %3548 = vrcp.f32 %v2921_v20 }
 0x93c   :  { %v3541_v47 = vpop.eup %3540 }
 0x93d   :  { %v3543_v57 = vpop.eup %3542 }
 0x93e   :  { %v3545_v19 = vpop.eup %3544  ;;  %v2925_v5 = vmul.f32 %v3543_v57, %v3541_v47 }
 0x93f   :  { %v2924_v48 = vmul.f32 %v3545_v19, %v13480_v21 }
 0x941   :  { %v11305_v3 = vadd.f32 %v2925_v5, %v2924_v48 }
 0x943   :  { %3550 = vtanh.f32 %v11305_v3  ;;  %v3547_v39 = vpop.eup %3546 }
 0x944   :  { %3552 = vrcp.f32 %v2892_v44  ;;  %v3549_v30 = vpop.eup %3548 }
 0x950   :  { %v3551_v13 = vpop.eup %3550 }
 0x951   :  { %v3553_v40 = vpop.eup %3552  ;;  %v2928_v2 = vmul.f32 %v3551_v13, %v3549_v30 }
 0x952   :  { %v2899_v0 = vmul.f32 %v3553_v40, %v3547_v39 }
 0x953   :  { %2999 = vmatprep.mubr.f32.mxu0 %v2928_v2  ;;  %3070 = vmatprep.mubr.f32.mxu1 %v2928_v2 }
 0x954   :  { %3000 = vmatmul.mubr.f32.vlgmr.msra.gmra.mxu0 %v2899_v0  ;;  %3071 = vmatmul.mubr.f32.vlgmr.msra.gmra.mxu1 %v2899_v0 }
 0x955   :  { %3275 = vmatpush3.msra.mxu0 %v3117_v46  ;;  %3306 = vmatprep.mubr.msk.f32.mxu0 %vm4340_vm0, %v13466_v59 }
 0x956   :  { %3276 = vmatprep.subr.mxu0 %v13466_v59 }
 0x957   :  { %3277 = vmatpush3.msra.mxu0 %v3116_v41 }
 0x958   :  { %3278 = vmatprep.subr.mxu0 %v13466_v59 }
 0x959   :  { %3279 = vmatpush3.msra.mxu0 %v3115_v60 }
 0x95a   :  { %3280 = vmatprep.subr.mxu0 %v13466_v59 }
 0x95b   :  { %3281 = vmatpush3.msra.mxu0 %v3114_v35 }
 0x95c   :  { %3282 = vmatprep.subr.mxu0 %v13466_v59 }
 0x95d   :  { %3283 = vmatpush3.msra.mxu0 %v3113_v10 }
 0x95e   :  { %3284 = vmatprep.subr.mxu0 %v13466_v59 }
 0x95f   :  { %3285 = vmatpush3.msra.mxu0 %v3112_v61 }
 0x960   :  { %3286 = vmatprep.subr.mxu0 %v13466_v59 }
 0x961   :  { %3287 = vmatpush3.msra.mxu0 %v3111_v56 }
 0x962   :  { %3288 = vmatprep.subr.mxu0 %v13466_v59 }
 0x963   :  { %3289 = vmatpush3.msra.mxu0 %v3110_v28 }
 0x964   :  { %3290 = vmatprep.subr.mxu0 %v13466_v59 }
 0x965   :  { %3291 = vmatpush3.msra.mxu0 %v3109_v22 }
 0x966   :  { %3292 = vmatprep.subr.mxu0 %v13466_v59 }
 0x967   :  { %3293 = vmatpush3.msra.mxu0 %v3108_v50 }
 0x968   :  { %3294 = vmatprep.subr.mxu0 %v13466_v59 }
 0x969   :  { %3295 = vmatpush3.msra.mxu0 %v3107_v51 }
 0x96a   :  { %3296 = vmatprep.subr.mxu0 %v13466_v59 }
 0x96b   :  { %3297 = vmatpush3.msra.mxu0 %v3106_v58 }
 0x96c   :  { %3298 = vmatprep.subr.mxu0 %v13466_v59 }
 0x96d   :  { %3299 = vmatpush3.msra.mxu0 %v3105_v24 }
 0x96e   :  { %3300 = vmatprep.subr.mxu0 %v13466_v59 }
 0x96f   :  { %3301 = vmatpush3.msra.mxu0 %v3104_v52 }
 0x970   :  { %3302 = vmatprep.subr.mxu0 %v13466_v59 }
 0x971   :  { %3303 = vmatpush3.msra.mxu0 %v3103_v16 }
 0x972   :  { %3304 = vmatprep.subr.mxu0 %v13466_v59 }
 0x973   :  { %3305 = vmatpush3.msra.mxu0 %v3102_v18 }
 0xa14   :  { %v3001_v63 = vpop.f32.mrf.mxu0  ;;  %v3072_v33 = vpop.f32.mrf.mxu1 }
 0xa15   :  { %v3002_v17 = vadd.f32 %v3001_v63, %v13471_v27  ;;  %v3073_v43 = vadd.f32 %v3072_v33, %v13478_v12 }
 0xa16   :  { %v3003_v7 = vpop.f32.mrf.mxu0  ;;  %v3074_v25 = vpop.f32.mrf.mxu1 }
 0xa17   :  { %v3253_v23 = vmul.f32 -1.442695, %v3002_v17  ;;  %v3004_v11 = vadd.f32 %v3003_v7, %v13472_v49  ;;  %v3075_v59 = vadd.f32 %v3074_v25, %v13477_v32 }
 0xa19   :  { %3554 = vpow2.f32 %v3253_v23  ;;  %v3254_v1 = vmul.f32 -1.442695, %v3004_v11  ;;  %v3255_v42 = vmul.f32 -1.442695, %v3075_v59 }
 0xa1b   :  { %3556 = vpow2.f32 %v3254_v1 }
 0xa1c   :  { %3558 = vpow2.f32 %v3255_v42 }
 0xa26   :  { %v3555_v4 = vpop.eup %3554 }
 0xa27   :  { %v3081_v38 = vadd.f32 1.0, %v3555_v4 }
 0xa28   :  { %v3557_v53 = vpop.eup %3556 }
 0xa29   :  { %3560 = vrcp.f32 %v3081_v38  ;;  %v3087_v27 = vadd.f32 1.0, %v3557_v53  ;;  %v3559_v9 = vpop.eup %3558 }
 0xa2a   :  { %3562 = vtanh.f32 %v3073_v43  ;;  %v3094_v6 = vadd.f32 1.0, %v3559_v9 }
 0xa2b   :  { %3564 = vrcp.f32 %v3087_v27 }
 0xa2c   :  { %3566 = vrcp.f32 %v3094_v6 }
 0xa36   :  { %v3561_v49 = vpop.eup %3560 }
 0xa37   :  { %v3563_v14 = vpop.eup %3562 }
 0xa38   :  { %v3565_v62 = vpop.eup %3564  ;;  %v3098_v31 = vmul.f32 %v3563_v14, %v3561_v49 }
 0xa39   :  { %v3097_v34 = vmul.f32 %v3565_v62, %v11305_v3  ;;  %v3567_v8 = vpop.eup %3566 }
 0xa3b   :  { %v3099_v32 = vadd.f32 %v3098_v31, %v3097_v34 }
 0xa3d   :  { %3568 = vtanh.f32 %v3099_v32 }
 0xa4a   :  { %v3569_v12 = vpop.eup %3568 }
 0xa4b   :  { %v3101_v55 = vmul.f32 %v3569_v12, %v3567_v8 }
 0xa4d   :  { %3307 = vmatmul.mubr.f32.vlgmr.msra.gmra.mxu0 %v3101_v55 }
 0xb0d   :  { %v3191_v26 = vpop.f32.mrf.mxu0 }
 0xb0e   :  { %v3192_v29 = vadd.f32 %v3256_v37, %v3191_v26 }
 0xb0f   :  { %v3308_v45 = vpop.f32.mrf.mxu0 }
 0xb10   :  { %3196 = vst.msk [vmem:[%s11390_s7] sm:$0xff] %vm3195_vm1, %v3192_v29 }

</bundles_post_ra>
